<compile_context>
chip_gen: v7x
topology: tpu7x:2x2x1
jax: 0.10.0
libtpu: 0.0.40
codegen_flags: <defaults>
</compile_context>

<pallas_src>
import functools
import math

import jax
import jax.numpy as jnp
from jax.experimental import pallas as pl
from jax.experimental.pallas import tpu as pltpu

FEATURE_DIM = [1280, 1280, 1408, 1536, 1792, 2048, 2304, 2560]


def _vmem_limit_bytes():
    # Per-generation VMEM budget (v5e/v6e: 128 MiB physical, v7x: 64 MiB).
    try:
        cap = pltpu.get_tpu_info().vmem_capacity_bytes
        return int(min(cap // 2, 64 * 1024 * 1024))
    except Exception:
        return 32 * 1024 * 1024


# ----------------------------------------------------------------------------
# Fused kernel: stem conv -> MBConv -> head conv -> global-avg-pool -> FC
# One grid step per batch tile; everything stays in VMEM between stages.
# ----------------------------------------------------------------------------
def _efficientnet_fused_kernel(patch_ref, stem_w_ref, stem_b_ref,
                               exp_w_ref, exp_b_ref,
                               dw_w_ref, dw_b_ref,
                               se_w1_ref, se_b1_ref, se_w2_ref, se_b2_ref,
                               proj_w_ref, proj_b_ref,
                               head_w_ref, head_b_ref,
                               fc_w_ref, fc_b_ref,
                               o_ref, pad_ref, *, H, W, tf):
    bf16 = jnp.bfloat16
    Bt, HW, KP = patch_ref.shape
    Cm = exp_w_ref.shape[1]
    F = head_w_ref.shape[1]
    NCp = fc_w_ref.shape[1]
    M = Bt * HW

    # ---- stem 3x3/stride-2 conv as matmul (BN folded; bf16 operands -> f32 acc) + swish
    y = jnp.dot(patch_ref[...].reshape(M, KP), stem_w_ref[...],
                preferred_element_type=jnp.float32) + stem_b_ref[...]
    y = y * jax.nn.sigmoid(y)                                    # (M, Cs) f32

    # ---- MBConv expand 1x1 (BN folded) + swish
    h = jnp.dot(y.astype(bf16), exp_w_ref[...],
                preferred_element_type=jnp.float32) + exp_b_ref[...]
    h = h * jax.nn.sigmoid(h)                                    # (M, Cm) f32

    # ---- depthwise 3x3 (stride 1, pad 1): zero-padded VMEM scratch written once,
    #      then 9 static shifted-slice taps (no concatenate copies).
    pad_ref[...] = jnp.zeros_like(pad_ref)
    pad_ref[:, 1:H + 1, 1:W + 1, :] = h.reshape(Bt, H, W, Cm)
    hp = pad_ref[...]                                            # (Bt, H+2, W+2, Cm)
    dw_w = dw_w_ref[...]                                         # (9, Cm), BN scale folded
    acc = jnp.zeros((Bt, H, W, Cm), jnp.float32)
    for k in range(9):
        dy, dx = k // 3, k % 3
        acc = acc + hp[:, dy:dy + H, dx:dx + W, :] * dw_w[k:k + 1, :].reshape(1, 1, 1, Cm)
    d = acc + dw_b_ref[...].reshape(1, 1, 1, Cm)
    d = d * jax.nn.sigmoid(d)                                    # (Bt, H, W, Cm)

    # ---- squeeze-excite on the per-image pooled vectors (tiny f32 matmuls, in VMEM)
    d2 = d.reshape(Bt, HW, Cm)
    sq = jnp.mean(d2, axis=1)                                    # (Bt, Cm)
    r = jnp.dot(sq, se_w1_ref[...], preferred_element_type=jnp.float32) + se_b1_ref[...]
    r = r * jax.nn.sigmoid(r)
    ex = jax.nn.sigmoid(jnp.dot(r, se_w2_ref[...],
                                preferred_element_type=jnp.float32) + se_b2_ref[...])
    d2 = d2 * ex[:, None, :]                                     # (Bt, HW, Cm)

    # ---- project 1x1 (BN folded) + fused residual add
    p = jnp.dot(d2.reshape(M, Cm).astype(bf16), proj_w_ref[...],
                preferred_element_type=jnp.float32) + proj_b_ref[...]
    yb = p + y                                                   # (M, Cs) f32
    yb16 = yb.astype(bf16)

    # ---- head 1x1 conv + swish + global-avg-pool + dropout(eval) + FC,
    #      unrolled over lane-dense feature chunks; the (M, F) slab never exists at once.
    inv_hw = 1.0 / float(HW)
    logits = jnp.zeros((Bt, NCp), jnp.float32)
    for s0 in range(0, F, tf):
        s1 = min(s0 + tf, F)
        f = jnp.dot(yb16, head_w_ref[:, s0:s1],
                    preferred_element_type=jnp.float32) + head_b_ref[:, s0:s1]
        f = f * jax.nn.sigmoid(f)                                # (M, s1-s0) f32
        pooled = jnp.sum(f.reshape(Bt, HW, s1 - s0), axis=1) * inv_hw   # (Bt, s1-s0)
        logits = logits + jnp.dot(pooled.astype(bf16), fc_w_ref[s0:s1, :],
                                  preferred_element_type=jnp.float32)
    o_ref[...] = (logits + fc_b_ref[...]).astype(o_ref.dtype)


def efficientnet_fused(patches, H, W, p):
    B, HW, KP = patches.shape
    bf16 = jnp.bfloat16
    Cs = p["stem_w"].shape[1]
    Cm = p["exp_w"].shape[1]
    Cse = p["se_w1"].shape[1]
    F, NC = p["fc_w"].shape
    NCp = max(128, ((NC + 127) // 128) * 128)

    # Pad the FC output to 128 lanes (lane-dense, unmasked store); sliced back below.
    fc_w = jnp.zeros((F, NCp), jnp.float32).at[:, :NC].set(p["fc_w"]).astype(bf16)
    fc_b = jnp.zeros((1, NCp), jnp.float32).at[:, :NC].set(p["fc_b"][None, :])

    # Head feature tile: largest multiple of 128 dividing F, capped at 640 lanes.
    tf = 128
    for cand in (640, 512, 384, 256, 128):
        if F % cand == 0:
            tf = cand
            break

    # Whole (toy) batch per grid step so each matmul sees M = B*HW rows.
    # TODO(synk): at production batch sizes split the batch axis into >= 2*num_cores
    #             tiles so the "parallel" axis can feed v7x's two TensorCores.
    bt = B
    grid = (B // bt,)

    kernel = functools.partial(_efficientnet_fused_kernel, H=H, W=W, tf=tf)
    out = pl.pallas_call(
        kernel,
        out_shape=jax.ShapeDtypeStruct((B, NCp), jnp.float32),
        grid=grid,
        in_specs=[
            pl.BlockSpec((bt, HW, KP), lambda i: (i, 0, 0)),
            pl.BlockSpec((KP, Cs), lambda i: (0, 0)),     # weights resident across steps
            pl.BlockSpec((1, Cs), lambda i: (0, 0)),
            pl.BlockSpec((Cs, Cm), lambda i: (0, 0)),
            pl.BlockSpec((1, Cm), lambda i: (0, 0)),
            pl.BlockSpec((9, Cm), lambda i: (0, 0)),
            pl.BlockSpec((1, Cm), lambda i: (0, 0)),
            pl.BlockSpec((Cm, Cse), lambda i: (0, 0)),
            pl.BlockSpec((1, Cse), lambda i: (0, 0)),
            pl.BlockSpec((Cse, Cm), lambda i: (0, 0)),
            pl.BlockSpec((1, Cm), lambda i: (0, 0)),
            pl.BlockSpec((Cm, Cs), lambda i: (0, 0)),
            pl.BlockSpec((1, Cs), lambda i: (0, 0)),
            pl.BlockSpec((Cs, F), lambda i: (0, 0)),
            pl.BlockSpec((1, F), lambda i: (0, 0)),
            pl.BlockSpec((F, NCp), lambda i: (0, 0)),
            pl.BlockSpec((1, NCp), lambda i: (0, 0)),
        ],
        out_specs=pl.BlockSpec((bt, NCp), lambda i: (i, 0)),
        scratch_shapes=[pltpu.VMEM((bt, H + 2, W + 2, Cm), jnp.float32)],
        compiler_params=pltpu.CompilerParams(
            dimension_semantics=("parallel",),
            vmem_limit_bytes=_vmem_limit_bytes()),
    )(patches.astype(bf16),
      p["stem_w"].astype(bf16), p["stem_b"].reshape(1, Cs),
      p["exp_w"].astype(bf16), p["exp_b"].reshape(1, Cm),
      p["dw_w"], p["dw_b"].reshape(1, Cm),
      p["se_w1"], p["se_b1"].reshape(1, Cse),
      p["se_w2"], p["se_b2"].reshape(1, Cm),
      p["proj_w"].astype(bf16), p["proj_b"].reshape(1, Cs),
      p["head_w"].astype(bf16), p["head_b"].reshape(1, F),
      fc_w, fc_b)
    return out[:, :NC]


# ----------------------------------------------------------------------------
# JAX glue: im2col patch extraction (stem only; 3 input channels -> negligible)
# ----------------------------------------------------------------------------
def extract_patches(x, ksize, stride, pad):
    # x: (B, H, W, C) NHWC -> (B, Ho, Wo, ksize*ksize, C)
    B, H, W, C = x.shape
    xp = jnp.pad(x, ((0, 0), (pad, pad), (pad, pad), (0, 0)))
    Ho = (H + 2 * pad - ksize) // stride + 1
    Wo = (W + 2 * pad - ksize) // stride + 1
    taps = []
    for dy in range(ksize):
        for dx in range(ksize):
            taps.append(xp[:, dy:dy + stride * Ho:stride, dx:dx + stride * Wo:stride, :])
    return jnp.stack(taps, axis=3), Ho, Wo


# ----------------------------------------------------------------------------
# Parameter construction (deterministic, synthetic). BN scale folded into weights.
# ----------------------------------------------------------------------------
def _bn_fold(key, c, eps=1e-3):
    k1, k2, k3, k4 = jax.random.split(key, 4)
    gamma = 1.0 + 0.1 * jax.random.normal(k1, (c,), jnp.float32)
    beta = 0.1 * jax.random.normal(k2, (c,), jnp.float32)
    mean = 0.1 * jax.random.normal(k3, (c,), jnp.float32)
    var = 1.0 + 0.1 * jax.random.uniform(k4, (c,), jnp.float32)
    scale = gamma / jnp.sqrt(var + eps)
    bias = beta - mean * scale
    return scale, bias


def _conv_w(key, cin, cout, k):
    # stored directly as (k*k*cin, cout) to match im2col tap ordering (dy, dx, cin)
    fan_in = cin * k * k
    return jax.random.normal(key, (k * k * cin, cout), jnp.float32) / math.sqrt(fan_in)


def init_params(key, name="efficientnet-b0", num_class=10):
    feature_dim = FEATURE_DIM[int(name[-1])]
    c_stem, expand, c_se = 32, 2, 8
    c_mid = c_stem * expand
    ks = jax.random.split(key, 16)
    p = {}
    w = _conv_w(ks[0], 3, c_stem, 3); s, b = _bn_fold(ks[1], c_stem)
    p["stem_w"], p["stem_b"] = w * s[None, :], b
    w = _conv_w(ks[2], c_stem, c_mid, 1); s, b = _bn_fold(ks[3], c_mid)
    p["exp_w"], p["exp_b"] = w * s[None, :], b
    w = jax.random.normal(ks[4], (9, c_mid), jnp.float32) / 3.0; s, b = _bn_fold(ks[5], c_mid)
    p["dw_w"], p["dw_b"] = w * s[None, :], b
    p["se_w1"] = jax.random.normal(ks[6], (c_mid, c_se), jnp.float32) / math.sqrt(c_mid)
    p["se_b1"] = 0.01 * jax.random.normal(ks[7], (c_se,), jnp.float32)
    p["se_w2"] = jax.random.normal(ks[8], (c_se, c_mid), jnp.float32) / math.sqrt(c_se)
    p["se_b2"] = 0.01 * jax.random.normal(ks[9], (c_mid,), jnp.float32)
    w = _conv_w(ks[10], c_mid, c_stem, 1); s, b = _bn_fold(ks[11], c_stem)
    p["proj_w"], p["proj_b"] = w * s[None, :], b
    w = _conv_w(ks[12], c_stem, feature_dim, 1); s, b = _bn_fold(ks[13], feature_dim)
    p["head_w"], p["head_b"] = w * s[None, :], b
    p["fc_w"] = jax.random.normal(ks[14], (feature_dim, num_class), jnp.float32) / math.sqrt(feature_dim)
    p["fc_b"] = 0.01 * jax.random.normal(ks[15], (num_class,), jnp.float32)
    return p


# ----------------------------------------------------------------------------
# Forward pass (Pallas) and pure-jnp reference (same bf16 operand casts at the dots)
# ----------------------------------------------------------------------------
def efficientnet_forward(params, x_nchw):
    x = jnp.transpose(x_nchw, (0, 2, 3, 1)).astype(jnp.float32)   # NCHW -> NHWC
    B = x.shape[0]
    patches, Ho, Wo = extract_patches(x, 3, 2, 1)                 # (B, Ho, Wo, 9, 3)
    patches = patches.reshape(B, Ho * Wo, -1)
    return efficientnet_fused(patches, Ho, Wo, params)


def efficientnet_forward_ref(params, x_nchw):
    bf16 = jnp.bfloat16
    bdot = lambda a, b: jnp.dot(a.astype(bf16), b.astype(bf16),
                                preferred_element_type=jnp.float32)
    swish = lambda t: t * jax.nn.sigmoid(t)
    x = jnp.transpose(x_nchw, (0, 2, 3, 1)).astype(jnp.float32)
    B = x.shape[0]
    patches, Ho, Wo = extract_patches(x, 3, 2, 1)
    y = swish(bdot(patches.reshape(B * Ho * Wo, -1), params["stem_w"]) + params["stem_b"])
    Cs = y.shape[-1]
    h = swish(bdot(y, params["exp_w"]) + params["exp_b"])
    Cm = h.shape[-1]
    dw_patches, _, _ = extract_patches(h.reshape(B, Ho, Wo, Cm), 3, 1, 1)
    d = jnp.sum(dw_patches * params["dw_w"][None, None, None], axis=3) + params["dw_b"]
    d = swish(d)                                                   # (B, Ho, Wo, Cm)
    sq = jnp.mean(d.reshape(B, Ho * Wo, Cm), axis=1)
    ex = jax.nn.sigmoid(swish(sq @ params["se_w1"] + params["se_b1"]) @ params["se_w2"]
                        + params["se_b2"])
    d = (d.reshape(B, Ho * Wo, Cm) * ex[:, None, :]).reshape(B * Ho * Wo, Cm)
    p = bdot(d, params["proj_w"]) + params["proj_b"]
    y = p + y
    f = swish(bdot(y, params["head_w"]) + params["head_b"])
    pooled = jnp.mean(f.reshape(B, Ho * Wo, -1), axis=1)
    return bdot(pooled, params["fc_w"]) + params["fc_b"]


if __name__ == "__main__":
    key = jax.random.PRNGKey(0)
    kp, kx = jax.random.split(key)
    params = init_params(kp, name="efficientnet-b0", num_class=10)

    # PyTorch-style NCHW input (small: batch=2, channels=3, spatial=16)
    x = jax.random.normal(kx, (2, 3, 16, 16), jnp.float32)

    fwd = jax.jit(efficientnet_forward)
    out = jax.block_until_ready(fwd(params, x))

    ref = efficientnet_forward_ref(params, x)
    assert out.shape == (2, 10), out.shape
    err = float(jnp.max(jnp.abs(out - ref)))
    assert jnp.allclose(out, ref, rtol=2e-2, atol=2e-2), err

    print("KERNEL_OK")
</pallas_src>

<mosaic_0001>
module attributes {stable_mosaic.version = 11 : i64} {
  func.func @_efficientnet_fused_kernel(%arg0: i32, %arg1: memref<2x64x27xbf16, #tpu.memory_space<vmem>>, %arg2: memref<27x32xbf16, #tpu.memory_space<vmem>>, %arg3: memref<1x32xf32, #tpu.memory_space<vmem>>, %arg4: memref<32x64xbf16, #tpu.memory_space<vmem>>, %arg5: memref<1x64xf32, #tpu.memory_space<vmem>>, %arg6: memref<9x64xf32, #tpu.memory_space<vmem>>, %arg7: memref<1x64xf32, #tpu.memory_space<vmem>>, %arg8: memref<64x8xf32, #tpu.memory_space<vmem>>, %arg9: memref<1x8xf32, #tpu.memory_space<vmem>>, %arg10: memref<8x64xf32, #tpu.memory_space<vmem>>, %arg11: memref<1x64xf32, #tpu.memory_space<vmem>>, %arg12: memref<64x32xbf16, #tpu.memory_space<vmem>>, %arg13: memref<1x32xf32, #tpu.memory_space<vmem>>, %arg14: memref<32x1280xbf16, #tpu.memory_space<vmem>>, %arg15: memref<1x1280xf32, #tpu.memory_space<vmem>>, %arg16: memref<1280x128xbf16, #tpu.memory_space<vmem>>, %arg17: memref<1x128xf32, #tpu.memory_space<vmem>>, %arg18: memref<2x128xf32, #tpu.memory_space<vmem>>, %arg19: memref<2x10x10x64xf32, #tpu.memory_space<vmem>>) attributes {dimension_semantics = [#tpu.dimension_semantics<parallel>], iteration_bounds = array<i64: 1>, scalar_prefetch = 0 : i64, scratch_operands = 1 : i64, tpu.core_type = #tpu.core_type<tc>, window_params = [{transform_indices = @transform_0, window_bounds = array<i64: 2, 64, 27>}, {pipeline_mode = #tpu.pipeline_mode<synchronous>, transform_indices = @transform_1, window_bounds = array<i64: 27, 32>}, {pipeline_mode = #tpu.pipeline_mode<synchronous>, transform_indices = @transform_2, window_bounds = array<i64: 1, 32>}, {pipeline_mode = #tpu.pipeline_mode<synchronous>, transform_indices = @transform_3, window_bounds = array<i64: 32, 64>}, {pipeline_mode = #tpu.pipeline_mode<synchronous>, transform_indices = @transform_4, window_bounds = array<i64: 1, 64>}, {pipeline_mode = #tpu.pipeline_mode<synchronous>, transform_indices = @transform_5, window_bounds = array<i64: 9, 64>}, {pipeline_mode = #tpu.pipeline_mode<synchronous>, transform_indices = @transform_6, window_bounds = array<i64: 1, 64>}, {pipeline_mode = #tpu.pipeline_mode<synchronous>, transform_indices = @transform_7, window_bounds = array<i64: 64, 8>}, {pipeline_mode = #tpu.pipeline_mode<synchronous>, transform_indices = @transform_8, window_bounds = array<i64: 1, 8>}, {pipeline_mode = #tpu.pipeline_mode<synchronous>, transform_indices = @transform_9, window_bounds = array<i64: 8, 64>}, {pipeline_mode = #tpu.pipeline_mode<synchronous>, transform_indices = @transform_10, window_bounds = array<i64: 1, 64>}, {pipeline_mode = #tpu.pipeline_mode<synchronous>, transform_indices = @transform_11, window_bounds = array<i64: 64, 32>}, {pipeline_mode = #tpu.pipeline_mode<synchronous>, transform_indices = @transform_12, window_bounds = array<i64: 1, 32>}, {pipeline_mode = #tpu.pipeline_mode<synchronous>, transform_indices = @transform_13, window_bounds = array<i64: 32, 1280>}, {pipeline_mode = #tpu.pipeline_mode<synchronous>, transform_indices = @transform_14, window_bounds = array<i64: 1, 1280>}, {pipeline_mode = #tpu.pipeline_mode<synchronous>, transform_indices = @transform_15, window_bounds = array<i64: 1280, 128>}, {pipeline_mode = #tpu.pipeline_mode<synchronous>, transform_indices = @transform_16, window_bounds = array<i64: 1, 128>}, {transform_indices = @transform_17, window_bounds = array<i64: 2, 128>}]} {
    %c0 = arith.constant 0 : index
    %c0_0 = arith.constant 0 : index
    %c0_1 = arith.constant 0 : index
    %0 = vector.load %arg1[%c0, %c0_0, %c0_1] : memref<2x64x27xbf16, #tpu.memory_space<vmem>>, vector<2x64x27xbf16>
    %1 = vector.shape_cast %0 : vector<2x64x27xbf16> to vector<128x27xbf16>
    %c0_2 = arith.constant 0 : index
    %c0_3 = arith.constant 0 : index
    %2 = vector.load %arg2[%c0_2, %c0_3] : memref<27x32xbf16, #tpu.memory_space<vmem>>, vector<27x32xbf16>
    %cst = arith.constant dense<0.000000e+00> : vector<128x32xf32>
    %3 = tpu.matmul %1, %2, %cst {dimension_numbers = #tpu.dot_dimension_numbers<[1], [0], [0], [1], [0, 0, 1, 1], [], []>} : vector<128x27xbf16>, vector<27x32xbf16>, vector<128x32xf32> -> vector<128x32xf32>
    %c0_4 = arith.constant 0 : index
    %c0_5 = arith.constant 0 : index
    %4 = vector.load %arg3[%c0_4, %c0_5] : memref<1x32xf32, #tpu.memory_space<vmem>>, vector<1x32xf32>
    %5 = vector.broadcast %4 : vector<1x32xf32> to vector<128x32xf32>
    %6 = arith.addf %3, %5 : vector<128x32xf32>
    %7 = arith.negf %6 : vector<128x32xf32>
    %8 = math.exp %7 : vector<128x32xf32>
    %cst_6 = arith.constant 1.000000e+00 : f32
    %9 = vector.broadcast %cst_6 : f32 to vector<128x32xf32>
    %10 = arith.addf %9, %8 : vector<128x32xf32>
    %11 = arith.divf %9, %10 : vector<128x32xf32>
    %12 = arith.mulf %6, %11 : vector<128x32xf32>
    %13 = arith.truncf %12 : vector<128x32xf32> to vector<128x32xbf16>
    %c0_7 = arith.constant 0 : index
    %c0_8 = arith.constant 0 : index
    %14 = vector.load %arg4[%c0_7, %c0_8] : memref<32x64xbf16, #tpu.memory_space<vmem>>, vector<32x64xbf16>
    %cst_9 = arith.constant dense<0.000000e+00> : vector<128x64xf32>
    %15 = tpu.matmul %13, %14, %cst_9 {dimension_numbers = #tpu.dot_dimension_numbers<[1], [0], [0], [1], [0, 0, 1, 1], [], []>} : vector<128x32xbf16>, vector<32x64xbf16>, vector<128x64xf32> -> vector<128x64xf32>
    %c0_10 = arith.constant 0 : index
    %c0_11 = arith.constant 0 : index
    %16 = vector.load %arg5[%c0_10, %c0_11] : memref<1x64xf32, #tpu.memory_space<vmem>>, vector<1x64xf32>
    %17 = vector.broadcast %16 : vector<1x64xf32> to vector<128x64xf32>
    %18 = arith.addf %15, %17 : vector<128x64xf32>
    %19 = arith.negf %18 : vector<128x64xf32>
    %20 = math.exp %19 : vector<128x64xf32>
    %cst_12 = arith.constant 1.000000e+00 : f32
    %21 = vector.broadcast %cst_12 : f32 to vector<128x64xf32>
    %22 = arith.addf %21, %20 : vector<128x64xf32>
    %23 = arith.divf %21, %22 : vector<128x64xf32>
    %24 = arith.mulf %18, %23 : vector<128x64xf32>
    %cst_13 = arith.constant 0.000000e+00 : f32
    %25 = vector.broadcast %cst_13 : f32 to vector<2x10x10x64xf32>
    %c0_14 = arith.constant 0 : index
    %c0_15 = arith.constant 0 : index
    %c0_16 = arith.constant 0 : index
    %c0_17 = arith.constant 0 : index
    %26 = vector.load %arg19[%c0_14, %c0_15, %c0_16, %c0_17] : memref<2x10x10x64xf32, #tpu.memory_space<vmem>>, vector<2x10x10x64xf32>
    tpu.vector_store %arg19[%c0_14, %c0_15, %c0_16, %c0_17], %25 {strides = array<i32>} : memref<2x10x10x64xf32, #tpu.memory_space<vmem>>, vector<2x10x10x64xf32>,
    %27 = vector.shape_cast %24 : vector<128x64xf32> to vector<2x8x8x64xf32>
    %c0_18 = arith.constant 0 : index
    %c1 = arith.constant 1 : index
    %c1_19 = arith.constant 1 : index
    %c0_20 = arith.constant 0 : index
    %28 = vector.load %arg19[%c0_18, %c1, %c1_19, %c0_20] : memref<2x10x10x64xf32, #tpu.memory_space<vmem>>, vector<2x8x8x64xf32>
    tpu.vector_store %arg19[%c0_18, %c1, %c1_19, %c0_20], %27 {strides = array<i32>} : memref<2x10x10x64xf32, #tpu.memory_space<vmem>>, vector<2x8x8x64xf32>,
    %c0_21 = arith.constant 0 : index
    %c0_22 = arith.constant 0 : index
    %c0_23 = arith.constant 0 : index
    %c0_24 = arith.constant 0 : index
    %29 = vector.load %arg19[%c0_21, %c0_22, %c0_23, %c0_24] : memref<2x10x10x64xf32, #tpu.memory_space<vmem>>, vector<2x10x10x64xf32>
    %c0_25 = arith.constant 0 : index
    %c0_26 = arith.constant 0 : index
    %30 = vector.load %arg6[%c0_25, %c0_26] : memref<9x64xf32, #tpu.memory_space<vmem>>, vector<9x64xf32>
    %cst_27 = arith.constant 0.000000e+00 : f32
    %31 = vector.broadcast %cst_27 : f32 to vector<2x8x8x64xf32>
    %32 = vector.extract_strided_slice %29 {offsets = [0, 0, 0, 0], sizes = [2, 8, 8, 64], strides = [1, 1, 1, 1]} : vector<2x10x10x64xf32> to vector<2x8x8x64xf32>
    %33 = vector.extract_strided_slice %30 {offsets = [0, 0], sizes = [1, 64], strides = [1, 1]} : vector<9x64xf32> to vector<1x64xf32>
    %34 = vector.shape_cast %33 : vector<1x64xf32> to vector<1x1x1x64xf32>
    %35 = vector.broadcast %34 : vector<1x1x1x64xf32> to vector<2x8x8x64xf32>
    %36 = arith.mulf %32, %35 : vector<2x8x8x64xf32>
    %37 = arith.addf %31, %36 : vector<2x8x8x64xf32>
    %38 = vector.extract_strided_slice %29 {offsets = [0, 0, 1, 0], sizes = [2, 8, 8, 64], strides = [1, 1, 1, 1]} : vector<2x10x10x64xf32> to vector<2x8x8x64xf32>
    %39 = vector.extract_strided_slice %30 {offsets = [1, 0], sizes = [1, 64], strides = [1, 1]} : vector<9x64xf32> to vector<1x64xf32>
    %40 = vector.shape_cast %39 : vector<1x64xf32> to vector<1x1x1x64xf32>
    %41 = vector.broadcast %40 : vector<1x1x1x64xf32> to vector<2x8x8x64xf32>
    %42 = arith.mulf %38, %41 : vector<2x8x8x64xf32>
    %43 = arith.addf %37, %42 : vector<2x8x8x64xf32>
    %44 = vector.extract_strided_slice %29 {offsets = [0, 0, 2, 0], sizes = [2, 8, 8, 64], strides = [1, 1, 1, 1]} : vector<2x10x10x64xf32> to vector<2x8x8x64xf32>
    %45 = vector.extract_strided_slice %30 {offsets = [2, 0], sizes = [1, 64], strides = [1, 1]} : vector<9x64xf32> to vector<1x64xf32>
    %46 = vector.shape_cast %45 : vector<1x64xf32> to vector<1x1x1x64xf32>
    %47 = vector.broadcast %46 : vector<1x1x1x64xf32> to vector<2x8x8x64xf32>
    %48 = arith.mulf %44, %47 : vector<2x8x8x64xf32>
    %49 = arith.addf %43, %48 : vector<2x8x8x64xf32>
    %50 = vector.extract_strided_slice %29 {offsets = [0, 1, 0, 0], sizes = [2, 8, 8, 64], strides = [1, 1, 1, 1]} : vector<2x10x10x64xf32> to vector<2x8x8x64xf32>
    %51 = vector.extract_strided_slice %30 {offsets = [3, 0], sizes = [1, 64], strides = [1, 1]} : vector<9x64xf32> to vector<1x64xf32>
    %52 = vector.shape_cast %51 : vector<1x64xf32> to vector<1x1x1x64xf32>
    %53 = vector.broadcast %52 : vector<1x1x1x64xf32> to vector<2x8x8x64xf32>
    %54 = arith.mulf %50, %53 : vector<2x8x8x64xf32>
    %55 = arith.addf %49, %54 : vector<2x8x8x64xf32>
    %56 = vector.extract_strided_slice %29 {offsets = [0, 1, 1, 0], sizes = [2, 8, 8, 64], strides = [1, 1, 1, 1]} : vector<2x10x10x64xf32> to vector<2x8x8x64xf32>
    %57 = vector.extract_strided_slice %30 {offsets = [4, 0], sizes = [1, 64], strides = [1, 1]} : vector<9x64xf32> to vector<1x64xf32>
    %58 = vector.shape_cast %57 : vector<1x64xf32> to vector<1x1x1x64xf32>
    %59 = vector.broadcast %58 : vector<1x1x1x64xf32> to vector<2x8x8x64xf32>
    %60 = arith.mulf %56, %59 : vector<2x8x8x64xf32>
    %61 = arith.addf %55, %60 : vector<2x8x8x64xf32>
    %62 = vector.extract_strided_slice %29 {offsets = [0, 1, 2, 0], sizes = [2, 8, 8, 64], strides = [1, 1, 1, 1]} : vector<2x10x10x64xf32> to vector<2x8x8x64xf32>
    %63 = vector.extract_strided_slice %30 {offsets = [5, 0], sizes = [1, 64], strides = [1, 1]} : vector<9x64xf32> to vector<1x64xf32>
    %64 = vector.shape_cast %63 : vector<1x64xf32> to vector<1x1x1x64xf32>
    %65 = vector.broadcast %64 : vector<1x1x1x64xf32> to vector<2x8x8x64xf32>
    %66 = arith.mulf %62, %65 : vector<2x8x8x64xf32>
    %67 = arith.addf %61, %66 : vector<2x8x8x64xf32>
    %68 = vector.extract_strided_slice %29 {offsets = [0, 2, 0, 0], sizes = [2, 8, 8, 64], strides = [1, 1, 1, 1]} : vector<2x10x10x64xf32> to vector<2x8x8x64xf32>
    %69 = vector.extract_strided_slice %30 {offsets = [6, 0], sizes = [1, 64], strides = [1, 1]} : vector<9x64xf32> to vector<1x64xf32>
    %70 = vector.shape_cast %69 : vector<1x64xf32> to vector<1x1x1x64xf32>
    %71 = vector.broadcast %70 : vector<1x1x1x64xf32> to vector<2x8x8x64xf32>
    %72 = arith.mulf %68, %71 : vector<2x8x8x64xf32>
    %73 = arith.addf %67, %72 : vector<2x8x8x64xf32>
    %74 = vector.extract_strided_slice %29 {offsets = [0, 2, 1, 0], sizes = [2, 8, 8, 64], strides = [1, 1, 1, 1]} : vector<2x10x10x64xf32> to vector<2x8x8x64xf32>
    %75 = vector.extract_strided_slice %30 {offsets = [7, 0], sizes = [1, 64], strides = [1, 1]} : vector<9x64xf32> to vector<1x64xf32>
    %76 = vector.shape_cast %75 : vector<1x64xf32> to vector<1x1x1x64xf32>
    %77 = vector.broadcast %76 : vector<1x1x1x64xf32> to vector<2x8x8x64xf32>
    %78 = arith.mulf %74, %77 : vector<2x8x8x64xf32>
    %79 = arith.addf %73, %78 : vector<2x8x8x64xf32>
    %80 = vector.extract_strided_slice %29 {offsets = [0, 2, 2, 0], sizes = [2, 8, 8, 64], strides = [1, 1, 1, 1]} : vector<2x10x10x64xf32> to vector<2x8x8x64xf32>
    %81 = vector.extract_strided_slice %30 {offsets = [8, 0], sizes = [1, 64], strides = [1, 1]} : vector<9x64xf32> to vector<1x64xf32>
    %82 = vector.shape_cast %81 : vector<1x64xf32> to vector<1x1x1x64xf32>
    %83 = vector.broadcast %82 : vector<1x1x1x64xf32> to vector<2x8x8x64xf32>
    %84 = arith.mulf %80, %83 : vector<2x8x8x64xf32>
    %85 = arith.addf %79, %84 : vector<2x8x8x64xf32>
    %c0_28 = arith.constant 0 : index
    %c0_29 = arith.constant 0 : index
    %86 = vector.load %arg7[%c0_28, %c0_29] : memref<1x64xf32, #tpu.memory_space<vmem>>, vector<1x64xf32>
    %87 = vector.shape_cast %86 : vector<1x64xf32> to vector<1x1x1x64xf32>
    %88 = vector.broadcast %87 : vector<1x1x1x64xf32> to vector<2x8x8x64xf32>
    %89 = arith.addf %85, %88 : vector<2x8x8x64xf32>
    %90 = arith.negf %89 : vector<2x8x8x64xf32>
    %91 = math.exp %90 : vector<2x8x8x64xf32>
    %cst_30 = arith.constant 1.000000e+00 : f32
    %92 = vector.broadcast %cst_30 : f32 to vector<2x8x8x64xf32>
    %93 = arith.addf %92, %91 : vector<2x8x8x64xf32>
    %94 = arith.divf %92, %93 : vector<2x8x8x64xf32>
    %95 = arith.mulf %89, %94 : vector<2x8x8x64xf32>
    %96 = vector.shape_cast %95 : vector<2x8x8x64xf32> to vector<2x64x64xf32>
    %cst_31 = arith.constant dense<0.000000e+00> : vector<2x64xf32>
    %97 = vector.multi_reduction <add>, %96, %cst_31 [1] : vector<2x64x64xf32> to vector<2x64xf32>
    %cst_32 = arith.constant 6.400000e+01 : f32
    %98 = vector.broadcast %cst_32 : f32 to vector<2x64xf32>
    %99 = arith.divf %97, %98 : vector<2x64xf32>
    %c0_33 = arith.constant 0 : index
    %c0_34 = arith.constant 0 : index
    %100 = vector.load %arg8[%c0_33, %c0_34] : memref<64x8xf32, #tpu.memory_space<vmem>>, vector<64x8xf32>
    %cst_35 = arith.constant dense<0.000000e+00> : vector<2x8xf32>
    %101 = tpu.matmul %99, %100, %cst_35 {dimension_numbers = #tpu.dot_dimension_numbers<[1], [0], [0], [1], [0, 0, 1, 1], [], []>} : vector<2x64xf32>, vector<64x8xf32>, vector<2x8xf32> -> vector<2x8xf32>
    %c0_36 = arith.constant 0 : index
    %c0_37 = arith.constant 0 : index
    %102 = vector.load %arg9[%c0_36, %c0_37] : memref<1x8xf32, #tpu.memory_space<vmem>>, vector<1x8xf32>
    %103 = vector.broadcast %102 : vector<1x8xf32> to vector<2x8xf32>
    %104 = arith.addf %101, %103 : vector<2x8xf32>
    %105 = arith.negf %104 : vector<2x8xf32>
    %106 = math.exp %105 : vector<2x8xf32>
    %cst_38 = arith.constant 1.000000e+00 : f32
    %107 = vector.broadcast %cst_38 : f32 to vector<2x8xf32>
    %108 = arith.addf %107, %106 : vector<2x8xf32>
    %109 = arith.divf %107, %108 : vector<2x8xf32>
    %110 = arith.mulf %104, %109 : vector<2x8xf32>
    %c0_39 = arith.constant 0 : index
    %c0_40 = arith.constant 0 : index
    %111 = vector.load %arg10[%c0_39, %c0_40] : memref<8x64xf32, #tpu.memory_space<vmem>>, vector<8x64xf32>
    %cst_41 = arith.constant dense<0.000000e+00> : vector<2x64xf32>
    %112 = tpu.matmul %110, %111, %cst_41 {dimension_numbers = #tpu.dot_dimension_numbers<[1], [0], [0], [1], [0, 0, 1, 1], [], []>} : vector<2x8xf32>, vector<8x64xf32>, vector<2x64xf32> -> vector<2x64xf32>
    %c0_42 = arith.constant 0 : index
    %c0_43 = arith.constant 0 : index
    %113 = vector.load %arg11[%c0_42, %c0_43] : memref<1x64xf32, #tpu.memory_space<vmem>>, vector<1x64xf32>
    %114 = vector.broadcast %113 : vector<1x64xf32> to vector<2x64xf32>
    %115 = arith.addf %112, %114 : vector<2x64xf32>
    %116 = arith.negf %115 : vector<2x64xf32>
    %117 = math.exp %116 : vector<2x64xf32>
    %cst_44 = arith.constant 1.000000e+00 : f32
    %118 = vector.broadcast %cst_44 : f32 to vector<2x64xf32>
    %119 = arith.addf %118, %117 : vector<2x64xf32>
    %120 = arith.divf %118, %119 : vector<2x64xf32>
    %121 = vector.shape_cast %120 : vector<2x64xf32> to vector<2x1x64xf32>
    %122 = vector.broadcast %121 : vector<2x1x64xf32> to vector<2x64x64xf32>
    %123 = arith.mulf %96, %122 : vector<2x64x64xf32>
    %124 = vector.shape_cast %123 : vector<2x64x64xf32> to vector<128x64xf32>
    %125 = arith.truncf %124 : vector<128x64xf32> to vector<128x64xbf16>
    %c0_45 = arith.constant 0 : index
    %c0_46 = arith.constant 0 : index
    %126 = vector.load %arg12[%c0_45, %c0_46] : memref<64x32xbf16, #tpu.memory_space<vmem>>, vector<64x32xbf16>
    %cst_47 = arith.constant dense<0.000000e+00> : vector<128x32xf32>
    %127 = tpu.matmul %125, %126, %cst_47 {dimension_numbers = #tpu.dot_dimension_numbers<[1], [0], [0], [1], [0, 0, 1, 1], [], []>} : vector<128x64xbf16>, vector<64x32xbf16>, vector<128x32xf32> -> vector<128x32xf32>
    %c0_48 = arith.constant 0 : index
    %c0_49 = arith.constant 0 : index
    %128 = vector.load %arg13[%c0_48, %c0_49] : memref<1x32xf32, #tpu.memory_space<vmem>>, vector<1x32xf32>
    %129 = vector.broadcast %128 : vector<1x32xf32> to vector<128x32xf32>
    %130 = arith.addf %127, %129 : vector<128x32xf32>
    %131 = arith.addf %130, %12 : vector<128x32xf32>
    %132 = arith.truncf %131 : vector<128x32xf32> to vector<128x32xbf16>
    %cst_50 = arith.constant 0.000000e+00 : f32
    %133 = vector.broadcast %cst_50 : f32 to vector<2x128xf32>
    %c0_51 = arith.constant 0 : index
    %c0_52 = arith.constant 0 : index
    %134 = vector.load %arg14[%c0_51, %c0_52] : memref<32x1280xbf16, #tpu.memory_space<vmem>>, vector<32x640xbf16>
    %cst_53 = arith.constant dense<0.000000e+00> : vector<128x640xf32>
    %135 = tpu.matmul %132, %134, %cst_53 {dimension_numbers = #tpu.dot_dimension_numbers<[1], [0], [0], [1], [0, 0, 1, 1], [], []>} : vector<128x32xbf16>, vector<32x640xbf16>, vector<128x640xf32> -> vector<128x640xf32>
    %c0_54 = arith.constant 0 : index
    %c0_55 = arith.constant 0 : index
    %136 = vector.load %arg15[%c0_54, %c0_55] : memref<1x1280xf32, #tpu.memory_space<vmem>>, vector<1x640xf32>
    %137 = vector.broadcast %136 : vector<1x640xf32> to vector<128x640xf32>
    %138 = arith.addf %135, %137 : vector<128x640xf32>
    %139 = arith.negf %138 : vector<128x640xf32>
    %140 = math.exp %139 : vector<128x640xf32>
    %cst_56 = arith.constant 1.000000e+00 : f32
    %141 = vector.broadcast %cst_56 : f32 to vector<128x640xf32>
    %142 = arith.addf %141, %140 : vector<128x640xf32>
    %143 = arith.divf %141, %142 : vector<128x640xf32>
    %144 = arith.mulf %138, %143 : vector<128x640xf32>
    %145 = vector.shape_cast %144 : vector<128x640xf32> to vector<2x64x640xf32>
    %cst_57 = arith.constant dense<0.000000e+00> : vector<2x640xf32>
    %146 = vector.multi_reduction <add>, %145, %cst_57 [1] : vector<2x64x640xf32> to vector<2x640xf32>
    %cst_58 = arith.constant 1.562500e-02 : f32
    %147 = vector.broadcast %cst_58 : f32 to vector<2x640xf32>
    %148 = arith.mulf %146, %147 : vector<2x640xf32>
    %149 = arith.truncf %148 : vector<2x640xf32> to vector<2x640xbf16>
    %c0_59 = arith.constant 0 : index
    %c0_60 = arith.constant 0 : index
    %150 = vector.load %arg16[%c0_59, %c0_60] : memref<1280x128xbf16, #tpu.memory_space<vmem>>, vector<640x128xbf16>
    %cst_61 = arith.constant dense<0.000000e+00> : vector<2x128xf32>
    %151 = tpu.matmul %149, %150, %cst_61 {dimension_numbers = #tpu.dot_dimension_numbers<[1], [0], [0], [1], [0, 0, 1, 1], [], []>} : vector<2x640xbf16>, vector<640x128xbf16>, vector<2x128xf32> -> vector<2x128xf32>
    %152 = arith.addf %133, %151 : vector<2x128xf32>
    %c0_62 = arith.constant 0 : index
    %c640 = arith.constant 640 : index
    %153 = vector.load %arg14[%c0_62, %c640] : memref<32x1280xbf16, #tpu.memory_space<vmem>>, vector<32x640xbf16>
    %cst_63 = arith.constant dense<0.000000e+00> : vector<128x640xf32>
    %154 = tpu.matmul %132, %153, %cst_63 {dimension_numbers = #tpu.dot_dimension_numbers<[1], [0], [0], [1], [0, 0, 1, 1], [], []>} : vector<128x32xbf16>, vector<32x640xbf16>, vector<128x640xf32> -> vector<128x640xf32>
    %c0_64 = arith.constant 0 : index
    %c640_65 = arith.constant 640 : index
    %155 = vector.load %arg15[%c0_64, %c640_65] : memref<1x1280xf32, #tpu.memory_space<vmem>>, vector<1x640xf32>
    %156 = vector.broadcast %155 : vector<1x640xf32> to vector<128x640xf32>
    %157 = arith.addf %154, %156 : vector<128x640xf32>
    %158 = arith.negf %157 : vector<128x640xf32>
    %159 = math.exp %158 : vector<128x640xf32>
    %cst_66 = arith.constant 1.000000e+00 : f32
    %160 = vector.broadcast %cst_66 : f32 to vector<128x640xf32>
    %161 = arith.addf %160, %159 : vector<128x640xf32>
    %162 = arith.divf %160, %161 : vector<128x640xf32>
    %163 = arith.mulf %157, %162 : vector<128x640xf32>
    %164 = vector.shape_cast %163 : vector<128x640xf32> to vector<2x64x640xf32>
    %cst_67 = arith.constant dense<0.000000e+00> : vector<2x640xf32>
    %165 = vector.multi_reduction <add>, %164, %cst_67 [1] : vector<2x64x640xf32> to vector<2x640xf32>
    %cst_68 = arith.constant 1.562500e-02 : f32
    %166 = vector.broadcast %cst_68 : f32 to vector<2x640xf32>
    %167 = arith.mulf %165, %166 : vector<2x640xf32>
    %168 = arith.truncf %167 : vector<2x640xf32> to vector<2x640xbf16>
    %c640_69 = arith.constant 640 : index
    %c0_70 = arith.constant 0 : index
    %169 = vector.load %arg16[%c640_69, %c0_70] : memref<1280x128xbf16, #tpu.memory_space<vmem>>, vector<640x128xbf16>
    %cst_71 = arith.constant dense<0.000000e+00> : vector<2x128xf32>
    %170 = tpu.matmul %168, %169, %cst_71 {dimension_numbers = #tpu.dot_dimension_numbers<[1], [0], [0], [1], [0, 0, 1, 1], [], []>} : vector<2x640xbf16>, vector<640x128xbf16>, vector<2x128xf32> -> vector<2x128xf32>
    %171 = arith.addf %152, %170 : vector<2x128xf32>
    %c0_72 = arith.constant 0 : index
    %c0_73 = arith.constant 0 : index
    %172 = vector.load %arg17[%c0_72, %c0_73] : memref<1x128xf32, #tpu.memory_space<vmem>>, vector<1x128xf32>
    %173 = vector.broadcast %172 : vector<1x128xf32> to vector<2x128xf32>
    %174 = arith.addf %171, %173 : vector<2x128xf32>
    %c0_74 = arith.constant 0 : index
    %c0_75 = arith.constant 0 : index
    %175 = vector.load %arg18[%c0_74, %c0_75] : memref<2x128xf32, #tpu.memory_space<vmem>>, vector<2x128xf32>
    tpu.vector_store %arg18[%c0_74, %c0_75], %174 {strides = array<i32>} : memref<2x128xf32, #tpu.memory_space<vmem>>, vector<2x128xf32>,
    return
  }
  func.func @transform_0(%arg0: i32) -> (i32, i32, i32) {
    %c0_i32 = arith.constant 0 : i32
    %c0_i32_0 = arith.constant 0 : i32
    %c0_i32_1 = arith.constant 0 : i32
    return %arg0, %c0_i32, %c0_i32_0 : i32, i32, i32
  }
  func.func @transform_1(%arg0: i32) -> (i32, i32) {
    %c0_i32 = arith.constant 0 : i32
    %c0_i32_0 = arith.constant 0 : i32
    %c0_i32_1 = arith.constant 0 : i32
    return %c0_i32, %c0_i32_0 : i32, i32
  }
  func.func @transform_2(%arg0: i32) -> (i32, i32) {
    %c0_i32 = arith.constant 0 : i32
    %c0_i32_0 = arith.constant 0 : i32
    %c0_i32_1 = arith.constant 0 : i32
    return %c0_i32, %c0_i32_0 : i32, i32
  }
  func.func @transform_3(%arg0: i32) -> (i32, i32) {
    %c0_i32 = arith.constant 0 : i32
    %c0_i32_0 = arith.constant 0 : i32
    %c0_i32_1 = arith.constant 0 : i32
    return %c0_i32, %c0_i32_0 : i32, i32
  }
  func.func @transform_4(%arg0: i32) -> (i32, i32) {
    %c0_i32 = arith.constant 0 : i32
    %c0_i32_0 = arith.constant 0 : i32
    %c0_i32_1 = arith.constant 0 : i32
    return %c0_i32, %c0_i32_0 : i32, i32
  }
  func.func @transform_5(%arg0: i32) -> (i32, i32) {
    %c0_i32 = arith.constant 0 : i32
    %c0_i32_0 = arith.constant 0 : i32
    %c0_i32_1 = arith.constant 0 : i32
    return %c0_i32, %c0_i32_0 : i32, i32
  }
  func.func @transform_6(%arg0: i32) -> (i32, i32) {
    %c0_i32 = arith.constant 0 : i32
    %c0_i32_0 = arith.constant 0 : i32
    %c0_i32_1 = arith.constant 0 : i32
    return %c0_i32, %c0_i32_0 : i32, i32
  }
  func.func @transform_7(%arg0: i32) -> (i32, i32) {
    %c0_i32 = arith.constant 0 : i32
    %c0_i32_0 = arith.constant 0 : i32
    %c0_i32_1 = arith.constant 0 : i32
    return %c0_i32, %c0_i32_0 : i32, i32
  }
  func.func @transform_8(%arg0: i32) -> (i32, i32) {
    %c0_i32 = arith.constant 0 : i32
    %c0_i32_0 = arith.constant 0 : i32
    %c0_i32_1 = arith.constant 0 : i32
    return %c0_i32, %c0_i32_0 : i32, i32
  }
  func.func @transform_9(%arg0: i32) -> (i32, i32) {
    %c0_i32 = arith.constant 0 : i32
    %c0_i32_0 = arith.constant 0 : i32
    %c0_i32_1 = arith.constant 0 : i32
    return %c0_i32, %c0_i32_0 : i32, i32
  }
  func.func @transform_10(%arg0: i32) -> (i32, i32) {
    %c0_i32 = arith.constant 0 : i32
    %c0_i32_0 = arith.constant 0 : i32
    %c0_i32_1 = arith.constant 0 : i32
    return %c0_i32, %c0_i32_0 : i32, i32
  }
  func.func @transform_11(%arg0: i32) -> (i32, i32) {
    %c0_i32 = arith.constant 0 : i32
    %c0_i32_0 = arith.constant 0 : i32
    %c0_i32_1 = arith.constant 0 : i32
    return %c0_i32, %c0_i32_0 : i32, i32
  }
  func.func @transform_12(%arg0: i32) -> (i32, i32) {
    %c0_i32 = arith.constant 0 : i32
    %c0_i32_0 = arith.constant 0 : i32
    %c0_i32_1 = arith.constant 0 : i32
    return %c0_i32, %c0_i32_0 : i32, i32
  }
  func.func @transform_13(%arg0: i32) -> (i32, i32) {
    %c0_i32 = arith.constant 0 : i32
    %c0_i32_0 = arith.constant 0 : i32
    %c0_i32_1 = arith.constant 0 : i32
    return %c0_i32, %c0_i32_0 : i32, i32
  }
  func.func @transform_14(%arg0: i32) -> (i32, i32) {
    %c0_i32 = arith.constant 0 : i32
    %c0_i32_0 = arith.constant 0 : i32
    %c0_i32_1 = arith.constant 0 : i32
    return %c0_i32, %c0_i32_0 : i32, i32
  }
  func.func @transform_15(%arg0: i32) -> (i32, i32) {
    %c0_i32 = arith.constant 0 : i32
    %c0_i32_0 = arith.constant 0 : i32
    %c0_i32_1 = arith.constant 0 : i32
    return %c0_i32, %c0_i32_0 : i32, i32
  }
  func.func @transform_16(%arg0: i32) -> (i32, i32) {
    %c0_i32 = arith.constant 0 : i32
    %c0_i32_0 = arith.constant 0 : i32
    %c0_i32_1 = arith.constant 0 : i32
    return %c0_i32, %c0_i32_0 : i32, i32
  }
  func.func @transform_17(%arg0: i32) -> (i32, i32) {
    %c0_i32 = arith.constant 0 : i32
    %c0_i32_0 = arith.constant 0 : i32
    return %arg0, %c0_i32 : i32, i32
  }
}

</mosaic_0001>

<bundles_post_ra>
// kernel: efficientnet_forward.1
= control target key start
LH: loop header
LB: loop body
LE: loop exit
PB: predicated region body
PF: predicated region fallthrough
CT: control target
= control target key end

     0   :  { %s11383_s0 = inlined_call_operand.vmem [shape: bf16[2,64,27], index: 0, kind: input, shape index: {}]   ;;  %s11384_s1 = inlined_call_operand.vmem [shape: bf16[27,32], index: 1, kind: input, shape index: {}]   ;;  %s11385_s2 = inlined_call_operand.vmem [shape: f32[1,32], index: 2, kind: input, shape index: {}]   ;;  %s11386_s3 = inlined_call_operand.vmem [shape: bf16[32,64], index: 3, kind: input, shape index: {}]   ;;  %s11387_s4 = inlined_call_operand.vmem [shape: f32[1,64], index: 4, kind: input, shape index: {}]   ;;  %s11388_s5 = inlined_call_operand.vmem [shape: f32[9,64], index: 5, kind: input, shape index: {}]   ;;  %s11389_s6 = inlined_call_operand.vmem [shape: f32[1,64], index: 6, kind: input, shape index: {}]   ;;  %s11390_s7 = inlined_call_operand.vmem [shape: f32[64,8], index: 7, kind: input, shape index: {}]   ;;  %s11391_s8 = inlined_call_operand.vmem [shape: f32[1,8], index: 8, kind: input, shape index: {}]   ;;  %s11392_s9 = inlined_call_operand.vmem [shape: f32[8,64], index: 9, kind: input, shape index: {}]   ;;  %s11393_s10 = inlined_call_operand.vmem [shape: f32[1,64], index: 10, kind: input, shape index: {}]   ;;  %s11394_s11 = inlined_call_operand.vmem [shape: bf16[64,32], index: 11, kind: input, shape index: {}]   ;;  %s11395_s12 = inlined_call_operand.vmem [shape: f32[1,32], index: 12, kind: input, shape index: {}]   ;;  %s11396_s13 = inlined_call_operand.vmem [shape: bf16[32,1280], index: 13, kind: input, shape index: {}]   ;;  %s11397_s14 = inlined_call_operand.vmem [shape: f32[1,1280], index: 14, kind: input, shape index: {}]   ;;  %s11398_s15 = inlined_call_operand.vmem [shape: bf16[1280,128], index: 15, kind: input, shape index: {}]   ;;  %s11399_s16 = inlined_call_operand.vmem [shape: f32[1,128], index: 16, kind: input, shape index: {}]   ;;  %s11400_s17 = inlined_call_operand.hbm [shape: f32[2,128], index: 17, kind: output, shape index: {}]  }
   0x1   :  { %11573 = sst [smem:[#allocation77_spill]] %s11383_s0 }
   0x2   :  { %11574 = sst [smem:[#allocation78_spill]] %s11384_s1 }
   0x3   :  { %s11575_s26 = sld [smem:[#allocation78_spill]]  ;;  %vm161_vm0 = vcmask 1044480   ;;  %vm162_vm1 = vcmask 1045504   ;;  %v7364_v2 = vmov 65535   ;;  %s11576_s30 = sld [smem:[#allocation77_spill]]  ;;  %vm136_vm2 = vcmask 220160  }
   0x4   :  { %v163_v3 = vsel %vm161_vm0, 4294967295, %v7364_v2 }
   0x5   :  { %v164_v5 = vsel %vm162_vm1, %v163_v3, 0 }
   0x9   :  { %v6356_v0 = vld [vmem:[%s11575_s26] sm:$0xff]   ;;  %v6357_v1 = vld [vmem:[%s11575_s26 + $0x8] sm:$0x3f]   ;;  %v6360_v8 = vld [vmem:[%s11576_s30 + $0x10] sm:$0xff]  }
   0xa   :  { %6169 = vmatprep.subr.bf16.mxu0 %v6356_v0  ;;  %v6358_v4 = vld [vmem:[%s11576_s30] sm:$0xff]   ;;  %v166_v6 = vand.u32 %v6357_v1, %v164_v5  ;;  %v6359_v7 = vld [vmem:[%s11576_s30 + $0x8] sm:$0xff]   ;;  %v6361_v9 = vld [vmem:[%s11576_s30 + $0x18] sm:$0xff]  }
   0xb   :  { %6170 = vmatpush3.bf16.msra.mxu0 %v6356_v0  ;;  %6173 = vmatprep.mubr.msk.bf16.mxu0 %vm136_vm2, %v6358_v4  ;;  %v6362_v10 = vld [vmem:[%s11576_s30 + $0x20] sm:$0xff]   ;;  %v6363_v11 = vld [vmem:[%s11576_s30 + $0x28] sm:$0xff]   ;;  %v6364_v12 = vld [vmem:[%s11576_s30 + $0x30] sm:$0xff]  }
   0xc   :  { %6171 = vmatprep.subr.bf16.mxu0 %v166_v6  ;;  %v6365_v13 = vld [vmem:[%s11576_s30 + $0x38] sm:$0xff]  }
   0xf   :  { %6172 = vmatpush3.bf16.msra.mxu0 %v166_v6 }
  0x12   :  { %6174 = vmatmul.mubr.msk.bf16.vlgmr.msra.gmra.mrb[0].mxu0 %vm136_vm2, %v6359_v7 }
  0x13   :  { %6177 = vmatprep.mubr.msk.bf16.mxu0 %vm136_vm2, %v6360_v8 }
  0x1a   :  { %6178 = vmatmul.mubr.msk.bf16.gmra.mrb[4].mxu0 %vm136_vm2, %v6361_v9 }
  0x1b   :  { %6181 = vmatprep.mubr.msk.bf16.mxu0 %vm136_vm2, %v6362_v10 }
  0x22   :  { %6182 = vmatmul.mubr.msk.bf16.gmra.mrb[8].mxu0 %vm136_vm2, %v6363_v11 }
  0x23   :  { %6185 = vmatprep.mubr.msk.bf16.mxu0 %vm136_vm2, %v6364_v12 }
  0x2a   :  { %6186 = vmatmul.mubr.msk.bf16.gmra.mrb[12].mxu0 %vm136_vm2, %v6365_v13 }
  0x2b   :  { %22 = vsyncpa [#allocation4], 0  ;;  %v6366_v14 = vld [vmem:[%s11386_s3] sm:$0xff]   ;;  %v6367_v15 = vld [vmem:[%s11386_s3 + $0x8] sm:$0xff]   ;;  %vm408_vm3 = vcmask 261120   ;;  %vm642_vm4 = vcmask 523264  }
  0x2c   :  { %6189 = vmatprep.subr.bf16.mxu1 %v6366_v14  ;;  %v7509_v16 = vld [vmem:[%s11385_s2] ss:$0 sm:$0xff]  ;;  %vm644_vm5 = vcmask 517120   ;;  %vm7367_vm6 = vmmov 0   ;;  %vm847_vm7 = vcmask 1046528   ;;  %vm1937_vm8 = vcmask 1041409  }
  0x2d   :  { %6190 = vmatpush3.bf16.msra.mxu1 %v6366_v14  ;;  %vm2026_vm9 = vcmask 64512   ;;  %s7370_s28 = smov [#allocation3]  }
  0x2e   :  { %6191 = vmatprep.subr.bf16.mxu1 %v6367_v15 }
  0x31   :  { %6192 = vmatpush3.bf16.msra.mxu1 %v6367_v15 }
  0xe5   :  { %v6175_v17 = vpop.f32.mrb[0].mxu0 }
  0xe6   :  { %v7512_v18 = vadd.f32 %v6175_v17, %v7509_v16  ;;  %v202_v19 = vpop.f32.mrb[1].mxu0 }
  0xe7   :  { %v7515_v20 = vadd.f32 %v7509_v16, %v202_v19  ;;  %v6176_v21 = vpop.f32.mrb[2].mxu0 }
  0xe8   :  { %v5613_v22 = vmul.f32 -1.442695, %v7512_v18  ;;  %v7519_v23 = vadd.f32 %v6176_v21, %v7509_v16  ;;  %v205_v24 = vpop.f32.mrb[3].mxu0 }
  0xe9   :  { %v5611_v25 = vmul.f32 -1.442695, %v7515_v20  ;;  %v7523_v26 = vadd.f32 %v7509_v16, %v205_v24 }
  0xea   :  { %6480 = vpow2.f32 %v5613_v22  ;;  %v5614_v27 = vmul.f32 -1.442695, %v7519_v23 }
  0xeb   :  { %6482 = vpow2.f32 %v5611_v25  ;;  %v5612_v28 = vmul.f32 -1.442695, %v7523_v26 }
  0xec   :  { %6484 = vpow2.f32 %v5614_v27 }
  0xed   :  { %6486 = vpow2.f32 %v5612_v28  ;;  %v6179_v29 = vpop.f32.mrb[4].mxu0 }
  0xee   :  { %v7528_v30 = vadd.f32 %v6179_v29, %v7509_v16  ;;  %v218_v31 = vpop.f32.mrb[5].mxu0 }
  0xef   :  { %v7531_v32 = vadd.f32 %v7509_v16, %v218_v31  ;;  %v6180_v33 = vpop.f32.mrb[6].mxu0 }
  0xf0   :  { %v5617_v34 = vmul.f32 -1.442695, %v7528_v30  ;;  %v7535_v35 = vadd.f32 %v6180_v33, %v7509_v16  ;;  %v221_v36 = vpop.f32.mrb[7].mxu0 }
  0xf1   :  { %v5615_v37 = vmul.f32 -1.442695, %v7531_v32  ;;  %v7539_v38 = vadd.f32 %v7509_v16, %v221_v36 }
  0xf2   :  { %6488 = vpow2.f32 %v5617_v34  ;;  %v5618_v39 = vmul.f32 -1.442695, %v7535_v35 }
  0xf3   :  { %6490 = vpow2.f32 %v5615_v37  ;;  %v5616_v40 = vmul.f32 -1.442695, %v7539_v38 }
  0xf4   :  { %v6481_v41 = vpop.eup %6480  ;;  %6492 = vpow2.f32 %v5618_v39 }
  0xf5   :  { %v6483_v42 = vpop.eup %6482  ;;  %v315_v43 = vadd.f32 1.0, %v6481_v41  ;;  %6494 = vpow2.f32 %v5616_v40  ;;  %v6183_v44 = vpop.f32.mrb[8].mxu0 }
  0xf6   :  { %v6485_v45 = vpop.eup %6484  ;;  %v313_v46 = vadd.f32 1.0, %v6483_v42  ;;  %v7544_v47 = vadd.f32 %v6183_v44, %v7509_v16  ;;  %v234_v48 = vpop.f32.mrb[9].mxu0 }
  0xf7   :  { %v6487_v49 = vpop.eup %6486  ;;  %6496 = vrcp.f32 %v315_v43  ;;  %v316_v50 = vadd.f32 1.0, %v6485_v45  ;;  %v7547_v51 = vadd.f32 %v7509_v16, %v234_v48  ;;  %v6184_v52 = vpop.f32.mrb[10].mxu0 }
  0xf8   :  { %6498 = vrcp.f32 %v313_v46  ;;  %v314_v53 = vadd.f32 1.0, %v6487_v49  ;;  %v5621_v54 = vmul.f32 -1.442695, %v7544_v47  ;;  %v7551_v55 = vadd.f32 %v6184_v52, %v7509_v16  ;;  %v237_v56 = vpop.f32.mrb[11].mxu0 }
  0xf9   :  { %6500 = vrcp.f32 %v316_v50  ;;  %v5619_v57 = vmul.f32 -1.442695, %v7547_v51  ;;  %v7555_v58 = vadd.f32 %v7509_v16, %v237_v56 }
  0xfa   :  { %6502 = vrcp.f32 %v314_v53  ;;  %v5622_v59 = vmul.f32 -1.442695, %v7551_v55 }
  0xfb   :  { %6504 = vpow2.f32 %v5621_v54  ;;  %v5620_v60 = vmul.f32 -1.442695, %v7555_v58 }
  0xfc   :  { %v6489_v61 = vpop.eup %6488  ;;  %6506 = vpow2.f32 %v5619_v57 }
  0xfd   :  { %v6491_v62 = vpop.eup %6490  ;;  %v319_v63 = vadd.f32 1.0, %v6489_v61  ;;  %6508 = vpow2.f32 %v5622_v59  ;;  %v6187_v0 = vpop.f32.mrb[12].mxu0 }
  0xfe   :  { %v6493_v1 = vpop.eup %6492  ;;  %v317_v2 = vadd.f32 1.0, %v6491_v62  ;;  %6510 = vpow2.f32 %v5620_v60  ;;  %v7560_v3 = vadd.f32 %v6187_v0, %v7509_v16  ;;  %v250_v4 = vpop.f32.mrb[13].mxu0 }
  0xff   :  { %v6495_v5 = vpop.eup %6494  ;;  %6512 = vrcp.f32 %v319_v63  ;;  %v320_v6 = vadd.f32 1.0, %v6493_v1  ;;  %v7563_v7 = vadd.f32 %v7509_v16, %v250_v4  ;;  %v6188_v8 = vpop.f32.mrb[14].mxu0 }
 0x100   :  { %6514 = vrcp.f32 %v317_v2  ;;  %v318_v9 = vadd.f32 1.0, %v6495_v5  ;;  %v5625_v10 = vmul.f32 -1.442695, %v7560_v3  ;;  %v7567_v11 = vadd.f32 %v6188_v8, %v7509_v16  ;;  %v253_v12 = vpop.f32.mrb[15].mxu0 }
 0x101   :  { %v6497_v13 = vpop.eup %6496  ;;  %6516 = vrcp.f32 %v320_v6  ;;  %v5623_v14 = vmul.f32 -1.442695, %v7563_v7  ;;  %v7571_v15 = vadd.f32 %v7509_v16, %v253_v12  ;;  %v1922_v12 = vld [vmem:[%s11390_s7 + $0x10] sm:$0xff] }
 0x102   :  { %v6499_v17 = vpop.eup %6498  ;;  %6518 = vrcp.f32 %v318_v9  ;;  %v5626_v19 = vmul.f32 -1.442695, %v7567_v11  ;;  %v7585_v31 = vmul.f32 %v6497_v13, %v7512_v18  ;;  %v7366_v13 = vmov 0.0|0.0  }
 0x103   :  { %v6501_v21 = vpop.eup %6500  ;;  %6520 = vpow2.f32 %v5625_v10  ;;  %v5624_v22 = vmul.f32 -1.442695, %v7571_v15  ;;  %v7579_v28 = vmul.f32 %v6499_v17, %v7515_v20  ;;  %6337 = vmatprep.subr.bf16.mxu0 %v7366_v13 }
 0x104   :  { %v6503_v24 = vpop.eup %6502  ;;  %v7576_v25 = vmul.f32 %v6501_v21, %v7519_v23  ;;  %6522 = vpow2.f32 %v5623_v14  ;;  %11580 = vst [vmem:[#allocation9_spill] sm:$0xff] %v7585_v31  ;;  %v1925_v21 = vld [vmem:[%s11390_s7 + $0x28] sm:$0xff] }
 0x105   :  { %v6505_v27 = vpop.eup %6504  ;;  %11578 = vst [vmem:[#allocation7_spill] sm:$0xff] %v7579_v28  ;;  %v7582_v16 = vmul.f32 %v6503_v24, %v7523_v26  ;;  %6524 = vpow2.f32 %v5626_v19  ;;  %v1924_v19 = vld [vmem:[%s11390_s7 + $0x20] sm:$0xff]  ;;  %v1926_v24 = vld [vmem:[%s11390_s7 + $0x30] sm:$0xff] }
 0x106   :  { %11577 = vst [vmem:[#allocation6_spill] sm:$0xff] %v7576_v25  ;;  %v6507_v29 = vpop.eup %6506  ;;  %v323_v33 = vadd.f32 1.0, %v6505_v27  ;;  %6526 = vpow2.f32 %v5624_v22  ;;  %v378_v20 = vpack.c.bf16 %v7576_v25, %v7585_v31  ;;  %v6344_v22 = vpack.c.bf16 %v1925_v21, %v1924_v19  ;;  %v1927_v27 = vld [vmem:[%s11390_s7 + $0x38] sm:$0xff] }
 0x107   :  { %11579 = vst [vmem:[#allocation8_spill] sm:$0xff] %v7582_v16  ;;  %v6509_v34 = vpop.eup %6508  ;;  %v321_v36 = vadd.f32 1.0, %v6507_v29  ;;  %v377_v23 = vpack.c.bf16 %v7582_v16, %v7579_v28  ;;  %v6347_v29 = vpack.c.bf16 %v1927_v27, %v1926_v24 }
 0x108   :  { %v6511_v37 = vpop.eup %6510  ;;  %6528 = vrcp.f32 %v323_v33  ;;  %v324_v26 = vadd.f32 1.0, %v6509_v34  ;;  %v7757_v33 = vld [vmem:[%s11387_s4] ss:$0 sm:$0xff] }
 0x109   :  { %v6513_v39 = vpop.eup %6512  ;;  %6530 = vrcp.f32 %v321_v36  ;;  %v322_v40 = vadd.f32 1.0, %v6511_v37  ;;  %6193 = vmatprep.mubr.msk.bf16.mxu1 %vm408_vm3, %v377_v23 }
 0x10a   :  { %v6515_v18 = vpop.eup %6514  ;;  %6532 = vrcp.f32 %v324_v26  ;;  %6194 = vmatmul.mubr.msk.bf16.vlgmr.msra.gmra.mrb[0].mxu1 %vm408_vm3, %v378_v20  ;;  %v7603_v49 = vmul.f32 %v6513_v39, %v7528_v30  ;;  %v743_v39 = vlaneseq }
 0x10b   :  { %v6517_v41 = vpop.eup %6516  ;;  %6534 = vrcp.f32 %v322_v40  ;;  %v7597_v45 = vmul.f32 %v6515_v18, %v7531_v32 }
 0x10c   :  { %v6519_v42 = vpop.eup %6518  ;;  %v7594_v43 = vmul.f32 %v6517_v41, %v7535_v35  ;;  %11584 = vst [vmem:[#allocation13_spill] sm:$0xff] %v7603_v49 }
 0x10d   :  { %v6521_v44 = vpop.eup %6520  ;;  %11582 = vst [vmem:[#allocation11_spill] sm:$0xff] %v7597_v45  ;;  %v7600_v46 = vmul.f32 %v6519_v42, %v7539_v38 }
 0x10e   :  { %11581 = vst [vmem:[#allocation10_spill] sm:$0xff] %v7594_v43  ;;  %v6523_v48 = vpop.eup %6522  ;;  %v327_v50 = vadd.f32 1.0, %v6521_v44  ;;  %v380_v35 = vpack.c.bf16 %v7594_v43, %v7603_v49 }
 0x10f   :  { %11583 = vst [vmem:[#allocation12_spill] sm:$0xff] %v7600_v46  ;;  %v6525_v52 = vpop.eup %6524  ;;  %v379_v53 = vpack.c.bf16 %v7600_v46, %v7597_v45  ;;  %v325_v54 = vadd.f32 1.0, %v6523_v48 }
 0x110   :  { %v6527_v56 = vpop.eup %6526  ;;  %6536 = vrcp.f32 %v327_v50  ;;  %v328_v32 = vadd.f32 1.0, %v6525_v52  ;;  %v7775_v50 = vshrl.u32 %v743_v39, 7 }
 0x111   :  { %6538 = vrcp.f32 %v325_v54  ;;  %v326_v57 = vadd.f32 1.0, %v6527_v56  ;;  %6197 = vmatprep.mubr.msk.bf16.mxu1 %vm408_vm3, %v379_v53 }
 0x112   :  { %v6529_v38 = vpop.eup %6528  ;;  %6540 = vrcp.f32 %v328_v32  ;;  %6198 = vmatmul.mubr.msk.bf16.gmra.mrb[4].mxu1 %vm408_vm3, %v380_v35  ;;  %11593 = vst [vmem:[#allocation22_spill] sm:$0xff] %v7775_v50  ;;  %v7784_v32 = vsub.s32 1, %v7775_v50 }
 0x113   :  { %v6531_v30 = vpop.eup %6530  ;;  %6542 = vrcp.f32 %v326_v57  ;;  %v7621_v0 = vmul.f32 %v6529_v38, %v7544_v47 }
 0x114   :  { %v6533_v59 = vpop.eup %6532  ;;  %v7615_v62 = vmul.f32 %v6531_v30, %v7547_v51  ;;  %11594 = vst [vmem:[#allocation23_spill] sm:$0xff] %v7784_v32 }
 0x115   :  { %v6535_v60 = vpop.eup %6534  ;;  %v7612_v61 = vmul.f32 %v6533_v59, %v7551_v55  ;;  %11588 = vst [vmem:[#allocation17_spill] sm:$0xff] %v7621_v0  ;;  %v7793_v59 = vld [vmem:[%s11388_s5] sm:$0xff] }
 0x116   :  { %11586 = vst [vmem:[#allocation15_spill] sm:$0xff] %v7615_v62  ;;  %v7618_v63 = vmul.f32 %v6535_v60, %v7555_v58 }
 0x117   :  { %11585 = vst [vmem:[#allocation14_spill] sm:$0xff] %v7612_v61  ;;  %v382_v2 = vpack.c.bf16 %v7612_v61, %v7621_v0 }
 0x118   :  { %11587 = vst [vmem:[#allocation16_spill] sm:$0xff] %v7618_v63  ;;  %v381_v1 = vpack.c.bf16 %v7618_v63, %v7615_v62 }
 0x11a   :  { %v6537_v4 = vpop.eup %6536  ;;  %6201 = vmatprep.mubr.msk.bf16.mxu1 %vm408_vm3, %v381_v1 }
 0x11b   :  { %v6539_v55 = vpop.eup %6538  ;;  %6202 = vmatmul.mubr.msk.bf16.gmra.mrb[8].mxu1 %vm408_vm3, %v382_v2  ;;  %v7639_v8 = vmul.f32 %v6537_v4, %v7560_v3  ;;  %v1920_v3 = vld [vmem:[%s11390_s7] sm:$0xff]  ;;  %v7800_v2 = vsub.s32 2, %v7775_v50 }
 0x11c   :  { %v6541_v51 = vpop.eup %6540  ;;  %v7633_v47 = vmul.f32 %v6539_v55, %v7563_v7  ;;  %v11403_v7 = vmov 0.0   ;;  %v7804_v55 = vsub.s32 0, %v7775_v50 }
 0x11d   :  { %v6543_v5 = vpop.eup %6542  ;;  %v7630_v58 = vmul.f32 %v6541_v51, %v7567_v11  ;;  %11592 = vst [vmem:[#allocation21_spill] sm:$0xff] %v7639_v8  ;;  %650 = vst.msk [vmem:[#allocation2 + $0x30] sm:$0xff] %vm642_vm4, %v11403_v7  ;;  %v1921_v11 = vld [vmem:[%s11390_s7 + $0x8] sm:$0xff]  ;;  %6225 = vmatprep.mubr.msk.f32.mxu0 %vm7367_vm6, %v11403_v7 }
 0x11e   :  { %11590 = vst [vmem:[#allocation19_spill] sm:$0xff] %v7633_v47  ;;  %v7636_v6 = vmul.f32 %v6543_v5, %v7571_v15  ;;  %651 = vst.msk [vmem:[#allocation2 + $0x38] sm:$0x3] %vm644_vm5, %v11403_v7  ;;  %v6338_v14 = vpack.c.bf16 %v1921_v11, %v1920_v3  ;;  %v1923_v15 = vld [vmem:[%s11390_s7 + $0x18] sm:$0xff]  ;;  %v7817_v21 = vrot.slane %v7793_v59, %v7804_v55 }
 0x11f   :  { %11589 = vst [vmem:[#allocation18_spill] sm:$0xff] %v7630_v58  ;;  %v384_v10 = vpack.c.bf16 %v7630_v58, %v7639_v8  ;;  %643 = vst.msk [vmem:[#allocation2] sm:$0xff] %vm642_vm4, %v11403_v7  ;;  %v6341_v17 = vpack.c.bf16 %v1923_v15, %v1922_v12 }
 0x120   :  { %11591 = vst [vmem:[#allocation20_spill] sm:$0xff] %v7636_v6  ;;  %v383_v9 = vpack.c.bf16 %v7636_v6, %v7633_v47  ;;  %645 = vst.msk [vmem:[#allocation2 + $0x8] sm:$0x3] %vm644_vm5, %v11403_v7  ;;  %6339 = vmatpush3.bf16.msra.mxu0 %v6338_v14 }
 0x121   :  { %646 = vst.msk [vmem:[#allocation2 + $0x10] sm:$0xff] %vm642_vm4, %v11403_v7  ;;  %648 = vst.msk [vmem:[#allocation2 + $0x20] sm:$0xff] %vm642_vm4, %v11403_v7  ;;  %6340 = vmatprep.subr.bf16.mxu0 %v7366_v13 }
 0x122   :  { %6205 = vmatprep.mubr.msk.bf16.mxu1 %vm408_vm3, %v383_v9  ;;  %647 = vst.msk [vmem:[#allocation2 + $0x18] sm:$0x3] %vm644_vm5, %v11403_v7  ;;  %649 = vst.msk [vmem:[#allocation2 + $0x28] sm:$0x3] %vm644_vm5, %v11403_v7  ;;  %v7809_v9 = vrot.slane %v7793_v59, %v7784_v32 }
 0x123   :  { %6206 = vmatmul.mubr.msk.bf16.gmra.mrb[12].mxu1 %vm408_vm3, %v384_v10  ;;  %652 = vst.msk [vmem:[#allocation2 + $0x40] sm:$0xff] %vm642_vm4, %v11403_v7  ;;  %654 = vst.msk [vmem:[#allocation2 + $0x50] sm:$0xff] %vm642_vm4, %v11403_v7 }
 0x124   :  { %653 = vst.msk [vmem:[#allocation2 + $0x48] sm:$0x3] %vm644_vm5, %v11403_v7  ;;  %655 = vst.msk [vmem:[#allocation2 + $0x58] sm:$0x3] %vm644_vm5, %v11403_v7  ;;  %6342 = vmatpush3.bf16.msra.mxu0 %v6341_v17 }
 0x125   :  { %656 = vst.msk [vmem:[#allocation2 + $0x60] sm:$0xff] %vm642_vm4, %v11403_v7  ;;  %658 = vst.msk [vmem:[#allocation2 + $0x70] sm:$0xff] %vm642_vm4, %v11403_v7  ;;  %6343 = vmatprep.subr.bf16.mxu0 %v7366_v13 }
 0x126   :  { %657 = vst.msk [vmem:[#allocation2 + $0x68] sm:$0x3] %vm644_vm5, %v11403_v7  ;;  %659 = vst.msk [vmem:[#allocation2 + $0x78] sm:$0x3] %vm644_vm5, %v11403_v7  ;;  %v701_v11 = vld [vmem:[#allocation2] sm:$0xff] }
 0x127   :  { %660 = vst.msk [vmem:[#allocation2 + $0x80] sm:$0xff] %vm642_vm4, %v11403_v7  ;;  %662 = vst.msk [vmem:[#allocation2 + $0x90] sm:$0xff] %vm642_vm4, %v11403_v7  ;;  %v702_v17 = vld [vmem:[#allocation2 + $0x8] sm:$0x3] }
 0x128   :  { %661 = vst.msk [vmem:[#allocation2 + $0x88] sm:$0x3] %vm644_vm5, %v11403_v7  ;;  %663 = vst.msk [vmem:[#allocation2 + $0x98] sm:$0x3] %vm644_vm5, %v11403_v7  ;;  %6345 = vmatpush3.bf16.msra.mxu0 %v6344_v22 }
 0x129   :  { %664 = vst.msk [vmem:[#allocation2 + $0xa0] sm:$0xff] %vm642_vm4, %v11403_v7  ;;  %666 = vst.msk [vmem:[#allocation2 + $0xb0] sm:$0xff] %vm642_vm4, %v11403_v7  ;;  %6346 = vmatprep.subr.bf16.mxu0 %v7366_v13  ;;  %v7813_v13 = vrot.slane %v7793_v59, %v7800_v2 }
 0x12a   :  { %665 = vst.msk [vmem:[#allocation2 + $0xa8] sm:$0x3] %vm644_vm5, %v11403_v7  ;;  %667 = vst.msk [vmem:[#allocation2 + $0xb8] sm:$0x3] %vm644_vm5, %v11403_v7 }
 0x12b   :  { %668 = vst.msk [vmem:[#allocation2 + $0xc0] sm:$0xff] %vm642_vm4, %v11403_v7  ;;  %670 = vst.msk [vmem:[#allocation2 + $0xd0] sm:$0xff] %vm642_vm4, %v11403_v7 }
 0x12c   :  { %669 = vst.msk [vmem:[#allocation2 + $0xc8] sm:$0x3] %vm644_vm5, %v11403_v7  ;;  %671 = vst.msk [vmem:[#allocation2 + $0xd8] sm:$0x3] %vm644_vm5, %v11403_v7  ;;  %6348 = vmatpush3.bf16.msra.mxu0 %v6347_v29 }
 0x12d   :  { %672 = vst.msk [vmem:[#allocation2 + $0xe0] sm:$0xff] %vm642_vm4, %v11403_v7  ;;  %674 = vst.msk [vmem:[#allocation2 + $0xf0] sm:$0xff] %vm642_vm4, %v11403_v7  ;;  %6228 = vmatprep.subr.mxu0 %v11403_v7 }
 0x12e   :  { %673 = vst.msk [vmem:[#allocation2 + $0xe8] sm:$0x3] %vm644_vm5, %v11403_v7  ;;  %675 = vst.msk [vmem:[#allocation2 + $0xf8] sm:$0x3] %vm644_vm5, %v11403_v7 }
 0x12f   :  { %676 = vst.msk [vmem:[#allocation2 + $0x100] sm:$0xff] %vm642_vm4, %v11403_v7  ;;  %678 = vst.msk [vmem:[#allocation2 + $0x110] sm:$0xff] %vm642_vm4, %v11403_v7 }
 0x130   :  { %677 = vst.msk [vmem:[#allocation2 + $0x108] sm:$0x3] %vm644_vm5, %v11403_v7  ;;  %679 = vst.msk [vmem:[#allocation2 + $0x118] sm:$0x3] %vm644_vm5, %v11403_v7 }
 0x131   :  { %680 = vst.msk [vmem:[#allocation2 + $0x120] sm:$0xff] %vm642_vm4, %v11403_v7  ;;  %682 = vst.msk [vmem:[#allocation2 + $0x130] sm:$0xff] %vm642_vm4, %v11403_v7 }
 0x132   :  { %681 = vst.msk [vmem:[#allocation2 + $0x128] sm:$0x3] %vm644_vm5, %v11403_v7  ;;  %683 = vst.msk [vmem:[#allocation2 + $0x138] sm:$0x3] %vm644_vm5, %v11403_v7 }
 0x133   :  { %11595 = vst [vmem:[#allocation24_spill] sm:$0xff] %v7800_v2  ;;  %11596 = vst [vmem:[#allocation25_spill] sm:$0xff] %v7804_v55 }
 0x1dd   :  { %v6195_v34 = vpop.f32.mrb[0].mxu1 }
 0x1de   :  { %v7760_v36 = vadd.f32 %v6195_v34, %v7757_v33  ;;  %v467_v23 = vpop.f32.mrb[1].mxu1 }
 0x1df   :  { %v7763_v37 = vadd.f32 %v7757_v33, %v467_v23  ;;  %v6196_v20 = vpop.f32.mrb[2].mxu1 }
 0x1e0   :  { %v5640_v26 = vmul.f32 -1.442695, %v7760_v36  ;;  %v7767_v40 = vadd.f32 %v6196_v20, %v7757_v33  ;;  %v470_v18 = vpop.f32.mrb[3].mxu1  ;;  %v7825_v20 = vld [vmem:[#allocation2 + $0xa0] sm:$0xff] }
 0x1e1   :  { %v5638_v41 = vmul.f32 -1.442695, %v7763_v37  ;;  %v7771_v42 = vadd.f32 %v7757_v33, %v470_v18 }
 0x1e2   :  { %6544 = vpow2.f32 %v5640_v26  ;;  %v5641_v44 = vmul.f32 -1.442695, %v7767_v40  ;;  %v7828_v26 = vmul.f32 %v7809_v9, %v701_v11 }
 0x1e3   :  { %6546 = vpow2.f32 %v5638_v41  ;;  %v5639_v48 = vmul.f32 -1.442695, %v7771_v42 }
 0x1e4   :  { %6548 = vpow2.f32 %v5641_v44  ;;  %v722_v44 = vld [vmem:[#allocation2 + $0xa8] sm:$0x3] }
 0x1e5   :  { %6550 = vpow2.f32 %v5639_v48  ;;  %v6199_v52 = vpop.f32.mrb[4].mxu1  ;;  %v784_v48 = vmul.f32 %v7809_v9, %v702_v17 }
 0x1e6   :  { %v7778_v53 = vadd.f32 %v6199_v52, %v7757_v33  ;;  %v483_v54 = vpop.f32.mrb[5].mxu1  ;;  %v7836_v52 = vsub.s32 4, %v7775_v50 }
 0x1e7   :  { %v7781_v56 = vadd.f32 %v7757_v33, %v483_v54  ;;  %v6200_v35 = vpop.f32.mrb[6].mxu1 }
 0x1e8   :  { %v5644_v57 = vmul.f32 -1.442695, %v7778_v53  ;;  %v7788_v38 = vadd.f32 %v6200_v35, %v7757_v33  ;;  %v486_v30 = vpop.f32.mrb[7].mxu1  ;;  %11597 = vst [vmem:[#allocation26_spill] sm:$0xff] %v7836_v52 }
 0x1e9   :  { %v5642_v60 = vmul.f32 -1.442695, %v7781_v56  ;;  %v7797_v1 = vadd.f32 %v7757_v33, %v486_v30  ;;  %v799_v30 = vmul.f32 %v7809_v9, %v7825_v20 }
 0x1ea   :  { %6552 = vpow2.f32 %v5644_v57  ;;  %v5645_v4 = vmul.f32 -1.442695, %v7788_v38 }
 0x1eb   :  { %6554 = vpow2.f32 %v5642_v60  ;;  %v5643_v51 = vmul.f32 -1.442695, %v7797_v1 }
 0x1ec   :  { %v6545_v5 = vpop.eup %6544  ;;  %6556 = vpow2.f32 %v5645_v4 }
 0x1ed   :  { %v6547_v10 = vpop.eup %6546  ;;  %v580_v3 = vadd.f32 1.0, %v6545_v5  ;;  %6558 = vpow2.f32 %v5643_v51  ;;  %v7847_v51 = vmul.f32 %v7817_v21, %v701_v11  ;;  %v800_v5 = vmul.f32 %v7809_v9, %v722_v44 }
 0x1ee   :  { %v6549_v12 = vpop.eup %6548  ;;  %v578_v14 = vadd.f32 1.0, %v6547_v10  ;;  %v6203_v15 = vpop.f32.mrb[8].mxu1 }
 0x1ef   :  { %v6551_v19 = vpop.eup %6550  ;;  %6560 = vrcp.f32 %v580_v3  ;;  %v581_v22 = vadd.f32 1.0, %v6549_v12  ;;  %v7820_v24 = vadd.f32 %v6203_v15, %v7757_v33  ;;  %v499_v27 = vpop.f32.mrb[9].mxu1  ;;  %v848_v12 = vrot.slane %v7828_v26, 1 }
 0x1f0   :  { %6562 = vrcp.f32 %v578_v14  ;;  %v579_v29 = vadd.f32 1.0, %v6551_v19  ;;  %v7823_v34 = vadd.f32 %v7757_v33, %v499_v27  ;;  %v6204_v23 = vpop.f32.mrb[10].mxu1  ;;  %v849_v14 = vrot.slane %v784_v48, 1 }
 0x1f1   :  { %6564 = vrcp.f32 %v581_v22  ;;  %v5648_v39 = vmul.f32 -1.442695, %v7820_v24  ;;  %v7832_v18 = vadd.f32 %v6204_v23, %v7757_v33  ;;  %v502_v41 = vpop.f32.mrb[11].mxu1  ;;  %v7852_v27 = vmul.f32 %v7813_v13, %v701_v11 }
 0x1f2   :  { %6566 = vrcp.f32 %v579_v29  ;;  %v5646_v54 = vmul.f32 -1.442695, %v7823_v34  ;;  %v7840_v35 = vadd.f32 %v7757_v33, %v502_v41  ;;  %v7855_v29 = vmul.f32 %v7813_v13, %v702_v17 }
 0x1f3   :  { %6568 = vpow2.f32 %v5648_v39  ;;  %v5649_v57 = vmul.f32 -1.442695, %v7832_v18 }
 0x1f4   :  { %v6553_v60 = vpop.eup %6552  ;;  %6570 = vpow2.f32 %v5646_v54  ;;  %v5647_v4 = vmul.f32 -1.442695, %v7840_v35 }
 0x1f5   :  { %v6555_v10 = vpop.eup %6554  ;;  %v584_v3 = vadd.f32 1.0, %v6553_v60  ;;  %6572 = vpow2.f32 %v5649_v57  ;;  %v872_v57 = vrot.slane %v799_v30, 1 }
 0x1f6   :  { %v6557_v15 = vpop.eup %6556  ;;  %v582_v19 = vadd.f32 1.0, %v6555_v10  ;;  %6574 = vpow2.f32 %v5647_v4  ;;  %v6207_v22 = vpop.f32.mrb[12].mxu1  ;;  %v873_v4 = vrot.slane %v800_v5, 1 }
 0x1f7   :  { %v6559_v23 = vpop.eup %6558  ;;  %6576 = vrcp.f32 %v584_v3  ;;  %v585_v39 = vadd.f32 1.0, %v6557_v15  ;;  %v7858_v41 = vadd.f32 %v6207_v22, %v7757_v33  ;;  %v515_v54 = vpop.f32.mrb[13].mxu1  ;;  %v948_v15 = vmul.f32 %v7813_v13, %v7825_v20 }
 0x1f8   :  { %6578 = vrcp.f32 %v582_v19  ;;  %v583_v26 = vadd.f32 1.0, %v6559_v23  ;;  %v7861_v48 = vadd.f32 %v7757_v33, %v515_v54  ;;  %v6208_v60 = vpop.f32.mrb[14].mxu1 }
 0x1f9   :  { %v6561_v11 = vpop.eup %6560  ;;  %6580 = vrcp.f32 %v585_v39  ;;  %v5652_v17 = vmul.f32 -1.442695, %v7858_v41  ;;  %v7865_v10 = vadd.f32 %v6208_v60, %v7757_v33  ;;  %v518_v3 = vpop.f32.mrb[15].mxu1  ;;  %v949_v60 = vmul.f32 %v7813_v13, %v722_v44 }
 0x1fa   :  { %v6563_v22 = vpop.eup %6562  ;;  %v628_v30 = vmul.f32 %v6561_v11, %v7760_v36  ;;  %6582 = vrcp.f32 %v583_v26  ;;  %v5650_v19 = vmul.f32 -1.442695, %v7861_v48  ;;  %v7872_v23 = vadd.f32 %v7757_v33, %v518_v3 }
 0x1fb   :  { %v6565_v5 = vpop.eup %6564  ;;  %v626_v39 = vmul.f32 %v6563_v22, %v7763_v37  ;;  %6584 = vpow2.f32 %v5652_v17  ;;  %v5653_v54 = vmul.f32 -1.442695, %v7865_v10  ;;  %v850_v26 = vsel %vm847_vm7, %v848_v12, %v849_v14 }
 0x1fc   :  { %v6567_v7 = vpop.eup %6566  ;;  %687 = vst.msk [vmem:[#allocation2 + $0x31] sm:$0xff] %vm642_vm4, %v628_v30  ;;  %v629_v32 = vmul.f32 %v6565_v5, %v7767_v40  ;;  %6586 = vpow2.f32 %v5650_v19  ;;  %v5651_v36 = vmul.f32 -1.442695, %v7872_v23  ;;  %v755_v11 = vmul.f32 %v7817_v21, %v7825_v20  ;;  %v719_v5 = vld [vmem:[#allocation2 + $0x90] sm:$0xff] }
 0x1fd   :  { %v6569_v33 = vpop.eup %6568  ;;  %685 = vst.msk [vmem:[#allocation2 + $0x11] sm:$0xff] %vm642_vm4, %v626_v39  ;;  %v627_v37 = vmul.f32 %v6567_v7, %v7771_v42  ;;  %6588 = vpow2.f32 %v5653_v54  ;;  %v874_v44 = vsel %vm847_vm7, %v872_v57, %v873_v4  ;;  %v996_v3 = vrot.slane %v7852_v27, 2  ;;  %v720_v39 = vld [vmem:[#allocation2 + $0x98] sm:$0x3] }
 0x1fe   :  { %v6571_v17 = vpop.eup %6570  ;;  %688 = vst.msk [vmem:[#allocation2 + $0x41] sm:$0xff] %vm642_vm4, %v629_v32  ;;  %v588_v40 = vadd.f32 1.0, %v6569_v33  ;;  %6590 = vpow2.f32 %v5651_v36  ;;  %v1446_v12 = vsub.s32 7, %v7775_v50  ;;  %v997_v7 = vrot.slane %v7855_v29, 2 }
 0x1ff   :  { %v6573_v14 = vpop.eup %6572  ;;  %686 = vst.msk [vmem:[#allocation2 + $0x21] sm:$0xff] %vm642_vm4, %v627_v37  ;;  %v586_v22 = vadd.f32 1.0, %v6571_v17  ;;  %v1020_v42 = vrot.slane %v948_v15, 2  ;;  %v1021_v30 = vrot.slane %v949_v60, 2  ;;  %v1262_v57 = vsub.s32 5, %v7775_v50 }
 0x200   :  { %v6575_v20 = vpop.eup %6574  ;;  %6592 = vrcp.f32 %v588_v40  ;;  %v589_v4 = vadd.f32 1.0, %v6573_v14  ;;  %v912_v32 = vadd.f32 %v850_v26, %v7847_v51  ;;  %v920_v54 = vadd.f32 %v874_v44, %v755_v11  ;;  %v739_v40 = vld [vmem:[#allocation2 + $0x130] sm:$0xff]  ;;  %v740_v14 = vld [vmem:[#allocation2 + $0x138] sm:$0x3] }
 0x201   :  { %v6577_v19 = vpop.eup %6576  ;;  %6594 = vrcp.f32 %v586_v22  ;;  %v587_v27 = vadd.f32 1.0, %v6575_v20  ;;  %v1410_v36 = vsub.s32 6, %v7775_v50  ;;  %v7896_v15 = vsub.s32 3, %v7775_v50 }
 0x202   :  { %v6579_v33 = vpop.eup %6578  ;;  %v632_v29 = vmul.f32 %v6577_v19, %v7778_v53  ;;  %6596 = vrcp.f32 %v589_v4  ;;  %v7899_v60 = vrot.slane %v7793_v59, %v1446_v12  ;;  %v998_v11 = vsel %vm162_vm1, %v996_v3, %v997_v7 }
 0x203   :  { %11598 = vst [vmem:[#allocation27_spill] sm:$0xff] %v7896_v15  ;;  %v6581_v37 = vpop.eup %6580  ;;  %v7901_v51 = vld [vmem:[#allocation2 + $0x38] sm:$0x3]  ;;  %v630_v26 = vmul.f32 %v6579_v33, %v7781_v56  ;;  %6598 = vrcp.f32 %v587_v27  ;;  %v1022_v44 = vsel %vm162_vm1, %v1020_v42, %v1021_v30  ;;  %v7914_v56 = vld [vmem:[#allocation2 + $0x30] sm:$0xff]  ;;  %v7918_v3 = vrot.slane %v7793_v59, %v7836_v52 }
 0x204   :  { %11599 = vst [vmem:[#allocation28_spill] sm:$0xff] %v7899_v60  ;;  %11600 = vst [vmem:[#allocation29_spill] sm:$0xff] %v7901_v51  ;;  %v6583_v17 = vpop.eup %6582  ;;  %v633_v53 = vmul.f32 %v6581_v37, %v7788_v38  ;;  %v7909_v12 = vmul.f32 %v7899_v60, %v719_v5  ;;  %v7912_v22 = vmul.f32 %v7899_v60, %v720_v39  ;;  %v7931_v4 = vld [vmem:[#allocation2 + $0x10] sm:$0xff]  ;;  %v704_v19 = vld [vmem:[#allocation2 + $0x18] sm:$0x3] }
 0x205   :  { %691 = vst.msk [vmem:[#allocation2 + $0x71] sm:$0xff] %vm642_vm4, %v632_v29  ;;  %v6585_v20 = vpop.eup %6584  ;;  %11603 = vst [vmem:[#allocation32_spill] sm:$0xff] %v7914_v56  ;;  %v7921_v7 = vrot.slane %v7793_v59, %v1262_v57  ;;  %v7925_v38 = vrot.slane %v7793_v59, %v1410_v36  ;;  %v7929_v30 = vmul.f32 %v7809_v9, %v7901_v51  ;;  %v7975_v52 = vld [vmem:[#allocation2 + $0x48] sm:$0x3] }
 0x206   :  { %11601 = vst [vmem:[#allocation30_spill] sm:$0xff] %v7909_v12  ;;  %11602 = vst [vmem:[#allocation31_spill] sm:$0xff] %v7912_v22  ;;  %v6587_v42 = vpop.eup %6586  ;;  %v7934_v27 = vadd.f32 %v998_v11, %v912_v32  ;;  %v7936_v39 = vadd.f32 %v1022_v44, %v920_v54  ;;  %v7940_v57 = vrot.slane %v7793_v59, %v7896_v15  ;;  %v7978_v2 = vld [vmem:[#allocation2 + $0x28] sm:$0x3]  ;;  %v592_v6 = vadd.f32 1.0, %v6585_v20  ;;  %v7984_v63 = vld [vmem:[#allocation2 + $0x20] sm:$0xff] }
 0x207   :  { %11604 = vst [vmem:[#allocation33_spill] sm:$0xff] %v7918_v3  ;;  %11605 = vst [vmem:[#allocation34_spill] sm:$0xff] %v7921_v7  ;;  %v6589_v36 = vpop.eup %6588  ;;  %v7943_v33 = vmul.f32 %v7925_v38, %v719_v5  ;;  %v7946_v29 = vmul.f32 %v7925_v38, %v739_v40  ;;  %v7949_v37 = vmul.f32 %v7899_v60, %v739_v40  ;;  %v590_v47 = vadd.f32 1.0, %v6587_v42 }
 0x208   :  { %689 = vst.msk [vmem:[#allocation2 + $0x51] sm:$0xff] %vm642_vm4, %v630_v26  ;;  %11606 = vst [vmem:[#allocation35_spill] sm:$0xff] %v7925_v38  ;;  %v7952_v26 = vmul.f32 %v7899_v60, %v740_v14  ;;  %v6591_v32 = vpop.eup %6590  ;;  %v7956_v54 = vmul.f32 %v7813_v13, %v7901_v51  ;;  %v7960_v59 = vmul.f32 %v7817_v21, %v7914_v56  ;;  %v593_v61 = vadd.f32 1.0, %v6589_v36 }
 0x209   :  { %11607 = vst [vmem:[#allocation36_spill] sm:$0xff] %v7931_v4  ;;  %692 = vst.msk [vmem:[#allocation2 + $0x81] sm:$0xff] %vm642_vm4, %v633_v53  ;;  %v7966_v44 = vmul.f32 %v7817_v21, %v7931_v4  ;;  %v785_v53 = vmul.f32 %v7809_v9, %v7931_v4  ;;  %v786_v40 = vmul.f32 %v7809_v9, %v704_v19  ;;  %v591_v0 = vadd.f32 1.0, %v6591_v32 }
 0x20a   :  { %11608 = vst [vmem:[#allocation37_spill] sm:$0xff] %v7934_v27  ;;  %11609 = vst [vmem:[#allocation38_spill] sm:$0xff] %v7936_v39  ;;  %v7973_v14 = vmul.f32 %v7813_v13, %v7931_v4  ;;  %v6593_v15 = vpop.eup %6592  ;;  %v631_v11 = vmul.f32 %v6583_v17, %v7797_v1  ;;  %v7982_v8 = vmul.f32 %v7813_v13, %v704_v19  ;;  %v7994_v1 = vld [vmem:[#allocation2 + $0x40] sm:$0xff]  ;;  %6600 = vrcp.f32 %v592_v6 }
 0x20b   :  { %11610 = vst [vmem:[#allocation39_spill] sm:$0xff] %v7940_v57  ;;  %11611 = vst [vmem:[#allocation40_spill] sm:$0xff] %v7943_v33  ;;  %v6595_v58 = vpop.eup %6594  ;;  %v636_v62 = vmul.f32 %v6593_v15, %v7820_v24  ;;  %v7989_v5 = vmul.f32 %v7918_v3, %v7931_v4  ;;  %v7992_v45 = vmul.f32 %v7918_v3, %v704_v19  ;;  %6602 = vrcp.f32 %v590_v47 }
 0x20c   :  { %11612 = vst [vmem:[#allocation41_spill] sm:$0xff] %v7946_v29  ;;  %11613 = vst [vmem:[#allocation42_spill] sm:$0xff] %v7949_v37  ;;  %v6597_v46 = vpop.eup %6596  ;;  %v634_v24 = vmul.f32 %v6595_v58, %v7823_v34  ;;  %v792_v42 = vmul.f32 %v7809_v9, %v7975_v52  ;;  %v788_v36 = vmul.f32 %v7809_v9, %v7978_v2  ;;  %v8008_v43 = vld [vmem:[#allocation2 + $0x70] sm:$0xff]  ;;  %v8010_v49 = vld [vmem:[#allocation2 + $0x78] sm:$0x3]  ;;  %6604 = vrcp.f32 %v593_v61 }
 0x20d   :  { %11614 = vst [vmem:[#allocation43_spill] sm:$0xff] %v7952_v26  ;;  %11615 = vst [vmem:[#allocation44_spill] sm:$0xff] %v7975_v52  ;;  %v6599_v15 = vpop.eup %6598  ;;  %v637_v32 = vmul.f32 %v6597_v46, %v7832_v18  ;;  %v787_v6 = vmul.f32 %v7809_v9, %v7984_v63  ;;  %v789_v34 = vmul.f32 %v7809_v9, %v7914_v56  ;;  %6606 = vrcp.f32 %v591_v0 }
 0x20e   :  { %11616 = vst [vmem:[#allocation45_spill] sm:$0xff] %v7978_v2  ;;  %11617 = vst [vmem:[#allocation46_spill] sm:$0xff] %v7984_v63  ;;  %v635_v58 = vmul.f32 %v6599_v15, %v7840_v35  ;;  %v791_v46 = vmul.f32 %v7809_v9, %v7994_v1  ;;  %v851_v18 = vrot.slane %v785_v53, 1  ;;  %v852_v61 = vrot.slane %v786_v40, 1 }
 0x20f   :  { %11618 = vst [vmem:[#allocation47_spill] sm:$0xff] %v7989_v5  ;;  %11619 = vst [vmem:[#allocation48_spill] sm:$0xff] %v7992_v45  ;;  %v7996_v17 = vld [vmem:[#allocation2 + $0x50] sm:$0xff]  ;;  %v7998_v20 = vld [vmem:[#allocation2 + $0x58] sm:$0x3]  ;;  %v8026_v35 = vmul.f32 %v7921_v7, %v704_v19  ;;  %v855_v0 = vrot.slane %v788_v36, 1  ;;  %v798_v15 = vmul.f32 %v7809_v9, %v8010_v49  ;;  %v8068_v12 = vmul.f32 %v7817_v21, %v8008_v43 }
 0x210   :  { %11620 = vst [vmem:[#allocation49_spill] sm:$0xff] %v7994_v1  ;;  %11621 = vst [vmem:[#allocation50_spill] sm:$0xff] %v7996_v17  ;;  %v794_v47 = vmul.f32 %v7809_v9, %v7998_v20  ;;  %v857_v16 = vrot.slane %v789_v34, 1  ;;  %v860_v28 = vrot.slane %v791_v46, 1  ;;  %v861_v25 = vrot.slane %v792_v42, 1 }
 0x211   :  { %11622 = vst [vmem:[#allocation51_spill] sm:$0xff] %v7998_v20  ;;  %690 = vst.msk [vmem:[#allocation2 + $0x61] sm:$0xff] %vm642_vm4, %v631_v11  ;;  %v8030_v11 = vmul.f32 %v7813_v13, %v7978_v2  ;;  %v853_v36 = vsel %vm847_vm7, %v851_v18, %v852_v61  ;;  %v749_v42 = vmul.f32 %v7817_v21, %v7984_v63 }
 0x212   :  { %695 = vst.msk [vmem:[#allocation2 + $0xd1] sm:$0xff] %vm642_vm4, %v636_v62  ;;  %11623 = vst [vmem:[#allocation52_spill] sm:$0xff] %v8008_v43  ;;  %v793_v62 = vmul.f32 %v7809_v9, %v7996_v17  ;;  %v864_v55 = vrot.slane %v794_v47, 1  ;;  %v8064_v50 = vmul.f32 %v7817_v21, %v7996_v17  ;;  %v862_v26 = vsel %vm847_vm7, %v860_v28, %v861_v25 }
 0x213   :  { %11624 = vst [vmem:[#allocation53_spill] sm:$0xff] %v8010_v49  ;;  %693 = vst.msk [vmem:[#allocation2 + $0xb1] sm:$0xff] %vm642_vm4, %v634_v24  ;;  %v797_v24 = vmul.f32 %v7809_v9, %v8008_v43  ;;  %v8084_v60 = vadd.f32 %v853_v36, %v7966_v44 }
 0x214   :  { %696 = vst.msk [vmem:[#allocation2 + $0xe1] sm:$0xff] %vm642_vm4, %v637_v32  ;;  %11625 = vst [vmem:[#allocation54_spill] sm:$0xff] %v8026_v35  ;;  %v854_v32 = vrot.slane %v787_v6, 1  ;;  %v863_v31 = vrot.slane %v793_v62, 1  ;;  %v8045_v6 = vmul.f32 %v7918_v3, %v7978_v2  ;;  %v870_v62 = vrot.slane %v798_v15, 1  ;;  %v6601_v47 = vpop.eup %6600 }
 0x215   :  { %694 = vst.msk [vmem:[#allocation2 + $0xc1] sm:$0xff] %vm642_vm4, %v635_v58  ;;  %v869_v46 = vrot.slane %v797_v24, 1  ;;  %v8060_v58 = vmul.f32 %v7817_v21, %v7994_v1  ;;  %v6603_v15 = vpop.eup %6602 }
 0x216   :  { %11626 = vst [vmem:[#allocation55_spill] sm:$0xff] %v8045_v6  ;;  %v856_v34 = vsel %vm847_vm7, %v854_v32, %v855_v0  ;;  %v11631_v0 = vrot.slane %v7929_v30, 1  ;;  %v8081_v37 = vsel %vm847_vm7, %v863_v31, %v864_v55  ;;  %v6605_v29 = vpop.eup %6604 }
 0x217   :  { %v8091_v33 = vadd.f32 %v856_v34, %v749_v42  ;;  %v6607_v38 = vpop.eup %6606  ;;  %v871_v36 = vsel %vm847_vm7, %v869_v46, %v870_v62  ;;  %v640_v46 = vmul.f32 %v6601_v47, %v7858_v41  ;;  %v638_v62 = vmul.f32 %v6603_v15, %v7861_v48 }
 0x218   :  { %v8047_v53 = vld [vmem:[#allocation2 + $0x60] sm:$0xff]  ;;  %v8054_v18 = vld [vmem:[#allocation2 + $0x68] sm:$0x3]  ;;  %v8073_v24 = vsel %vm847_vm7, %v857_v16, %v11631_v0  ;;  %v639_v57 = vmul.f32 %v6607_v38, %v7872_v23 }
 0x219   :  { %11627 = vst [vmem:[#allocation56_spill] sm:$0xff] %v8047_v53  ;;  %11629 = vst [vmem:[#allocation58_spill] sm:$0xff] %v8054_v18  ;;  %v8056_v61 = vld [vmem:[#allocation2 + $0xd8] sm:$0x3]  ;;  %v8075_v32 = vld [vmem:[#allocation2 + $0xd0] sm:$0xff]  ;;  %v753_v16 = vmul.f32 %v7817_v21, %v8047_v53  ;;  %v795_v0 = vmul.f32 %v7809_v9, %v8047_v53  ;;  %v796_v44 = vmul.f32 %v7809_v9, %v8054_v18 }
 0x21a   :  { %v8049_v40 = vld [vmem:[#allocation2 + $0xb0] sm:$0xff]  ;;  %v724_v19 = vld [vmem:[#allocation2 + $0xb8] sm:$0x3]  ;;  %11630 = vst [vmem:[#allocation59_spill] sm:$0xff] %v8056_v61  ;;  %11632 = vst [vmem:[#allocation60_spill] sm:$0xff] %v8075_v32  ;;  %v806_v25 = vmul.f32 %v7809_v9, %v8056_v61  ;;  %v8097_v28 = vmul.f32 %v7813_v13, %v8056_v61  ;;  %v805_v6 = vmul.f32 %v7809_v9, %v8075_v32 }
 0x21b   :  { %11628 = vst [vmem:[#allocation57_spill] sm:$0xff] %v8049_v40  ;;  %v801_v22 = vmul.f32 %v7809_v9, %v8049_v40  ;;  %v802_v30 = vmul.f32 %v7809_v9, %v724_v19  ;;  %11633 = vst [vmem:[#allocation61_spill] sm:$0xff] %v8091_v33  ;;  %v8099_v31 = vld [vmem:[#allocation2 + $0xe8] sm:$0x3]  ;;  %v8108_v42 = vmul.f32 %v7813_v13, %v8049_v40  ;;  %v8116_v2 = vld [vmem:[#allocation2 + $0xe0] sm:$0xff] }
 0x21c   :  { %11634 = vst [vmem:[#allocation62_spill] sm:$0xff] %v8099_v31  ;;  %v8101_v55 = vld [vmem:[#allocation2 + $0xc8] sm:$0x3]  ;;  %v8111_v34 = vmul.f32 %v7813_v13, %v724_v19  ;;  %v8114_v35 = vmul.f32 %v7918_v3, %v724_v19  ;;  %11637 = vst [vmem:[#allocation65_spill] sm:$0xff] %v8116_v2  ;;  %v8118_v45 = vld [vmem:[#allocation2 + $0xc0] sm:$0xff]  ;;  %v641_v61 = vmul.f32 %v6605_v29, %v7865_v10  ;;  %v866_v10 = vrot.slane %v795_v0, 1 }
 0x21d   :  { %11635 = vst [vmem:[#allocation63_spill] sm:$0xff] %v8101_v55  ;;  %11638 = vst [vmem:[#allocation66_spill] sm:$0xff] %v8118_v45  ;;  %v875_v5 = vrot.slane %v801_v22, 1  ;;  %v876_v51 = vrot.slane %v802_v30, 1  ;;  %v808_v39 = vmul.f32 %v7809_v9, %v8099_v31  ;;  %v804_v27 = vmul.f32 %v7809_v9, %v8101_v55 }
 0x21e   :  { %11636 = vst [vmem:[#allocation64_spill] sm:$0xff] %v8114_v35  ;;  %699 = vst.msk [vmem:[#allocation2 + $0x111] sm:$0xff] %vm642_vm4, %v640_v46  ;;  %v803_v41 = vmul.f32 %v7809_v9, %v8118_v45  ;;  %v807_v48 = vmul.f32 %v7809_v9, %v8116_v2  ;;  %v867_v22 = vrot.slane %v796_v44, 1  ;;  %v756_v29 = vmul.f32 %v7817_v21, %v8049_v40 }
 0x21f   :  { %697 = vst.msk [vmem:[#allocation2 + $0xf1] sm:$0xff] %vm642_vm4, %v638_v62  ;;  %700 = vst.msk [vmem:[#allocation2 + $0x121] sm:$0xff] %vm642_vm4, %v641_v61  ;;  %v8140_v47 = vmul.f32 %v7921_v7, %v724_v19  ;;  %v8144_v23 = vmul.f32 %v7813_v13, %v8101_v55  ;;  %v758_v38 = vmul.f32 %v7817_v21, %v8075_v32  ;;  %v882_v61 = vrot.slane %v806_v25, 1 }
 0x220   :  { %698 = vst.msk [vmem:[#allocation2 + $0x101] sm:$0xff] %vm642_vm4, %v639_v57  ;;  %v8152_v30 = vmul.f32 %v7918_v3, %v8049_v40  ;;  %v881_v0 = vrot.slane %v805_v6, 1  ;;  %v879_v44 = vrot.slane %v804_v27, 1  ;;  %v878_v19 = vrot.slane %v803_v41, 1 }
 0x221   :  { %11639 = vst [vmem:[#allocation67_spill] sm:$0xff] %v8140_v47  ;;  %v884_v46 = vrot.slane %v807_v48, 1  ;;  %v885_v62 = vrot.slane %v808_v39, 1  ;;  %v877_v7 = vsel %vm847_vm7, %v875_v5, %v876_v51  ;;  %v868_v33 = vsel %vm847_vm7, %v866_v10, %v867_v22 }
 0x222   :  { %11640 = vst [vmem:[#allocation68_spill] sm:$0xff] %v8152_v30  ;;  %v8162_v30 = vmul.f32 %v7918_v3, %v8101_v55  ;;  %v757_v27 = vmul.f32 %v7817_v21, %v8118_v45  ;;  %v759_v51 = vmul.f32 %v7817_v21, %v8116_v2  ;;  %v883_v39 = vsel %vm847_vm7, %v881_v0, %v882_v61 }
 0x223   :  { %v8171_v5 = vadd.f32 %v8073_v24, %v7960_v59  ;;  %v8174_v6 = vadd.f32 %v862_v26, %v8060_v58  ;;  %v880_v22 = vsel %vm847_vm7, %v878_v19, %v879_v44  ;;  %v886_v25 = vsel %vm847_vm7, %v884_v46, %v885_v62 }
 0x224   :  { %11641 = vst [vmem:[#allocation69_spill] sm:$0xff] %v8162_v30  ;;  %v8186_v61 = vadd.f32 %v8081_v37, %v8064_v50  ;;  %v8188_v0 = vadd.f32 %v868_v33, %v753_v16  ;;  %v8199_v44 = vadd.f32 %v871_v36, %v8068_v12  ;;  %v8201_v19 = vadd.f32 %v877_v7, %v756_v29 }
 0x225   :  { %v8176_v41 = vld [vmem:[#allocation2 + $0x110] sm:$0xff]  ;;  %v8178_v48 = vld [vmem:[#allocation2 + $0x118] sm:$0x3]  ;;  %v8211_v16 = vadd.f32 %v883_v39, %v758_v38  ;;  %v8215_v12 = vadd.f32 %v880_v22, %v757_v27  ;;  %v8217_v7 = vadd.f32 %v886_v25, %v759_v51  ;;  %v936_v36 = vmul.f32 %v7813_v13, %v7984_v63 }
 0x226   :  { %11642 = vst [vmem:[#allocation70_spill] sm:$0xff] %v8176_v41  ;;  %11643 = vst [vmem:[#allocation71_spill] sm:$0xff] %v8178_v48  ;;  %v8180_v10 = vld [vmem:[#allocation2 + $0xf0] sm:$0xff]  ;;  %v8190_v59 = vld [vmem:[#allocation2 + $0xf8] sm:$0x3]  ;;  %v813_v24 = vmul.f32 %v7809_v9, %v8176_v41  ;;  %v814_v37 = vmul.f32 %v7809_v9, %v8178_v48  ;;  %v938_v38 = vmul.f32 %v7813_v13, %v7914_v56 }
 0x227   :  { %11644 = vst [vmem:[#allocation72_spill] sm:$0xff] %v8180_v10  ;;  %11645 = vst [vmem:[#allocation73_spill] sm:$0xff] %v8190_v59  ;;  %v8192_v26 = vld [vmem:[#allocation2 + $0x100] sm:$0xff]  ;;  %v809_v58 = vmul.f32 %v7809_v9, %v8180_v10  ;;  %v8203_v46 = vld [vmem:[#allocation2 + $0x108] sm:$0x3]  ;;  %v810_v50 = vmul.f32 %v7809_v9, %v8190_v59  ;;  %v940_v39 = vmul.f32 %v7813_v13, %v7994_v1 }
 0x228   :  { %11646 = vst [vmem:[#allocation74_spill] sm:$0xff] %v8192_v26  ;;  %11647 = vst [vmem:[#allocation75_spill] sm:$0xff] %v8203_v46  ;;  %v811_v33 = vmul.f32 %v7809_v9, %v8192_v26  ;;  %v812_v62 = vmul.f32 %v7809_v9, %v8203_v46  ;;  %v893_v15 = vrot.slane %v813_v24, 1  ;;  %v894_v4 = vrot.slane %v814_v37, 1 }
 0x229   :  { %v887_v29 = vrot.slane %v809_v58, 1  ;;  %v888_v57 = vrot.slane %v810_v50, 1  ;;  %v941_v9 = vmul.f32 %v7813_v13, %v7975_v52  ;;  %v942_v25 = vmul.f32 %v7813_v13, %v7996_v17 }
 0x22a   :  { %v890_v47 = vrot.slane %v811_v33, 1  ;;  %v891_v55 = vrot.slane %v812_v62, 1  ;;  %v943_v27 = vmul.f32 %v7813_v13, %v7998_v20  ;;  %v944_v51 = vmul.f32 %v7813_v13, %v8047_v53 }
 0x22b   :  { %v945_v22 = vmul.f32 %v7813_v13, %v8054_v18  ;;  %v946_v58 = vmul.f32 %v7813_v13, %v8008_v43  ;;  %v947_v24 = vmul.f32 %v7813_v13, %v8010_v49  ;;  %v952_v50 = vmul.f32 %v7813_v13, %v8118_v45 }
 0x22c   :  { %v760_v33 = vmul.f32 %v7817_v21, %v8180_v10  ;;  %v762_v37 = vmul.f32 %v7817_v21, %v8176_v41  ;;  %v889_v62 = vsel %vm847_vm7, %v887_v29, %v888_v57  ;;  %v895_v35 = vsel %vm847_vm7, %v893_v15, %v894_v4 }
 0x22d   :  { %v761_v30 = vmul.f32 %v7817_v21, %v8192_v26  ;;  %v892_v18 = vsel %vm847_vm7, %v890_v47, %v891_v55  ;;  %v954_v49 = vmul.f32 %v7813_v13, %v8075_v32  ;;  %v956_v20 = vmul.f32 %v7813_v13, %v8116_v2 }
 0x22e   :  { %v957_v52 = vmul.f32 %v7813_v13, %v8099_v31  ;;  %v958_v3 = vmul.f32 %v7813_v13, %v8180_v10  ;;  %v959_v4 = vmul.f32 %v7813_v13, %v8190_v59  ;;  %v1002_v15 = vrot.slane %v936_v36, 2 }
 0x22f   :  { %v925_v57 = vadd.f32 %v889_v62, %v760_v33  ;;  %v927_v21 = vadd.f32 %v895_v35, %v762_v37  ;;  %v960_v55 = vmul.f32 %v7813_v13, %v8192_v26  ;;  %v961_v47 = vmul.f32 %v7813_v13, %v8203_v46 }
 0x230   :  { %v926_v29 = vadd.f32 %v892_v18, %v761_v30  ;;  %v962_v2 = vmul.f32 %v7813_v13, %v8176_v41  ;;  %v963_v31 = vmul.f32 %v7813_v13, %v8178_v48  ;;  %v11648_v10 = vrot.slane %v7982_v8, 2 }
 0x231   :  { %v11649_v59 = vrot.slane %v7973_v14, 2  ;;  %v1005_v35 = vrot.slane %v938_v38, 2  ;;  %v1006_v33 = vrot.slane %v7956_v54, 2  ;;  %v1008_v37 = vrot.slane %v940_v39, 2 }
 0x232   :  { %v1009_v62 = vrot.slane %v941_v9, 2  ;;  %v11650_v46 = vrot.slane %v8030_v11, 2  ;;  %v1011_v30 = vrot.slane %v942_v25, 2  ;;  %v1012_v41 = vrot.slane %v943_v27, 2 }
 0x233   :  { %v1001_v36 = vsel %vm162_vm1, %v11649_v59, %v11648_v10  ;;  %v1014_v26 = vrot.slane %v944_v51, 2  ;;  %v1015_v32 = vrot.slane %v945_v22, 2  ;;  %v1017_v13 = vrot.slane %v946_v58, 2 }
 0x234   :  { %v1004_v18 = vsel %vm162_vm1, %v1002_v15, %v11650_v46  ;;  %v1018_v48 = vrot.slane %v947_v24, 2  ;;  %v1026_v8 = vrot.slane %v952_v50, 2  ;;  %v1029_v45 = vrot.slane %v954_v49, 2 }
 0x235   :  { %v1030_v14 = vrot.slane %v8097_v28, 2  ;;  %v1032_v10 = vrot.slane %v956_v20, 2  ;;  %v1033_v59 = vrot.slane %v957_v52, 2  ;;  %v1035_v38 = vrot.slane %v958_v3, 2 }
 0x236   :  { %v1036_v54 = vrot.slane %v959_v4, 2  ;;  %v1038_v39 = vrot.slane %v960_v55, 2  ;;  %v1039_v9 = vrot.slane %v961_v47, 2  ;;  %v1007_v11 = vsel %vm162_vm1, %v1005_v35, %v1006_v33  ;;  %v8302_v4 = vld [vmem:[#allocation2 + $0x80] sm:$0xff] }
 0x237   :  { %v1010_v46 = vsel %vm162_vm1, %v1008_v37, %v1009_v62  ;;  %v1041_v25 = vrot.slane %v962_v2, 2  ;;  %v1042_v27 = vrot.slane %v963_v31, 2  ;;  %v1013_v51 = vsel %vm162_vm1, %v1011_v30, %v1012_v41  ;;  %v11658_v37 = vld [vmem:[#allocation39_spill] sm:$0xff]  ;;  %v11660_v30 = vld [vmem:[#allocation60_spill] sm:$0xff] }
 0x238   :  { %v1016_v22 = vsel %vm162_vm1, %v1014_v26, %v1015_v32  ;;  %v1019_v49 = vsel %vm162_vm1, %v1017_v13, %v1018_v48  ;;  %v11651_v28 = vrot.slane %v8111_v34, 2  ;;  %v11652_v52 = vrot.slane %v8108_v42, 2  ;;  %v11654_v48 = vld [vmem:[#allocation61_spill] sm:$0xff] }
 0x239   :  { %v11653_v20 = vrot.slane %v8144_v23, 2  ;;  %v1031_v24 = vsel %vm162_vm1, %v1029_v45, %v1030_v14  ;;  %v1034_v2 = vsel %vm162_vm1, %v1032_v10, %v1033_v59  ;;  %v1061_v31 = vadd.f32 %v1001_v36, %v8084_v60  ;;  %11655 = vst [vmem:[#allocation61_spill] sm:$0xff] %v8302_v4  ;;  %v11662_v10 = vld [vmem:[#allocation72_spill] sm:$0xff] }
 0x23a   :  { %v1025_v3 = vsel %vm162_vm1, %v11652_v52, %v11651_v28  ;;  %v1037_v32 = vsel %vm162_vm1, %v1035_v38, %v1036_v54  ;;  %v1040_v41 = vsel %vm162_vm1, %v1038_v39, %v1039_v9  ;;  %v1062_v34 = vadd.f32 %v1004_v18, %v11654_v48  ;;  %v11663_v38 = vld [vmem:[#allocation74_spill] sm:$0xff] }
 0x23b   :  { %v1028_v58 = vsel %vm162_vm1, %v1026_v8, %v11653_v20  ;;  %v1063_v42 = vadd.f32 %v1007_v11, %v8171_v5  ;;  %v1043_v26 = vsel %vm162_vm1, %v1041_v25, %v1042_v27  ;;  %v1064_v23 = vadd.f32 %v1010_v46, %v8174_v6  ;;  %v8309_v6 = vld [vmem:[#allocation2 + $0x120] sm:$0xff] }
 0x23c   :  { %v1065_v50 = vadd.f32 %v1013_v51, %v8186_v61  ;;  %v1066_v45 = vadd.f32 %v1016_v22, %v8188_v0  ;;  %v1067_v60 = vadd.f32 %v1019_v49, %v8199_v44  ;;  %v1069_v15 = vadd.f32 %v1025_v3, %v8201_v19  ;;  %11656 = vst [vmem:[#allocation76_spill] sm:$0xff] %v8309_v6  ;;  %v11657_v61 = vld [vmem:[#allocation36_spill] sm:$0xff]  ;;  %v11661_v8 = vld [vmem:[#allocation65_spill] sm:$0xff]  ;;  %v11664_v39 = vld [vmem:[#allocation70_spill] sm:$0xff] }
 0x23d   :  { %v1070_v55 = vadd.f32 %v1028_v58, %v8215_v12  ;;  %v1071_v47 = vadd.f32 %v1031_v24, %v8211_v16  ;;  %v1072_v5 = vadd.f32 %v1034_v2, %v8217_v7  ;;  %v1073_v36 = vadd.f32 %v1037_v32, %v925_v57  ;;  %v11665_v46 = vld [vmem:[#allocation37_spill] sm:$0xff]  ;;  %v11666_v20 = vld [vmem:[#allocation38_spill] sm:$0xff] }
 0x23e   :  { %v1074_v35 = vadd.f32 %v1040_v41, %v926_v29  ;;  %v1075_v33 = vadd.f32 %v1043_v26, %v927_v21  ;;  %v1080_v0 = vmul.f32 %v11658_v37, %v11657_v61  ;;  %v1081_v62 = vmul.f32 %v11658_v37, %v7984_v63  ;;  %v11659_v29 = vld [vmem:[#allocation66_spill] sm:$0xff]  ;;  %v11668_v26 = vld [vmem:[#allocation33_spill] sm:$0xff] }
 0x23f   :  { %v1082_v44 = vmul.f32 %v11658_v37, %v7914_v56  ;;  %v1083_v19 = vmul.f32 %v11658_v37, %v7994_v1  ;;  %v1084_v16 = vmul.f32 %v11658_v37, %v7996_v17  ;;  %v1085_v12 = vmul.f32 %v11658_v37, %v8047_v53 }
 0x240   :  { %v1086_v7 = vmul.f32 %v11658_v37, %v8008_v43  ;;  %v1087_v57 = vmul.f32 %v11658_v37, %v8302_v4  ;;  %v1088_v21 = vmul.f32 %v11658_v37, %v8049_v40  ;;  %v1089_v18 = vmul.f32 %v11658_v37, %v11659_v29 }
 0x241   :  { %v1090_v13 = vmul.f32 %v11658_v37, %v11660_v30  ;;  %v1091_v14 = vmul.f32 %v11658_v37, %v11661_v8  ;;  %v1092_v59 = vmul.f32 %v11658_v37, %v11662_v10  ;;  %v1093_v54 = vmul.f32 %v11658_v37, %v11663_v38 }
 0x242   :  { %v1094_v9 = vmul.f32 %v11658_v37, %v11664_v39  ;;  %v1095_v11 = vmul.f32 %v11658_v37, %v8309_v6  ;;  %v8344_v25 = vadd.f32 %v1080_v0, %v11665_v46  ;;  %v8346_v27 = vadd.f32 %v1081_v62, %v1061_v31  ;;  %v11672_v37 = vld [vmem:[#allocation58_spill] sm:$0xff] }
 0x243   :  { %v8348_v51 = vadd.f32 %v1082_v44, %v1062_v34  ;;  %v8350_v22 = vadd.f32 %v1083_v19, %v1063_v42  ;;  %v8352_v49 = vadd.f32 %v1084_v16, %v1064_v23  ;;  %v8354_v28 = vadd.f32 %v1085_v12, %v1065_v50  ;;  %v8377_v42 = vld [vmem:[#allocation2 + $0x88] sm:$0x3]  ;;  %v11673_v44 = vld [vmem:[#allocation53_spill] sm:$0xff] }
 0x244   :  { %v8356_v52 = vadd.f32 %v1086_v7, %v1066_v45  ;;  %v8358_v3 = vadd.f32 %v1087_v57, %v1067_v60  ;;  %v8361_v58 = vadd.f32 %v1088_v21, %v11666_v20  ;;  %v8363_v24 = vadd.f32 %v1089_v18, %v1069_v15  ;;  %11667 = vst [vmem:[#allocation36_spill] sm:$0xff] %v8377_v42  ;;  %v11669_v45 = vld [vmem:[#allocation29_spill] sm:$0xff]  ;;  %v11674_v21 = vld [vmem:[#allocation59_spill] sm:$0xff]  ;;  %v8418_v46 = vld [vmem:[#allocation2 + $0x128] sm:$0x3] }
 0x245   :  { %v8365_v2 = vadd.f32 %v1090_v13, %v1070_v55  ;;  %v8367_v31 = vadd.f32 %v1091_v14, %v1071_v47  ;;  %v8369_v32 = vadd.f32 %v1092_v59, %v1072_v5  ;;  %v8371_v41 = vadd.f32 %v1093_v54, %v1073_v36  ;;  %v11670_v55 = vld [vmem:[#allocation44_spill] sm:$0xff]  ;;  %v11671_v36 = vld [vmem:[#allocation51_spill] sm:$0xff]  ;;  %v11675_v14 = vld [vmem:[#allocation62_spill] sm:$0xff]  ;;  %11677 = vst [vmem:[#allocation39_spill] sm:$0xff] %v8418_v46 }
 0x246   :  { %v8373_v48 = vadd.f32 %v1094_v9, %v1074_v35  ;;  %v8375_v34 = vadd.f32 %v1095_v11, %v1075_v33  ;;  %v1118_v23 = vmul.f32 %v11668_v26, %v7984_v63  ;;  %v1120_v50 = vmul.f32 %v11668_v26, %v7914_v56  ;;  %v11676_v9 = vld [vmem:[#allocation47_spill] sm:$0xff] }
 0x247   :  { %v1121_v60 = vmul.f32 %v11668_v26, %v11669_v45  ;;  %v1122_v15 = vmul.f32 %v11668_v26, %v7994_v1  ;;  %v1123_v47 = vmul.f32 %v11668_v26, %v11670_v55  ;;  %v1124_v5 = vmul.f32 %v11668_v26, %v7996_v17  ;;  %v11684_v45 = vld [vmem:[#allocation68_spill] sm:$0xff] }
 0x248   :  { %v1125_v35 = vmul.f32 %v11668_v26, %v11671_v36  ;;  %v1126_v33 = vmul.f32 %v11668_v26, %v8047_v53  ;;  %v1127_v0 = vmul.f32 %v11668_v26, %v11672_v37  ;;  %v1128_v62 = vmul.f32 %v11668_v26, %v8008_v43  ;;  %v11680_v43 = vld [vmem:[#allocation75_spill] sm:$0xff] }
 0x249   :  { %v1129_v19 = vmul.f32 %v11668_v26, %v11673_v44  ;;  %v1130_v16 = vmul.f32 %v11668_v26, %v8302_v4  ;;  %v1131_v12 = vmul.f32 %v11668_v26, %v8377_v42  ;;  %v1134_v7 = vmul.f32 %v11668_v26, %v11659_v29  ;;  %v11678_v29 = vld [vmem:[#allocation55_spill] sm:$0xff]  ;;  %v11679_v4 = vld [vmem:[#allocation73_spill] sm:$0xff] }
 0x24a   :  { %v1136_v57 = vmul.f32 %v11668_v26, %v11660_v30  ;;  %v1137_v18 = vmul.f32 %v11668_v26, %v11674_v21  ;;  %v1138_v13 = vmul.f32 %v11668_v26, %v11661_v8  ;;  %v1139_v59 = vmul.f32 %v11668_v26, %v11675_v14  ;;  %v11681_v37 = vld [vmem:[#allocation71_spill] sm:$0xff] }
 0x24b   :  { %v1140_v54 = vmul.f32 %v11668_v26, %v11662_v10  ;;  %v1180_v11 = vrot.slane %v11676_v9, 1  ;;  %v1183_v20 = vrot.slane %v1118_v23, 1  ;;  %v1184_v40 = vrot.slane %v11678_v29, 1 }
 0x24c   :  { %v1186_v30 = vrot.slane %v1120_v50, 1  ;;  %v1187_v42 = vrot.slane %v1121_v60, 1  ;;  %v1141_v21 = vmul.f32 %v11668_v26, %v11679_v4  ;;  %v1142_v8 = vmul.f32 %v11668_v26, %v11663_v38  ;;  %v11682_v60 = vld [vmem:[#allocation48_spill] sm:$0xff] }
 0x24d   :  { %v1189_v44 = vrot.slane %v1122_v15, 1  ;;  %v1190_v14 = vrot.slane %v1123_v47, 1  ;;  %v1143_v10 = vmul.f32 %v11668_v26, %v11680_v43  ;;  %v1144_v9 = vmul.f32 %v11668_v26, %v11664_v39 }
 0x24e   :  { %v1145_v23 = vmul.f32 %v11668_v26, %v11681_v37  ;;  %v1146_v29 = vmul.f32 %v11668_v26, %v8309_v6  ;;  %v1147_v50 = vmul.f32 %v11668_v26, %v8418_v46  ;;  %v11683_v4 = vrot.slane %v11682_v60, 1  ;;  %v11685_v60 = vld [vmem:[#allocation69_spill] sm:$0xff] }
 0x24f   :  { %v1192_v47 = vrot.slane %v1124_v5, 1  ;;  %v1193_v38 = vrot.slane %v1125_v35, 1  ;;  %v1185_v43 = vsel %vm847_vm7, %v1183_v20, %v1184_v40  ;;  %v1188_v53 = vsel %vm847_vm7, %v1186_v30, %v1187_v42 }
 0x250   :  { %v1182_v15 = vsel %vm847_vm7, %v1180_v11, %v11683_v4  ;;  %v1195_v39 = vrot.slane %v1126_v33, 1  ;;  %v1196_v36 = vrot.slane %v1127_v0, 1  ;;  %v1191_v37 = vsel %vm847_vm7, %v1189_v44, %v1190_v14 }
 0x251   :  { %v1198_v17 = vrot.slane %v1128_v62, 1  ;;  %v1199_v55 = vrot.slane %v1129_v19, 1  ;;  %v1201_v6 = vrot.slane %v1130_v16, 1  ;;  %v1202_v1 = vrot.slane %v1131_v12, 1 }
 0x252   :  { %v1204_v26 = vrot.slane %v11684_v45, 1  ;;  %v1207_v46 = vrot.slane %v1134_v7, 1  ;;  %v1208_v56 = vrot.slane %v11685_v60, 1  ;;  %v1210_v4 = vrot.slane %v1136_v57, 1  ;;  %v11686_v7 = vld [vmem:[#allocation64_spill] sm:$0xff] }
 0x253   :  { %v1211_v5 = vrot.slane %v1137_v18, 1  ;;  %v1213_v35 = vrot.slane %v1138_v13, 1  ;;  %v1214_v11 = vrot.slane %v1139_v59, 1  ;;  %v1216_v40 = vrot.slane %v1140_v54, 1 }
 0x254   :  { %v1217_v20 = vrot.slane %v1141_v21, 1  ;;  %v1219_v30 = vrot.slane %v1142_v8, 1  ;;  %v1220_v42 = vrot.slane %v1143_v10, 1  ;;  %v1194_v33 = vsel %vm847_vm7, %v1192_v47, %v1193_v38 }
 0x255   :  { %v1197_v0 = vsel %vm847_vm7, %v1195_v39, %v1196_v36  ;;  %v1222_v62 = vrot.slane %v1144_v9, 1  ;;  %v1223_v44 = vrot.slane %v1145_v23, 1  ;;  %v1200_v19 = vsel %vm847_vm7, %v1198_v17, %v1199_v55  ;;  %v11694_v23 = vld [vmem:[#allocation50_spill] sm:$0xff] }
 0x256   :  { %v1203_v45 = vsel %vm847_vm7, %v1201_v6, %v1202_v1  ;;  %v1225_v16 = vrot.slane %v1146_v29, 1  ;;  %v1226_v12 = vrot.slane %v1147_v50, 1  ;;  %v11687_v57 = vrot.slane %v11686_v7, 1  ;;  %v11695_v29 = vld [vmem:[#allocation51_spill] sm:$0xff] }
 0x257   :  { %v1209_v21 = vsel %vm847_vm7, %v1207_v46, %v1208_v56  ;;  %v1212_v8 = vsel %vm847_vm7, %v1210_v4, %v1211_v5  ;;  %v1215_v10 = vsel %vm847_vm7, %v1213_v35, %v1214_v11  ;;  %v1218_v38 = vsel %vm847_vm7, %v1216_v40, %v1217_v20  ;;  %v11698_v4 = vld [vmem:[#allocation52_spill] sm:$0xff]  ;;  %v11699_v35 = vld [vmem:[#allocation53_spill] sm:$0xff]  ;;  %v11706_v7 = vld [vmem:[#allocation59_spill] sm:$0xff] }
 0x258   :  { %v1206_v18 = vsel %vm847_vm7, %v1204_v26, %v11687_v57  ;;  %v1221_v39 = vsel %vm847_vm7, %v1219_v30, %v1220_v42  ;;  %v8456_v17 = vadd.f32 %v1182_v15, %v8344_v25  ;;  %v8459_v1 = vadd.f32 %v1185_v43, %v8346_v27  ;;  %v11696_v15 = vld [vmem:[#allocation56_spill] sm:$0xff]  ;;  %v11697_v26 = vld [vmem:[#allocation58_spill] sm:$0xff]  ;;  %v11700_v40 = vld [vmem:[#allocation61_spill] sm:$0xff] }
 0x259   :  { %v1224_v6 = vsel %vm847_vm7, %v1222_v62, %v1223_v44  ;;  %v8463_v55 = vadd.f32 %v1188_v53, %v8348_v51  ;;  %v8466_v56 = vadd.f32 %v1191_v37, %v8350_v22  ;;  %v8469_v36 = vadd.f32 %v1194_v33, %v8352_v49  ;;  %v11701_v30 = vld [vmem:[#allocation36_spill] sm:$0xff]  ;;  %v11702_v33 = vld [vmem:[#allocation57_spill] sm:$0xff]  ;;  %v11703_v62 = vld [vmem:[#allocation66_spill] sm:$0xff] }
 0x25a   :  { %v1227_v13 = vsel %vm847_vm7, %v1225_v16, %v1226_v12  ;;  %v8473_v14 = vadd.f32 %v1197_v0, %v8354_v28  ;;  %v8476_v25 = vadd.f32 %v1200_v19, %v8356_v52  ;;  %v8479_v43 = vadd.f32 %v1203_v45, %v8358_v3  ;;  %v11704_v19 = vld [vmem:[#allocation63_spill] sm:$0xff]  ;;  %v11705_v16 = vld [vmem:[#allocation60_spill] sm:$0xff] }
 0x25b   :  { %v8482_v53 = vadd.f32 %v1206_v18, %v8361_v58  ;;  %v8485_v27 = vadd.f32 %v1209_v21, %v8363_v24  ;;  %v8488_v51 = vadd.f32 %v1212_v8, %v8365_v2  ;;  %v8491_v22 = vadd.f32 %v1215_v10, %v8367_v31  ;;  %v11688_v58 = vld [vmem:[#allocation34_spill] sm:$0xff]  ;;  %v11689_v31 = vld [vmem:[#allocation45_spill] sm:$0xff] }
 0x25c   :  { %v8494_v49 = vadd.f32 %v1218_v38, %v8369_v32  ;;  %v8497_v28 = vadd.f32 %v1221_v39, %v8371_v41  ;;  %v8500_v52 = vadd.f32 %v1224_v6, %v8373_v48  ;;  %v8503_v3 = vadd.f32 %v1227_v13, %v8375_v34  ;;  %v11690_v32 = vld [vmem:[#allocation32_spill] sm:$0xff]  ;;  %v11691_v41 = vld [vmem:[#allocation29_spill] sm:$0xff]  ;;  %v11708_v8 = vld [vmem:[#allocation62_spill] sm:$0xff] }
 0x25d   :  { %v1264_v24 = vmul.f32 %v11688_v58, %v11657_v61  ;;  %v1266_v2 = vmul.f32 %v11688_v58, %v7984_v63  ;;  %v1267_v37 = vmul.f32 %v11688_v58, %v11689_v31  ;;  %v1268_v59 = vmul.f32 %v11688_v58, %v11690_v32  ;;  %v11692_v48 = vld [vmem:[#allocation49_spill] sm:$0xff]  ;;  %v11693_v34 = vld [vmem:[#allocation44_spill] sm:$0xff]  ;;  %v11712_v31 = vld [vmem:[#allocation75_spill] sm:$0xff] }
 0x25e   :  { %v1269_v54 = vmul.f32 %v11688_v58, %v11691_v41  ;;  %v1270_v46 = vmul.f32 %v11688_v58, %v11692_v48  ;;  %v1271_v9 = vmul.f32 %v11688_v58, %v11693_v34  ;;  %v1272_v61 = vmul.f32 %v11688_v58, %v11694_v23  ;;  %v11707_v18 = vld [vmem:[#allocation65_spill] sm:$0xff]  ;;  %v11709_v38 = vld [vmem:[#allocation72_spill] sm:$0xff] }
 0x25f   :  { %v1273_v50 = vmul.f32 %v11688_v58, %v11695_v29  ;;  %v1274_v47 = vmul.f32 %v11688_v58, %v11696_v15  ;;  %v1275_v60 = vmul.f32 %v11688_v58, %v11697_v26  ;;  %v1276_v5 = vmul.f32 %v11688_v58, %v11698_v4  ;;  %v11711_v26 = vld [vmem:[#allocation74_spill] sm:$0xff] }
 0x260   :  { %v1277_v11 = vmul.f32 %v11688_v58, %v11699_v35  ;;  %v1278_v20 = vmul.f32 %v11688_v58, %v11700_v40  ;;  %v1279_v42 = vmul.f32 %v11688_v58, %v11701_v30  ;;  %v1280_v0 = vmul.f32 %v11688_v58, %v11702_v33  ;;  %v11710_v30 = vld [vmem:[#allocation73_spill] sm:$0xff] }
 0x261   :  { %v1282_v44 = vmul.f32 %v11688_v58, %v11703_v62  ;;  %v1283_v45 = vmul.f32 %v11688_v58, %v11704_v19  ;;  %v1284_v12 = vmul.f32 %v11688_v58, %v11705_v16  ;;  %v1285_v57 = vmul.f32 %v11688_v58, %v11706_v7 }
 0x262   :  { %v1286_v21 = vmul.f32 %v11688_v58, %v11707_v18  ;;  %v1287_v10 = vmul.f32 %v11688_v58, %v11708_v8  ;;  %v1288_v39 = vmul.f32 %v11688_v58, %v11709_v38  ;;  %v1328_v6 = vrot.slane %v1264_v24, 2  ;;  %v11713_v8 = vld [vmem:[#allocation70_spill] sm:$0xff]  ;;  %v11714_v38 = vld [vmem:[#allocation71_spill] sm:$0xff] }
 0x263   :  { %v1331_v13 = vrot.slane %v1266_v2, 2  ;;  %v1332_v41 = vrot.slane %v1267_v37, 2  ;;  %v1334_v33 = vrot.slane %v1268_v59, 2  ;;  %v1335_v19 = vrot.slane %v1269_v54, 2  ;;  %v11715_v2 = vld [vmem:[#allocation76_spill] sm:$0xff]  ;;  %v11716_v59 = vld [vmem:[#allocation39_spill] sm:$0xff] }
 0x264   :  { %v1289_v35 = vmul.f32 %v11688_v58, %v11710_v30  ;;  %v1290_v7 = vmul.f32 %v11688_v58, %v11711_v26  ;;  %v1337_v29 = vrot.slane %v1270_v46, 2  ;;  %v1338_v34 = vrot.slane %v1271_v9, 2  ;;  %v11717_v30 = vld [vmem:[#allocation54_spill] sm:$0xff] }
 0x265   :  { %v1291_v18 = vmul.f32 %v11688_v58, %v11712_v31  ;;  %v1292_v16 = vmul.f32 %v11688_v58, %v11713_v8  ;;  %v1293_v24 = vmul.f32 %v11688_v58, %v11714_v38  ;;  %v1294_v37 = vmul.f32 %v11688_v58, %v11715_v2 }
 0x266   :  { %v1295_v54 = vmul.f32 %v11688_v58, %v11716_v59  ;;  %v11718_v62 = vrot.slane %v11717_v30, 2  ;;  %v1340_v9 = vrot.slane %v1272_v61, 2  ;;  %v1341_v26 = vrot.slane %v1273_v50, 2 }
 0x267   :  { %v1333_v31 = vsel %vm162_vm1, %v1331_v13, %v1332_v41  ;;  %v1336_v40 = vsel %vm162_vm1, %v1334_v33, %v1335_v19  ;;  %v1343_v8 = vrot.slane %v1274_v47, 2  ;;  %v1344_v4 = vrot.slane %v1275_v60, 2  ;;  %v11728_v33 = vld [vmem:[#allocation61_spill] sm:$0xff] }
 0x268   :  { %v1330_v46 = vsel %vm162_vm1, %v1328_v6, %v11718_v62  ;;  %v1339_v38 = vsel %vm162_vm1, %v1337_v29, %v1338_v34  ;;  %v1346_v15 = vrot.slane %v1276_v5, 2  ;;  %v1347_v23 = vrot.slane %v1277_v11, 2 }
 0x269   :  { %v1349_v2 = vrot.slane %v1278_v20, 2  ;;  %v1350_v48 = vrot.slane %v1279_v42, 2  ;;  %v1352_v32 = vrot.slane %v1280_v0, 2  ;;  %v1355_v58 = vrot.slane %v1282_v44, 2  ;;  %v11719_v0 = vld [vmem:[#allocation67_spill] sm:$0xff] }
 0x26a   :  { %v1356_v59 = vrot.slane %v1283_v45, 2  ;;  %v1358_v30 = vrot.slane %v1284_v12, 2  ;;  %v1359_v63 = vrot.slane %v1285_v57, 2  ;;  %v1361_v62 = vrot.slane %v1286_v21, 2 }
 0x26b   :  { %v1362_v61 = vrot.slane %v1287_v10, 2  ;;  %v1364_v50 = vrot.slane %v1288_v39, 2  ;;  %v1365_v6 = vrot.slane %v1289_v35, 2  ;;  %v1367_v13 = vrot.slane %v1290_v7, 2  ;;  %v11726_v39 = vld [vmem:[#allocation56_spill] sm:$0xff] }
 0x26c   :  { %v1368_v41 = vrot.slane %v1291_v18, 2  ;;  %v1342_v47 = vsel %vm162_vm1, %v1340_v9, %v1341_v26  ;;  %v1345_v60 = vsel %vm162_vm1, %v1343_v8, %v1344_v4  ;;  %v1370_v34 = vrot.slane %v1292_v16, 2  ;;  %v11721_v8 = vld [vmem:[#allocation46_spill] sm:$0xff]  ;;  %v11732_v9 = vld [vmem:[#allocation72_spill] sm:$0xff] }
 0x26d   :  { %v1371_v29 = vrot.slane %v1293_v24, 2  ;;  %v1348_v5 = vsel %vm162_vm1, %v1346_v15, %v1347_v23  ;;  %v1351_v11 = vsel %vm162_vm1, %v1349_v2, %v1350_v48  ;;  %v1373_v20 = vrot.slane %v1294_v37, 2  ;;  %v11729_v24 = vld [vmem:[#allocation66_spill] sm:$0xff]  ;;  %v11730_v37 = vld [vmem:[#allocation60_spill] sm:$0xff] }
 0x26e   :  { %v1374_v42 = vrot.slane %v1295_v54, 2  ;;  %v11720_v44 = vrot.slane %v11719_v0, 2  ;;  %v1357_v35 = vsel %vm162_vm1, %v1355_v58, %v1356_v59  ;;  %v1360_v45 = vsel %vm162_vm1, %v1358_v30, %v1359_v63  ;;  %v11731_v54 = vld [vmem:[#allocation65_spill] sm:$0xff]  ;;  %v11733_v30 = vld [vmem:[#allocation74_spill] sm:$0xff] }
 0x26f   :  { %v1363_v26 = vsel %vm162_vm1, %v1361_v62, %v1362_v61  ;;  %v1366_v4 = vsel %vm162_vm1, %v1364_v50, %v1365_v6  ;;  %v1369_v16 = vsel %vm162_vm1, %v1367_v13, %v1368_v41  ;;  %v1392_v23 = vadd.f32 %v1330_v46, %v8456_v17  ;;  %v11734_v61 = vld [vmem:[#allocation70_spill] sm:$0xff]  ;;  %v11735_v6 = vld [vmem:[#allocation76_spill] sm:$0xff] }
 0x270   :  { %v1354_v19 = vsel %vm162_vm1, %v1352_v32, %v11720_v44  ;;  %v1393_v48 = vadd.f32 %v1333_v31, %v8459_v1  ;;  %v1372_v15 = vsel %vm162_vm1, %v1370_v34, %v1371_v29  ;;  %v1394_v12 = vadd.f32 %v1336_v40, %v8463_v55 }
 0x271   :  { %v1395_v32 = vadd.f32 %v1339_v38, %v8466_v56  ;;  %v1396_v7 = vadd.f32 %v1342_v47, %v8469_v36  ;;  %v1375_v63 = vsel %vm162_vm1, %v1373_v20, %v1374_v42  ;;  %v1397_v57 = vadd.f32 %v1345_v60, %v8473_v14  ;;  %v11724_v38 = vld [vmem:[#allocation49_spill] sm:$0xff]  ;;  %v11736_v20 = vld [vmem:[#allocation40_spill] sm:$0xff] }
 0x272   :  { %v1398_v18 = vadd.f32 %v1348_v5, %v8476_v25  ;;  %v1399_v21 = vadd.f32 %v1351_v11, %v8479_v43  ;;  %v1400_v17 = vadd.f32 %v1354_v19, %v8482_v53  ;;  %v1401_v1 = vadd.f32 %v1357_v35, %v8485_v27  ;;  %v11722_v25 = vld [vmem:[#allocation35_spill] sm:$0xff]  ;;  %v11723_v43 = vld [vmem:[#allocation32_spill] sm:$0xff] }
 0x273   :  { %v1402_v31 = vadd.f32 %v1360_v45, %v8488_v51  ;;  %v1403_v55 = vadd.f32 %v1363_v26, %v8491_v22  ;;  %v1404_v56 = vadd.f32 %v1366_v4, %v8494_v49  ;;  %v1405_v36 = vadd.f32 %v1369_v16, %v8497_v28  ;;  %v11725_v51 = vld [vmem:[#allocation50_spill] sm:$0xff]  ;;  %v11727_v28 = vld [vmem:[#allocation52_spill] sm:$0xff]  ;;  %v11737_v16 = vld [vmem:[#allocation41_spill] sm:$0xff] }
 0x274   :  { %v1406_v40 = vadd.f32 %v1372_v15, %v8500_v52  ;;  %v1407_v14 = vadd.f32 %v1375_v63, %v8503_v3  ;;  %v1412_v10 = vmul.f32 %v11722_v25, %v11721_v8  ;;  %v1413_v53 = vmul.f32 %v11722_v25, %v11723_v43 }
 0x275   :  { %v1414_v27 = vmul.f32 %v11722_v25, %v11724_v38  ;;  %v1415_v22 = vmul.f32 %v11722_v25, %v11725_v51  ;;  %v1416_v49 = vmul.f32 %v11722_v25, %v11726_v39  ;;  %v1417_v52 = vmul.f32 %v11722_v25, %v11727_v28 }
 0x276   :  { %v1418_v3 = vmul.f32 %v11722_v25, %v11728_v33  ;;  %v1420_v2 = vmul.f32 %v11722_v25, %v11729_v24  ;;  %v1421_v59 = vmul.f32 %v11722_v25, %v11730_v37  ;;  %v1422_v46 = vmul.f32 %v11722_v25, %v11731_v54 }
 0x277   :  { %v1423_v58 = vmul.f32 %v11722_v25, %v11732_v9  ;;  %v1424_v62 = vmul.f32 %v11722_v25, %v11733_v30  ;;  %v1425_v50 = vmul.f32 %v11722_v25, %v11734_v61  ;;  %v1426_v13 = vmul.f32 %v11722_v25, %v11735_v6  ;;  %v11743_v25 = vld [vmem:[#allocation53_spill] sm:$0xff] }
 0x278   :  { %v8629_v41 = vadd.f32 %v1412_v10, %v1392_v23  ;;  %v8631_v47 = vadd.f32 %v1413_v53, %v1393_v48  ;;  %v8633_v60 = vadd.f32 %v1414_v27, %v1394_v12  ;;  %v8635_v34 = vadd.f32 %v1415_v22, %v1395_v32  ;;  %v11738_v48 = vld [vmem:[#allocation28_spill] sm:$0xff]  ;;  %v11739_v12 = vld [vmem:[#allocation45_spill] sm:$0xff] }
 0x279   :  { %v8637_v29 = vadd.f32 %v1416_v49, %v1396_v7  ;;  %v8639_v5 = vadd.f32 %v1417_v52, %v1397_v57  ;;  %v8641_v11 = vadd.f32 %v1418_v3, %v1398_v18  ;;  %v8644_v42 = vadd.f32 %v11736_v20, %v1399_v21  ;;  %v8667_v7 = vld [vmem:[#allocation2 + $0x30] sm:$0xff]  ;;  %v8671_v57 = vld [vmem:[#allocation2 + $0x38] sm:$0x3]  ;;  %v11747_v3 = vld [vmem:[#allocation62_spill] sm:$0xff] }
 0x27a   :  { %v8646_v0 = vadd.f32 %v1420_v2, %v1400_v17  ;;  %v8648_v44 = vadd.f32 %v1421_v59, %v1401_v1  ;;  %v8650_v19 = vadd.f32 %v1422_v46, %v1402_v31  ;;  %v8652_v35 = vadd.f32 %v1423_v58, %v1403_v55  ;;  %v11740_v17 = vld [vmem:[#allocation44_spill] sm:$0xff]  ;;  %v11741_v55 = vld [vmem:[#allocation51_spill] sm:$0xff] }
 0x27b   :  { %v8654_v45 = vadd.f32 %v1424_v62, %v1404_v56  ;;  %v8656_v26 = vadd.f32 %v1425_v50, %v1405_v36  ;;  %v8658_v4 = vadd.f32 %v1426_v13, %v1406_v40  ;;  %v8661_v23 = vadd.f32 %v11737_v16, %v1407_v14  ;;  %v11742_v40 = vld [vmem:[#allocation58_spill] sm:$0xff]  ;;  %v11744_v53 = vld [vmem:[#allocation36_spill] sm:$0xff]  ;;  %v11746_v49 = vld [vmem:[#allocation59_spill] sm:$0xff] }
 0x27c   :  { %v1448_v15 = vmul.f32 %v11738_v48, %v11721_v8  ;;  %v1449_v32 = vmul.f32 %v11738_v48, %v11739_v12  ;;  %v1450_v63 = vmul.f32 %v8667_v7, %v11738_v48  ;;  %v1451_v18 = vmul.f32 %v8671_v57, %v11738_v48  ;;  %v11748_v16 = vld [vmem:[#allocation73_spill] sm:$0xff] }
 0x27d   :  { %v1452_v21 = vmul.f32 %v11738_v48, %v11724_v38  ;;  %v1453_v1 = vmul.f32 %v11738_v48, %v11740_v17  ;;  %v1454_v31 = vmul.f32 %v11738_v48, %v11725_v51  ;;  %v1455_v56 = vmul.f32 %v11738_v48, %v11741_v55  ;;  %v11745_v51 = vld [vmem:[#allocation63_spill] sm:$0xff] }
 0x27e   :  { %v1456_v36 = vmul.f32 %v11738_v48, %v11726_v39  ;;  %v1457_v14 = vmul.f32 %v11738_v48, %v11742_v40  ;;  %v1458_v8 = vmul.f32 %v11738_v48, %v11727_v28  ;;  %v1459_v10 = vmul.f32 %v11738_v48, %v11743_v25  ;;  %v11749_v40 = vld [vmem:[#allocation75_spill] sm:$0xff] }
 0x27f   :  { %v1460_v43 = vmul.f32 %v11738_v48, %v11728_v33  ;;  %v1461_v38 = vmul.f32 %v11738_v48, %v11744_v53  ;;  %v1464_v27 = vmul.f32 %v11738_v48, %v11729_v24  ;;  %v1465_v22 = vmul.f32 %v11738_v48, %v11745_v51 }
 0x280   :  { %v1466_v39 = vmul.f32 %v11738_v48, %v11730_v37  ;;  %v1467_v28 = vmul.f32 %v11738_v48, %v11746_v49  ;;  %v1468_v52 = vmul.f32 %v11738_v48, %v11731_v54  ;;  %v1469_v2 = vmul.f32 %v11738_v48, %v11747_v3 }
 0x281   :  { %v1512_v59 = vrot.slane %v1448_v15, 1  ;;  %v1513_v46 = vrot.slane %v1449_v32, 1  ;;  %v1515_v58 = vrot.slane %v1450_v63, 1  ;;  %v1516_v62 = vrot.slane %v1451_v18, 1  ;;  %v11750_v32 = vld [vmem:[#allocation71_spill] sm:$0xff] }
 0x282   :  { %v1518_v50 = vrot.slane %v1452_v21, 1  ;;  %v1519_v13 = vrot.slane %v1453_v1, 1  ;;  %v1470_v20 = vmul.f32 %v11738_v48, %v11732_v9  ;;  %v1471_v37 = vmul.f32 %v11738_v48, %v11748_v16  ;;  %v11751_v21 = vld [vmem:[#allocation39_spill] sm:$0xff] }
 0x283   :  { %v1521_v12 = vrot.slane %v1454_v31, 1  ;;  %v1522_v17 = vrot.slane %v1455_v56, 1  ;;  %v1472_v55 = vmul.f32 %v11738_v48, %v11733_v30  ;;  %v1473_v25 = vmul.f32 %v11738_v48, %v11749_v40 }
 0x284   :  { %v1474_v15 = vmul.f32 %v11738_v48, %v11734_v61  ;;  %v1475_v63 = vmul.f32 %v11738_v48, %v11750_v32  ;;  %v1476_v18 = vmul.f32 %v11738_v48, %v11735_v6  ;;  %v1477_v1 = vmul.f32 %v11738_v48, %v11751_v21 }
 0x285   :  { %v1514_v31 = vsel %vm847_vm7, %v1512_v59, %v1513_v46  ;;  %v1524_v56 = vrot.slane %v1456_v36, 1  ;;  %v1517_v49 = vsel %vm847_vm7, %v1515_v58, %v1516_v62  ;;  %v1520_v3 = vsel %vm847_vm7, %v1518_v50, %v1519_v13 }
 0x286   :  { %v1525_v40 = vrot.slane %v1457_v14, 1  ;;  %v1527_v30 = vrot.slane %v1458_v8, 1  ;;  %v1523_v61 = vsel %vm847_vm7, %v1521_v12, %v1522_v17  ;;  %v1528_v16 = vrot.slane %v1459_v10, 1  ;;  %v11752_v8 = vld [vmem:[#allocation42_spill] sm:$0xff]  ;;  %v11753_v12 = vld [vmem:[#allocation43_spill] sm:$0xff] }
 0x287   :  { %v1530_v9 = vrot.slane %v1460_v43, 1  ;;  %v1531_v32 = vrot.slane %v1461_v38, 1  ;;  %v1536_v54 = vrot.slane %v1464_v27, 1  ;;  %v1537_v51 = vrot.slane %v1465_v22, 1  ;;  %v11754_v22 = vld [vmem:[#allocation31_spill] sm:$0xff] }
 0x288   :  { %v1539_v6 = vrot.slane %v1466_v39, 1  ;;  %v1540_v24 = vrot.slane %v1467_v28, 1  ;;  %v1542_v53 = vrot.slane %v1468_v52, 1  ;;  %v1543_v48 = vrot.slane %v1469_v2, 1  ;;  %v11756_v28 = vld [vmem:[#allocation30_spill] sm:$0xff] }
 0x289   :  { %v1545_v21 = vrot.slane %v1470_v20, 1  ;;  %v1546_v59 = vrot.slane %v1471_v37, 1  ;;  %v1548_v36 = vrot.slane %v1472_v55, 1  ;;  %v1549_v46 = vrot.slane %v1473_v25, 1 }
 0x28a   :  { %v1551_v58 = vrot.slane %v1474_v15, 1  ;;  %v1552_v62 = vrot.slane %v1475_v63, 1  ;;  %v1554_v50 = vrot.slane %v1476_v18, 1  ;;  %v1555_v14 = vrot.slane %v1477_v1, 1  ;;  %v7326_v1 = vld [vmem:[#allocation2 + $0x50] sm:$0xff] }
 0x28b   :  { %v1557_v13 = vrot.slane %v11752_v8, 1  ;;  %v1558_v10 = vrot.slane %v11753_v12, 1  ;;  %v1526_v43 = vsel %vm847_vm7, %v1524_v56, %v1525_v40  ;;  %v1529_v38 = vsel %vm847_vm7, %v1527_v30, %v1528_v16 }
 0x28c   :  { %v1532_v27 = vsel %vm847_vm7, %v1530_v9, %v1531_v32  ;;  %v11755_v39 = vrot.slane %v11754_v22, 1  ;;  %v11757_v52 = vrot.slane %v11756_v28, 1  ;;  %v1538_v20 = vsel %vm847_vm7, %v1536_v54, %v1537_v51  ;;  %v7334_v22 = vld [vmem:[#allocation2 + $0xd0] sm:$0xff]  ;;  %v7335_v28 = vld [vmem:[#allocation2 + $0xd8] sm:$0x3] }
 0x28d   :  { %v1541_v37 = vsel %vm847_vm7, %v1539_v6, %v1540_v24  ;;  %v1544_v17 = vsel %vm847_vm7, %v1542_v53, %v1543_v48  ;;  %v1547_v55 = vsel %vm847_vm7, %v1545_v21, %v1546_v59  ;;  %v1550_v40 = vsel %vm847_vm7, %v1548_v36, %v1549_v46  ;;  %v5654_v53 = vld [vmem:[%s11388_s5 + $0x8] ss:$0 sm:$0xff]  ;;  %v7330_v36 = vld [vmem:[#allocation2 + $0x70] sm:$0xff] }
 0x28e   :  { %v1535_v2 = vsel %vm847_vm7, %v11757_v52, %v11755_v39  ;;  %v1553_v30 = vsel %vm847_vm7, %v1551_v58, %v1552_v62  ;;  %v8744_v9 = vadd.f32 %v1514_v31, %v8629_v41  ;;  %v8747_v16 = vadd.f32 %v1517_v49, %v8631_v47  ;;  %v7327_v31 = vld [vmem:[#allocation2 + $0x58] sm:$0x3]  ;;  %v7328_v49 = vld [vmem:[#allocation2 + $0x60] sm:$0xff]  ;;  %v7329_v48 = vld [vmem:[#allocation2 + $0x68] sm:$0x3] }
 0x28f   :  { %v1556_v25 = vsel %vm847_vm7, %v1554_v50, %v1555_v14  ;;  %v1559_v54 = vsel %vm847_vm7, %v1557_v13, %v1558_v10  ;;  %v8752_v24 = vadd.f32 %v1520_v3, %v8633_v60  ;;  %v8755_v6 = vadd.f32 %v1523_v61, %v8635_v34  ;;  %v11759_v62 = vld [vmem:[#allocation36_spill] sm:$0xff]  ;;  %v11760_v10 = vld [vmem:[#allocation66_spill] sm:$0xff] }
 0x290   :  { %v8761_v41 = vadd.f32 %v1526_v43, %v8637_v29  ;;  %v8764_v47 = vadd.f32 %v1529_v38, %v8639_v5  ;;  %v8767_v51 = vadd.f32 %v1532_v27, %v8641_v11  ;;  %v8770_v15 = vadd.f32 %v1535_v2, %v8644_v42  ;;  %v7332_v14 = vld [vmem:[#allocation2 + $0x90] sm:$0xff]  ;;  %v7333_v13 = vld [vmem:[#allocation2 + $0x98] sm:$0x3]  ;;  %v11762_v2 = vld [vmem:[#allocation65_spill] sm:$0xff] }
 0x291   :  { %v8773_v60 = vadd.f32 %v1538_v20, %v8646_v0  ;;  %v8776_v61 = vadd.f32 %v1541_v37, %v8648_v44  ;;  %v8779_v34 = vadd.f32 %v1544_v17, %v8650_v19  ;;  %v8782_v29 = vadd.f32 %v1547_v55, %v8652_v35  ;;  %v7322_v44 = vld [vmem:[#allocation2 + $0x20] sm:$0xff]  ;;  %v7323_v19 = vld [vmem:[#allocation2 + $0x28] sm:$0x3]  ;;  %v11761_v38 = vld [vmem:[#allocation63_spill] sm:$0xff] }
 0x292   :  { %v8785_v5 = vadd.f32 %v1550_v40, %v8654_v45  ;;  %v8788_v11 = vadd.f32 %v1553_v30, %v8656_v26  ;;  %v8791_v42 = vadd.f32 %v1556_v25, %v8658_v4  ;;  %v8794_v0 = vadd.f32 %v1559_v54, %v8661_v23  ;;  %v7324_v26 = vld [vmem:[#allocation2 + $0x40] sm:$0xff]  ;;  %v7325_v4 = vld [vmem:[#allocation2 + $0x48] sm:$0x3]  ;;  %v11763_v55 = vld [vmem:[#allocation72_spill] sm:$0xff] }
 0x293   :  { %v8796_v32 = vmul.f32 %v7322_v44, %v5654_v53  ;;  %v8798_v63 = vmul.f32 %v7323_v19, %v5654_v53  ;;  %v8801_v35 = vmul.f32 %v8667_v7, %v5654_v53  ;;  %v8804_v45 = vmul.f32 %v8671_v57, %v5654_v53  ;;  %v7331_v7 = vld [vmem:[#allocation2 + $0x78] sm:$0x3]  ;;  %v7336_v37 = vld [vmem:[#allocation2 + $0xe8] sm:$0x3]  ;;  %v11764_v40 = vld [vmem:[#allocation73_spill] sm:$0xff] }
 0x294   :  { %11758 = vst [vmem:[#allocation37_spill] sm:$0xff] %v8794_v0  ;;  %v8806_v18 = vmul.f32 %v7324_v26, %v5654_v53  ;;  %v1601_v21 = vmul.f32 %v7325_v4, %v5654_v53  ;;  %v1602_v23 = vmul.f32 %v7326_v1, %v5654_v53  ;;  %v1603_v56 = vmul.f32 %v7327_v31, %v5654_v53  ;;  %v11765_v25 = vld [vmem:[#allocation74_spill] sm:$0xff]  ;;  %v11766_v44 = vld [vmem:[#allocation75_spill] sm:$0xff] }
 0x295   :  { %v1604_v3 = vmul.f32 %v7328_v49, %v5654_v53  ;;  %v1605_v59 = vmul.f32 %v7329_v48, %v5654_v53  ;;  %v1606_v46 = vmul.f32 %v7330_v36, %v5654_v53  ;;  %v1607_v58 = vmul.f32 %v7331_v7, %v5654_v53  ;;  %v11767_v26 = vld [vmem:[#allocation70_spill] sm:$0xff]  ;;  %v11768_v1 = vld [vmem:[#allocation71_spill] sm:$0xff]  ;;  %v11769_v49 = vld [vmem:[#allocation76_spill] sm:$0xff] }
 0x296   :  { %v1608_v57 = vmul.f32 %v5654_v53, %v11728_v33  ;;  %v1609_v50 = vmul.f32 %v5654_v53, %v11759_v62  ;;  %v1610_v8 = vmul.f32 %v7332_v14, %v5654_v53  ;;  %v1611_v12 = vmul.f32 %v7333_v13, %v5654_v53  ;;  %v11770_v36 = vld [vmem:[#allocation39_spill] sm:$0xff]  ;;  %v7338_v13 = vld [vmem:[#allocation2 + $0x138] sm:$0x3] }
 0x297   :  { %v1612_v43 = vmul.f32 %v5654_v53, %v11760_v10  ;;  %v1613_v27 = vmul.f32 %v5654_v53, %v11761_v38  ;;  %v1614_v39 = vmul.f32 %v7334_v22, %v5654_v53  ;;  %v1615_v52 = vmul.f32 %v7335_v28, %v5654_v53  ;;  %v7337_v62 = vld [vmem:[#allocation2 + $0x130] sm:$0xff] }
 0x298   :  { %v1616_v20 = vmul.f32 %v5654_v53, %v11762_v2  ;;  %v1617_v17 = vmul.f32 %v7336_v37, %v5654_v53  ;;  %v1618_v33 = vmul.f32 %v5654_v53, %v11763_v55  ;;  %v1619_v30 = vmul.f32 %v5654_v53, %v11764_v40 }
 0x299   :  { %v8816_v54 = vmul.f32 %v5654_v53, %v11765_v25  ;;  %v8819_v19 = vmul.f32 %v5654_v53, %v11766_v44  ;;  %v8822_v4 = vmul.f32 %v5654_v53, %v11767_v26  ;;  %v8825_v31 = vmul.f32 %v5654_v53, %v11768_v1 }
 0x29a   :  { %v8828_v48 = vmul.f32 %v5654_v53, %v11769_v49  ;;  %v8831_v7 = vmul.f32 %v5654_v53, %v11770_v36  ;;  %v8833_v14 = vmul.f32 %v7337_v62, %v5654_v53  ;;  %v8835_v10 = vmul.f32 %v7338_v13, %v5654_v53 }
 0x29b   :  { %v1660_v38 = vrot.slane %v8796_v32, 2  ;;  %v1661_v22 = vrot.slane %v8798_v63, 2  ;;  %v1663_v28 = vrot.slane %v8801_v35, 2  ;;  %v1664_v2 = vrot.slane %v8804_v45, 2 }
 0x29c   :  { %v1666_v37 = vrot.slane %v8806_v18, 2  ;;  %v1667_v55 = vrot.slane %v1601_v21, 2  ;;  %v1669_v40 = vrot.slane %v1602_v23, 2  ;;  %v1670_v25 = vrot.slane %v1603_v56, 2 }
 0x29d   :  { %v1672_v44 = vrot.slane %v1604_v3, 2  ;;  %v1673_v26 = vrot.slane %v1605_v59, 2  ;;  %v1675_v1 = vrot.slane %v1606_v46, 2  ;;  %v1676_v49 = vrot.slane %v1607_v58, 2 }
 0x29e   :  { %v1678_v36 = vrot.slane %v1608_v57, 2  ;;  %v1679_v53 = vrot.slane %v1609_v50, 2  ;;  %v1681_v62 = vrot.slane %v1610_v8, 2  ;;  %v1682_v13 = vrot.slane %v1611_v12, 2 }
 0x29f   :  { %v1662_v32 = vsel %vm162_vm1, %v1660_v38, %v1661_v22  ;;  %v1665_v63 = vsel %vm162_vm1, %v1663_v28, %v1664_v2  ;;  %v1684_v35 = vrot.slane %v1612_v43, 2  ;;  %v1685_v0 = vrot.slane %v1613_v27, 2 }
 0x2a0   :  { %v1668_v45 = vsel %vm162_vm1, %v1666_v37, %v1667_v55  ;;  %v1671_v18 = vsel %vm162_vm1, %v1669_v40, %v1670_v25  ;;  %v1687_v21 = vrot.slane %v1614_v39, 2  ;;  %v1688_v23 = vrot.slane %v1615_v52, 2 }
 0x2a1   :  { %v1674_v56 = vsel %vm162_vm1, %v1672_v44, %v1673_v26  ;;  %v1677_v3 = vsel %vm162_vm1, %v1675_v1, %v1676_v49  ;;  %v1690_v59 = vrot.slane %v1616_v20, 2  ;;  %v1691_v46 = vrot.slane %v1617_v17, 2 }
 0x2a2   :  { %v1680_v58 = vsel %vm162_vm1, %v1678_v36, %v1679_v53  ;;  %v1683_v57 = vsel %vm162_vm1, %v1681_v62, %v1682_v13  ;;  %v1693_v50 = vrot.slane %v1618_v33, 2  ;;  %v1694_v8 = vrot.slane %v1619_v30, 2  ;;  %v5655_v33 = vld [vmem:[%s11389_s6] ss:$0 sm:$0xff] }
 0x2a3   :  { %v1686_v12 = vsel %vm162_vm1, %v1684_v35, %v1685_v0  ;;  %v1724_v43 = vadd.f32 %v1662_v32, %v8744_v9  ;;  %v1725_v27 = vadd.f32 %v1665_v63, %v8747_v16  ;;  %v1726_v39 = vadd.f32 %v1668_v45, %v8752_v24 }
 0x2a4   :  { %v1689_v52 = vsel %vm162_vm1, %v1687_v21, %v1688_v23  ;;  %v1696_v38 = vrot.slane %v8816_v54, 2  ;;  %v1697_v20 = vrot.slane %v8819_v19, 2  ;;  %v1727_v17 = vadd.f32 %v1671_v18, %v8755_v6 }
 0x2a5   :  { %v1692_v0 = vsel %vm162_vm1, %v1690_v59, %v1691_v46  ;;  %v1699_v9 = vrot.slane %v8822_v4, 2  ;;  %v1700_v16 = vrot.slane %v8825_v31, 2  ;;  %v1728_v24 = vadd.f32 %v1674_v56, %v8761_v41 }
 0x2a6   :  { %v1695_v30 = vsel %vm162_vm1, %v1693_v50, %v1694_v8  ;;  %v1702_v54 = vrot.slane %v8828_v48, 2  ;;  %v1703_v19 = vrot.slane %v8831_v7, 2  ;;  %v1729_v6 = vadd.f32 %v1677_v3, %v8764_v47 }
 0x2a7   :  { %v1730_v22 = vadd.f32 %v1680_v58, %v8767_v51  ;;  %v8870_v28 = vadd.f32 %v5655_v33, %v1724_v43  ;;  %v8872_v2 = vadd.f32 %v5655_v33, %v1725_v27  ;;  %v8874_v37 = vadd.f32 %v5655_v33, %v1726_v39 }
 0x2a8   :  { %v1705_v4 = vrot.slane %v8833_v14, 2  ;;  %v1706_v41 = vrot.slane %v8835_v10, 2  ;;  %v1731_v31 = vadd.f32 %v1683_v57, %v8770_v15  ;;  %v8879_v55 = vadd.f32 %v5655_v33, %v1727_v17 }
 0x2a9   :  { %v1698_v48 = vsel %vm162_vm1, %v1696_v38, %v1697_v20  ;;  %v1701_v47 = vsel %vm162_vm1, %v1699_v9, %v1700_v16  ;;  %v1732_v51 = vadd.f32 %v1686_v12, %v8773_v60  ;;  %v8884_v7 = vadd.f32 %v5655_v33, %v1728_v24 }
 0x2aa   :  { %v1704_v40 = vsel %vm162_vm1, %v1702_v54, %v1703_v19  ;;  %v1733_v25 = vadd.f32 %v1689_v52, %v8776_v61  ;;  %v1734_v14 = vadd.f32 %v1692_v0, %v8779_v34  ;;  %v8889_v44 = vadd.f32 %v5655_v33, %v1729_v6 }
 0x2ab   :  { %v8891_v10 = vadd.f32 %v5655_v33, %v1730_v22  ;;  %v5656_v15 = vmul.f32 -1.442695, %v8870_v28  ;;  %v5657_v26 = vmul.f32 -1.442695, %v8872_v2  ;;  %v5658_v1 = vmul.f32 -1.442695, %v8874_v37 }
 0x2ac   :  { %v1707_v60 = vsel %vm162_vm1, %v1705_v4, %v1706_v41  ;;  %v1735_v49 = vadd.f32 %v1695_v30, %v8782_v29  ;;  %v8898_v36 = vadd.f32 %v5655_v33, %v1731_v31  ;;  %v5659_v61 = vmul.f32 -1.442695, %v8879_v55 }
 0x2ad   :  { %v1736_v34 = vadd.f32 %v1698_v48, %v8785_v5  ;;  %v8902_v53 = vadd.f32 %v5655_v33, %v1732_v51  ;;  %6608 = vpow2.f32 %v5656_v15  ;;  %v5660_v62 = vmul.f32 -1.442695, %v8884_v7  ;;  %v11771_v5 = vld [vmem:[#allocation37_spill] sm:$0xff] }
 0x2ae   :  { %v1737_v13 = vadd.f32 %v1701_v47, %v8788_v11  ;;  %v8906_v32 = vadd.f32 %v5655_v33, %v1733_v25  ;;  %6610 = vpow2.f32 %v5657_v26  ;;  %v5661_v63 = vmul.f32 -1.442695, %v8889_v44 }
 0x2af   :  { %v1738_v29 = vadd.f32 %v1704_v40, %v8791_v42  ;;  %v8910_v35 = vadd.f32 %v5655_v33, %v1734_v14  ;;  %6612 = vpow2.f32 %v5658_v1  ;;  %v5662_v45 = vmul.f32 -1.442695, %v8891_v10 }
 0x2b0   :  { %v1739_v18 = vadd.f32 %v1707_v60, %v11771_v5  ;;  %v8914_v21 = vadd.f32 %v5655_v33, %v1735_v49  ;;  %6614 = vpow2.f32 %v5659_v61  ;;  %v5663_v23 = vmul.f32 -1.442695, %v8898_v36 }
 0x2b1   :  { %v8917_v11 = vadd.f32 %v5655_v33, %v1736_v34  ;;  %6616 = vpow2.f32 %v5660_v62  ;;  %v5664_v56 = vmul.f32 -1.442695, %v8902_v53  ;;  %v8920_v3 = vadd.f32 %v5655_v33, %v1737_v13 }
 0x2b2   :  { %6618 = vpow2.f32 %v5661_v63  ;;  %v5665_v42 = vmul.f32 -1.442695, %v8906_v32  ;;  %v8923_v59 = vadd.f32 %v5655_v33, %v1738_v29  ;;  %v5666_v46 = vmul.f32 -1.442695, %v8910_v35 }
 0x2b3   :  { %6620 = vpow2.f32 %v5662_v45  ;;  %v8926_v58 = vadd.f32 %v5655_v33, %v1739_v18  ;;  %v5667_v57 = vmul.f32 -1.442695, %v8914_v21  ;;  %v5668_v50 = vmul.f32 -1.442695, %v8917_v11 }
 0x2b4   :  { %6622 = vpow2.f32 %v5663_v23  ;;  %v5669_v8 = vmul.f32 -1.442695, %v8920_v3  ;;  %v5670_v43 = vmul.f32 -1.442695, %v8923_v59 }
 0x2b5   :  { %6624 = vpow2.f32 %v5664_v56  ;;  %v5671_v39 = vmul.f32 -1.442695, %v8926_v58 }
 0x2b6   :  { %6626 = vpow2.f32 %v5665_v42 }
 0x2b7   :  { %v6609_v12 = vpop.eup %6608  ;;  %6628 = vpow2.f32 %v5666_v46 }
 0x2b8   :  { %v6611_v27 = vpop.eup %6610  ;;  %6630 = vpow2.f32 %v5667_v57  ;;  %v1811_v38 = vadd.f32 1.0, %v6609_v12 }
 0x2b9   :  { %v6613_v52 = vpop.eup %6612  ;;  %6632 = vpow2.f32 %v5668_v50  ;;  %v1812_v17 = vadd.f32 1.0, %v6611_v27 }
 0x2ba   :  { %v6615_v20 = vpop.eup %6614  ;;  %6634 = vpow2.f32 %v5669_v8  ;;  %v1813_v0 = vadd.f32 1.0, %v6613_v52 }
 0x2bb   :  { %v6617_v33 = vpop.eup %6616  ;;  %6636 = vpow2.f32 %v5670_v43  ;;  %v1814_v16 = vadd.f32 1.0, %v6615_v20 }
 0x2bc   :  { %v6619_v9 = vpop.eup %6618  ;;  %6638 = vpow2.f32 %v5671_v39  ;;  %v1815_v30 = vadd.f32 1.0, %v6617_v33 }
 0x2bd   :  { %v6621_v24 = vpop.eup %6620  ;;  %6640 = vrcp.f32 %v1811_v38  ;;  %v1816_v19 = vadd.f32 1.0, %v6619_v9 }
 0x2be   :  { %v6623_v54 = vpop.eup %6622  ;;  %6642 = vrcp.f32 %v1812_v17  ;;  %v1817_v22 = vadd.f32 1.0, %v6621_v24 }
 0x2bf   :  { %v6625_v6 = vpop.eup %6624  ;;  %6644 = vrcp.f32 %v1813_v0  ;;  %v1818_v41 = vadd.f32 1.0, %v6623_v54 }
 0x2c0   :  { %v6627_v4 = vpop.eup %6626  ;;  %6646 = vrcp.f32 %v1814_v16  ;;  %v1819_v48 = vadd.f32 1.0, %v6625_v6 }
 0x2c1   :  { %v6629_v31 = vpop.eup %6628  ;;  %6648 = vrcp.f32 %v1815_v30  ;;  %v1820_v51 = vadd.f32 1.0, %v6627_v4 }
 0x2c2   :  { %v6631_v47 = vpop.eup %6630  ;;  %6650 = vrcp.f32 %v1816_v19  ;;  %v1821_v25 = vadd.f32 1.0, %v6629_v31 }
 0x2c3   :  { %v6633_v40 = vpop.eup %6632  ;;  %6652 = vrcp.f32 %v1817_v22  ;;  %v1822_v15 = vadd.f32 1.0, %v6631_v47 }
 0x2c4   :  { %v6635_v14 = vpop.eup %6634  ;;  %6654 = vrcp.f32 %v1818_v41  ;;  %v1823_v1 = vadd.f32 1.0, %v6633_v40 }
 0x2c5   :  { %v6637_v26 = vpop.eup %6636  ;;  %6656 = vrcp.f32 %v1819_v48  ;;  %v1824_v49 = vadd.f32 1.0, %v6635_v14 }
 0x2c6   :  { %v6639_v60 = vpop.eup %6638  ;;  %6658 = vrcp.f32 %v1820_v51  ;;  %v1825_v34 = vadd.f32 1.0, %v6637_v26 }
 0x2c7   :  { %v6641_v61 = vpop.eup %6640  ;;  %6660 = vrcp.f32 %v1821_v25  ;;  %v1826_v5 = vadd.f32 1.0, %v6639_v60 }
 0x2c8   :  { %v6643_v62 = vpop.eup %6642  ;;  %6662 = vrcp.f32 %v1822_v15  ;;  %v8934_v13 = vmul.f32 %v6641_v61, %v8870_v28 }
 0x2c9   :  { %v6645_v63 = vpop.eup %6644  ;;  %6664 = vrcp.f32 %v1823_v1  ;;  %v8937_v29 = vmul.f32 %v6643_v62, %v8872_v2 }
 0x2ca   :  { %v6647_v45 = vpop.eup %6646  ;;  %6666 = vrcp.f32 %v1824_v49  ;;  %v8940_v18 = vmul.f32 %v6645_v63, %v8874_v37  ;;  %v1875_v28 = vsel %vm642_vm4, %v8934_v13, 0.0 }
 0x2cb   :  { %v6649_v23 = vpop.eup %6648  ;;  %6668 = vrcp.f32 %v1825_v34  ;;  %v8943_v56 = vmul.f32 %v6647_v45, %v8879_v55  ;;  %v1876_v42 = vsel %vm642_vm4, %v8937_v29, 0.0 }
 0x2cc   :  { %v6651_v46 = vpop.eup %6650  ;;  %v1877_v2 = vadd.f32 %v1876_v42, %v1875_v28  ;;  %v1878_v57 = vsel %vm642_vm4, %v8940_v18, 0.0  ;;  %v8952_v37 = vmul.f32 %v6649_v23, %v8884_v7  ;;  %6670 = vrcp.f32 %v1826_v5 }
 0x2cd   :  { %v6653_v50 = vpop.eup %6652  ;;  %v8955_v8 = vmul.f32 %v6651_v46, %v8889_v44  ;;  %v1880_v39 = vsel %vm642_vm4, %v8943_v56, 0.0 }
 0x2ce   :  { %v6655_v55 = vpop.eup %6654  ;;  %v1879_v12 = vadd.f32 %v1878_v57, %v1877_v2  ;;  %v8958_v27 = vmul.f32 %v6653_v50, %v8891_v10  ;;  %v1882_v44 = vsel %vm642_vm4, %v8952_v37, 0.0 }
 0x2cf   :  { %v6657_v43 = vpop.eup %6656  ;;  %v1884_v33 = vsel %vm642_vm4, %v8955_v8, 0.0  ;;  %v8973_v0 = vmul.f32 %v6655_v55, %v8898_v36 }
 0x2d0   :  { %v6659_v52 = vpop.eup %6658  ;;  %v8963_v38 = vmul.f32 %v6657_v43, %v8902_v53  ;;  %v1881_v20 = vadd.f32 %v1880_v39, %v1879_v12  ;;  %v11772_v43 = vmov 0.0   ;;  %v2018_v39 = vld [vmem:[%s11392_s9] sm:$0xff]  ;;  %s5584_s9 = sshll.u32 %s7370_s28, 4  ;;  %s5585_s9 = int_to_ptr.vmem [resolvable:$true] %s5584_s9 }
 0x2d1   :  { %v6661_v7 = vpop.eup %6660  ;;  %v8966_v17 = vmul.f32 %v6659_v52, %v8906_v32  ;;  %v1886_v32 = vsel %vm642_vm4, %v8958_v27, 0.0  ;;  %v1888_v47 = vsel %vm642_vm4, %v8973_v0, 0.0  ;;  %v5672_v52 = vld [vmem:[%s11391_s8] ss:$0 sm:$0xff]  ;;  %s7340_s29 = scalar_lea.vmem %s5585_s9, 32  ;;  %p7345_p1 = scmp.lt.s32.totalorder %s5585_s9, %s5585_s9 }
 0x2d2   :  { %v6663_v10 = vpop.eup %6662  ;;  %v8976_v9 = vmul.f32 %v6661_v7, %v8910_v35  ;;  %v1883_v53 = vadd.f32 %v1882_v44, %v1881_v20  ;;  %v1896_v30 = vsel %vm642_vm4, %v8963_v38, 0.0  ;;  %p7341_p0 = scmp.ne.s32.totalorder %s5585_s9, %s7340_s29  ;;  %p7346_p2 = scmp.lt.s32.totalorder %s7340_s29, %s7340_s29 }
 0x2d3   :  { %v6665_v16 = vpop.eup %6664  ;;  %v8979_v24 = vmul.f32 %v6663_v10, %v8914_v21  ;;  %v1897_v54 = vsel %vm642_vm4, %v8966_v17, 0.0 }
 0x2d4   :  { %v6667_v19 = vpop.eup %6666  ;;  %v1885_v36 = vadd.f32 %v1884_v33, %v1883_v53  ;;  %v1898_v6 = vadd.f32 %v1897_v54, %v1896_v30  ;;  %v1899_v35 = vsel %vm642_vm4, %v8976_v9, 0.0  ;;  %v8990_v4 = vmul.f32 %v6665_v16, %v8917_v11  ;;  %v6368_v30 = vld [vmem:[%s11394_s11] sm:$0xff]   ;;  %v6369_v54 = vld [vmem:[%s11394_s11 + $0x8] sm:$0xff]   ;;  %p7347_p3 = por %p7346_p2, %p7345_p1 }
 0x2d5   :  { %v6669_v22 = vpop.eup %6668  ;;  %v8993_v21 = vmul.f32 %v6667_v19, %v8920_v3  ;;  %v1901_v51 = vsel %vm642_vm4, %v8979_v24, 0.0  ;;  %v6370_v19 = vld [vmem:[%s11394_s11 + $0x10] sm:$0xff]  }
 0x2d6   :  { %v1887_v41 = vadd.f32 %v1886_v32, %v1885_v36  ;;  %v1900_v31 = vadd.f32 %v1899_v35, %v1898_v6  ;;  %v8996_v48 = vmul.f32 %v6669_v22, %v8923_v59  ;;  %v6671_v40 = vpop.eup %6670  ;;  %v1903_v11 = vsel %vm642_vm4, %v8990_v4, 0.0  ;;  %v6371_v36 = vld [vmem:[%s11394_s11 + $0x18] sm:$0xff]   ;;  %v6372_v6 = vld [vmem:[%s11396_s13] ss:$40 sps:$4 sm:$0xff]   ;;  %v6374_v35 = vld [vmem:[%s11396_s13 + $0x4] ss:$40 sps:$4 sm:$0xff]   ;;  %p7348_p4 = pnand %p7347_p3, %p7341_p0 }
 0x2d7   :  { %v1905_v3 = vsel %vm642_vm4, %v8993_v21, 0.0  ;;  %v9007_v59 = vmul.f32 %v6671_v40, %v8926_v58  ;;  %v6377_v22 = vld [vmem:[%s11396_s13 + $0x54] ss:$40 sps:$4 sm:$0xff]   ;;  %2462 = vmatprep.subr.bf16.mxu1 %v6374_v35 }
 0x2d8   :  { %v1889_v25 = vadd.f32 %v1888_v47, %v1887_v41  ;;  %v1902_v14 = vadd.f32 %v1901_v51, %v1900_v31  ;;  %v1907_v1 = vsel %vm642_vm4, %v8996_v48, 0.0  ;;  %2463 = vmatpush1.bf16.msra.mxu1 %v6372_v6  ;;  %v6375_v41 = vld [vmem:[%s11396_s13 + $0x50] ss:$40 sps:$4 sm:$0xff]   ;;  %v5675_v31 = vld [vmem:[%s11393_s10] ss:$0 sm:$0xff] }
 0x2d9   :  { %v1909_v62 = vsel %vm642_vm4, %v9007_v59, 0.0  ;;  %2464 = vmatprep.subr.bf16.mxu1 %v6377_v22  ;;  %v11775_v35 = vld [vmem:[#allocation9_spill] sm:$0xff] }
 0x2da   :  { %v1890_v15 = vrot.slane %v1889_v25, 4  ;;  %v1904_v26 = vadd.f32 %v1903_v11, %v1902_v14 }
 0x2dc   :  { %v1891_v60 = vadd.f32 %v1890_v15, %v1889_v25  ;;  %v1906_v49 = vadd.f32 %v1905_v3, %v1904_v26  ;;  %2465 = vmatpush1.bf16.msra.mxu1 %v6375_v41  ;;  %v7368_v3 = vmov 1966171168   ;;  %v11776_v41 = vld [vmem:[#allocation6_spill] sm:$0xff] }
 0x2dd   :  { %v2108_v15 = vunpack.c.l.s4 %v7368_v3 }
 0x2de   :  { %v1892_v61 = vrot.slane %v1891_v60, 2  ;;  %v1908_v34 = vadd.f32 %v1907_v1, %v1906_v49  ;;  %v11773_v1 = vld [vmem:[#allocation22_spill] sm:$0xff] }
 0x2df   :  { %v2109_v26 = vunpack.c.0.s8 %v2108_v15  ;;  %v6385_v15 = vld [vmem:[%s11396_s13 + $0x60] ss:$40 sps:$4 sm:$0xff]  }
 0x2e0   :  { %v1910_v63 = vadd.f32 %v1909_v62, %v1908_v34  ;;  %v1893_v45 = vadd.f32 %v1892_v61, %v1891_v60 }
 0x2e1   :  { %v2112_v60 = vsub.s32 %v2109_v26, %v11773_v1 }
 0x2e2   :  { %v1911_v5 = vrot.slane %v1910_v63, 4  ;;  %v1894_v28 = vrot.slane %v1893_v45, 1 }
 0x2e4   :  { %v1912_v23 = vadd.f32 %v1911_v5, %v1910_v63  ;;  %v1895_v2 = vadd.f32 %v1894_v28, %v1893_v45  ;;  %v11774_v63 = vld [vmem:[#allocation25_spill] sm:$0xff] }
 0x2e6   :  { %v1913_v42 = vrot.slane %v1912_v23, 2  ;;  %v1918_v50 = vmul.f32 0.015625, %v1895_v2 }
 0x2e8   :  { %v1914_v46 = vadd.f32 %v1913_v42, %v1912_v23 }
 0x2ea   :  { %v1915_v58 = vrot.slane %v1914_v46, 1 }
 0x2ec   :  { %v1916_v57 = vadd.f32 %v1915_v58, %v1914_v46 }
 0x2ee   :  { %v1919_v55 = vmul.f32 0.015625, %v1916_v57 }
 0x2f0   :  { %v1938_v12 = vsel %vm1937_vm8, %v1919_v55, %v1918_v50 }
 0x2f1   :  { %6226 = vmatmul.mubr.msk.f32.vlgmr.msra.gmra.mrb[16].mxu0 %vm642_vm4, %v1938_v12 }
 0x2f2   :  { %6230 = vmatprep.mubr.msk.f32.mxu0 %vm7367_vm6, %v11772_v43  ;;  %6229 = vmatpush3.msra.mxu0 %v2018_v39 }
 0x2f3   :  { %6233 = vmatprep.subr.bf16.mxu0 %v6368_v30 }
 0x3c4   :  { %v2007_v20 = vpop.f32.mrb[16].mxu0 }
 0x3c5   :  { %v2008_v7 = vadd.f32 %v5672_v52, %v2007_v20  ;;  %v6227_v44 = vpop.f32.mrb[17].mxu0 }
 0x3c7   :  { %v5674_v33 = vmul.f32 -1.442695, %v2008_v7 }
 0x3c9   :  { %6672 = vpow2.f32 %v5674_v33  ;;  %v6388_v33 = vld [vmem:[%s11396_s13 + $0x20] ss:$40 sps:$4 sm:$0xff]  }
 0x3d3   :  { %v6673_v10 = vpop.eup %6672 }
 0x3d4   :  { %v2014_v53 = vadd.f32 1.0, %v6673_v10  ;;  %v9100_v10 = vld [vmem:[%s11395_s12] ss:$0 sm:$0xff] }
 0x3d6   :  { %6674 = vrcp.f32 %v2014_v53 }
 0x3e0   :  { %v6675_v16 = vpop.eup %6674 }
 0x3e1   :  { %v2017_v32 = vmul.f32 %v6675_v16, %v2008_v7 }
 0x3e3   :  { %6231 = vmatmul.mubr.msk.f32.vlgmr.msra.gmra.mrb[18].mxu0 %vm2026_vm9, %v2017_v32 }
 0x3e4   :  { %6234 = vmatpush3.bf16.msra.mxu0 %v6368_v30 }
 0x3e5   :  { %6235 = vmatprep.subr.bf16.mxu0 %v6369_v54 }
 0x3e8   :  { %6236 = vmatpush3.bf16.msra.mxu0 %v6369_v54 }
 0x3e9   :  { %6237 = vmatprep.subr.bf16.mxu0 %v6370_v19 }
 0x3ec   :  { %6238 = vmatpush3.bf16.msra.mxu0 %v6370_v19 }
 0x3ed   :  { %6239 = vmatprep.subr.bf16.mxu0 %v6371_v36 }
 0x3f0   :  { %6240 = vmatpush3.bf16.msra.mxu0 %v6371_v36 }
 0x4b6   :  { %v2096_v47 = vpop.f32.mrb[18].mxu0 }
 0x4b7   :  { %v2097_v51 = vadd.f32 %v5675_v31, %v2096_v47  ;;  %v6232_v40 = vpop.f32.mrb[19].mxu0  ;;  %v11777_v47 = vld [vmem:[#allocation7_spill] sm:$0xff] }
 0x4b8   :  { %v11778_v40 = vld [vmem:[#allocation8_spill] sm:$0xff] }
 0x4b9   :  { %v5677_v25 = vmul.f32 -1.442695, %v2097_v51 }
 0x4bb   :  { %6676 = vpow2.f32 %v5677_v25 }
 0x4c5   :  { %v6677_v14 = vpop.eup %6676 }
 0x4c6   :  { %v2103_v11 = vadd.f32 1.0, %v6677_v14 }
 0x4c8   :  { %6678 = vrcp.f32 %v2103_v11 }
 0x4d2   :  { %v6679_v49 = vpop.eup %6678 }
 0x4d3   :  { %v2113_v61 = vrot.slane %v6679_v49, %v2112_v60 }
 0x4d5   :  { %v2114_v34 = vcombine.high %v2113_v61, %v2113_v61  ;;  %v2121_v62 = vrot.slane %v2113_v61, %v2112_v60 }
 0x4d7   :  { %v2132_v45 = vrot.slane %v2121_v62, %v11774_v63  ;;  %v2128_v5 = vrot.slane %v2114_v34, %v2112_v60  ;;  %v6386_v60 = vld [vmem:[%s11396_s13 + $0x1c] ss:$40 sps:$4 sm:$0xff]   ;;  %v6391_v34 = vld [vmem:[%s11396_s13 + $0x70] ss:$40 sps:$4 sm:$0xff]  }
 0x4d9   :  { %v2139_v23 = vmul.f32 %v2132_v45, %v8934_v13  ;;  %v2140_v28 = vmul.f32 %v2132_v45, %v8937_v29  ;;  %v2141_v42 = vmul.f32 %v2132_v45, %v8940_v18  ;;  %v2142_v46 = vmul.f32 %v2132_v45, %v8943_v56 }
 0x4da   :  { %v2143_v2 = vmul.f32 %v2132_v45, %v8952_v37  ;;  %v2144_v58 = vmul.f32 %v2132_v45, %v8955_v8  ;;  %v2136_v55 = vrot.slane %v2128_v5, %v11774_v63  ;;  %v2145_v13 = vmul.f32 %v2132_v45, %v8958_v27 }
 0x4db   :  { %v2155_v57 = vpack.c.bf16 %v2140_v28, %v2139_v23  ;;  %v2156_v50 = vpack.c.bf16 %v2142_v46, %v2141_v42  ;;  %v2146_v29 = vmul.f32 %v2132_v45, %v8973_v0  ;;  %v6394_v23 = vld [vmem:[%s11396_s13 + $0x18] ss:$40 sps:$4 sm:$0xff]  }
 0x4dc   :  { %v2157_v12 = vpack.c.bf16 %v2144_v58, %v2143_v2  ;;  %v2147_v18 = vmul.f32 %v2136_v55, %v8963_v38  ;;  %v2148_v56 = vmul.f32 %v2136_v55, %v8966_v17  ;;  %v2149_v39 = vmul.f32 %v2136_v55, %v8976_v9  ;;  %v6378_v9 = vld [vmem:[%s11396_s13 + $0x8] ss:$40 sps:$4 sm:$0xff]   ;;  %v11779_v28 = vld [vmem:[#allocation13_spill] sm:$0xff]  ;;  %v6389_v58 = vld [vmem:[%s11396_s13 + $0x6c] ss:$40 sps:$4 sm:$0xff]  }
 0x4dd   :  { %6241 = vmatprep.mubr.msk.bf16.mxu0 %vm642_vm4, %v2155_v57  ;;  %v2158_v37 = vpack.c.bf16 %v2146_v29, %v2145_v13  ;;  %v2150_v52 = vmul.f32 %v2136_v55, %v8979_v24  ;;  %v2151_v20 = vmul.f32 %v2136_v55, %v8990_v4  ;;  %v2152_v27 = vmul.f32 %v2136_v55, %v8993_v21  ;;  %v6380_v24 = vld [vmem:[%s11396_s13 + $0xc] ss:$40 sps:$4 sm:$0xff]   ;;  %v6383_v4 = vld [vmem:[%s11396_s13 + $0x5c] ss:$40 sps:$4 sm:$0xff]   ;;  %v6381_v21 = vld [vmem:[%s11396_s13 + $0x58] ss:$40 sps:$4 sm:$0xff]  }
 0x4de   :  { %6242 = vmatmul.mubr.msk.bf16.vlgmr.msra.gmra.mrb[20].mxu0 %vm642_vm4, %v2156_v50  ;;  %v2159_v8 = vpack.c.bf16 %v2148_v56, %v2147_v18  ;;  %v2153_v38 = vmul.f32 %v2136_v55, %v8996_v48  ;;  %v2154_v17 = vmul.f32 %v2136_v55, %v9007_v59  ;;  %2575 = vmatprep.subr.bf16.mxu0 %v6380_v24  ;;  %v6384_v48 = vld [vmem:[%s11396_s13 + $0x10] ss:$40 sps:$4 sm:$0xff]   ;;  %v7369_v59 = vmov 0   ;;  %v11780_v46 = vld [vmem:[#allocation10_spill] sm:$0xff] }
 0x4df   :  { %6245 = vmatprep.mubr.msk.bf16.mxu0 %vm642_vm4, %v2157_v12  ;;  %v2160_v7 = vpack.c.bf16 %v2150_v52, %v2149_v39  ;;  %v2161_v0 = vpack.c.bf16 %v2152_v27, %v2151_v20  ;;  %2576 = vmatpush1.bf16.msra.mxu0 %v6378_v9  ;;  %v11781_v57 = vld [vmem:[#allocation11_spill] sm:$0xff]  ;;  %v11782_v55 = vld [vmem:[#allocation12_spill] sm:$0xff] }
 0x4e0   :  { %v2162_v44 = vpack.c.bf16 %v2154_v17, %v2153_v38  ;;  %2577 = vmatprep.subr.bf16.mxu0 %v6383_v4  ;;  %2494 = vmatprep.mubr.bf16.mxu1 %v7369_v59  ;;  %v11784_v38 = vld [vmem:[#allocation14_spill] sm:$0xff]  ;;  %v11786_v24 = vld [vmem:[#allocation16_spill] sm:$0xff] }
 0x4e1   :  { %6257 = vmatprep.subr.bf16.mxu1 %v6384_v48 }
 0x4e3   :  { %2578 = vmatpush1.bf16.msra.mxu0 %v6381_v21 }
 0x4e4   :  { %3779 = vmatprep.subr.bf16.mxu0 %v6388_v33 }
 0x4e6   :  { %6246 = vmatmul.mubr.msk.bf16.gmra.mrb[24].mxu0 %vm642_vm4, %v2158_v37 }
 0x4e7   :  { %6249 = vmatprep.mubr.msk.bf16.mxu0 %vm642_vm4, %v2159_v8 }
 0x4ee   :  { %6250 = vmatmul.mubr.msk.bf16.gmra.mrb[28].mxu0 %vm642_vm4, %v2160_v7  ;;  %v11783_v7 = vld [vmem:[#allocation17_spill] sm:$0xff] }
 0x4ef   :  { %6253 = vmatprep.mubr.msk.bf16.mxu0 %vm642_vm4, %v2161_v0 }
 0x4f6   :  { %6254 = vmatmul.mubr.msk.bf16.gmra.mrb[32].mxu0 %vm642_vm4, %v2162_v44  ;;  %v11785_v44 = vld [vmem:[#allocation15_spill] sm:$0xff] }
 0x4f7   :  { %2607 = vmatprep.mubr.bf16.mxu0 %v7369_v59 }
 0x5b1   :  { %v6243_v53 = vpop.f32.mrb[20].mxu0 }
 0x5b2   :  { %v2269_v16 = vadd.f32 %v6243_v53, %v9100_v10  ;;  %v2260_v32 = vpop.f32.mrb[21].mxu0 }
 0x5b3   :  { %v2261_v30 = vadd.f32 %v9100_v10, %v2260_v32  ;;  %v6244_v54 = vpop.f32.mrb[22].mxu0 }
 0x5b4   :  { %v2272_v19 = vadd.f32 %v6244_v54, %v9100_v10  ;;  %v2263_v36 = vpop.f32.mrb[23].mxu0  ;;  %v2325_v22 = vadd.f32 %v2269_v16, %v11775_v35 }
 0x5b5   :  { %v2264_v6 = vadd.f32 %v9100_v10, %v2263_v36  ;;  %v2323_v51 = vadd.f32 %v2261_v30, %v11777_v47 }
 0x5b6   :  { %v2326_v31 = vadd.f32 %v2272_v19, %v11776_v41 }
 0x5b7   :  { %v2324_v25 = vadd.f32 %v2264_v6, %v11778_v40  ;;  %v11787_v6 = vld [vmem:[#allocation21_spill] sm:$0xff] }
 0x5b8   :  { %v9110_v14 = vpack.c.bf16 %v2326_v31, %v2325_v22  ;;  %v11788_v22 = vld [vmem:[#allocation18_spill] sm:$0xff]  ;;  %v11789_v31 = vld [vmem:[#allocation19_spill] sm:$0xff] }
 0x5b9   :  { %v9112_v11 = vpack.c.bf16 %v2324_v25, %v2323_v51  ;;  %v6247_v3 = vpop.f32.mrb[24].mxu0  ;;  %v11790_v51 = vld [vmem:[#allocation20_spill] sm:$0xff] }
 0x5ba   :  { %v2285_v26 = vadd.f32 %v6247_v3, %v9100_v10  ;;  %v2276_v1 = vpop.f32.mrb[25].mxu0 }
 0x5bb   :  { %v2277_v49 = vadd.f32 %v9100_v10, %v2276_v1  ;;  %v6248_v61 = vpop.f32.mrb[26].mxu0  ;;  %5701 = vmatmul.mubr.msk.bf16.vlgmr.msra.gmra.mrb[16].mxu1 %vm408_vm3, %v9112_v11  ;;  %5709 = vmatmul.mubr.msk.bf16.vlgmr.msra.gmra.mrb[36].mxu0 %vm408_vm3, %v9112_v11  ;;  %v6398_v1 = vld [vmem:[%s11396_s13 + $0x24] ss:$40 sps:$4 sm:$0xff]  }
 0x5bc   :  { %v2288_v62 = vadd.f32 %v6248_v61, %v9100_v10  ;;  %6258 = vmatpush3.bf16.msra.mxu1 %v6384_v48  ;;  %v2279_v45 = vpop.f32.mrb[27].mxu0  ;;  %2504 = vmatprep.mubr.bf16.mxu1 %v7369_v59  ;;  %v2329_v42 = vadd.f32 %v2285_v26, %v11779_v28  ;;  %v6395_v26 = vld [vmem:[%s11396_s13 + $0x64] ss:$40 sps:$4 sm:$0xff]  }
 0x5bd   :  { %v2280_v5 = vadd.f32 %v9100_v10, %v2279_v45  ;;  %2617 = vmatprep.mubr.bf16.mxu0 %v7369_v59  ;;  %6259 = vmatprep.subr.bf16.mxu1 %v6385_v15  ;;  %v2327_v50 = vadd.f32 %v2277_v49, %v11781_v57  ;;  %v11793_v61 = vld [vmem:[#allocation23_spill] sm:$0xff] }
 0x5be   :  { %v2330_v2 = vadd.f32 %v2288_v62, %v11780_v46  ;;  %3780 = vmatpush1.bf16.msra.mxu0 %v6386_v60  ;;  %v6399_v60 = vld [vmem:[%s11396_s13 + $0x74] ss:$40 sps:$4 sm:$0xff]   ;;  %v11794_v62 = vld [vmem:[#allocation27_spill] sm:$0xff] }
 0x5bf   :  { %v2328_v12 = vadd.f32 %v2280_v5, %v11782_v55  ;;  %3781 = vmatprep.subr.bf16.mxu0 %v6391_v34 }
 0x5c0   :  { %v9143_v13 = vpack.c.bf16 %v2330_v2, %v2329_v42  ;;  %6260 = vmatpush3.bf16.msra.mxu1 %v6385_v15  ;;  %v6397_v15 = vld [vmem:[%s11396_s13 + $0x68] ss:$40 sps:$4 sm:$0xff]  }
 0x5c1   :  { %v9145_v29 = vpack.c.bf16 %v2328_v12, %v2327_v50  ;;  %v6251_v18 = vpop.f32.mrb[28].mxu0  ;;  %3666 = vmatprep.subr.bf16.mxu1 %v6394_v23 }
 0x5c2   :  { %v2301_v56 = vadd.f32 %v6251_v18, %v9100_v10  ;;  %v2292_v37 = vpop.f32.mrb[29].mxu0  ;;  %3782 = vmatpush1.bf16.msra.mxu0 %v6389_v58 }
 0x5c3   :  { %v2293_v8 = vadd.f32 %v9100_v10, %v2292_v37  ;;  %v6252_v39 = vpop.f32.mrb[30].mxu0  ;;  %5702 = vmatmul.mubr.msk.bf16.gmra.mrb[20].mxu1 %vm408_vm3, %v9110_v14  ;;  %5710 = vmatmul.mubr.msk.bf16.gmra.mrb[40].mxu0 %vm408_vm3, %v9110_v14 }
 0x5c4   :  { %v2304_v52 = vadd.f32 %v6252_v39, %v9100_v10  ;;  %v2295_v20 = vpop.f32.mrb[31].mxu0  ;;  %2514 = vmatprep.mubr.bf16.mxu1 %v7369_v59  ;;  %2627 = vmatprep.mubr.bf16.mxu0 %v7369_v59  ;;  %v2333_v0 = vadd.f32 %v2301_v56, %v11783_v7 }
 0x5c5   :  { %v2296_v27 = vadd.f32 %v9100_v10, %v2295_v20  ;;  %v2331_v9 = vadd.f32 %v2293_v8, %v11785_v44 }
 0x5c6   :  { %v2334_v17 = vadd.f32 %v2304_v52, %v11784_v38 }
 0x5c7   :  { %v2332_v4 = vadd.f32 %v2296_v27, %v11786_v24 }
 0x5c8   :  { %v9161_v21 = vpack.c.bf16 %v2334_v17, %v2333_v0 }
 0x5c9   :  { %v9163_v48 = vpack.c.bf16 %v2332_v4, %v2331_v9  ;;  %v6255_v33 = vpop.f32.mrb[32].mxu0 }
 0x5ca   :  { %v2317_v53 = vadd.f32 %v6255_v33, %v9100_v10  ;;  %v2308_v16 = vpop.f32.mrb[33].mxu0 }
 0x5cb   :  { %v2309_v32 = vadd.f32 %v9100_v10, %v2308_v16  ;;  %v6256_v30 = vpop.f32.mrb[34].mxu0  ;;  %5703 = vmatmul.mubr.msk.bf16.gmra.mrb[24].mxu1 %vm408_vm3, %v9145_v29  ;;  %5711 = vmatmul.mubr.msk.bf16.gmra.mrb[44].mxu0 %vm408_vm3, %v9145_v29 }
 0x5cc   :  { %v2320_v54 = vadd.f32 %v6256_v30, %v9100_v10  ;;  %v2311_v19 = vpop.f32.mrb[35].mxu0  ;;  %2524 = vmatprep.mubr.bf16.mxu1 %v7369_v59  ;;  %2637 = vmatprep.mubr.bf16.mxu0 %v7369_v59  ;;  %v2337_v35 = vadd.f32 %v2317_v53, %v11787_v6 }
 0x5cd   :  { %v2312_v36 = vadd.f32 %v9100_v10, %v2311_v19  ;;  %v2335_v47 = vadd.f32 %v2309_v32, %v11789_v31  ;;  %v6392_v10 = vld [vmem:[%s11396_s13 + $0x14] ss:$40 sps:$4 sm:$0xff]  }
 0x5ce   :  { %v2338_v41 = vadd.f32 %v2320_v54, %v11788_v22 }
 0x5cf   :  { %v2336_v40 = vadd.f32 %v2312_v36, %v11790_v51 }
 0x5d0   :  { %v9179_v25 = vpack.c.bf16 %v2338_v41, %v2337_v35 }
 0x5d1   :  { %v9181_v3 = vpack.c.bf16 %v2336_v40, %v2335_v47 }
 0x5d3   :  { %5704 = vmatmul.mubr.msk.bf16.gmra.mrb[28].mxu1 %vm408_vm3, %v9143_v13  ;;  %5712 = vmatmul.mubr.msk.bf16.gmra.mrb[48].mxu0 %vm408_vm3, %v9143_v13 }
 0x5d4   :  { %2534 = vmatprep.mubr.bf16.mxu1 %v7369_v59  ;;  %2647 = vmatprep.mubr.bf16.mxu0 %v7369_v59 }
 0x5db   :  { %5705 = vmatmul.mubr.msk.bf16.gmra.mrb[32].mxu1 %vm408_vm3, %v9163_v48  ;;  %5713 = vmatmul.mubr.msk.bf16.gmra.mrb[52].mxu0 %vm408_vm3, %v9163_v48 }
 0x5dc   :  { %2544 = vmatprep.mubr.bf16.mxu1 %v7369_v59  ;;  %2657 = vmatprep.mubr.bf16.mxu0 %v7369_v59 }
 0x5e3   :  { %5706 = vmatmul.mubr.msk.bf16.gmra.mrb[36].mxu1 %vm408_vm3, %v9161_v21  ;;  %5714 = vmatmul.mubr.msk.bf16.gmra.mrb[56].mxu0 %vm408_vm3, %v9161_v21 }
 0x5e4   :  { %2554 = vmatprep.mubr.bf16.mxu1 %v7369_v59  ;;  %2667 = vmatprep.mubr.bf16.mxu0 %v7369_v59 }
 0x5eb   :  { %5707 = vmatmul.mubr.msk.bf16.gmra.mrb[40].mxu1 %vm408_vm3, %v9181_v3  ;;  %5715 = vmatmul.mubr.msk.bf16.gmra.mrb[60].mxu0 %vm408_vm3, %v9181_v3 }
 0x5ec   :  { %2564 = vmatprep.mubr.bf16.mxu1 %v7369_v59  ;;  %2677 = vmatprep.mubr.bf16.mxu0 %v7369_v59 }
 0x5f3   :  { %5708 = vmatmul.mubr.msk.bf16.gmra.mrb[44].mxu1 %vm408_vm3, %v9179_v25  ;;  %5716 = vmatmul.mubr.msk.bf16.gmra.mrb[64].mxu0 %vm408_vm3, %v9179_v25 }
 0x5f4   :  { %6261 = vmatprep.mubr.msk.bf16.mxu1 %vm408_vm3, %v9112_v11  ;;  %3811 = vmatprep.mubr.bf16.mxu0 %v7369_v59 }
 0x5fb   :  { %6262 = vmatmul.mubr.msk.bf16.vlgmr.msra.gmra.mrb[48].mxu1 %vm408_vm3, %v9110_v14  ;;  %5823 = vmatmul.mubr.msk.bf16.vlgmr.msra.gmra.mrb[68].mxu0 %vm408_vm3, %v9112_v11 }
 0x5fc   :  { %3667 = vmatpush1.bf16.msra.mxu1 %v6392_v10  ;;  %6265 = vmatprep.mubr.msk.bf16.mxu1 %vm408_vm3, %v9145_v29 }
 0x5fd   :  { %3821 = vmatprep.mubr.bf16.mxu0 %v7369_v59  ;;  %3668 = vmatprep.subr.bf16.mxu1 %v6397_v15 }
 0x600   :  { %3669 = vmatpush1.bf16.msra.mxu1 %v6395_v26 }
 0x601   :  { %6277 = vmatprep.subr.bf16.mxu1 %v6398_v1 }
 0x603   :  { %6266 = vmatmul.mubr.msk.bf16.gmra.mrb[52].mxu1 %vm408_vm3, %v9143_v13  ;;  %5824 = vmatmul.mubr.msk.bf16.gmra.mrb[72].mxu0 %vm408_vm3, %v9110_v14 }
 0x604   :  { %6269 = vmatprep.mubr.msk.bf16.mxu1 %vm408_vm3, %v9163_v48  ;;  %3831 = vmatprep.mubr.bf16.mxu0 %v7369_v59 }
 0x60b   :  { %6270 = vmatmul.mubr.msk.bf16.gmra.mrb[56].mxu1 %vm408_vm3, %v9161_v21  ;;  %5825 = vmatmul.mubr.msk.bf16.gmra.mrb[76].mxu0 %vm408_vm3, %v9145_v29 }
 0x60c   :  { %6273 = vmatprep.mubr.msk.bf16.mxu1 %vm408_vm3, %v9181_v3  ;;  %3841 = vmatprep.mubr.bf16.mxu0 %v7369_v59 }
 0x613   :  { %6274 = vmatmul.mubr.msk.bf16.gmra.mrb[60].mxu1 %vm408_vm3, %v9179_v25  ;;  %5826 = vmatmul.mubr.msk.bf16.gmra.mrb[80].mxu0 %vm408_vm3, %v9143_v13 }
 0x614   :  { %3698 = vmatprep.mubr.bf16.mxu1 %v7369_v59  ;;  %3851 = vmatprep.mubr.bf16.mxu0 %v7369_v59 }
 0x61b   :  { %5815 = vmatmul.mubr.msk.bf16.vlgmr.msra.gmra.mrb[64].mxu1 %vm408_vm3, %v9112_v11  ;;  %5827 = vmatmul.mubr.msk.bf16.gmra.mrb[84].mxu0 %vm408_vm3, %v9163_v48 }
 0x61c   :  { %6278 = vmatpush3.bf16.msra.mxu1 %v6398_v1  ;;  %3708 = vmatprep.mubr.bf16.mxu1 %v7369_v59 }
 0x61d   :  { %3861 = vmatprep.mubr.bf16.mxu0 %v7369_v59  ;;  %6279 = vmatprep.subr.bf16.mxu1 %v6399_v60 }
 0x620   :  { %6280 = vmatpush3.bf16.msra.mxu1 %v6399_v60 }
 0x623   :  { %5816 = vmatmul.mubr.msk.bf16.gmra.mrb[68].mxu1 %vm408_vm3, %v9110_v14  ;;  %5828 = vmatmul.mubr.msk.bf16.gmra.mrb[88].mxu0 %vm408_vm3, %v9161_v21 }
 0x624   :  { %3718 = vmatprep.mubr.bf16.mxu1 %v7369_v59  ;;  %3871 = vmatprep.mubr.bf16.mxu0 %v7369_v59 }
 0x62b   :  { %5817 = vmatmul.mubr.msk.bf16.gmra.mrb[72].mxu1 %vm408_vm3, %v9145_v29  ;;  %5829 = vmatmul.mubr.msk.bf16.gmra.mrb[92].mxu0 %vm408_vm3, %v9181_v3 }
 0x62c   :  { %3728 = vmatprep.mubr.bf16.mxu1 %v7369_v59  ;;  %3881 = vmatprep.mubr.bf16.mxu0 %v7369_v59 }
 0x633   :  { %5818 = vmatmul.mubr.msk.bf16.gmra.mrb[76].mxu1 %vm408_vm3, %v9143_v13  ;;  %5830 = vmatmul.mubr.msk.bf16.gmra.mrb[96].mxu0 %vm408_vm3, %v9179_v25 }
 0x634   :  { %3738 = vmatprep.mubr.bf16.mxu1 %v7369_v59 }
 0x63b   :  { %5819 = vmatmul.mubr.msk.bf16.gmra.mrb[80].mxu1 %vm408_vm3, %v9163_v48 }
 0x63c   :  { %3748 = vmatprep.mubr.bf16.mxu1 %v7369_v59 }
 0x643   :  { %5820 = vmatmul.mubr.msk.bf16.gmra.mrb[84].mxu1 %vm408_vm3, %v9161_v21 }
 0x644   :  { %3758 = vmatprep.mubr.bf16.mxu1 %v7369_v59 }
 0x64b   :  { %5821 = vmatmul.mubr.msk.bf16.gmra.mrb[88].mxu1 %vm408_vm3, %v9181_v3 }
 0x64c   :  { %3768 = vmatprep.mubr.bf16.mxu1 %v7369_v59  ;;  %v9309_v59 = vld [vmem:[%s11397_s14] sm:$0x1f] }
 0x64d   :  { %11791 = vst [vmem:[#allocation38_spill] sm:$0xff] %v9309_v59  ;;  %v9321_v34 = vrot.slane %v9309_v59, %v11793_v61  ;;  %v9325_v45 = vrot.slane %v9309_v59, %v11794_v62 }
 0x653   :  { %5822 = vmatmul.mubr.msk.bf16.gmra.mrb[92].mxu1 %vm408_vm3, %v9179_v25 }
 0x654   :  { %6281 = vmatprep.mubr.msk.bf16.mxu1 %vm408_vm3, %v9112_v11  ;;  %v11792_v11 = vld [vmem:[#allocation24_spill] sm:$0xff] }
 0x655   :  { %v9317_v49 = vrot.slane %v9309_v59, %v11792_v11 }
 0x65b   :  { %6282 = vmatmul.mubr.msk.bf16.vlgmr.msra.gmra.mrb[96].mxu1 %vm408_vm3, %v9110_v14  ;;  %v9313_v14 = vrot.slane %v9309_v59, %v11774_v63 }
 0x65c   :  { %6285 = vmatprep.mubr.msk.bf16.mxu1 %vm408_vm3, %v9145_v29 }
 0x663   :  { %6286 = vmatmul.mubr.msk.bf16.gmra.mrb[100].mxu1 %vm408_vm3, %v9143_v13 }
 0x664   :  { %6289 = vmatprep.mubr.msk.bf16.mxu1 %vm408_vm3, %v9163_v48 }
 0x66b   :  { %6290 = vmatmul.mubr.msk.bf16.gmra.mrb[104].mxu1 %vm408_vm3, %v9161_v21 }
 0x66c   :  { %6293 = vmatprep.mubr.msk.bf16.mxu1 %vm408_vm3, %v9181_v3 }
 0x673   :  { %6294 = vmatmul.mubr.msk.bf16.gmra.mrb[108].mxu1 %vm408_vm3, %v9179_v25 }
 0x68e   :  { %v2496_v5 = vpop.f32.mrb[16].mxu1  ;;  %v2609_v23 = vpop.f32.mrb[36].mxu0 }
 0x68f   :  { %v9328_v28 = vadd.f32 %v2496_v5, %v9313_v14  ;;  %v9331_v42 = vadd.f32 %v2609_v23, %v9317_v49  ;;  %v2498_v46 = vpop.f32.mrb[17].mxu1  ;;  %v2611_v2 = vpop.f32.mrb[37].mxu0 }
 0x690   :  { %v9334_v58 = vadd.f32 %v2498_v46, %v9321_v34  ;;  %v9337_v57 = vadd.f32 %v2611_v2, %v9325_v45  ;;  %v2500_v50 = vpop.f32.mrb[18].mxu1  ;;  %v2613_v55 = vpop.f32.mrb[38].mxu0 }
 0x691   :  { %v5725_v12 = vmul.f32 -1.442695, %v9328_v28  ;;  %v5727_v13 = vmul.f32 -1.442695, %v9331_v42  ;;  %v9342_v29 = vadd.f32 %v2500_v50, %v9313_v14  ;;  %v9345_v18 = vadd.f32 %v2613_v55, %v9317_v49  ;;  %v2502_v56 = vpop.f32.mrb[19].mxu1  ;;  %v2615_v37 = vpop.f32.mrb[39].mxu0 }
 0x692   :  { %v5726_v8 = vmul.f32 -1.442695, %v9334_v58  ;;  %v5728_v39 = vmul.f32 -1.442695, %v9337_v57  ;;  %v9350_v52 = vadd.f32 %v2502_v56, %v9321_v34  ;;  %v9353_v20 = vadd.f32 %v2615_v37, %v9325_v45 }
 0x693   :  { %6680 = vpow2.f32 %v5725_v12  ;;  %v5730_v27 = vmul.f32 -1.442695, %v9342_v29  ;;  %v5732_v7 = vmul.f32 -1.442695, %v9345_v18 }
 0x694   :  { %6682 = vpow2.f32 %v5727_v13  ;;  %v5731_v0 = vmul.f32 -1.442695, %v9350_v52  ;;  %v5733_v38 = vmul.f32 -1.442695, %v9353_v20 }
 0x695   :  { %6684 = vpow2.f32 %v5726_v8 }
 0x696   :  { %6686 = vpow2.f32 %v5728_v39  ;;  %v2506_v17 = vpop.f32.mrb[20].mxu1  ;;  %v2619_v44 = vpop.f32.mrb[40].mxu0 }
 0x697   :  { %6688 = vpow2.f32 %v5730_v27  ;;  %v9360_v9 = vadd.f32 %v2506_v17, %v9313_v14  ;;  %v9363_v24 = vadd.f32 %v2619_v44, %v9317_v49  ;;  %v2508_v4 = vpop.f32.mrb[21].mxu1  ;;  %v2621_v21 = vpop.f32.mrb[41].mxu0 }
 0x698   :  { %6690 = vpow2.f32 %v5732_v7  ;;  %v9366_v48 = vadd.f32 %v2508_v4, %v9321_v34  ;;  %v9369_v33 = vadd.f32 %v2621_v21, %v9325_v45  ;;  %v2510_v53 = vpop.f32.mrb[22].mxu1  ;;  %v2623_v16 = vpop.f32.mrb[42].mxu0 }
 0x699   :  { %6692 = vpow2.f32 %v5731_v0  ;;  %v5735_v32 = vmul.f32 -1.442695, %v9360_v9  ;;  %v5737_v30 = vmul.f32 -1.442695, %v9363_v24  ;;  %v9374_v54 = vadd.f32 %v2510_v53, %v9313_v14  ;;  %v2512_v19 = vpop.f32.mrb[23].mxu1  ;;  %v2625_v36 = vpop.f32.mrb[43].mxu0 }
 0x69a   :  { %6694 = vpow2.f32 %v5733_v38  ;;  %v5736_v6 = vmul.f32 -1.442695, %v9366_v48  ;;  %v5738_v35 = vmul.f32 -1.442695, %v9369_v33  ;;  %v9380_v12 = vadd.f32 %v2623_v16, %v9317_v49 }
 0x69b   :  { %6696 = vpow2.f32 %v5735_v32  ;;  %v5740_v22 = vmul.f32 -1.442695, %v9374_v54  ;;  %v9383_v8 = vadd.f32 %v2512_v19, %v9321_v34  ;;  %v9387_v4 = vadd.f32 %v2625_v36, %v9325_v45 }
 0x69c   :  { %6698 = vpow2.f32 %v5737_v30  ;;  %v5742_v44 = vmul.f32 -1.442695, %v9380_v12 }
 0x69d   :  { %v6681_v41 = vpop.eup %6680  ;;  %6700 = vpow2.f32 %v5736_v6  ;;  %v5741_v32 = vmul.f32 -1.442695, %v9383_v8 }
 0x69e   :  { %v6683_v31 = vpop.eup %6682  ;;  %v3025_v47 = vadd.f32 1.0, %v6681_v41  ;;  %6702 = vpow2.f32 %v5738_v35  ;;  %v2516_v51 = vpop.f32.mrb[24].mxu1 }
 0x69f   :  { %v2629_v40 = vpop.f32.mrb[44].mxu0  ;;  %v6685_v25 = vpop.eup %6684  ;;  %v3027_v3 = vadd.f32 1.0, %v6683_v31  ;;  %6704 = vpow2.f32 %v5740_v22  ;;  %v9391_v30 = vadd.f32 %v2516_v51, %v9313_v14 }
 0x6a0   :  { %v2518_v10 = vpop.f32.mrb[25].mxu1  ;;  %v2631_v15 = vpop.f32.mrb[45].mxu0  ;;  %6706 = vrcp.f32 %v3025_v47  ;;  %v3026_v1 = vadd.f32 1.0, %v6685_v25  ;;  %v9396_v41 = vadd.f32 %v2629_v40, %v9317_v49 }
 0x6a1   :  { %v6687_v26 = vpop.eup %6686  ;;  %v2520_v60 = vpop.f32.mrb[26].mxu1  ;;  %6708 = vrcp.f32 %v3027_v3  ;;  %v9399_v36 = vadd.f32 %v2518_v10, %v9321_v34  ;;  %v9406_v3 = vadd.f32 %v2631_v15, %v9325_v45 }
 0x6a2   :  { %v2633_v5 = vpop.f32.mrb[46].mxu0  ;;  %v6689_v23 = vpop.eup %6688  ;;  %v3028_v46 = vadd.f32 1.0, %v6687_v26  ;;  %6710 = vrcp.f32 %v3026_v1  ;;  %v9409_v26 = vadd.f32 %v2520_v60, %v9313_v14  ;;  %v5743_v60 = vmul.f32 -1.442695, %v9387_v4 }
 0x6a3   :  { %v2522_v2 = vpop.f32.mrb[27].mxu1  ;;  %v6691_v50 = vpop.eup %6690  ;;  %v3030_v55 = vadd.f32 1.0, %v6689_v23 }
 0x6a4   :  { %v2635_v13 = vpop.f32.mrb[47].mxu0  ;;  %v6693_v56 = vpop.eup %6692  ;;  %6712 = vrcp.f32 %v3028_v46  ;;  %v3032_v37 = vadd.f32 1.0, %v6691_v50  ;;  %v9416_v46 = vadd.f32 %v2633_v5, %v9317_v49  ;;  %v9419_v50 = vadd.f32 %v2522_v2, %v9321_v34 }
 0x6a5   :  { %v6695_v39 = vpop.eup %6694  ;;  %6714 = vrcp.f32 %v3030_v55  ;;  %v3031_v27 = vadd.f32 1.0, %v6693_v56  ;;  %v5746_v5 = vmul.f32 -1.442695, %v9399_v36  ;;  %v5750_v2 = vmul.f32 -1.442695, %v9409_v26 }
 0x6a6   :  { %v6697_v7 = vpop.eup %6696  ;;  %6716 = vrcp.f32 %v3032_v37  ;;  %v3033_v0 = vadd.f32 1.0, %v6695_v39  ;;  %v2526_v21 = vpop.f32.mrb[28].mxu1  ;;  %v5745_v37 = vmul.f32 -1.442695, %v9391_v30  ;;  %v5747_v39 = vmul.f32 -1.442695, %v9396_v41 }
 0x6a7   :  { %v6699_v38 = vpop.eup %6698  ;;  %6718 = vrcp.f32 %v3031_v27  ;;  %v3035_v17 = vadd.f32 1.0, %v6697_v7  ;;  %v2639_v19 = vpop.f32.mrb[48].mxu0  ;;  %v5748_v7 = vmul.f32 -1.442695, %v9406_v3 }
 0x6a8   :  { %v6701_v53 = vpop.eup %6700  ;;  %6720 = vrcp.f32 %v3033_v0  ;;  %v3037_v16 = vadd.f32 1.0, %v6699_v38  ;;  %v9393_v6 = vpop.f32.mrb[29].mxu1  ;;  %v5752_v38 = vmul.f32 -1.442695, %v9416_v46  ;;  %v9450_v63 = vadd.f32 %v2639_v19, %v9317_v49 }
 0x6a9   :  { %v6703_v35 = vpop.eup %6702  ;;  %6722 = vrcp.f32 %v3035_v17  ;;  %v3036_v22 = vadd.f32 1.0, %v6701_v53  ;;  %v9401_v31 = vpop.f32.mrb[49].mxu0  ;;  %v5751_v17 = vmul.f32 -1.442695, %v9419_v50  ;;  %v9432_v53 = vadd.f32 %v2635_v13, %v9325_v45 }
 0x6aa   :  { %v9403_v47 = vpop.f32.mrb[30].mxu1  ;;  %v6705_v25 = vpop.eup %6704  ;;  %6724 = vrcp.f32 %v3037_v16  ;;  %v3038_v51 = vadd.f32 1.0, %v6703_v35 }
 0x6ab   :  { %v9411_v1 = vpop.f32.mrb[50].mxu0  ;;  %v9413_v40 = vpop.f32.mrb[31].mxu1  ;;  %6726 = vrcp.f32 %v3036_v22  ;;  %v3040_v10 = vadd.f32 1.0, %v6705_v25 }
 0x6ac   :  { %v6707_v23 = vpop.eup %6706  ;;  %v9421_v55 = vpop.f32.mrb[51].mxu0  ;;  %6728 = vrcp.f32 %v3038_v51  ;;  %v9441_v51 = vadd.f32 %v2526_v21, %v9313_v14 }
 0x6ad   :  { %v6709_v15 = vpop.eup %6708  ;;  %6730 = vrcp.f32 %v3040_v10  ;;  %v3265_v22 = vmul.f32 %v6707_v23, %v9328_v28 }
 0x6ae   :  { %v6711_v56 = vpop.eup %6710  ;;  %6732 = vpow2.f32 %v5742_v44  ;;  %v9434_v16 = vpop.f32.mrb[32].mxu1  ;;  %v3267_v13 = vmul.f32 %v6709_v15, %v9331_v42 }
 0x6af   :  { %v6713_v27 = vpop.eup %6712  ;;  %6734 = vpow2.f32 %v5741_v32  ;;  %v9436_v35 = vpop.f32.mrb[52].mxu0  ;;  %v3266_v21 = vmul.f32 %v6711_v56, %v9334_v58  ;;  %v5753_v58 = vmul.f32 -1.442695, %v9432_v53 }
 0x6b0   :  { %v6715_v0 = vpop.eup %6714  ;;  %6736 = vpow2.f32 %v5743_v60  ;;  %v9443_v32 = vpop.f32.mrb[33].mxu1  ;;  %v3268_v15 = vmul.f32 %v6713_v27, %v9337_v57 }
 0x6b1   :  { %v6717_v44 = vpop.eup %6716  ;;  %v3270_v25 = vmul.f32 %v6715_v0, %v9342_v29  ;;  %v9445_v10 = vpop.f32.mrb[53].mxu0  ;;  %6738 = vpow2.f32 %v5745_v37 }
 0x6b2   :  { %v6719_v43 = vpop.eup %6718  ;;  %v3272_v61 = vmul.f32 %v6717_v44, %v9345_v18  ;;  %v9452_v28 = vpop.f32.mrb[34].mxu1  ;;  %6740 = vpow2.f32 %v5747_v39  ;;  %v5755_v39 = vmul.f32 -1.442695, %v9441_v51 }
 0x6b3   :  { %v9454_v29 = vpop.f32.mrb[54].mxu0  ;;  %v6721_v23 = vpop.eup %6720  ;;  %v3345_v60 = vadd.f32 %v3270_v25, %v3265_v22  ;;  %v3271_v0 = vmul.f32 %v6719_v43, %v9350_v52  ;;  %6742 = vpow2.f32 %v5746_v5 }
 0x6b4   :  { %v9458_v62 = vpop.f32.mrb[35].mxu1  ;;  %v9460_v42 = vpop.f32.mrb[55].mxu0  ;;  %v3371_v19 = vadd.f32 %v3272_v61, %v3267_v13  ;;  %v3273_v37 = vmul.f32 %v6721_v23, %v9353_v20  ;;  %6744 = vpow2.f32 %v5748_v7  ;;  %v5757_v20 = vmul.f32 -1.442695, %v9450_v63 }
 0x6b5   :  { %v6723_v18 = vpop.eup %6722  ;;  %v3358_v11 = vadd.f32 %v3271_v0, %v3266_v21  ;;  %6746 = vpow2.f32 %v5750_v2 }
 0x6b6   :  { %v6725_v44 = vpop.eup %6724  ;;  %v3275_v59 = vmul.f32 %v6723_v18, %v9360_v9  ;;  %v3384_v52 = vadd.f32 %v3273_v37, %v3268_v15  ;;  %6748 = vpow2.f32 %v5752_v38  ;;  %v9473_v7 = vpop.f32.mrb[36].mxu1 }
 0x6b7   :  { %v6727_v43 = vpop.eup %6726  ;;  %v3277_v56 = vmul.f32 %v6725_v44, %v9363_v24  ;;  %6750 = vpow2.f32 %v5751_v17  ;;  %v9475_v25 = vpop.f32.mrb[56].mxu0 }
 0x6b8   :  { %v6729_v22 = vpop.eup %6728  ;;  %v3346_v57 = vadd.f32 %v3345_v60, %v3275_v59  ;;  %v3276_v61 = vmul.f32 %v6727_v43, %v9366_v48  ;;  %6752 = vpow2.f32 %v5753_v58  ;;  %v9480_v48 = vpop.f32.mrb[37].mxu1 }
 0x6b9   :  { %v6731_v27 = vpop.eup %6730  ;;  %v9470_v5 = vadd.f32 %v3371_v19, %v3277_v56  ;;  %v3278_v9 = vmul.f32 %v6729_v22, %v9369_v33  ;;  %v9482_v38 = vpop.f32.mrb[57].mxu0  ;;  %6754 = vpow2.f32 %v5755_v39 }
 0x6ba   :  { %v6733_v24 = vpop.eup %6732  ;;  %v9477_v2 = vadd.f32 %v3358_v11, %v3276_v61  ;;  %v3280_v59 = vmul.f32 %v6731_v27, %v9374_v54  ;;  %v9486_v33 = vpop.f32.mrb[38].mxu1  ;;  %6756 = vpow2.f32 %v5757_v20 }
 0x6bb   :  { %v6735_v13 = vpop.eup %6734  ;;  %v9484_v23 = vadd.f32 %v3384_v52, %v3278_v9  ;;  %v3042_v21 = vadd.f32 1.0, %v6733_v24  ;;  %v9488_v17 = vpop.f32.mrb[58].mxu0  ;;  %v9498_v52 = vadd.f32 %v9393_v6, %v9321_v34  ;;  %v9506_v24 = vadd.f32 %v9401_v31, %v9325_v45 }
 0x6bc   :  { %v6737_v60 = vpop.eup %6736  ;;  %v9490_v0 = vadd.f32 %v3346_v57, %v3280_v59  ;;  %v3041_v11 = vadd.f32 1.0, %v6735_v13  ;;  %v9492_v54 = vpop.f32.mrb[39].mxu1 }
 0x6bd   :  { %v9494_v18 = vpop.f32.mrb[59].mxu0  ;;  %v6739_v15 = vpop.eup %6738  ;;  %6758 = vrcp.f32 %v3042_v21  ;;  %v3043_v19 = vadd.f32 1.0, %v6737_v60  ;;  %v5756_v60 = vmul.f32 -1.442695, %v9498_v52 }
 0x6be   :  { %v6741_v37 = vpop.eup %6740  ;;  %6760 = vrcp.f32 %v3041_v11  ;;  %v3045_v44 = vadd.f32 1.0, %v6739_v15  ;;  %v9500_v61 = vpop.f32.mrb[40].mxu1  ;;  %v9515_v11 = vadd.f32 %v9403_v47, %v9313_v14 }
 0x6bf   :  { %v6743_v58 = vpop.eup %6742  ;;  %6762 = vrcp.f32 %v3043_v19  ;;  %v3047_v43 = vadd.f32 1.0, %v6741_v37  ;;  %v9502_v20 = vpop.f32.mrb[60].mxu0 }
 0x6c0   :  { %v6745_v56 = vpop.eup %6744  ;;  %6764 = vrcp.f32 %v3045_v44  ;;  %v3046_v39 = vadd.f32 1.0, %v6743_v58  ;;  %v9508_v59 = vpop.f32.mrb[41].mxu1  ;;  %v9523_v44 = vadd.f32 %v9411_v1, %v9317_v49  ;;  %v9527_v58 = vadd.f32 %v9413_v40, %v9321_v34 }
 0x6c1   :  { %v6747_v22 = vpop.eup %6746  ;;  %6766 = vrcp.f32 %v3047_v43  ;;  %v3048_v57 = vadd.f32 1.0, %v6745_v56  ;;  %v9510_v6 = vpop.f32.mrb[61].mxu0  ;;  %v5758_v40 = vmul.f32 -1.442695, %v9506_v24 }
 0x6c2   :  { %v6749_v27 = vpop.eup %6748  ;;  %6768 = vrcp.f32 %v3046_v39  ;;  %v3050_v9 = vadd.f32 1.0, %v6747_v22  ;;  %v9517_v15 = vpop.f32.mrb[42].mxu1  ;;  %11797 = vst [vmem:[#allocation55_spill] sm:$0xff] %v9527_v58  ;;  %v9535_v22 = vadd.f32 %v9421_v55, %v9325_v45  ;;  %v9549_v55 = vadd.f32 %v9443_v32, %v9321_v34 }
 0x6c3   :  { %v6751_v13 = vpop.eup %6750  ;;  %6770 = vrcp.f32 %v3048_v57  ;;  %v3052_v21 = vadd.f32 1.0, %v6749_v27  ;;  %11795 = vst [vmem:[#allocation33_spill] sm:$0xff] %v9517_v15  ;;  %v9519_v19 = vpop.f32.mrb[62].mxu0  ;;  %v9539_v57 = vadd.f32 %v9434_v16, %v9313_v14 }
 0x6c4   :  { %11796 = vst [vmem:[#allocation47_spill] sm:$0xff] %v9519_v19  ;;  %v6753_v37 = vpop.eup %6752  ;;  %6772 = vrcp.f32 %v3050_v9  ;;  %v3051_v31 = vadd.f32 1.0, %v6751_v13  ;;  %v9529_v43 = vpop.f32.mrb[43].mxu1  ;;  %v9544_v9 = vadd.f32 %v9436_v35, %v9317_v49 }
 0x6c5   :  { %11798 = vst [vmem:[#allocation48_spill] sm:$0xff] %v9529_v43  ;;  %v9531_v56 = vpop.f32.mrb[63].mxu0  ;;  %v6755_v47 = vpop.eup %6754  ;;  %6774 = vrcp.f32 %v3052_v21  ;;  %v3053_v39 = vadd.f32 1.0, %v6753_v37  ;;  %11800 = vst [vmem:[#allocation69_spill] sm:$0xff] %v9539_v57  ;;  %v5760_v37 = vmul.f32 -1.442695, %v9515_v11 }
 0x6c6   :  { %11799 = vst [vmem:[#allocation68_spill] sm:$0xff] %v9531_v56  ;;  %v6757_v1 = vpop.eup %6756  ;;  %6776 = vrcp.f32 %v3051_v31  ;;  %v3055_v27 = vadd.f32 1.0, %v6755_v47  ;;  %v5762_v31 = vmul.f32 -1.442695, %v9523_v44  ;;  %v5761_v47 = vmul.f32 -1.442695, %v9527_v58 }
 0x6c7   :  { %v6759_v13 = vpop.eup %6758  ;;  %6778 = vrcp.f32 %v3053_v39  ;;  %v3057_v21 = vadd.f32 1.0, %v6757_v1  ;;  %v5763_v39 = vmul.f32 -1.442695, %v9535_v22  ;;  %v5765_v1 = vmul.f32 -1.442695, %v9539_v57  ;;  %v9557_v19 = vpop.f32.mrb[44].mxu1 }
 0x6c8   :  { %v6761_v16 = vpop.eup %6760  ;;  %v3282_v56 = vmul.f32 %v6759_v13, %v9380_v12  ;;  %6780 = vrcp.f32 %v3055_v27  ;;  %11801 = vst [vmem:[#allocation64_spill] sm:$0xff] %v9557_v19  ;;  %v9559_v32 = vpop.f32.mrb[64].mxu0  ;;  %v5767_v13 = vmul.f32 -1.442695, %v9544_v9 }
 0x6c9   :  { %v6763_v43 = vpop.eup %6762  ;;  %v3281_v35 = vmul.f32 %v6761_v16, %v9383_v8  ;;  %6782 = vrcp.f32 %v3057_v21  ;;  %11802 = vst [vmem:[#allocation34_spill] sm:$0xff] %v9559_v32  ;;  %v9564_v58 = vpop.f32.mrb[45].mxu1  ;;  %v5766_v32 = vmul.f32 -1.442695, %v9549_v55 }
 0x6ca   :  { %v6765_v15 = vpop.eup %6764  ;;  %v3373_v12 = vadd.f32 %v9470_v5, %v3282_v56  ;;  %v3283_v27 = vmul.f32 %v6763_v43, %v9387_v4  ;;  %6784 = vpow2.f32 %v5756_v60  ;;  %v9566_v8 = vpop.f32.mrb[65].mxu0  ;;  %v9579_v56 = vadd.f32 %v9452_v28, %v9313_v14 }
 0x6cb   :  { %v6767_v21 = vpop.eup %6766  ;;  %v3360_v16 = vadd.f32 %v9477_v2, %v3281_v35  ;;  %v3285_v57 = vmul.f32 %v6765_v15, %v9391_v30  ;;  %6786 = vpow2.f32 %v5758_v40  ;;  %v9571_v19 = vpop.f32.mrb[46].mxu1  ;;  %v9594_v28 = vadd.f32 %v9458_v62, %v9321_v34 }
 0x6cc   :  { %v9573_v5 = vpop.f32.mrb[66].mxu0  ;;  %v6769_v4 = vpop.eup %6768  ;;  %v3386_v60 = vadd.f32 %v9484_v23, %v3283_v27  ;;  %v3287_v43 = vmul.f32 %v6767_v21, %v9396_v41  ;;  %6788 = vpow2.f32 %v5760_v37  ;;  %v9589_v23 = vadd.f32 %v9454_v29, %v9317_v49 }
 0x6cd   :  { %v9581_v2 = vpop.f32.mrb[47].mxu1  ;;  %v9583_v30 = vpop.f32.mrb[67].mxu0  ;;  %v3348_v40 = vadd.f32 %v9490_v0, %v3285_v57  ;;  %v3286_v35 = vmul.f32 %v6769_v4, %v9399_v36  ;;  %6790 = vpow2.f32 %v5762_v31  ;;  %v5770_v29 = vmul.f32 -1.442695, %v9579_v56 }
 0x6ce   :  { %11803 = vst [vmem:[#allocation29_spill] sm:$0xff] %v9583_v30  ;;  %v6771_v15 = vpop.eup %6770  ;;  %v3374_v37 = vadd.f32 %v3373_v12, %v3287_v43  ;;  %6792 = vpow2.f32 %v5761_v47  ;;  %v5772_v62 = vmul.f32 -1.442695, %v9589_v23  ;;  %v9601_v47 = vpop.f32.mrb[48].mxu1 }
 0x6cf   :  { %v6773_v41 = vpop.eup %6772  ;;  %v3288_v27 = vmul.f32 %v6771_v15, %v9406_v3  ;;  %v3361_v30 = vadd.f32 %v3360_v16, %v3286_v35  ;;  %6794 = vpow2.f32 %v5763_v39  ;;  %v9603_v16 = vpop.f32.mrb[68].mxu0 }
 0x6d0   :  { %v6775_v21 = vpop.eup %6774  ;;  %v3290_v0 = vmul.f32 %v6773_v41, %v9409_v26  ;;  %6796 = vpow2.f32 %v5765_v1  ;;  %v9607_v1 = vpop.f32.mrb[49].mxu1 }
 0x6d1   :  { %v6777_v36 = vpop.eup %6776  ;;  %v3387_v57 = vadd.f32 %v3386_v60, %v3288_v27  ;;  %v3292_v31 = vmul.f32 %v6775_v21, %v9416_v46  ;;  %6798 = vpow2.f32 %v5767_v13  ;;  %v5771_v46 = vmul.f32 -1.442695, %v9594_v28  ;;  %v9609_v43 = vpop.f32.mrb[69].mxu0 }
 0x6d2   :  { %v6779_v12 = vpop.eup %6778  ;;  %v3349_v4 = vadd.f32 %v3348_v40, %v3290_v0  ;;  %v3291_v3 = vmul.f32 %v6777_v36, %v9419_v50  ;;  %6800 = vpow2.f32 %v5766_v32  ;;  %v9614_v40 = vpop.f32.mrb[50].mxu1 }
 0x6d3   :  { %v6781_v26 = vpop.eup %6780  ;;  %v3375_v39 = vadd.f32 %v3374_v37, %v3292_v31  ;;  %v3293_v60 = vmul.f32 %v6779_v12, %v9432_v53  ;;  %v9616_v35 = vpop.f32.mrb[70].mxu0  ;;  %6802 = vpow2.f32 %v5770_v29 }
 0x6d4   :  { %v6783_v15 = vpop.eup %6782  ;;  %v9611_v50 = vadd.f32 %v3361_v30, %v3291_v3  ;;  %v3295_v13 = vmul.f32 %v6781_v26, %v9441_v51  ;;  %v9621_v32 = vpop.f32.mrb[51].mxu1  ;;  %v9629_v51 = vadd.f32 %v9445_v10, %v9325_v45  ;;  %6804 = vpow2.f32 %v5772_v62 }
 0x6d5   :  { %v6785_v41 = vpop.eup %6784  ;;  %v9618_v37 = vadd.f32 %v3387_v57, %v3293_v60  ;;  %v3297_v53 = vmul.f32 %v6783_v15, %v9450_v63  ;;  %11804 = vst [vmem:[#allocation57_spill] sm:$0xff] %v9621_v32  ;;  %v9623_v27 = vpop.f32.mrb[71].mxu0  ;;  %6806 = vpow2.f32 %v5771_v46  ;;  %v9640_v46 = vadd.f32 %v9460_v42, %v9325_v45 }
 0x6d6   :  { %11805 = vst [vmem:[#allocation54_spill] sm:$0xff] %v9623_v27  ;;  %v6787_v21 = vpop.eup %6786  ;;  %v9625_v0 = vadd.f32 %v3349_v4, %v3295_v13  ;;  %v3056_v30 = vadd.f32 1.0, %v6785_v41  ;;  %v5768_v60 = vmul.f32 -1.442695, %v9629_v51  ;;  %v9634_v15 = vpop.f32.mrb[52].mxu1  ;;  %v9644_v13 = vadd.f32 %v9473_v7, %v9313_v14 }
 0x6d7   :  { %v6789_v36 = vpop.eup %6788  ;;  %v9631_v31 = vadd.f32 %v3375_v39, %v3297_v53  ;;  %v3058_v57 = vadd.f32 1.0, %v6787_v21  ;;  %11806 = vst [vmem:[#allocation67_spill] sm:$0xff] %v9634_v15  ;;  %v9636_v10 = vpop.f32.mrb[72].mxu0 }
 0x6d8   :  { %v6791_v63 = vpop.eup %6790  ;;  %6808 = vrcp.f32 %v3056_v30  ;;  %v3060_v29 = vadd.f32 1.0, %v6789_v36  ;;  %11807 = vst [vmem:[#allocation46_spill] sm:$0xff] %v9636_v10  ;;  %v9646_v41 = vpop.f32.mrb[53].mxu1  ;;  %v9650_v30 = vadd.f32 %v9475_v25, %v9317_v49  ;;  %v9654_v36 = vadd.f32 %v9480_v48, %v9321_v34  ;;  %v11815_v10 = vld [vmem:[#allocation38_spill] sm:$0xff] }
 0x6d9   :  { %v6793_v12 = vpop.eup %6792  ;;  %6810 = vrcp.f32 %v3058_v57  ;;  %v3062_v3 = vadd.f32 1.0, %v6791_v63  ;;  %11808 = vst [vmem:[#allocation35_spill] sm:$0xff] %v9646_v41  ;;  %v9656_v57 = vpop.f32.mrb[73].mxu0  ;;  %v11814_v41 = vld [vmem:[#allocation26_spill] sm:$0xff] }
 0x6da   :  { %v6795_v26 = vpop.eup %6794  ;;  %6812 = vrcp.f32 %v3060_v29  ;;  %v3061_v4 = vadd.f32 1.0, %v6793_v12  ;;  %11809 = vst [vmem:[#allocation32_spill] sm:$0xff] %v9656_v57  ;;  %v9658_v42 = vpop.f32.mrb[54].mxu1  ;;  %v9662_v29 = vadd.f32 %v9482_v38, %v9325_v45  ;;  %v9666_v12 = vadd.f32 %v9486_v33, %v9313_v14 }
 0x6db   :  { %v6797_v62 = vpop.eup %6796  ;;  %6814 = vrcp.f32 %v3062_v3  ;;  %v3063_v39 = vadd.f32 1.0, %v6795_v26  ;;  %11810 = vst [vmem:[#allocation49_spill] sm:$0xff] %v9658_v42  ;;  %v9668_v25 = vpop.f32.mrb[74].mxu0  ;;  %v9674_v26 = vadd.f32 %v9488_v17, %v9317_v49  ;;  %v5773_v38 = vmul.f32 -1.442695, %v9640_v46 }
 0x6dc   :  { %v6799_v53 = vpop.eup %6798  ;;  %6816 = vrcp.f32 %v3061_v4  ;;  %v3065_v21 = vadd.f32 1.0, %v6797_v62  ;;  %11811 = vst [vmem:[#allocation50_spill] sm:$0xff] %v9668_v25  ;;  %v9670_v3 = vpop.f32.mrb[55].mxu1  ;;  %v9682_v33 = vadd.f32 %v9492_v54, %v9321_v34  ;;  %v5776_v17 = vmul.f32 -1.442695, %v9654_v36 }
 0x6dd   :  { %v6801_v63 = vpop.eup %6800  ;;  %6818 = vrcp.f32 %v3063_v39  ;;  %v3067_v7 = vadd.f32 1.0, %v6799_v53  ;;  %11812 = vst [vmem:[#allocation56_spill] sm:$0xff] %v9670_v3  ;;  %v9676_v4 = vpop.f32.mrb[75].mxu0  ;;  %v5775_v39 = vmul.f32 -1.442695, %v9644_v13 }
 0x6de   :  { %v3066_v48 = vadd.f32 1.0, %v6801_v63  ;;  %6820 = vpow2.f32 %v5768_v60  ;;  %11813 = vst [vmem:[#allocation52_spill] sm:$0xff] %v9676_v4  ;;  %v6803_v62 = vpop.eup %6802  ;;  %v5777_v60 = vmul.f32 -1.442695, %v9650_v30  ;;  %v5780_v25 = vmul.f32 -1.442695, %v9666_v12 }
 0x6df   :  { %6822 = vrcp.f32 %v3065_v21  ;;  %v6805_v53 = vpop.eup %6804  ;;  %v3070_v63 = vadd.f32 1.0, %v6803_v62  ;;  %v5778_v21 = vmul.f32 -1.442695, %v9662_v29  ;;  %v5782_v54 = vmul.f32 -1.442695, %v9674_v26  ;;  %v9693_v62 = vpop.f32.mrb[56].mxu1 }
 0x6e0   :  { %6824 = vrcp.f32 %v3067_v7  ;;  %v6807_v3 = vpop.eup %6806  ;;  %v3072_v4 = vadd.f32 1.0, %v6805_v53  ;;  %v9691_v7 = vrot.slane %v11815_v10, %v11814_v41  ;;  %11816 = vst [vmem:[#allocation61_spill] sm:$0xff] %v9693_v62  ;;  %v9695_v15 = vpop.f32.mrb[76].mxu0  ;;  %v5781_v53 = vmul.f32 -1.442695, %v9682_v33 }
 0x6e1   :  { %6826 = vrcp.f32 %v3066_v48  ;;  %v3071_v57 = vadd.f32 1.0, %v6807_v3  ;;  %11817 = vst [vmem:[#allocation60_spill] sm:$0xff] %v9695_v15  ;;  %v9703_v3 = vpop.f32.mrb[57].mxu1  ;;  %v9705_v32 = vpop.f32.mrb[77].mxu0  ;;  %v9710_v15 = vadd.f32 %v9500_v61, %v9313_v14 }
 0x6e2   :  { %v6809_v42 = vpop.eup %6808  ;;  %6828 = vrcp.f32 %v3070_v63  ;;  %v9701_v63 = vadd.f32 %v9494_v18, %v9325_v45  ;;  %11818 = vst [vmem:[#allocation40_spill] sm:$0xff] %v9703_v3  ;;  %11819 = vst [vmem:[#allocation41_spill] sm:$0xff] %v9705_v32  ;;  %v9718_v18 = vpop.f32.mrb[78].mxu0 }
 0x6e3   :  { %v6811_v27 = vpop.eup %6810  ;;  %v3296_v48 = vmul.f32 %v6809_v42, %v9498_v52  ;;  %6830 = vrcp.f32 %v3072_v4  ;;  %v9714_v52 = vadd.f32 %v9502_v20, %v9317_v49  ;;  %v9716_v42 = vpop.f32.mrb[58].mxu1  ;;  %11821 = vst [vmem:[#allocation45_spill] sm:$0xff] %v9718_v18 }
 0x6e4   :  { %v6813_v10 = vpop.eup %6812  ;;  %v3298_v41 = vmul.f32 %v6811_v27, %v9506_v24  ;;  %6832 = vrcp.f32 %v3071_v57  ;;  %11820 = vst [vmem:[#allocation28_spill] sm:$0xff] %v9716_v42  ;;  %v9724_v24 = vadd.f32 %v9508_v59, %v9321_v34  ;;  %v9726_v61 = vpop.f32.mrb[59].mxu1  ;;  %v11826_v59 = vld [vmem:[#allocation55_spill] sm:$0xff] }
 0x6e5   :  { %v6815_v4 = vpop.eup %6814  ;;  %v3363_v3 = vadd.f32 %v9611_v50, %v3296_v48  ;;  %v3300_v32 = vmul.f32 %v6813_v10, %v9515_v11  ;;  %6834 = vpow2.f32 %v5773_v38  ;;  %11823 = vst [vmem:[#allocation51_spill] sm:$0xff] %v9726_v61  ;;  %v9728_v27 = vpop.f32.mrb[79].mxu0  ;;  %v9734_v50 = vadd.f32 %v9510_v6, %v9325_v45  ;;  %v11827_v10 = vld [vmem:[#allocation33_spill] sm:$0xff]  ;;  %v11829_v6 = vld [vmem:[#allocation47_spill] sm:$0xff] }
 0x6e6   :  { %11822 = vst [vmem:[#allocation44_spill] sm:$0xff] %v9724_v24  ;;  %11824 = vst [vmem:[#allocation58_spill] sm:$0xff] %v9728_v27  ;;  %v6817_v20 = vpop.eup %6816  ;;  %v3389_v57 = vadd.f32 %v9618_v37, %v3298_v41  ;;  %v3302_v42 = vmul.f32 %v6815_v4, %v9523_v44  ;;  %6836 = vpow2.f32 %v5775_v39  ;;  %v9742_v27 = vadd.f32 %v11827_v10, %v9313_v14 }
 0x6e7   :  { %11825 = vst [vmem:[#allocation53_spill] sm:$0xff] %v9734_v50  ;;  %v6819_v11 = vpop.eup %6818  ;;  %v9737_v38 = vadd.f32 %v9625_v0, %v3300_v32  ;;  %v3301_v48 = vmul.f32 %v6817_v20, %v11826_v59  ;;  %6838 = vpow2.f32 %v5777_v60  ;;  %v9750_v41 = vadd.f32 %v11829_v6, %v9317_v49  ;;  %v9755_v32 = vld [vmem:[%s11397_s14 + $0x5] sm:$0x1f]  ;;  %v9769_v20 = vpop.f32.mrb[60].mxu1 }
 0x6e8   :  { %11828 = vst [vmem:[#allocation59_spill] sm:$0xff] %v9742_v27  ;;  %v6821_v61 = vpop.eup %6820  ;;  %v9745_v37 = vadd.f32 %v9631_v31, %v3302_v42  ;;  %v3303_v44 = vmul.f32 %v6819_v11, %v9535_v22  ;;  %6840 = vpow2.f32 %v5776_v17  ;;  %11831 = vst [vmem:[#allocation42_spill] sm:$0xff] %v9755_v32  ;;  %v5783_v60 = vmul.f32 -1.442695, %v9701_v63  ;;  %v9771_v11 = vpop.f32.mrb[80].mxu0 }
 0x6e9   :  { %11830 = vst [vmem:[#allocation62_spill] sm:$0xff] %v9750_v41  ;;  %v6823_v0 = vpop.eup %6822  ;;  %v9757_v39 = vadd.f32 %v3363_v3, %v3301_v48  ;;  %6842 = vpow2.f32 %v5778_v21  ;;  %v5785_v31 = vmul.f32 -1.442695, %v9710_v15  ;;  %v9764_v17 = vmul.f32 -1.442695, %v9714_v52  ;;  %11832 = vst [vmem:[#allocation43_spill] sm:$0xff] %v9769_v20 }
 0x6ea   :  { %v6825_v42 = vpop.eup %6824  ;;  %v9761_v22 = vadd.f32 %v3389_v57, %v3303_v44  ;;  %6844 = vpow2.f32 %v5780_v25  ;;  %v9767_v4 = vmul.f32 -1.442695, %v9724_v24  ;;  %11833 = vst [vmem:[#allocation31_spill] sm:$0xff] %v9771_v11  ;;  %v9774_v21 = vmul.f32 -1.442695, %v9734_v50  ;;  %v11834_v57 = vld [vmem:[#allocation24_spill] sm:$0xff] }
 0x6eb   :  { %v6827_v3 = vpop.eup %6826  ;;  %6846 = vpow2.f32 %v5782_v54  ;;  %v9777_v59 = vmul.f32 -1.442695, %v9742_v27  ;;  %v9781_v25 = vrot.slane %v9755_v32, %v11834_v57  ;;  %v9783_v48 = vpop.f32.mrb[61].mxu1  ;;  %v3068_v6 = vadd.f32 1.0, %v6821_v61  ;;  %v11837_v54 = vld [vmem:[#allocation48_spill] sm:$0xff]  ;;  %v11840_v27 = vld [vmem:[#allocation69_spill] sm:$0xff] }
 0x6ec   :  { %11835 = vst [vmem:[#allocation30_spill] sm:$0xff] %v9783_v48  ;;  %v9785_v10 = vpop.f32.mrb[81].mxu0  ;;  %v6829_v44 = vpop.eup %6828  ;;  %6848 = vpow2.f32 %v5781_v53  ;;  %v9788_v11 = vmul.f32 -1.442695, %v9750_v41  ;;  %v9792_v20 = vadd.f32 %v11837_v54, %v9321_v34  ;;  %v3305_v50 = vmul.f32 %v6823_v0, %v11840_v27  ;;  %v11841_v61 = vld [vmem:[#allocation68_spill] sm:$0xff] }
 0x6ed   :  { %11836 = vst [vmem:[#allocation36_spill] sm:$0xff] %v9785_v10  ;;  %v9794_v18 = vpop.f32.mrb[62].mxu1  ;;  %v9796_v62 = vpop.f32.mrb[82].mxu0  ;;  %v3310_v48 = vmul.f32 %v6829_v44, %v9579_v56  ;;  %6850 = vpow2.f32 %v5783_v60  ;;  %v9802_v53 = vadd.f32 %v11841_v61, %v9325_v45  ;;  %v3307_v24 = vmul.f32 %v6825_v42, %v9544_v9  ;;  %v11845_v61 = vld [vmem:[#allocation34_spill] sm:$0xff] }
 0x6ee   :  { %11838 = vst [vmem:[#allocation66_spill] sm:$0xff] %v9794_v18  ;;  %11839 = vst [vmem:[#allocation63_spill] sm:$0xff] %v9796_v62  ;;  %v6831_v57 = vpop.eup %6830  ;;  %v9804_v10 = vpop.f32.mrb[63].mxu1  ;;  %6852 = vpow2.f32 %v5785_v31  ;;  %v11844_v62 = vld [vmem:[#allocation64_spill] sm:$0xff]  ;;  %v3306_v0 = vmul.f32 %v6827_v3, %v9549_v55  ;;  %v9825_v31 = vmul.f32 -1.442695, %v9792_v20 }
 0x6ef   :  { %11842 = vst [vmem:[#allocation65_spill] sm:$0xff] %v9804_v10  ;;  %v9806_v41 = vpop.f32.mrb[83].mxu0  ;;  %v6833_v54 = vpop.eup %6832  ;;  %v3312_v18 = vmul.f32 %v6831_v57, %v9589_v23  ;;  %v9812_v27 = vadd.f32 %v11844_v62, %v9313_v14  ;;  %v9815_v60 = vadd.f32 %v3310_v48, %v3305_v50  ;;  %6854 = vrcp.f32 %v3068_v6 }
 0x6f0   :  { %11843 = vst [vmem:[#allocation72_spill] sm:$0xff] %v9806_v41  ;;  %v6835_v56 = vpop.eup %6834  ;;  %v3311_v44 = vmul.f32 %v6833_v54, %v9594_v28  ;;  %v9820_v41 = vadd.f32 %v11845_v61, %v9317_v49  ;;  %v9830_v50 = vmul.f32 -1.442695, %v9802_v53  ;;  %v9834_v28 = vadd.f32 %v9564_v58, %v9321_v34  ;;  %v9843_v57 = vpop.f32.mrb[64].mxu1 }
 0x6f1   :  { %v6837_v10 = vpop.eup %6836  ;;  %v9822_v9 = vadd.f32 %v3312_v18, %v3307_v24  ;;  %v3073_v23 = vadd.f32 1.0, %v6835_v56  ;;  %v9837_v18 = vmul.f32 -1.442695, %v9812_v27  ;;  %v11846_v24 = vld [vmem:[#allocation27_spill] sm:$0xff]  ;;  %11847 = vst [vmem:[#allocation73_spill] sm:$0xff] %v9843_v57 }
 0x6f2   :  { %v6839_v62 = vpop.eup %6838  ;;  %v9827_v42 = vadd.f32 %v3311_v44, %v3306_v0  ;;  %v3075_v55 = vadd.f32 1.0, %v6837_v10  ;;  %v9841_v6 = vrot.slane %v9755_v32, %v11846_v24  ;;  %v9845_v10 = vpop.f32.mrb[84].mxu0  ;;  %v9848_v58 = vmul.f32 -1.442695, %v9820_v41 }
 0x6f3   :  { %v6841_v3 = vpop.eup %6840  ;;  %6856 = vrcp.f32 %v3073_v23  ;;  %v3077_v48 = vadd.f32 1.0, %v6839_v62  ;;  %11848 = vst [vmem:[#allocation74_spill] sm:$0xff] %v9845_v10  ;;  %v9852_v0 = vadd.f32 %v9566_v8, %v9325_v45  ;;  %v9854_v44 = vpop.f32.mrb[65].mxu1  ;;  %v3352_v62 = vrot.slane %v9737_v38, 4 }
 0x6f4   :  { %v6843_v54 = vpop.eup %6842  ;;  %6858 = vrcp.f32 %v3075_v55  ;;  %v3076_v56 = vadd.f32 1.0, %v6841_v3  ;;  %11849 = vst [vmem:[#allocation75_spill] sm:$0xff] %v9854_v44  ;;  %v9856_v61 = vpop.f32.mrb[85].mxu0  ;;  %v9861_v55 = vadd.f32 %v9571_v19, %v9313_v14  ;;  %v9868_v44 = vmul.f32 -1.442695, %v9834_v28 }
 0x6f5   :  { %11850 = vst [vmem:[#allocation70_spill] sm:$0xff] %v9856_v61  ;;  %v6845_v23 = vpop.eup %6844  ;;  %6860 = vrcp.f32 %v3077_v48  ;;  %v3078_v24 = vadd.f32 1.0, %v6843_v54  ;;  %v9863_v3 = vpop.f32.mrb[66].mxu1  ;;  %v9872_v61 = vadd.f32 %v9573_v5, %v9317_v49  ;;  %v3378_v32 = vrot.slane %v9745_v37, 4 }
 0x6f6   :  { %11851 = vst [vmem:[#allocation71_spill] sm:$0xff] %v9863_v3  ;;  %v9865_v10 = vpop.f32.mrb[86].mxu0  ;;  %v6847_v57 = vpop.eup %6846  ;;  %6862 = vrcp.f32 %v3076_v56  ;;  %v3080_v8 = vadd.f32 1.0, %v6845_v23  ;;  %v11855_v56 = vld [vmem:[#allocation29_spill] sm:$0xff]  ;;  %v9889_v5 = vadd.f32 %v9601_v47, %v9691_v7 }
 0x6f7   :  { %11852 = vst [vmem:[#allocation76_spill] sm:$0xff] %v9865_v10  ;;  %v9874_v48 = vpop.f32.mrb[67].mxu1  ;;  %v9876_v54 = vpop.f32.mrb[87].mxu0  ;;  %6864 = vrcp.f32 %v3078_v24  ;;  %v3082_v19 = vadd.f32 1.0, %v6847_v57  ;;  %v9880_v10 = vadd.f32 %v9581_v2, %v9321_v34  ;;  %v9884_v23 = vadd.f32 %v11855_v56, %v9325_v45 }
 0x6f8   :  { %11853 = vst [vmem:[#allocation39_spill] sm:$0xff] %v9874_v48  ;;  %11854 = vst [vmem:[#allocation37_spill] sm:$0xff] %v9876_v54  ;;  %v6849_v14 = vpop.eup %6848  ;;  %6866 = vrcp.f32 %v3080_v8  ;;  %v3353_v57 = vadd.f32 %v3352_v62, %v9737_v38  ;;  %v9894_v34 = vadd.f32 %v9603_v16, %v9781_v25  ;;  %v9897_v2 = vmul.f32 -1.442695, %v9852_v0  ;;  %v9912_v62 = vpop.f32.mrb[68].mxu1 }
 0x6f9   :  { %v6851_v3 = vpop.eup %6850  ;;  %v3081_v49 = vadd.f32 1.0, %v6849_v14  ;;  %11856 = vst [vmem:[#allocation22_spill] sm:$0xff] %v9889_v5  ;;  %6868 = vrcp.f32 %v3082_v19  ;;  %v9900_v8 = vmul.f32 -1.442695, %v9861_v55  ;;  %v9903_v47 = vmul.f32 -1.442695, %v9872_v61 }
 0x6fa   :  { %v6853_v54 = vpop.eup %6852  ;;  %v3083_v24 = vadd.f32 1.0, %v6851_v3  ;;  %11857 = vst [vmem:[#allocation9_spill] sm:$0xff] %v9894_v34  ;;  %v9906_v38 = vmul.f32 -1.442695, %v9880_v10  ;;  %v9910_v16 = vadd.f32 %v9607_v1, %v9691_v7  ;;  %11859 = vst [vmem:[#allocation7_spill] sm:$0xff] %v9912_v62  ;;  %v9914_v3 = vpop.f32.mrb[88].mxu0 }
 0x6fb   :  { %6870 = vrcp.f32 %v3081_v49  ;;  %v3085_v45 = vadd.f32 1.0, %v6853_v54  ;;  %v6855_v14 = vpop.eup %6854  ;;  %11860 = vst [vmem:[#allocation8_spill] sm:$0xff] %v9914_v3  ;;  %v3379_v54 = vadd.f32 %v3378_v32, %v9745_v37  ;;  %v9918_v19 = vmul.f32 -1.442695, %v9884_v23  ;;  %v9923_v49 = vpop.f32.mrb[69].mxu1 }
 0x6fc   :  { %6872 = vrcp.f32 %v3083_v24  ;;  %11858 = vst [vmem:[#allocation6_spill] sm:$0xff] %v9910_v16  ;;  %v9921_v56 = vmul.f32 -1.442695, %v9889_v5  ;;  %11861 = vst [vmem:[#allocation13_spill] sm:$0xff] %v9923_v49  ;;  %v9925_v24 = vpop.f32.mrb[89].mxu0  ;;  %v3354_v1 = vrot.slane %v3353_v57, 2  ;;  %v9933_v37 = vadd.f32 %v9609_v43, %v9841_v6 }
 0x6fd   :  { %6874 = vrcp.f32 %v3085_v45  ;;  %11862 = vst [vmem:[#allocation10_spill] sm:$0xff] %v9925_v24  ;;  %v6857_v48 = vpop.eup %6856  ;;  %v9929_v62 = vmul.f32 -1.442695, %v9894_v34  ;;  %v9935_v32 = vpop.f32.mrb[70].mxu1  ;;  %v3308_v49 = vmul.f32 %v6855_v14, %v9629_v51  ;;  %v9957_v51 = vadd.f32 %v9616_v35, %v9781_v25 }
 0x6fe   :  { %6876 = vpow2.f32 %v9764_v17  ;;  %11863 = vst [vmem:[#allocation11_spill] sm:$0xff] %v9935_v32  ;;  %v9937_v45 = vpop.f32.mrb[90].mxu0  ;;  %v6859_v3 = vpop.eup %6858  ;;  %v3313_v24 = vmul.f32 %v6857_v48, %v9640_v46  ;;  %v9944_v17 = vadd.f32 %v9614_v40, %v9691_v7 }
 0x6ff   :  { %11864 = vst [vmem:[#allocation12_spill] sm:$0xff] %v9937_v45  ;;  %6878 = vpow2.f32 %v9767_v4  ;;  %v9946_v5 = vpop.f32.mrb[71].mxu1  ;;  %v9948_v34 = vpop.f32.mrb[91].mxu0  ;;  %v3315_v32 = vmul.f32 %v6859_v3, %v9644_v13  ;;  %v9953_v45 = vmul.f32 -1.442695, %v9910_v16  ;;  %v3380_v4 = vrot.slane %v3379_v54, 2 }
 0x700   :  { %11865 = vst [vmem:[#allocation17_spill] sm:$0xff] %v9946_v5  ;;  %11866 = vst [vmem:[#allocation14_spill] sm:$0xff] %v9948_v34  ;;  %v6861_v43 = vpop.eup %6860  ;;  %6880 = vpow2.f32 %v9774_v21  ;;  %v3449_v40 = vadd.f32 %v3313_v24, %v3308_v49  ;;  %v3355_v34 = vadd.f32 %v3354_v1, %v3353_v57  ;;  %v3365_v5 = vrot.slane %v9757_v39, 4 }
 0x701   :  { %v6863_v46 = vpop.eup %6862  ;;  %v3317_v48 = vmul.f32 %v6861_v43, %v9650_v30  ;;  %6882 = vpow2.f32 %v9777_v59  ;;  %v3411_v13 = vadd.f32 %v9815_v60, %v3315_v32  ;;  %v3391_v59 = vrot.slane %v9761_v22, 4 }
 0x702   :  { %v6865_v14 = vpop.eup %6864  ;;  %v3316_v21 = vmul.f32 %v6863_v46, %v9654_v36  ;;  %6884 = vpow2.f32 %v9788_v11  ;;  %v9972_v36 = vpop.f32.mrb[72].mxu1  ;;  %v3381_v24 = vadd.f32 %v3380_v4, %v3379_v54  ;;  %v3356_v32 = vrot.slane %v3355_v34, 1 }
 0x703   :  { %v6867_v3 = vpop.eup %6866  ;;  %v3437_v35 = vadd.f32 %v9822_v9, %v3317_v48  ;;  %v3318_v16 = vmul.f32 %v6865_v14, %v9662_v29  ;;  %6886 = vpow2.f32 %v9825_v31  ;;  %11867 = vst [vmem:[#allocation15_spill] sm:$0xff] %v9972_v36  ;;  %v9974_v11 = vpop.f32.mrb[92].mxu0  ;;  %v11938_v36 = vld [vmem:[#allocation65_spill] sm:$0xff] }
 0x704   :  { %v6869_v30 = vpop.eup %6868  ;;  %v3424_v57 = vadd.f32 %v9827_v42, %v3316_v21  ;;  %v3320_v60 = vmul.f32 %v6867_v3, %v9666_v12  ;;  %6888 = vpow2.f32 %v9830_v50  ;;  %11868 = vst [vmem:[#allocation16_spill] sm:$0xff] %v9974_v11  ;;  %v9978_v31 = vpop.f32.mrb[73].mxu1  ;;  %v3357_v21 = vadd.f32 %v3356_v32, %v3355_v34 }
 0x705   :  { %v6871_v49 = vpop.eup %6870  ;;  %v3450_v9 = vadd.f32 %v3449_v40, %v3318_v16  ;;  %v3322_v29 = vmul.f32 %v6869_v30, %v9674_v26  ;;  %6890 = vpow2.f32 %v9837_v18  ;;  %11869 = vst [vmem:[#allocation21_spill] sm:$0xff] %v9978_v31  ;;  %v9980_v1 = vpop.f32.mrb[93].mxu0  ;;  %v3366_v26 = vadd.f32 %v3365_v5, %v9757_v39  ;;  %v11934_v31 = vld [vmem:[#allocation66_spill] sm:$0xff] }
 0x706   :  { %11870 = vst [vmem:[#allocation18_spill] sm:$0xff] %v9980_v1  ;;  %v6873_v42 = vpop.eup %6872  ;;  %v3412_v12 = vadd.f32 %v3411_v13, %v3320_v60  ;;  %v3321_v50 = vmul.f32 %v6871_v49, %v9682_v33  ;;  %6892 = vpow2.f32 %v9848_v58  ;;  %v9984_v43 = vpop.f32.mrb[74].mxu1  ;;  %v3392_v58 = vadd.f32 %v3391_v59, %v9761_v22 }
 0x707   :  { %11871 = vst [vmem:[#allocation19_spill] sm:$0xff] %v9984_v43  ;;  %v9986_v46 = vpop.f32.mrb[94].mxu0  ;;  %v6875_v16 = vpop.eup %6874  ;;  %v9989_v54 = vadd.f32 %v3437_v35, %v3322_v29  ;;  %v3323_v18 = vmul.f32 %v6873_v42, %v9701_v63  ;;  %6894 = vpow2.f32 %v9868_v44  ;;  %v3382_v5 = vrot.slane %v3381_v24, 1 }
 0x708   :  { %11872 = vst [vmem:[#allocation20_spill] sm:$0xff] %v9986_v46  ;;  %v9993_v4 = vpop.f32.mrb[75].mxu1  ;;  %v9995_v40 = vpop.f32.mrb[95].mxu0  ;;  %v9998_v48 = vadd.f32 %v3424_v57, %v3321_v50  ;;  %v3325_v14 = vmul.f32 %v6875_v16, %v9710_v15  ;;  %6896 = vpow2.f32 %v9897_v2  ;;  %v10009_v15 = vmul.f32 -1.442695, %v9933_v37  ;;  %v11875_v2 = vld [vmem:[#allocation57_spill] sm:$0xff] }
 0x709   :  { %11873 = vst [vmem:[#allocation38_spill] sm:$0xff] %v9993_v4  ;;  %11874 = vst [vmem:[#allocation55_spill] sm:$0xff] %v9995_v40  ;;  %v6877_v33 = vpop.eup %6876  ;;  %v10002_v13 = vadd.f32 %v3450_v9, %v3323_v18  ;;  %6898 = vpow2.f32 %v9900_v8  ;;  %v10013_v59 = vadd.f32 %v11875_v2, %v9691_v7  ;;  %v3367_v60 = vrot.slane %v3366_v26, 2  ;;  %v10015_v49 = vpop.f32.mrb[76].mxu1 }
 0x70a   :  { %v6879_v39 = vpop.eup %6878  ;;  %v3087_v63 = vadd.f32 1.0, %v6877_v33  ;;  %v10005_v3 = vadd.f32 %v3412_v12, %v3325_v14  ;;  %6900 = vpow2.f32 %v9903_v47  ;;  %v3393_v8 = vrot.slane %v3392_v58, 2  ;;  %11876 = vst [vmem:[#allocation33_spill] sm:$0xff] %v10015_v49  ;;  %v10017_v9 = vpop.f32.mrb[96].mxu0 }
 0x70b   :  { %v6881_v44 = vpop.eup %6880  ;;  %v3086_v35 = vadd.f32 1.0, %v6879_v39  ;;  %11877 = vst [vmem:[#allocation47_spill] sm:$0xff] %v10017_v9  ;;  %v3383_v29 = vadd.f32 %v3382_v5, %v3381_v24  ;;  %v10020_v32 = vmul.f32 -1.442695, %v9944_v17  ;;  %v10022_v12 = vpop.f32.mrb[77].mxu1  ;;  %v3475_v18 = vmul.f32 0.015625, %v3357_v21 }
 0x70c   :  { %v6883_v22 = vpop.eup %6882  ;;  %6902 = vrcp.f32 %v3087_v63  ;;  %v3088_v30 = vadd.f32 1.0, %v6881_v44  ;;  %11878 = vst [vmem:[#allocation24_spill] sm:$0xff] %v10022_v12  ;;  %v10024_v50 = vpop.f32.mrb[97].mxu0  ;;  %v10027_v14 = vmul.f32 -1.442695, %v9957_v51  ;;  %v10276_v11 = vadd.f32 %v11934_v31, %v9691_v7 }
 0x70d   :  { %v6885_v57 = vpop.eup %6884  ;;  %6904 = vrcp.f32 %v3086_v35  ;;  %v3090_v34 = vadd.f32 1.0, %v6883_v22  ;;  %11879 = vst [vmem:[#allocation48_spill] sm:$0xff] %v10024_v50  ;;  %v10029_v39 = vpop.f32.mrb[78].mxu1  ;;  %v10034_v44 = vmul.f32 -1.442695, %v10013_v59  ;;  %v11882_v35 = vld [vmem:[#allocation54_spill] sm:$0xff] }
 0x70e   :  { %v6887_v47 = vpop.eup %6886  ;;  %6906 = vrcp.f32 %v3088_v30  ;;  %v3092_v42 = vadd.f32 1.0, %v6885_v57  ;;  %11880 = vst [vmem:[#allocation69_spill] sm:$0xff] %v10029_v39  ;;  %v10031_v63 = vpop.f32.mrb[98].mxu0  ;;  %v10038_v22 = vadd.f32 %v11882_v35, %v9841_v6  ;;  %v10044_v57 = vadd.f32 %v3367_v60, %v3366_v26  ;;  %v11887_v39 = vld [vmem:[#allocation67_spill] sm:$0xff]  ;;  %v11888_v26 = vld [vmem:[#allocation46_spill] sm:$0xff] }
 0x70f   :  { %v6889_v16 = vpop.eup %6888  ;;  %6908 = vrcp.f32 %v3090_v34  ;;  %v3091_v33 = vadd.f32 1.0, %v6887_v47  ;;  %11881 = vst [vmem:[#allocation68_spill] sm:$0xff] %v10031_v63  ;;  %v10040_v21 = vpop.f32.mrb[79].mxu1  ;;  %v10046_v34 = vadd.f32 %v3393_v8, %v3392_v58  ;;  %v10052_v35 = vadd.f32 %v11887_v39, %v9691_v7 }
 0x710   :  { %v6891_v24 = vpop.eup %6890  ;;  %6910 = vrcp.f32 %v3092_v42  ;;  %v3093_v5 = vadd.f32 1.0, %v6889_v16  ;;  %11883 = vst [vmem:[#allocation64_spill] sm:$0xff] %v10040_v21  ;;  %v10042_v30 = vpop.f32.mrb[99].mxu0  ;;  %11885 = vst [vmem:[#allocation27_spill] sm:$0xff] %v10044_v57  ;;  %v10048_v16 = vmul.f32 0.015625, %v3383_v29  ;;  %v3485_v21 = vpack.c.bf16 %v3475_v18, %v3475_v18 }
 0x711   :  { %11884 = vst [vmem:[#allocation34_spill] sm:$0xff] %v10042_v30  ;;  %v6893_v2 = vpop.eup %6892  ;;  %11886 = vst [vmem:[#allocation29_spill] sm:$0xff] %v10046_v34  ;;  %6912 = vrcp.f32 %v3091_v33  ;;  %v3095_v47 = vadd.f32 1.0, %v6891_v24  ;;  %v10056_v60 = vadd.f32 %v11888_v26, %v9781_v25  ;;  %v10059_v29 = vmul.f32 -1.442695, %v10038_v22  ;;  %v11889_v33 = vld [vmem:[#allocation35_spill] sm:$0xff] }
 0x712   :  { %v6895_v42 = vpop.eup %6894  ;;  %6914 = vrcp.f32 %v3093_v5  ;;  %v3097_v63 = vadd.f32 1.0, %v6893_v2  ;;  %v10063_v24 = vadd.f32 %v11889_v33, %v9691_v7  ;;  %v10072_v12 = vunpack.c.l.b16 %v3485_v21 }
 0x713   :  { %v6897_v50 = vpop.eup %6896  ;;  %6916 = vrcp.f32 %v3095_v47  ;;  %v3096_v30 = vadd.f32 1.0, %v6895_v42  ;;  %v10076_v5 = vmul.f32 -1.442695, %v10056_v60 }
 0x714   :  { %v6899_v58 = vpop.eup %6898  ;;  %6918 = vrcp.f32 %v3097_v63  ;;  %v3098_v8 = vadd.f32 1.0, %v6897_v50  ;;  %v10070_v63 = vmul.f32 -1.442695, %v10052_v35  ;;  %11890 = vst [vmem:[#allocation57_spill] sm:$0xff] %v10072_v12  ;;  %v10080_v42 = vmul.f32 -1.442695, %v10063_v24 }
 0x715   :  { %v6901_v39 = vpop.eup %6900  ;;  %6920 = vrcp.f32 %v3096_v30  ;;  %v3100_v2 = vadd.f32 1.0, %v6899_v58  ;;  %v11891_v58 = vld [vmem:[#allocation44_spill] sm:$0xff]  ;;  %v11893_v12 = vld [vmem:[#allocation53_spill] sm:$0xff] }
 0x716   :  { %v6903_v47 = vpop.eup %6902  ;;  %6922 = vrcp.f32 %v3098_v8  ;;  %v3102_v50 = vadd.f32 1.0, %v6901_v39  ;;  %v11892_v8 = vld [vmem:[#allocation32_spill] sm:$0xff] }
 0x717   :  { %v6905_v26 = vpop.eup %6904  ;;  %v3327_v33 = vmul.f32 %v6903_v47, %v9714_v52  ;;  %6924 = vrcp.f32 %v3100_v2  ;;  %v10084_v39 = vadd.f32 %v11892_v8, %v9841_v6  ;;  %v11894_v2 = vld [vmem:[#allocation49_spill] sm:$0xff]  ;;  %v11896_v8 = vld [vmem:[#allocation50_spill] sm:$0xff] }
 0x718   :  { %v6907_v30 = vpop.eup %6906  ;;  %v3326_v18 = vmul.f32 %v6905_v26, %v11891_v58  ;;  %6926 = vrcp.f32 %v3102_v50  ;;  %v10091_v47 = vadd.f32 %v11894_v2, %v9691_v7  ;;  %v11895_v58 = vld [vmem:[#allocation59_spill] sm:$0xff]  ;;  %v10098_v9 = vadd.f32 %v11896_v8, %v9781_v25 }
 0x719   :  { %v6909_v34 = vpop.eup %6908  ;;  %v3439_v21 = vadd.f32 %v9989_v54, %v3327_v33  ;;  %v3328_v52 = vmul.f32 %v6907_v30, %v11893_v12  ;;  %6928 = vpow2.f32 %v9906_v38  ;;  %v11897_v33 = vld [vmem:[#allocation62_spill] sm:$0xff]  ;;  %v11898_v30 = vld [vmem:[#allocation56_spill] sm:$0xff] }
 0x71a   :  { %v6911_v26 = vpop.eup %6910  ;;  %v3426_v50 = vadd.f32 %v9998_v48, %v3326_v18  ;;  %v3330_v57 = vmul.f32 %v6909_v34, %v11895_v58  ;;  %6930 = vpow2.f32 %v9918_v19  ;;  %v10105_v2 = vadd.f32 %v11898_v30, %v9691_v7  ;;  %v10107_v48 = vpop.f32.mrb[80].mxu1  ;;  %v11900_v58 = vld [vmem:[#allocation52_spill] sm:$0xff] }
 0x71b   :  { %v6913_v54 = vpop.eup %6912  ;;  %v3452_v12 = vadd.f32 %v10002_v13, %v3328_v52  ;;  %v3332_v38 = vmul.f32 %v6911_v26, %v11897_v33  ;;  %6932 = vpow2.f32 %v9921_v56  ;;  %11899 = vst [vmem:[#allocation54_spill] sm:$0xff] %v10107_v48  ;;  %v10114_v13 = vadd.f32 %v11900_v58, %v9841_v6  ;;  %v10116_v52 = vpop.f32.mrb[81].mxu1 }
 0x71c   :  { %v6915_v34 = vpop.eup %6914  ;;  %v3414_v19 = vadd.f32 %v10005_v3, %v3330_v57  ;;  %v3331_v18 = vmul.f32 %v6913_v54, %v9792_v20  ;;  %6934 = vpow2.f32 %v9929_v62  ;;  %11901 = vst [vmem:[#allocation67_spill] sm:$0xff] %v10116_v52  ;;  %v10121_v33 = vmul.f32 -1.442695, %v10084_v39  ;;  %v10123_v3 = vpop.f32.mrb[82].mxu1 }
 0x71d   :  { %v6917_v56 = vpop.eup %6916  ;;  %v3440_v26 = vadd.f32 %v3439_v21, %v3332_v38  ;;  %v3333_v8 = vmul.f32 %v6915_v34, %v9802_v53  ;;  %6936 = vpow2.f32 %v9953_v45  ;;  %11902 = vst [vmem:[#allocation46_spill] sm:$0xff] %v10123_v3  ;;  %v10128_v54 = vmul.f32 -1.442695, %v10091_v47  ;;  %v10130_v30 = vpop.f32.mrb[83].mxu1  ;;  %v11904_v38 = vld [vmem:[#allocation61_spill] sm:$0xff] }
 0x71e   :  { %v6919_v20 = vpop.eup %6918  ;;  %v3427_v57 = vadd.f32 %v3426_v50, %v3331_v18  ;;  %v3335_v62 = vmul.f32 %v6917_v56, %v9812_v27  ;;  %6938 = vpow2.f32 %v10009_v15  ;;  %11903 = vst [vmem:[#allocation35_spill] sm:$0xff] %v10130_v30  ;;  %v10136_v34 = vadd.f32 %v11904_v38, %v9691_v7 }
 0x71f   :  { %v6921_v21 = vpop.eup %6920  ;;  %v3453_v53 = vadd.f32 %v3452_v12, %v3333_v8  ;;  %v3337_v45 = vmul.f32 %v6919_v20, %v9820_v41  ;;  %6940 = vpow2.f32 %v10020_v32  ;;  %v10141_v15 = vmul.f32 -1.442695, %v10098_v9 }
 0x720   :  { %11905 = vst [vmem:[#allocation44_spill] sm:$0xff] %v10136_v34  ;;  %v6923_v50 = vpop.eup %6922  ;;  %v3415_v18 = vadd.f32 %v3414_v19, %v3335_v62  ;;  %v3336_v27 = vmul.f32 %v6921_v21, %v9834_v28  ;;  %6942 = vpow2.f32 %v10027_v14  ;;  %v10146_v41 = vmul.f32 -1.442695, %v10105_v2  ;;  %v11906_v28 = vld [vmem:[#allocation60_spill] sm:$0xff] }
 0x721   :  { %v6925_v58 = vpop.eup %6924  ;;  %v3441_v56 = vadd.f32 %v3440_v26, %v3337_v45  ;;  %v3338_v12 = vmul.f32 %v6923_v50, %v9852_v0  ;;  %6944 = vpow2.f32 %v10034_v44  ;;  %v10154_v14 = vadd.f32 %v11906_v28, %v9781_v25  ;;  %v11907_v44 = vld [vmem:[#allocation40_spill] sm:$0xff] }
 0x722   :  { %v6927_v32 = vpop.eup %6926  ;;  %v10148_v8 = vadd.f32 %v3427_v57, %v3336_v27  ;;  %v3340_v19 = vmul.f32 %v6925_v58, %v9861_v55  ;;  %6946 = vpow2.f32 %v10059_v29  ;;  %v10162_v62 = vadd.f32 %v11907_v44, %v9691_v7  ;;  %v10164_v57 = vpop.f32.mrb[84].mxu1 }
 0x723   :  { %v6929_v20 = vpop.eup %6928  ;;  %v10156_v26 = vadd.f32 %v3453_v53, %v3338_v12  ;;  %v3342_v0 = vmul.f32 %v6927_v32, %v9872_v61  ;;  %6948 = vpow2.f32 %v10070_v63  ;;  %11908 = vst [vmem:[#allocation32_spill] sm:$0xff] %v10164_v57  ;;  %v10170_v45 = vmul.f32 -1.442695, %v10114_v13  ;;  %v10172_v53 = vpop.f32.mrb[85].mxu1  ;;  %v11911_v12 = vld [vmem:[#allocation41_spill] sm:$0xff] }
 0x724   :  { %v6931_v55 = vpop.eup %6930  ;;  %v10166_v21 = vadd.f32 %v3415_v18, %v3340_v19  ;;  %v3101_v29 = vadd.f32 1.0, %v6929_v20  ;;  %6950 = vpow2.f32 %v10076_v5  ;;  %11909 = vst [vmem:[#allocation53_spill] sm:$0xff] %v10172_v53  ;;  %v10178_v50 = vmul.f32 -1.442695, %v10136_v34  ;;  %v10180_v27 = vpop.f32.mrb[86].mxu1  ;;  %v11913_v20 = vld [vmem:[#allocation28_spill] sm:$0xff] }
 0x725   :  { %v6933_v61 = vpop.eup %6932  ;;  %v10174_v38 = vadd.f32 %v3441_v56, %v3342_v0  ;;  %v3103_v63 = vadd.f32 1.0, %v6931_v55  ;;  %6952 = vpow2.f32 %v10080_v42  ;;  %11910 = vst [vmem:[#allocation49_spill] sm:$0xff] %v10180_v27  ;;  %v10183_v5 = vmul.f32 -1.442695, %v10154_v14  ;;  %v10189_v56 = vpop.f32.mrb[87].mxu1  ;;  %v11918_v27 = vld [vmem:[#allocation58_spill] sm:$0xff] }
 0x726   :  { %v6935_v18 = vpop.eup %6934  ;;  %6954 = vrcp.f32 %v3101_v29  ;;  %v3039_v58 = vadd.f32 1.0, %v6933_v61  ;;  %v10187_v32 = vadd.f32 %v11911_v12, %v9841_v6  ;;  %11912 = vst [vmem:[#allocation59_spill] sm:$0xff] %v10189_v56  ;;  %v10192_v28 = vmul.f32 -1.442695, %v10162_v62  ;;  %v11915_v29 = vld [vmem:[#allocation45_spill] sm:$0xff]  ;;  %v11916_v12 = vld [vmem:[#allocation51_spill] sm:$0xff] }
 0x727   :  { %v6937_v19 = vpop.eup %6936  ;;  %6956 = vrcp.f32 %v3103_v63  ;;  %v4231_v42 = vadd.f32 1.0, %v6935_v18  ;;  %v10196_v0 = vadd.f32 %v11913_v20, %v9691_v7  ;;  %v10200_v61 = vadd.f32 %v11915_v29, %v9781_v25  ;;  %v11920_v20 = vld [vmem:[#allocation43_spill] sm:$0xff]  ;;  %v10231_v3 = vpop.f32.mrb[88].mxu1  ;;  %11935 = vst [vmem:[#allocation58_spill] sm:$0xff] %v10276_v11 }
 0x728   :  { %v6939_v44 = vpop.eup %6938  ;;  %6958 = vrcp.f32 %v3039_v58  ;;  %v3029_v55 = vadd.f32 1.0, %v6937_v19  ;;  %v10204_v56 = vadd.f32 %v11916_v12, %v9691_v7  ;;  %v10208_v53 = vadd.f32 %v11918_v27, %v9841_v6  ;;  %v11922_v12 = vld [vmem:[#allocation31_spill] sm:$0xff]  ;;  %11926 = vst [vmem:[#allocation40_spill] sm:$0xff] %v10231_v3 }
 0x729   :  { %11914 = vst [vmem:[#allocation50_spill] sm:$0xff] %v10196_v0  ;;  %v6941_v63 = vpop.eup %6940  ;;  %6960 = vrcp.f32 %v4231_v42  ;;  %v4232_v18 = vadd.f32 1.0, %v6939_v44  ;;  %v10212_v57 = vadd.f32 %v11920_v20, %v9691_v7  ;;  %v10215_v29 = vmul.f32 -1.442695, %v10187_v32  ;;  %v6400_v42 = vld [vmem:[%s11398_s15 + $0x200] sm:$0xff]  }
 0x72a   :  { %11917 = vst [vmem:[#allocation62_spill] sm:$0xff] %v10204_v56  ;;  %11919 = vst [vmem:[#allocation56_spill] sm:$0xff] %v10208_v53  ;;  %v6943_v58 = vpop.eup %6942  ;;  %6962 = vrcp.f32 %v3029_v55  ;;  %v3044_v19 = vadd.f32 1.0, %v6941_v63  ;;  %v10219_v30 = vadd.f32 %v11922_v12, %v9781_v25  ;;  %v10225_v20 = vmul.f32 -1.442695, %v10196_v0  ;;  %v11924_v55 = vld [vmem:[#allocation30_spill] sm:$0xff]  ;;  %6085 = vmatprep.subr.bf16.mxu1 %v6400_v42 }
 0x72b   :  { %11921 = vst [vmem:[#allocation52_spill] sm:$0xff] %v10212_v57  ;;  %v6945_v27 = vpop.eup %6944  ;;  %6964 = vrcp.f32 %v4232_v18  ;;  %v4236_v44 = vadd.f32 1.0, %v6943_v58  ;;  %v10229_v63 = vadd.f32 %v11924_v55, %v9691_v7  ;;  %v6401_v12 = vld [vmem:[%s11398_s15 + $0x1c0] sm:$0xff]   ;;  %v10237_v49 = vmul.f32 -1.442695, %v10200_v61  ;;  %v10242_v58 = vpop.f32.mrb[89].mxu1 }
 0x72c   :  { %11923 = vst [vmem:[#allocation61_spill] sm:$0xff] %v10219_v30  ;;  %v6947_v52 = vpop.eup %6946  ;;  %6966 = vrcp.f32 %v3044_v19  ;;  %v3034_v48 = vadd.f32 1.0, %v6945_v27  ;;  %v10240_v18 = vmul.f32 -1.442695, %v10204_v56  ;;  %11927 = vst [vmem:[#allocation41_spill] sm:$0xff] %v10242_v58  ;;  %v10250_v19 = vpop.f32.mrb[90].mxu1  ;;  %6086 = vmatpush3.bf16.msra.mxu1 %v6401_v12  ;;  %v10285_v0 = vadd.f32 %v11938_v36, %v9691_v7 }
 0x72d   :  { %11925 = vst [vmem:[#allocation60_spill] sm:$0xff] %v10229_v63  ;;  %v6949_v55 = vpop.eup %6948  ;;  %6968 = vrcp.f32 %v4236_v44  ;;  %v4237_v40 = vadd.f32 1.0, %v6947_v52  ;;  %v10245_v3 = vmul.f32 -1.442695, %v10208_v53  ;;  %v10248_v4 = vmul.f32 -1.442695, %v10212_v57 }
 0x72e   :  { %11928 = vst [vmem:[#allocation28_spill] sm:$0xff] %v10250_v19  ;;  %v6951_v27 = vpop.eup %6950  ;;  %6970 = vrcp.f32 %v3034_v48  ;;  %v3059_v46 = vadd.f32 1.0, %v6949_v55  ;;  %v10253_v43 = vmul.f32 -1.442695, %v10219_v30  ;;  %v11929_v58 = vld [vmem:[#allocation25_spill] sm:$0xff]  ;;  %v11930_v42 = vld [vmem:[#allocation42_spill] sm:$0xff] }
 0x72f   :  { %v10257_v1 = vrot.slane %v11930_v42, %v11929_v58  ;;  %v10259_v52 = vpop.f32.mrb[91].mxu1  ;;  %v6404_v44 = vld [vmem:[%s11398_s15 + $0x208] sm:$0xff]   ;;  %v6953_v57 = vpop.eup %6952  ;;  %6972 = vrcp.f32 %v4237_v40  ;;  %v4241_v19 = vadd.f32 1.0, %v6951_v27  ;;  %v10265_v12 = vmul.f32 -1.442695, %v10229_v63  ;;  %v11932_v48 = vld [vmem:[#allocation36_spill] sm:$0xff] }
 0x730   :  { %11931 = vst [vmem:[#allocation45_spill] sm:$0xff] %v10259_v52  ;;  %v10269_v55 = vadd.f32 %v11932_v48, %v9841_v6  ;;  %v6405_v58 = vld [vmem:[%s11398_s15 + $0x1c8] sm:$0xff]   ;;  %v6955_v30 = vpop.eup %6954  ;;  %6974 = vrcp.f32 %v3059_v46  ;;  %v3049_v52 = vadd.f32 1.0, %v6953_v57  ;;  %6087 = vmatprep.subr.bf16.mxu1 %v6404_v44  ;;  %11939 = vst [vmem:[#allocation31_spill] sm:$0xff] %v10285_v0  ;;  %v11940_v46 = vld [vmem:[#allocation72_spill] sm:$0xff] }
 0x731   :  { %v11936_v40 = vld [vmem:[#allocation63_spill] sm:$0xff]  ;;  %v6957_v63 = vpop.eup %6956  ;;  %v3341_v48 = vmul.f32 %v6955_v30, %v9880_v10  ;;  %6976 = vrcp.f32 %v4241_v19  ;;  %v10289_v57 = vadd.f32 %v11940_v46, %v9841_v6  ;;  %6088 = vmatpush3.bf16.msra.mxu1 %v6405_v58  ;;  %v11944_v10 = vld [vmem:[#allocation74_spill] sm:$0xff]  ;;  %v10315_v46 = vpop.f32.mrb[92].mxu1 }
 0x732   :  { %11933 = vst [vmem:[#allocation51_spill] sm:$0xff] %v10269_v55  ;;  %v10280_v27 = vadd.f32 %v11936_v40, %v9781_v25  ;;  %v6959_v31 = vpop.eup %6958  ;;  %v3343_v34 = vmul.f32 %v6957_v63, %v9884_v23  ;;  %6978 = vrcp.f32 %v3049_v52  ;;  %v11942_v40 = vld [vmem:[#allocation73_spill] sm:$0xff]  ;;  %v10298_v30 = vadd.f32 %v11944_v10, %v9781_v25  ;;  %v6406_v7 = vld [vmem:[%s11398_s15 + $0x210] sm:$0xff]   ;;  %v11947_v52 = vld [vmem:[#allocation70_spill] sm:$0xff] }
 0x733   :  { %11941 = vst [vmem:[#allocation30_spill] sm:$0xff] %v10289_v57  ;;  %v10294_v44 = vadd.f32 %v11942_v40, %v10257_v1  ;;  %v6961_v36 = vpop.eup %6960  ;;  %v10304_v19 = vadd.f32 %v10148_v8, %v3341_v48  ;;  %6980 = vpow2.f32 %v10121_v33  ;;  %v11946_v23 = vld [vmem:[#allocation23_spill] sm:$0xff]  ;;  %v10313_v58 = vadd.f32 %v11947_v52, %v9841_v6  ;;  %11949 = vst [vmem:[#allocation66_spill] sm:$0xff] %v10315_v46  ;;  %v10330_v48 = vpop.f32.mrb[93].mxu1  ;;  %v11959_v53 = vld [vmem:[#allocation6_spill] sm:$0xff] }
 0x734   :  { %11937 = vst [vmem:[#allocation43_spill] sm:$0xff] %v10280_v27  ;;  %11945 = vst [vmem:[#allocation42_spill] sm:$0xff] %v10298_v30  ;;  %v10309_v63 = vrot.slane %v11930_v42, %v11946_v23  ;;  %v6407_v40 = vld [vmem:[%s11398_s15 + $0x1d0] sm:$0xff]   ;;  %v6963_v10 = vpop.eup %6962  ;;  %v10321_v8 = vadd.f32 %v10156_v26, %v3343_v34  ;;  %6982 = vpow2.f32 %v10128_v54  ;;  %v10325_v33 = vmul.f32 -1.442695, %v10269_v55  ;;  %6089 = vmatprep.subr.bf16.mxu1 %v6406_v7  ;;  %v10340_v54 = vpop.f32.mrb[94].mxu1 }
 0x735   :  { %11943 = vst [vmem:[#allocation25_spill] sm:$0xff] %v10294_v44  ;;  %11948 = vst [vmem:[#allocation36_spill] sm:$0xff] %v10313_v58  ;;  %v10328_v42 = vmul.f32 -1.442695, %v10276_v11  ;;  %v6965_v23 = vpop.eup %6964  ;;  %v3417_v52 = vrot.slane %v10166_v21, 4  ;;  %6984 = vpow2.f32 %v10141_v15  ;;  %6090 = vmatpush3.bf16.msra.mxu1 %v6407_v40  ;;  %v11952_v11 = vpack.c.bf16 %v10048_v16, %v10048_v16  ;;  %v6410_v40 = vld [vmem:[%s11398_s15 + $0x218] sm:$0xff]  }
 0x736   :  { %11950 = vst [vmem:[#allocation63_spill] sm:$0xff] %v10330_v48  ;;  %v10335_v46 = vmul.f32 -1.442695, %v10280_v27  ;;  %v10338_v34 = vmul.f32 -1.442695, %v10285_v0  ;;  %11951 = vst [vmem:[#allocation65_spill] sm:$0xff] %v10340_v54  ;;  %v6967_v26 = vpop.eup %6966  ;;  %6986 = vpow2.f32 %v10146_v41  ;;  %6091 = vmatprep.subr.bf16.mxu1 %v6410_v40  ;;  %v4472_v56 = vmul.f32 %v6965_v23, %v9933_v37 }
 0x737   :  { %v10345_v48 = vunpack.c.l.b16 %v11952_v11  ;;  %v10349_v7 = vmul.f32 -1.442695, %v10289_v57  ;;  %v10352_v15 = vmul.f32 -1.442695, %v10298_v30  ;;  %v10354_v27 = vpop.f32.mrb[95].mxu1  ;;  %v6969_v54 = vpop.eup %6968  ;;  %6988 = vpow2.f32 %v10170_v45  ;;  %v11956_v16 = vld [vmem:[#allocation75_spill] sm:$0xff] }
 0x738   :  { %11955 = vst [vmem:[#allocation74_spill] sm:$0xff] %v10354_v27  ;;  %v10361_v11 = vmul.f32 -1.442695, %v10294_v44  ;;  %v10365_v41 = vadd.f32 %v11956_v16, %v10309_v63  ;;  %v6411_v27 = vld [vmem:[%s11398_s15 + $0x1d8] sm:$0xff]   ;;  %v6971_v30 = vpop.eup %6970  ;;  %v3443_v57 = vrot.slane %v10174_v38, 4  ;;  %v4476_v45 = vmul.f32 %v6969_v54, %v9957_v51  ;;  %v10395_v37 = vpop.f32.mrb[96].mxu1 }
 0x739   :  { %11953 = vst [vmem:[#allocation72_spill] sm:$0xff] %v10345_v48  ;;  %11954 = vst [vmem:[#allocation73_spill] sm:$0xff] %v10352_v15  ;;  %v10368_v48 = vmul.f32 -1.442695, %v10313_v58  ;;  %v11958_v0 = vld [vmem:[#allocation9_spill] sm:$0xff]  ;;  %6990 = vpow2.f32 %v10178_v50  ;;  %v6973_v44 = vpop.eup %6972  ;;  %v3418_v16 = vadd.f32 %v3417_v52, %v10166_v21  ;;  %v3269_v58 = vmul.f32 %v6963_v10, %v11959_v53  ;;  %6092 = vmatpush3.bf16.msra.mxu1 %v6411_v27  ;;  %v11960_v53 = vld [vmem:[#allocation22_spill] sm:$0xff] }
 0x73a   :  { %v4471_v55 = vmul.f32 %v6961_v36, %v11958_v0  ;;  %6992 = vpow2.f32 %v10183_v5  ;;  %v10381_v15 = vpop.eup %6974  ;;  %v4477_v51 = vmul.f32 %v6973_v44, %v10038_v22  ;;  %v6412_v21 = vld [vmem:[%s11398_s15 + $0x220] sm:$0xff]   ;;  %v3279_v36 = vmul.f32 %v6959_v31, %v11960_v53  ;;  %v11961_v5 = vld [vmem:[#allocation71_spill] sm:$0xff]  ;;  %11962 = vst [vmem:[#allocation70_spill] sm:$0xff] %v10395_v37 }
 0x73b   :  { %11957 = vst [vmem:[#allocation23_spill] sm:$0xff] %v10368_v48  ;;  %v3274_v48 = vmul.f32 %v6971_v30, %v10013_v59  ;;  %6994 = vpow2.f32 %v10192_v28  ;;  %v6977_v50 = vpop.eup %6976  ;;  %v10393_v27 = vadd.f32 %v11961_v5, %v10257_v1  ;;  %v6413_v22 = vld [vmem:[%s11398_s15 + $0x1e0] sm:$0xff]   ;;  %6093 = vmatprep.subr.bf16.mxu1 %v6412_v21  ;;  %v6417_v40 = vld [vmem:[%s11398_s15 + $0x1e8] sm:$0xff]  }
 0x73c   :  { %v4575_v0 = vadd.f32 %v4476_v45, %v4471_v55  ;;  %6996 = vpow2.f32 %v10215_v29  ;;  %v6979_v28 = vpop.eup %6978  ;;  %v3444_v55 = vadd.f32 %v3443_v57, %v10174_v38  ;;  %v10401_v44 = vadd.f32 %v4477_v51, %v4472_v56  ;;  %v10405_v29 = vpop.f32.mrb[97].mxu1  ;;  %v11967_v51 = vld [vmem:[#allocation39_spill] sm:$0xff]  ;;  %v6403_v5 = vld [vmem:[%s11398_s15 + $0x140] sm:$0xff]  }
 0x73d   :  { %v3397_v59 = vadd.f32 %v3274_v48, %v3269_v58  ;;  %v4481_v31 = vmul.f32 %v6977_v50, %v10056_v60  ;;  %6998 = vpow2.f32 %v10225_v20  ;;  %11963 = vst [vmem:[#allocation75_spill] sm:$0xff] %v10405_v29  ;;  %v6981_v30 = vpop.eup %6980  ;;  %v3284_v58 = vmul.f32 %v6967_v26, %v9944_v17  ;;  %v10410_v23 = vpop.f32.mrb[98].mxu1  ;;  %6094 = vmatpush3.bf16.msra.mxu1 %v6413_v22  ;;  %v6416_v17 = vld [vmem:[%s11398_s15 + $0x228] sm:$0xff]  }
 0x73e   :  { %v3289_v48 = vmul.f32 %v6979_v28, %v10063_v24  ;;  %7000 = vpow2.f32 %v10237_v49  ;;  %11964 = vst [vmem:[#allocation9_spill] sm:$0xff] %v10410_v23  ;;  %v6983_v38 = vpop.eup %6982  ;;  %v3419_v56 = vrot.slane %v3418_v16, 2  ;;  %v4242_v60 = vadd.f32 1.0, %v6981_v30  ;;  %v10415_v20 = vpop.f32.mrb[99].mxu1  ;;  %v11966_v49 = vld [vmem:[#allocation76_spill] sm:$0xff]  ;;  %6095 = vmatprep.subr.bf16.mxu1 %v6416_v17 }
 0x73f   :  { %v3398_v10 = vadd.f32 %v3397_v59, %v3279_v36  ;;  %v10412_v57 = vadd.f32 %v4575_v0, %v4481_v31  ;;  %7002 = vpow2.f32 %v10240_v18  ;;  %11965 = vst [vmem:[#allocation6_spill] sm:$0xff] %v10415_v20  ;;  %v6985_v52 = vpop.eup %6984  ;;  %v3064_v54 = vadd.f32 1.0, %v6983_v38  ;;  %v6402_v59 = vld [vmem:[%s11398_s15 + $0x180] sm:$0xff]  }
 0x740   :  { %7004 = vpow2.f32 %v10245_v3  ;;  %v10423_v26 = vadd.f32 %v11966_v49, %v9781_v25  ;;  %v6987_v18 = vpop.eup %6986  ;;  %v3445_v45 = vrot.slane %v3444_v55, 2  ;;  %v4246_v0 = vadd.f32 1.0, %v6985_v52  ;;  %6063 = vmatprep.subr.bf16.mxu0 %v6402_v59 }
 0x741   :  { %v3399_v24 = vadd.f32 %v3398_v10, %v3284_v58  ;;  %7006 = vrcp.f32 %v4242_v60  ;;  %v10430_v21 = vadd.f32 %v11967_v51, %v10309_v63  ;;  %v6989_v50 = vpop.eup %6988  ;;  %v3054_v3 = vadd.f32 1.0, %v6987_v18  ;;  %6096 = vmatpush3.bf16.msra.mxu1 %v6417_v40  ;;  %v6418_v58 = vld [vmem:[%s11398_s15 + $0x230] sm:$0xff]   ;;  %v11968_v60 = vld [vmem:[#allocation37_spill] sm:$0xff]  ;;  %6064 = vmatpush3.bf16.msra.mxu0 %v6403_v5 }
 0x742   :  { %7008 = vrcp.f32 %v3064_v54  ;;  %v10435_v36 = vmul.f32 -1.442695, %v10365_v41  ;;  %v3420_v28 = vadd.f32 %v3419_v56, %v3418_v16  ;;  %v4247_v31 = vadd.f32 1.0, %v6989_v50  ;;  %v10456_v16 = vpop.f32.mrb[100].mxu1  ;;  %v6419_v56 = vld [vmem:[%s11398_s15 + $0x1f0] sm:$0xff]   ;;  %6097 = vmatprep.subr.bf16.mxu1 %v6418_v58 }
 0x743   :  { %v10432_v53 = vadd.f32 %v3399_v24, %v3289_v48  ;;  %v6991_v22 = vpop.eup %6990  ;;  %7010 = vrcp.f32 %v4246_v0  ;;  %v10444_v30 = vmul.f32 -1.442695, %v10393_v27  ;;  %v10450_v38 = vmul.f32 -1.442695, %v10423_v26  ;;  %11969 = vst [vmem:[#allocation22_spill] sm:$0xff] %v10456_v16  ;;  %v10464_v40 = vpop.f32.mrb[101].mxu1 }
 0x744   :  { %v6993_v10 = vpop.eup %6992  ;;  %7012 = vrcp.f32 %v3054_v3  ;;  %v3079_v48 = vadd.f32 1.0, %v6991_v22  ;;  %v10454_v17 = vadd.f32 %v11968_v60, %v9841_v6  ;;  %v3446_v24 = vadd.f32 %v3445_v45, %v3444_v55  ;;  %11970 = vst [vmem:[#allocation71_spill] sm:$0xff] %v10464_v40  ;;  %v11971_v51 = vld [vmem:[#allocation7_spill] sm:$0xff]  ;;  %v11972_v3 = vld [vmem:[#allocation8_spill] sm:$0xff]  ;;  %v10474_v55 = vpop.f32.mrb[102].mxu1 }
 0x745   :  { %v6995_v52 = vpop.eup %6994  ;;  %7014 = vrcp.f32 %v4247_v31  ;;  %v4251_v54 = vadd.f32 1.0, %v6993_v10  ;;  %v10462_v49 = vmul.f32 -1.442695, %v10430_v21  ;;  %v10468_v50 = vadd.f32 %v11971_v51, %v10257_v1  ;;  %11973 = vst [vmem:[#allocation76_spill] sm:$0xff] %v10474_v55  ;;  %6098 = vmatpush3.bf16.msra.mxu1 %v6419_v56  ;;  %v11974_v31 = vld [vmem:[#allocation13_spill] sm:$0xff]  ;;  %v10480_v10 = vpop.f32.mrb[103].mxu1 }
 0x746   :  { %v6997_v18 = vpop.eup %6996  ;;  %7016 = vrcp.f32 %v3079_v48  ;;  %v3069_v0 = vadd.f32 1.0, %v6995_v52  ;;  %v10472_v59 = vadd.f32 %v11972_v3, %v9781_v25  ;;  %v3421_v22 = vrot.slane %v3420_v28, 1  ;;  %11975 = vst [vmem:[#allocation39_spill] sm:$0xff] %v10480_v10  ;;  %v11976_v52 = vld [vmem:[#allocation10_spill] sm:$0xff]  ;;  %v11978_v3 = vld [vmem:[#allocation11_spill] sm:$0xff] }
 0x747   :  { %v6999_v45 = vpop.eup %6998  ;;  %7018 = vrcp.f32 %v4251_v54  ;;  %v4252_v5 = vadd.f32 1.0, %v6997_v18  ;;  %v10478_v58 = vadd.f32 %v11974_v31, %v10309_v63  ;;  %v10484_v51 = vadd.f32 %v11976_v52, %v9841_v6  ;;  %v6422_v54 = vld [vmem:[%s11398_s15 + $0x238] sm:$0xff]  }
 0x748   :  { %v7001_v48 = vpop.eup %7000  ;;  %7020 = vrcp.f32 %v3069_v0  ;;  %v3084_v60 = vadd.f32 1.0, %v6999_v45  ;;  %v10488_v56 = vadd.f32 %v11978_v3, %v10257_v1  ;;  %v6423_v18 = vld [vmem:[%s11398_s15 + $0x1f8] sm:$0xff]   ;;  %v3447_v10 = vrot.slane %v3446_v24, 1  ;;  %6099 = vmatprep.subr.bf16.mxu1 %v6422_v54 }
 0x749   :  { %11977 = vst [vmem:[#allocation37_spill] sm:$0xff] %v10484_v51  ;;  %v7003_v31 = vpop.eup %7002  ;;  %7022 = vrcp.f32 %v4252_v5  ;;  %v4256_v0 = vadd.f32 1.0, %v7001_v48  ;;  %v11980_v45 = vld [vmem:[#allocation12_spill] sm:$0xff]  ;;  %v10501_v40 = vmul.f32 -1.442695, %v10454_v17  ;;  %v3422_v23 = vadd.f32 %v3421_v22, %v3420_v28  ;;  %6100 = vmatpush3.bf16.msra.mxu1 %v6423_v18  ;;  %v6424_v48 = vld [vmem:[%s11398_s15 + $0x40] sm:$0xff]  }
 0x74a   :  { %11979 = vst [vmem:[#allocation7_spill] sm:$0xff] %v10488_v56  ;;  %v10498_v52 = vadd.f32 %v11980_v45, %v9781_v25  ;;  %v7005_v55 = vpop.eup %7004  ;;  %7024 = vrcp.f32 %v3084_v60  ;;  %v3074_v3 = vadd.f32 1.0, %v7003_v31  ;;  %v10504_v16 = vmul.f32 -1.442695, %v10468_v50  ;;  %v10519_v28 = vpop.f32.mrb[104].mxu1  ;;  %6116 = vmatprep.subr.bf16.mxu1 %v6424_v48 }
 0x74b   :  { %v7007_v20 = vpop.eup %7006  ;;  %7026 = vrcp.f32 %v4256_v0  ;;  %v4257_v29 = vadd.f32 1.0, %v7005_v55  ;;  %v10507_v5 = vmul.f32 -1.442695, %v10472_v59  ;;  %v10514_v45 = vmul.f32 -1.442695, %v10478_v58  ;;  %11982 = vst [vmem:[#allocation13_spill] sm:$0xff] %v10519_v28 }
 0x74c   :  { %11981 = vst [vmem:[#allocation8_spill] sm:$0xff] %v10498_v52  ;;  %v7009_v60 = vpop.eup %7008  ;;  %v4482_v31 = vmul.f32 %v7007_v20, %v10084_v39  ;;  %7028 = vrcp.f32 %v3074_v3  ;;  %v10517_v54 = vmul.f32 -1.442695, %v10484_v51  ;;  %v3448_v22 = vadd.f32 %v3447_v10, %v3446_v24  ;;  %v10527_v37 = vpop.f32.mrb[105].mxu1 }
 0x74d   :  { %v7011_v55 = vpop.eup %7010  ;;  %7030 = vrcp.f32 %v4257_v29  ;;  %v10522_v18 = vmul.f32 -1.442695, %v10488_v56  ;;  %v10525_v0 = vmul.f32 -1.442695, %v10498_v52  ;;  %11983 = vst [vmem:[#allocation10_spill] sm:$0xff] %v10527_v37  ;;  %v3430_v20 = vrot.slane %v10304_v19, 4 }
 0x74e   :  { %v7013_v39 = vpop.eup %7012  ;;  %v4589_v3 = vadd.f32 %v10401_v44, %v4482_v31  ;;  %v4486_v51 = vmul.f32 %v7011_v55, %v10098_v9  ;;  %7032 = vpow2.f32 %v10248_v4  ;;  %v10533_v24 = vpop.f32.mrb[106].mxu1  ;;  %v3480_v10 = vmul.f32 0.015625, %v3422_v23  ;;  %v11985_v37 = vld [vmem:[#allocation17_spill] sm:$0xff]  ;;  %v6408_v4 = vld [vmem:[%s11398_s15 + $0x188] sm:$0xff]  }
 0x74f   :  { %11984 = vst [vmem:[#allocation11_spill] sm:$0xff] %v10533_v24  ;;  %v7015_v29 = vpop.eup %7014  ;;  %v3294_v28 = vmul.f32 %v7013_v39, %v10105_v2  ;;  %7034 = vpow2.f32 %v10253_v43  ;;  %v10539_v48 = vadd.f32 %v11985_v37, %v10309_v63  ;;  %v3456_v56 = vrot.slane %v10321_v8, 4  ;;  %v10548_v2 = vpop.f32.mrb[107].mxu1  ;;  %6065 = vmatprep.subr.bf16.mxu0 %v6408_v4  ;;  %v11989_v4 = vld [vmem:[#allocation73_spill] sm:$0xff] }
 0x750   :  { %v7017_v52 = vpop.eup %7016  ;;  %v4577_v44 = vadd.f32 %v10412_v57, %v4486_v51  ;;  %v4487_v9 = vmul.f32 %v7015_v29, %v10114_v13  ;;  %7036 = vpow2.f32 %v10265_v12  ;;  %11986 = vst [vmem:[#allocation12_spill] sm:$0xff] %v10548_v2  ;;  %v10550_v23 = vmul.f32 0.015625, %v3448_v22  ;;  %v6409_v13 = vld [vmem:[%s11398_s15 + $0x148] sm:$0xff]  }
 0x751   :  { %v7019_v43 = vpop.eup %7018  ;;  %v3299_v37 = vmul.f32 %v10381_v15, %v10052_v35  ;;  %v3401_v31 = vadd.f32 %v10432_v53, %v3294_v28  ;;  %7038 = vpow2.f32 %v10325_v33  ;;  %v3431_v57 = vadd.f32 %v3430_v20, %v10304_v19  ;;  %6066 = vmatpush3.bf16.msra.mxu0 %v6409_v13 }
 0x752   :  { %v7021_v12 = vpop.eup %7020  ;;  %v4590_v51 = vadd.f32 %v4589_v3, %v4487_v9  ;;  %v4491_v55 = vmul.f32 %v7019_v43, %v10154_v14  ;;  %7040 = vpow2.f32 %v10328_v42  ;;  %v3490_v39 = vpack.c.bf16 %v3480_v10, %v3480_v10  ;;  %v6414_v14 = vld [vmem:[%s11398_s15 + $0x190] sm:$0xff]  }
 0x753   :  { %v7023_v22 = vpop.eup %7022  ;;  %v3304_v35 = vmul.f32 %v7009_v60, %v10091_v47  ;;  %v3402_v15 = vadd.f32 %v3401_v31, %v3299_v37  ;;  %7042 = vpow2.f32 %v10335_v46  ;;  %v3457_v53 = vadd.f32 %v3456_v56, %v10321_v8  ;;  %v11987_v46 = vld [vmem:[#allocation14_spill] sm:$0xff]  ;;  %6067 = vmatprep.subr.bf16.mxu0 %v6414_v14  ;;  %v11990_v31 = vld [vmem:[#allocation56_spill] sm:$0xff] }
 0x754   :  { %v7025_v33 = vpop.eup %7024  ;;  %v4578_v28 = vadd.f32 %v4577_v44, %v4491_v55  ;;  %v4492_v19 = vmul.f32 %v7023_v22, %v10187_v32  ;;  %7044 = vpow2.f32 %v10338_v34  ;;  %v3492_v47 = vpack.c.bf16 %v10550_v23, %v10550_v23  ;;  %v6415_v32 = vld [vmem:[%s11398_s15 + $0x150] sm:$0xff]   ;;  %v11988_v44 = vld [vmem:[#allocation62_spill] sm:$0xff] }
 0x755   :  { %v7027_v42 = vpop.eup %7026  ;;  %v10572_v60 = vadd.f32 %v3402_v15, %v3304_v35  ;;  %7046 = vpow2.f32 %v10349_v7  ;;  %v10577_v8 = vadd.f32 %v11987_v46, %v9841_v6  ;;  %v3432_v56 = vrot.slane %v3431_v57, 2  ;;  %6068 = vmatpush3.bf16.msra.mxu0 %v6415_v32  ;;  %v11992_v22 = vld [vmem:[#allocation23_spill] sm:$0xff]  ;;  %v11993_v14 = vld [vmem:[#allocation50_spill] sm:$0xff] }
 0x756   :  { %v7029_v34 = vpop.eup %7028  ;;  %v4591_v20 = vadd.f32 %v4590_v51, %v4492_v19  ;;  %v4496_v3 = vmul.f32 %v7027_v42, %v10200_v61  ;;  %7048 = vpow2.f32 %v10361_v11  ;;  %v10584_v10 = vunpack.c.l.b16 %v3490_v39  ;;  %v6420_v61 = vld [vmem:[%s11398_s15 + $0x198] sm:$0xff]  }
 0x757   :  { %v7031_v29 = vpop.eup %7030  ;;  %v3309_v7 = vmul.f32 %v7021_v12, %v10162_v62  ;;  %v3314_v9 = vmul.f32 %v7029_v34, %v11988_v44  ;;  %7050 = vpow2.f32 %v11989_v4  ;;  %v3458_v23 = vrot.slane %v3457_v53, 2  ;;  %v11991_v51 = vld [vmem:[#allocation44_spill] sm:$0xff]  ;;  %6069 = vmatprep.subr.bf16.mxu0 %v6420_v61 }
 0x758   :  { %v7033_v43 = vpop.eup %7032  ;;  %v10589_v37 = vadd.f32 %v4578_v28, %v4496_v3  ;;  %v4497_v13 = vmul.f32 %v7031_v29, %v11990_v31  ;;  %7052 = vpow2.f32 %v10435_v36  ;;  %v3319_v62 = vmul.f32 %v7017_v52, %v11991_v51  ;;  %v6421_v39 = vld [vmem:[%s11398_s15 + $0x158] sm:$0xff]   ;;  %v11995_v29 = vld [vmem:[#allocation15_spill] sm:$0xff] }
 0x759   :  { %v7035_v11 = vpop.eup %7034  ;;  %v3462_v12 = vadd.f32 %v3314_v9, %v3309_v7  ;;  %v3099_v55 = vadd.f32 1.0, %v7033_v43  ;;  %7054 = vpow2.f32 %v11992_v22  ;;  %v10601_v15 = vadd.f32 %v3432_v56, %v3431_v57  ;;  %6070 = vmatpush3.bf16.msra.mxu0 %v6421_v39  ;;  %v11997_v51 = vld [vmem:[#allocation21_spill] sm:$0xff]  ;;  %v11998_v39 = vld [vmem:[#allocation18_spill] sm:$0xff] }
 0x75a   :  { %v7037_v35 = vpop.eup %7036  ;;  %v10603_v28 = vadd.f32 %v4591_v20, %v4497_v13  ;;  %v4261_v36 = vadd.f32 1.0, %v7035_v11  ;;  %7056 = vpow2.f32 %v10444_v30  ;;  %v3324_v52 = vmul.f32 %v7025_v33, %v11993_v14  ;;  %v11999_v14 = vld [vmem:[#allocation19_spill] sm:$0xff] }
 0x75b   :  { %v7039_v19 = vpop.eup %7038  ;;  %v3463_v42 = vadd.f32 %v3462_v12, %v3319_v62  ;;  %7058 = vrcp.f32 %v3099_v55  ;;  %v3089_v46 = vadd.f32 1.0, %v7037_v35  ;;  %v10607_v34 = vunpack.c.l.b16 %v3492_v47 }
 0x75c   :  { %v7041_v32 = vpop.eup %7040  ;;  %v10609_v3 = vadd.f32 %v3458_v23, %v3457_v53  ;;  %7060 = vrcp.f32 %v4261_v36  ;;  %v4262_v57 = vadd.f32 1.0, %v7039_v19  ;;  %v10615_v7 = vadd.f32 %v11995_v29, %v10257_v1  ;;  %v11996_v23 = vld [vmem:[#allocation16_spill] sm:$0xff] }
 0x75d   :  { %11994 = vst [vmem:[#allocation17_spill] sm:$0xff] %v10607_v34  ;;  %v7043_v56 = vpop.eup %7042  ;;  %7062 = vrcp.f32 %v3089_v46  ;;  %v10611_v20 = vadd.f32 %v3463_v42, %v3324_v52  ;;  %v3104_v30 = vadd.f32 1.0, %v7041_v32  ;;  %v10618_v9 = vmul.f32 -1.442695, %v10539_v48  ;;  %v12000_v42 = vld [vmem:[#allocation20_spill] sm:$0xff] }
 0x75e   :  { %v7045_v33 = vpop.eup %7044  ;;  %7064 = vrcp.f32 %v4262_v57  ;;  %v4266_v44 = vadd.f32 1.0, %v7043_v56  ;;  %v10621_v53 = vmul.f32 -1.442695, %v10577_v8  ;;  %v10626_v31 = vadd.f32 %v11996_v23, %v9781_v25  ;;  %v12005_v23 = vld [vmem:[#allocation33_spill] sm:$0xff] }
 0x75f   :  { %v7047_v47 = vpop.eup %7046  ;;  %7066 = vrcp.f32 %v3104_v30  ;;  %v3094_v43 = vadd.f32 1.0, %v7045_v33  ;;  %v10631_v62 = vadd.f32 %v11997_v51, %v10309_v63  ;;  %v10634_v22 = vmul.f32 -1.442695, %v10615_v7  ;;  %v12001_v30 = vld [vmem:[#allocation38_spill] sm:$0xff] }
 0x760   :  { %v7049_v13 = vpop.eup %7048  ;;  %7068 = vrcp.f32 %v4266_v44  ;;  %v4267_v11 = vadd.f32 1.0, %v7047_v47  ;;  %v10638_v35 = vadd.f32 %v11998_v39, %v9841_v6  ;;  %v10642_v52 = vadd.f32 %v11999_v14, %v10257_v1  ;;  %v12003_v47 = vld [vmem:[#allocation55_spill] sm:$0xff] }
 0x761   :  { %v7051_v12 = vpop.eup %7050  ;;  %7070 = vrcp.f32 %v3094_v43  ;;  %v4229_v55 = vadd.f32 1.0, %v7049_v13  ;;  %v10646_v46 = vadd.f32 %v12000_v42, %v9781_v25  ;;  %v10649_v56 = vmul.f32 -1.442695, %v10626_v31 }
 0x762   :  { %v7053_v36 = vpop.eup %7052  ;;  %7072 = vrcp.f32 %v4267_v11  ;;  %v4271_v19 = vadd.f32 1.0, %v7051_v12  ;;  %v10653_v29 = vadd.f32 %v12001_v30, %v10309_v63  ;;  %v10657_v43 = vadd.f32 %v12003_v47, %v9841_v6  ;;  %v12010_v47 = vld [vmem:[#allocation24_spill] sm:$0xff] }
 0x763   :  { %v7055_v32 = vpop.eup %7054  ;;  %7074 = vrcp.f32 %v4229_v55  ;;  %v4230_v57 = vadd.f32 1.0, %v7053_v36  ;;  %v10661_v13 = vadd.f32 %v12005_v23, %v10257_v1  ;;  %v10664_v12 = vmul.f32 -1.442695, %v10631_v62  ;;  %v12007_v55 = vld [vmem:[#allocation47_spill] sm:$0xff] }
 0x764   :  { %12002 = vst [vmem:[#allocation14_spill] sm:$0xff] %v10653_v29  ;;  %v7057_v33 = vpop.eup %7056  ;;  %7076 = vrcp.f32 %v4271_v19  ;;  %v4272_v44 = vadd.f32 1.0, %v7055_v32  ;;  %12004 = vst [vmem:[#allocation62_spill] sm:$0xff] %v10657_v43  ;;  %v10668_v39 = vadd.f32 %v12007_v55, %v9781_v25  ;;  %v10671_v19 = vmul.f32 -1.442695, %v10638_v35  ;;  %v12012_v55 = vld [vmem:[#allocation60_spill] sm:$0xff] }
 0x765   :  { %12006 = vst [vmem:[#allocation73_spill] sm:$0xff] %v10661_v13  ;;  %v7059_v11 = vpop.eup %7058  ;;  %7078 = vrcp.f32 %v4230_v57  ;;  %v4234_v51 = vadd.f32 1.0, %v7057_v33  ;;  %v10674_v14 = vmul.f32 -1.442695, %v10642_v52  ;;  %v10677_v42 = vmul.f32 -1.442695, %v10646_v46 }
 0x766   :  { %12008 = vst [vmem:[#allocation56_spill] sm:$0xff] %v10668_v39  ;;  %v7061_v36 = vpop.eup %7060  ;;  %7080 = vrcp.f32 %v4272_v44  ;;  %v12009_v57 = vld [vmem:[#allocation61_spill] sm:$0xff]  ;;  %v10681_v33 = vmul.f32 -1.442695, %v10653_v29  ;;  %v10685_v23 = vadd.f32 %v12010_v47, %v10309_v63  ;;  %v10690_v4 = vmul.f32 -1.442695, %v10657_v43 }
 0x767   :  { %v7063_v32 = vpop.eup %7062  ;;  %v4501_v30 = vmul.f32 %v7061_v36, %v12009_v57  ;;  %7082 = vrcp.f32 %v4234_v51  ;;  %v10693_v2 = vmul.f32 -1.442695, %v10661_v13  ;;  %v12013_v57 = vld [vmem:[#allocation51_spill] sm:$0xff]  ;;  %v10699_v47 = vmul.f32 -1.442695, %v10668_v39  ;;  %v12016_v13 = vld [vmem:[#allocation69_spill] sm:$0xff] }
 0x768   :  { %12011 = vst [vmem:[#allocation44_spill] sm:$0xff] %v10685_v23  ;;  %v7065_v44 = vpop.eup %7064  ;;  %v3329_v61 = vmul.f32 %v7063_v32, %v12012_v55  ;;  %7084 = vpow2.f32 %v10450_v38  ;;  %v12014_v38 = vld [vmem:[#allocation48_spill] sm:$0xff]  ;;  %v10709_v43 = vadd.f32 %v12016_v13, %v10257_v1  ;;  %v10722_v13 = vmul.f32 -1.442695, %v10685_v23 }
 0x769   :  { %v7067_v36 = vpop.eup %7066  ;;  %v4580_v51 = vadd.f32 %v10589_v37, %v4501_v30  ;;  %v4502_v24 = vmul.f32 %v7065_v44, %v12013_v57  ;;  %7086 = vpow2.f32 %v10462_v49  ;;  %v10705_v55 = vadd.f32 %v12014_v38, %v9841_v6  ;;  %v12018_v49 = vld [vmem:[#allocation43_spill] sm:$0xff]  ;;  %v12019_v57 = vld [vmem:[#allocation68_spill] sm:$0xff] }
 0x76a   :  { %v7069_v34 = vpop.eup %7068  ;;  %v3465_v32 = vadd.f32 %v10611_v20, %v3329_v61  ;;  %7088 = vpow2.f32 %v10501_v40  ;;  %12017 = vst [vmem:[#allocation50_spill] sm:$0xff] %v10709_v43  ;;  %v10716_v20 = vadd.f32 %v12019_v57, %v9781_v25  ;;  %v3404_v61 = vrot.slane %v10572_v60, 4  ;;  %v12021_v38 = vld [vmem:[#allocation31_spill] sm:$0xff]  ;;  %v12023_v25 = vld [vmem:[#allocation64_spill] sm:$0xff] }
 0x76b   :  { %12015 = vst [vmem:[#allocation23_spill] sm:$0xff] %v10705_v55  ;;  %v7071_v37 = vpop.eup %7070  ;;  %v4593_v30 = vadd.f32 %v10603_v28, %v4502_v24  ;;  %v4506_v44 = vmul.f32 %v7069_v34, %v12018_v49  ;;  %7090 = vpow2.f32 %v10504_v16  ;;  %v12022_v28 = vld [vmem:[#allocation30_spill] sm:$0xff]  ;;  %v10730_v16 = vadd.f32 %v12023_v25, %v10309_v63  ;;  %v12025_v57 = vld [vmem:[#allocation52_spill] sm:$0xff] }
 0x76c   :  { %12020 = vst [vmem:[#allocation15_spill] sm:$0xff] %v10716_v20  ;;  %v7073_v40 = vpop.eup %7072  ;;  %v3334_v39 = vmul.f32 %v7071_v37, %v12021_v38  ;;  %7092 = vpow2.f32 %v10507_v5  ;;  %v3339_v37 = vmul.f32 %v7059_v11, %v12025_v57  ;;  %v10737_v5 = vmul.f32 -1.442695, %v10705_v55  ;;  %v12028_v57 = vld [vmem:[#allocation58_spill] sm:$0xff]  ;;  %v12056_v23 = vld [vmem:[#allocation28_spill] sm:$0xff] }
 0x76d   :  { %v7075_v29 = vpop.eup %7074  ;;  %v10724_v24 = vadd.f32 %v4580_v51, %v4506_v44  ;;  %v4507_v34 = vmul.f32 %v7073_v40, %v12022_v28  ;;  %7094 = vpow2.f32 %v10514_v45  ;;  %12024 = vst [vmem:[#allocation16_spill] sm:$0xff] %v10730_v16  ;;  %v6426_v51 = vld [vmem:[%s11398_s15 + $0x1a0] sm:$0xff]   ;;  %v10745_v44 = vpop.f32.mrb[108].mxu1  ;;  %v10756_v11 = vmul.f32 -1.442695, %v10716_v20 }
 0x76e   :  { %v10732_v49 = vpop.eup %7076  ;;  %v3466_v38 = vadd.f32 %v3465_v32, %v3334_v39  ;;  %7096 = vpow2.f32 %v10517_v54  ;;  %v6427_v45 = vld [vmem:[%s11398_s15 + $0x160] sm:$0xff]   ;;  %12026 = vst [vmem:[#allocation21_spill] sm:$0xff] %v10745_v44  ;;  %v10753_v54 = vmul.f32 -1.442695, %v10709_v43  ;;  %v10758_v39 = vpop.f32.mrb[109].mxu1  ;;  %v3405_v25 = vadd.f32 %v3404_v61, %v10572_v60  ;;  %6071 = vmatprep.subr.bf16.mxu0 %v6426_v51  ;;  %v12033_v43 = vld [vmem:[#allocation67_spill] sm:$0xff] }
 0x76f   :  { %v10747_v40 = vpop.eup %7078  ;;  %v10749_v28 = vadd.f32 %v4593_v30, %v4507_v34  ;;  %7098 = vpow2.f32 %v10522_v18  ;;  %12027 = vst [vmem:[#allocation18_spill] sm:$0xff] %v10758_v39  ;;  %v3344_v44 = vmul.f32 %v7067_v36, %v12028_v57  ;;  %v12029_v18 = vld [vmem:[#allocation34_spill] sm:$0xff]  ;;  %v10776_v60 = vadd.f32 %v12033_v43, %v10309_v63  ;;  %6072 = vmatpush3.bf16.msra.mxu0 %v6427_v45  ;;  %v12039_v45 = vld [vmem:[#allocation35_spill] sm:$0xff] }
 0x770   :  { %v10760_v32 = vpop.eup %7080  ;;  %v3467_v55 = vadd.f32 %v3466_v38, %v3339_v37  ;;  %7100 = vpow2.f32 %v10525_v0  ;;  %v10768_v34 = vadd.f32 %v12029_v18, %v9841_v6  ;;  %v12031_v20 = vld [vmem:[#allocation54_spill] sm:$0xff]  ;;  %v12035_v0 = vld [vmem:[#allocation25_spill] sm:$0xff]  ;;  %v10783_v6 = vpop.f32.mrb[110].mxu1  ;;  %v10800_v18 = vmul.f32 -1.442695, %v10730_v16 }
 0x771   :  { %v7083_v30 = vpop.eup %7082  ;;  %7102 = vpow2.f32 %v10618_v9  ;;  %v10772_v39 = vadd.f32 %v12031_v20, %v10257_v1  ;;  %12034 = vst [vmem:[#allocation38_spill] sm:$0xff] %v10776_v60  ;;  %v4469_v37 = vmul.f32 %v7075_v29, %v12035_v0  ;;  %12036 = vst [vmem:[#allocation55_spill] sm:$0xff] %v10783_v6  ;;  %v12037_v20 = vld [vmem:[#allocation46_spill] sm:$0xff] }
 0x772   :  { %12030 = vst [vmem:[#allocation19_spill] sm:$0xff] %v10768_v34  ;;  %v7085_v36 = vpop.eup %7084  ;;  %v10778_v61 = vadd.f32 %v3467_v55, %v3344_v44  ;;  %v4474_v9 = vmul.f32 %v7083_v30, %v10393_v27  ;;  %7104 = vpow2.f32 %v10621_v53  ;;  %v10788_v43 = vadd.f32 %v12037_v20, %v10257_v1  ;;  %v10794_v44 = vpop.f32.mrb[111].mxu1 }
 0x773   :  { %12032 = vst [vmem:[#allocation20_spill] sm:$0xff] %v10772_v39  ;;  %v7087_v38 = vpop.eup %7086  ;;  %v4276_v51 = vadd.f32 1.0, %v7085_v36  ;;  %7106 = vpow2.f32 %v10634_v22  ;;  %v10792_v55 = vadd.f32 %v12039_v45, %v10309_v63  ;;  %12041 = vst [vmem:[#allocation61_spill] sm:$0xff] %v10794_v44  ;;  %v3406_v27 = vrot.slane %v3405_v25, 2 }
 0x774   :  { %12038 = vst [vmem:[#allocation33_spill] sm:$0xff] %v10788_v43  ;;  %v7089_v29 = vpop.eup %7088  ;;  %v10796_v57 = vadd.f32 %v4474_v9, %v4469_v37  ;;  %v4235_v53 = vadd.f32 1.0, %v7087_v38  ;;  %7108 = vpow2.f32 %v10649_v56  ;;  %v10803_v36 = vmul.f32 -1.442695, %v10768_v34 }
 0x775   :  { %12040 = vst [vmem:[#allocation47_spill] sm:$0xff] %v10792_v55  ;;  %v7091_v30 = vpop.eup %7090  ;;  %7110 = vrcp.f32 %v4276_v51  ;;  %v4277_v22 = vadd.f32 1.0, %v7089_v29  ;;  %v10806_v45 = vmul.f32 -1.442695, %v10772_v39  ;;  %v10809_v37 = vmul.f32 -1.442695, %v10776_v60 }
 0x776   :  { %v7093_v0 = vpop.eup %7092  ;;  %7112 = vrcp.f32 %v4235_v53  ;;  %v4239_v20 = vadd.f32 1.0, %v7091_v30  ;;  %v10812_v38 = vmul.f32 -1.442695, %v10788_v43  ;;  %v12042_v51 = vld [vmem:[#allocation32_spill] sm:$0xff]  ;;  %v10818_v44 = vadd.f32 %v3406_v27, %v3405_v25  ;;  %v12047_v43 = vld [vmem:[#allocation49_spill] sm:$0xff]  ;;  %v12049_v27 = vld [vmem:[#allocation59_spill] sm:$0xff] }
 0x777   :  { %v7095_v9 = vpop.eup %7094  ;;  %7114 = vrcp.f32 %v4277_v22  ;;  %v4281_v56 = vadd.f32 1.0, %v7093_v0  ;;  %v10816_v29 = vadd.f32 %v12042_v51, %v10257_v1  ;;  %v10821_v30 = vmul.f32 -1.442695, %v10792_v55  ;;  %v12045_v22 = vld [vmem:[#allocation53_spill] sm:$0xff] }
 0x778   :  { %v7097_v6 = vpop.eup %7096  ;;  %7116 = vrcp.f32 %v4239_v20  ;;  %v4240_v53 = vadd.f32 1.0, %v7095_v9  ;;  %v10825_v0 = vadd.f32 %v12045_v22, %v10309_v63  ;;  %v10829_v34 = vadd.f32 %v12047_v43, %v10257_v1  ;;  %v12051_v9 = vld [vmem:[#allocation40_spill] sm:$0xff]  ;;  %v12054_v43 = vld [vmem:[#allocation41_spill] sm:$0xff] }
 0x779   :  { %12043 = vst [vmem:[#allocation24_spill] sm:$0xff] %v10816_v29  ;;  %12044 = vst [vmem:[#allocation60_spill] sm:$0xff] %v10821_v30  ;;  %v7099_v60 = vpop.eup %7098  ;;  %7118 = vrcp.f32 %v4281_v56  ;;  %v4282_v39 = vadd.f32 1.0, %v7097_v6  ;;  %v10833_v20 = vadd.f32 %v12049_v27, %v10309_v63  ;;  %v10837_v55 = vadd.f32 %v12051_v9, %v10257_v1 }
 0x77a   :  { %12046 = vst [vmem:[#allocation51_spill] sm:$0xff] %v10825_v0  ;;  %12048 = vst [vmem:[#allocation48_spill] sm:$0xff] %v10829_v34  ;;  %v7101_v51 = vpop.eup %7100  ;;  %7120 = vrcp.f32 %v4240_v53  ;;  %v4244_v25 = vadd.f32 1.0, %v7099_v60  ;;  %v10840_v22 = vmul.f32 -1.442695, %v10816_v29  ;;  %v10844_v16 = vadd.f32 %v12054_v43, %v10309_v63 }
 0x77b   :  { %12050 = vst [vmem:[#allocation69_spill] sm:$0xff] %v10833_v20  ;;  %12052 = vst [vmem:[#allocation43_spill] sm:$0xff] %v10837_v55  ;;  %v7103_v6 = vpop.eup %7102  ;;  %7122 = vrcp.f32 %v4282_v39  ;;  %v4286_v56 = vadd.f32 1.0, %v7101_v51  ;;  %v10849_v30 = vadd.f32 %v12056_v23, %v10257_v1  ;;  %v10852_v51 = vmul.f32 -1.442695, %v10825_v0 }
 0x77c   :  { %12053 = vst [vmem:[#allocation68_spill] sm:$0xff] %v10840_v22  ;;  %12055 = vst [vmem:[#allocation31_spill] sm:$0xff] %v10844_v16  ;;  %v7105_v53 = vpop.eup %7104  ;;  %7124 = vrcp.f32 %v4244_v25  ;;  %v4245_v27 = vadd.f32 1.0, %v7103_v6  ;;  %v10855_v29 = vmul.f32 -1.442695, %v10829_v34 }
 0x77d   :  { %v7107_v9 = vpop.eup %7106  ;;  %7126 = vrcp.f32 %v4286_v56  ;;  %v4287_v39 = vadd.f32 1.0, %v7105_v53  ;;  %v10858_v60 = vmul.f32 -1.442695, %v10833_v20  ;;  %v10861_v25 = vmul.f32 -1.442695, %v10837_v55  ;;  %v12060_v53 = vld [vmem:[#allocation45_spill] sm:$0xff] }
 0x77e   :  { %12057 = vst [vmem:[#allocation30_spill] sm:$0xff] %v10855_v29  ;;  %v7109_v43 = vpop.eup %7108  ;;  %7128 = vrcp.f32 %v4245_v27  ;;  %v4249_v22 = vadd.f32 1.0, %v7107_v9  ;;  %v10864_v56 = vmul.f32 -1.442695, %v10844_v16  ;;  %v10868_v0 = vadd.f32 %v12060_v53, %v10309_v63  ;;  %v12061_v29 = vld [vmem:[#allocation42_spill] sm:$0xff] }
 0x77f   :  { %12058 = vst [vmem:[#allocation64_spill] sm:$0xff] %v10861_v25  ;;  %v7111_v23 = vpop.eup %7110  ;;  %7130 = vrcp.f32 %v4287_v39  ;;  %v4291_v6 = vadd.f32 1.0, %v7109_v43  ;;  %v4511_v27 = vmul.f32 %v10732_v49, %v12061_v29  ;;  %v10874_v55 = vmul.f32 -1.442695, %v10849_v30  ;;  %v12062_v53 = vld [vmem:[#allocation66_spill] sm:$0xff]  ;;  %v12063_v25 = vld [vmem:[#allocation36_spill] sm:$0xff] }
 0x780   :  { %12059 = vst [vmem:[#allocation52_spill] sm:$0xff] %v10864_v56  ;;  %v7113_v34 = vpop.eup %7112  ;;  %v4516_v9 = vmul.f32 %v7111_v23, %v10423_v26  ;;  %7132 = vrcp.f32 %v4249_v22  ;;  %v4470_v39 = vmul.f32 %v10747_v40, %v10365_v41  ;;  %v10881_v16 = vadd.f32 %v12062_v53, %v10257_v1  ;;  %v6432_v41 = vld [vmem:[%s11398_s15 + $0x1a8] sm:$0xff]  }
 0x781   :  { %v7115_v20 = vpop.eup %7114  ;;  %v4475_v43 = vmul.f32 %v7113_v34, %v10430_v21  ;;  %7134 = vrcp.f32 %v4291_v6  ;;  %v4512_v49 = vmul.f32 %v10760_v32, %v12063_v25  ;;  %v6433_v21 = vld [vmem:[%s11398_s15 + $0x168] sm:$0xff]   ;;  %v3469_v34 = vrot.slane %v10778_v61, 4  ;;  %6073 = vmatprep.subr.bf16.mxu0 %v6432_v41 }
 0x782   :  { %v7117_v56 = vpop.eup %7116  ;;  %v4640_v26 = vadd.f32 %v4516_v9, %v4511_v27  ;;  %v4517_v29 = vmul.f32 %v7115_v20, %v10454_v17  ;;  %7136 = vpow2.f32 %v10664_v12  ;;  %v6438_v17 = vld [vmem:[%s11398_s15 + $0x1b0] sm:$0xff]   ;;  %v10902_v25 = vmul.f32 -1.442695, %v10868_v0  ;;  %6074 = vmatpush3.bf16.msra.mxu0 %v6433_v21 }
 0x783   :  { %v7119_v40 = vpop.eup %7118  ;;  %v4562_v22 = vadd.f32 %v4475_v43, %v4470_v39  ;;  %v4479_v23 = vmul.f32 %v7117_v56, %v10468_v50  ;;  %7138 = vpow2.f32 %v10671_v19  ;;  %v12064_v19 = vld [vmem:[#allocation63_spill] sm:$0xff]  ;;  %v12065_v39 = vld [vmem:[#allocation37_spill] sm:$0xff]  ;;  %6075 = vmatprep.subr.bf16.mxu0 %v6438_v17  ;;  %v3470_v53 = vadd.f32 %v3469_v34, %v10778_v61 }
 0x784   :  { %v7121_v12 = vpop.eup %7120  ;;  %v4653_v32 = vadd.f32 %v4517_v29, %v4512_v49  ;;  %v4521_v20 = vmul.f32 %v7119_v40, %v10472_v59  ;;  %7140 = vpow2.f32 %v10674_v14  ;;  %v10909_v56 = vadd.f32 %v12064_v19, %v10309_v63  ;;  %v6439_v59 = vld [vmem:[%s11398_s15 + $0x170] sm:$0xff]  }
 0x785   :  { %v7123_v6 = vpop.eup %7122  ;;  %v4550_v27 = vadd.f32 %v10796_v57, %v4479_v23  ;;  %v4480_v50 = vmul.f32 %v7121_v12, %v10478_v58  ;;  %7142 = vpow2.f32 %v10677_v42  ;;  %v10917_v57 = vmul.f32 -1.442695, %v10881_v16  ;;  %v6444_v58 = vld [vmem:[%s11398_s15 + $0x1b8] sm:$0xff]   ;;  %v12066_v29 = vld [vmem:[#allocation7_spill] sm:$0xff] }
 0x786   :  { %v7125_v14 = vpop.eup %7124  ;;  %v4641_v9 = vadd.f32 %v4640_v26, %v4521_v20  ;;  %v4522_v43 = vmul.f32 %v7123_v6, %v12065_v39  ;;  %7144 = vpow2.f32 %v10681_v33  ;;  %v4582_v21 = vrot.slane %v10724_v24, 4  ;;  %v12067_v40 = vld [vmem:[#allocation8_spill] sm:$0xff]  ;;  %v12068_v61 = vld [vmem:[#allocation27_spill] sm:$0xff]  ;;  %6076 = vmatpush3.bf16.msra.mxu0 %v6439_v59 }
 0x787   :  { %v7127_v42 = vpop.eup %7126  ;;  %v4563_v49 = vadd.f32 %v4562_v22, %v4480_v50  ;;  %v4484_v41 = vmul.f32 %v7125_v14, %v12066_v29  ;;  %7146 = vpow2.f32 %v10690_v4  ;;  %v12069_v34 = vrot.slane %v12068_v61, 1  ;;  %v6445_v4 = vld [vmem:[%s11398_s15 + $0x178] sm:$0xff]   ;;  %6077 = vmatprep.subr.bf16.mxu0 %v6444_v58 }
 0x788   :  { %v7129_v26 = vpop.eup %7128  ;;  %v4654_v33 = vadd.f32 %v4653_v32, %v4522_v43  ;;  %v4526_v23 = vmul.f32 %v7127_v42, %v12067_v40  ;;  %7148 = vpow2.f32 %v10693_v2 }
 0x789   :  { %v7131_v17 = vpop.eup %7130  ;;  %v4551_v12 = vadd.f32 %v4550_v27, %v4484_v41  ;;  %v4485_v20 = vmul.f32 %v7129_v26, %v10539_v48  ;;  %7150 = vpow2.f32 %v10699_v47  ;;  %v3370_v22 = vadd.f32 %v12069_v34, %v12068_v61 }
 0x78a   :  { %v7133_v32 = vpop.eup %7132  ;;  %v4642_v6 = vadd.f32 %v4641_v9, %v4526_v23  ;;  %v4527_v50 = vmul.f32 %v7131_v17, %v10577_v8  ;;  %7152 = vpow2.f32 %v10722_v13  ;;  %v12070_v48 = vrot.slane %v10601_v15, 1  ;;  %6078 = vmatpush3.bf16.msra.mxu0 %v6445_v4 }
 0x78b   :  { %v7135_v47 = vpop.eup %7134  ;;  %v3471_v27 = vrot.slane %v3470_v53, 2  ;;  %v10941_v19 = vadd.f32 %v4563_v49, %v4485_v20  ;;  %v4489_v59 = vmul.f32 %v7133_v32, %v10615_v7  ;;  %7154 = vpow2.f32 %v10737_v5 }
 0x78c   :  { %v3435_v2 = vadd.f32 %v12070_v48, %v10601_v15  ;;  %v7137_v14 = vpop.eup %7136  ;;  %v4583_v9 = vadd.f32 %v4582_v21, %v10724_v24  ;;  %v10946_v39 = vadd.f32 %v4654_v33, %v4527_v50  ;;  %v4531_v8 = vmul.f32 %v7135_v47, %v10626_v31  ;;  %v12074_v47 = vld [vmem:[#allocation57_spill] sm:$0xff] }
 0x78d   :  { %7156 = vpow2.f32 %v10753_v54  ;;  %v7139_v13 = vpop.eup %7138  ;;  %v10950_v15 = vadd.f32 %v4551_v12, %v4489_v59  ;;  %v4250_v43 = vadd.f32 1.0, %v7137_v14  ;;  %v3476_v58 = vmul.f32 0.015625, %v3370_v22 }
 0x78e   :  { %7158 = vpow2.f32 %v10756_v11  ;;  %v7141_v7 = vpop.eup %7140  ;;  %v10953_v42 = vadd.f32 %v4642_v6, %v4531_v8  ;;  %v4292_v5 = vadd.f32 1.0, %v7139_v13  ;;  %v3481_v24 = vmul.f32 0.015625, %v3435_v2  ;;  %v12072_v11 = vld [vmem:[#allocation65_spill] sm:$0xff]  ;;  %v12075_v13 = vld [vmem:[#allocation26_spill] sm:$0xff] }
 0x78f   :  { %7160 = vpow2.f32 %v10800_v18  ;;  %v12071_v49 = vmov 0.0   ;;  %v7143_v31 = vpop.eup %7142  ;;  %v3472_v29 = vadd.f32 %v3471_v27, %v3470_v53  ;;  %v4254_v54 = vadd.f32 1.0, %v7141_v7 }
 0x790   :  { %6297 = vmatprep.subr.bf16.mxu0 %v12071_v49  ;;  %7162 = vrcp.f32 %v4250_v43  ;;  %v3486_v41 = vpack.c.bf16 %v3476_v58, %v3476_v58  ;;  %v7145_v26 = vpop.eup %7144  ;;  %v4296_v21 = vadd.f32 1.0, %v7143_v31  ;;  %v10959_v33 = vadd.f32 %v12072_v11, %v10257_v1  ;;  %v12073_v1 = vld [vmem:[#allocation74_spill] sm:$0xff] }
 0x791   :  { %7164 = vrcp.f32 %v4292_v5  ;;  %v3491_v40 = vpack.c.bf16 %v3481_v24, %v3481_v24  ;;  %v7147_v23 = vpop.eup %7146  ;;  %v4584_v17 = vrot.slane %v4583_v9, 2  ;;  %v4255_v18 = vadd.f32 1.0, %v7145_v26 }
 0x792   :  { %7166 = vrcp.f32 %v4254_v54  ;;  %v10962_v12 = vmul.f32 -1.442695, %v10909_v56  ;;  %v7149_v20 = vpop.eup %7148  ;;  %v4297_v53 = vadd.f32 1.0, %v7147_v23  ;;  %v5185_v61 = vunpack.c.l.b16 %v3486_v41 }
 0x793   :  { %7168 = vrcp.f32 %v4296_v21  ;;  %v5190_v34 = vunpack.c.l.b16 %v3491_v40  ;;  %v7151_v22 = vpop.eup %7150  ;;  %v3473_v4 = vrot.slane %v3472_v29, 1  ;;  %v4259_v32 = vadd.f32 1.0, %v7149_v20  ;;  %v12077_v40 = vld [vmem:[#allocation29_spill] sm:$0xff] }
 0x794   :  { %7170 = vrcp.f32 %v4255_v18  ;;  %v10966_v6 = vadd.f32 %v12073_v1, %v10309_v63  ;;  %v7153_v50 = vpop.eup %7152  ;;  %v4301_v48 = vadd.f32 1.0, %v7151_v22  ;;  %v10974_v27 = vsel %vm1937_vm8, %v10584_v10, %v12074_v47  ;;  %v7339_v63 = vld [vmem:[%s11397_s14 + $0x5] sm:$0x1f] }
 0x795   :  { %7172 = vrcp.f32 %v4297_v53  ;;  %v10969_v2 = vsel %vm1937_vm8, %v5190_v34, %v5185_v61  ;;  %v7155_v59 = vpop.eup %7154  ;;  %v4260_v14 = vadd.f32 1.0, %v7153_v50  ;;  %v10977_v8 = vmul.f32 -1.442695, %v10959_v33 }
 0x796   :  { %7174 = vrcp.f32 %v4259_v32  ;;  %v10983_v43 = vrot.slane %v7339_v63, %v12075_v13  ;;  %v10985_v7 = vadd.f32 %v4584_v17, %v4583_v9  ;;  %v4595_v5 = vrot.slane %v10749_v28, 4 }
 0x797   :  { %v7157_v58 = vpop.eup %7156  ;;  %7176 = vrcp.f32 %v4301_v48  ;;  %v4302_v10 = vadd.f32 1.0, %v7155_v59  ;;  %v12076_v54 = vrot.slane %v10818_v44, 1  ;;  %v3474_v26 = vadd.f32 %v3473_v4, %v3472_v29 }
 0x798   :  { %v7159_v24 = vpop.eup %7158  ;;  %7178 = vrcp.f32 %v4260_v14  ;;  %v4264_v31 = vadd.f32 1.0, %v7157_v58  ;;  %v12078_v23 = vrot.slane %v12077_v40, 1  ;;  %v12079_v17 = vrot.slane %v10609_v3, 1 }
 0x799   :  { %v3409_v41 = vadd.f32 %v12076_v54, %v10818_v44  ;;  %v7161_v21 = vpop.eup %7160  ;;  %7180 = vrcp.f32 %v4302_v10  ;;  %v4306_v11 = vadd.f32 1.0, %v7159_v24  ;;  %v3484_v34 = vmul.f32 0.015625, %v3474_v26  ;;  %v12080_v24 = vld [vmem:[#allocation14_spill] sm:$0xff] }
 0x79a   :  { %v3396_v9 = vadd.f32 %v12078_v23, %v12077_v40  ;;  %v3461_v18 = vadd.f32 %v12079_v17, %v10609_v3  ;;  %v7163_v20 = vpop.eup %7162  ;;  %7182 = vrcp.f32 %v4264_v31  ;;  %v4265_v53 = vadd.f32 1.0, %v7161_v21  ;;  %v12081_v54 = vld [vmem:[#allocation62_spill] sm:$0xff]  ;;  %v12085_v17 = vld [vmem:[#allocation68_spill] sm:$0xff] }
 0x79b   :  { %v3479_v61 = vmul.f32 0.015625, %v3409_v41  ;;  %v7165_v22 = vpop.eup %7164  ;;  %v4490_v44 = vmul.f32 %v7163_v20, %v10631_v62  ;;  %7184 = vrcp.f32 %v4306_v11  ;;  %v3494_v48 = vpack.c.bf16 %v3484_v34, %v3484_v34  ;;  %v12083_v11 = vld [vmem:[#allocation60_spill] sm:$0xff] }
 0x79c   :  { %v3478_v29 = vmul.f32 0.015625, %v3396_v9  ;;  %v3483_v4 = vmul.f32 0.015625, %v3461_v18  ;;  %v7167_v32 = vpop.eup %7166  ;;  %v4532_v1 = vmul.f32 %v7165_v22, %v10638_v35  ;;  %7186 = vrcp.f32 %v4265_v53  ;;  %v12084_v9 = vld [vmem:[#allocation56_spill] sm:$0xff] }
 0x79d   :  { %v3489_v50 = vpack.c.bf16 %v3479_v61, %v3479_v61  ;;  %v7169_v47 = vpop.eup %7168  ;;  %v4565_v3 = vadd.f32 %v10941_v19, %v4490_v44  ;;  %v4494_v59 = vmul.f32 %v7167_v32, %v10642_v52  ;;  %7188 = vpow2.f32 %v10803_v36  ;;  %v12086_v20 = vld [vmem:[#allocation44_spill] sm:$0xff]  ;;  %v12087_v44 = vld [vmem:[#allocation23_spill] sm:$0xff] }
 0x79e   :  { %v3488_v14 = vpack.c.bf16 %v3478_v29, %v3478_v29  ;;  %v7171_v63 = vpop.eup %7170  ;;  %v4656_v62 = vadd.f32 %v10946_v39, %v4532_v1  ;;  %v4536_v13 = vmul.f32 %v7169_v47, %v10646_v46  ;;  %7190 = vpow2.f32 %v10806_v45  ;;  %v12082_v45 = vld [vmem:[#allocation73_spill] sm:$0xff] }
 0x79f   :  { %v5188_v58 = vunpack.c.l.b16 %v3489_v50  ;;  %v7173_v35 = vpop.eup %7172  ;;  %v4553_v10 = vadd.f32 %v10950_v15, %v4494_v59  ;;  %v4495_v31 = vmul.f32 %v7171_v63, %v12080_v24  ;;  %7192 = vpow2.f32 %v10809_v37  ;;  %v12091_v59 = vld [vmem:[#allocation17_spill] sm:$0xff] }
 0x7a0   :  { %v5193_v19 = vunpack.c.l.b16 %v3494_v48  ;;  %v7175_v52 = vpop.eup %7174  ;;  %v4644_v36 = vadd.f32 %v10953_v42, %v4536_v13  ;;  %v4537_v41 = vmul.f32 %v7173_v35, %v12081_v54  ;;  %7194 = vpow2.f32 %v10812_v38  ;;  %v12089_v48 = vld [vmem:[#allocation50_spill] sm:$0xff] }
 0x7a1   :  { %v3493_v39 = vpack.c.bf16 %v3483_v4, %v3483_v4  ;;  %v7177_v46 = vpop.eup %7176  ;;  %v4566_v26 = vadd.f32 %v4565_v3, %v4495_v31  ;;  %v4499_v21 = vmul.f32 %v7175_v52, %v12082_v45  ;;  %7196 = vpow2.f32 %v12083_v11  ;;  %v12088_v4 = vld [vmem:[#allocation30_spill] sm:$0xff]  ;;  %v12090_v3 = vld [vmem:[#allocation72_spill] sm:$0xff] }
 0x7a2   :  { %v11014_v15 = vsel %vm1937_vm8, %v5193_v19, %v5188_v58  ;;  %v7179_v40 = vpop.eup %7178  ;;  %v4586_v37 = vrot.slane %v10985_v7, 1  ;;  %v4657_v23 = vadd.f32 %v4656_v62, %v4537_v41  ;;  %v4541_v42 = vmul.f32 %v7177_v46, %v12084_v9  ;;  %v12092_v62 = vld [vmem:[#allocation15_spill] sm:$0xff]  ;;  %v12093_v58 = vld [vmem:[#allocation64_spill] sm:$0xff] }
 0x7a3   :  { %7198 = vpow2.f32 %v12085_v17  ;;  %v7181_v18 = vpop.eup %7180  ;;  %v4554_v38 = vadd.f32 %v4553_v10, %v4499_v21  ;;  %v4500_v53 = vmul.f32 %v7179_v40, %v12086_v20  ;;  %v5187_v61 = vunpack.c.l.b16 %v3488_v14  ;;  %v12094_v31 = vld [vmem:[#allocation16_spill] sm:$0xff] }
 0x7a4   :  { %7200 = vpow2.f32 %v10852_v51  ;;  %v7183_v34 = vpop.eup %7182  ;;  %v4645_v22 = vadd.f32 %v4644_v36, %v4541_v42  ;;  %v4542_v29 = vmul.f32 %v7181_v18, %v12087_v44  ;;  %v5192_v32 = vunpack.c.l.b16 %v3493_v39  ;;  %v12095_v52 = vld [vmem:[#allocation52_spill] sm:$0xff]  ;;  %v12096_v39 = vld [vmem:[#allocation70_spill] sm:$0xff]  ;;  %v12098_v18 = vld [vmem:[#allocation9_spill] sm:$0xff] }
 0x7a5   :  { %7202 = vpow2.f32 %v12088_v4  ;;  %v7185_v1 = vpop.eup %7184  ;;  %v4567_v50 = vadd.f32 %v4566_v26, %v4500_v53  ;;  %v4504_v47 = vmul.f32 %v7183_v34, %v12089_v48  ;;  %v11028_v63 = vsel %vm1937_vm8, %v12091_v59, %v12090_v3 }
 0x7a6   :  { %7204 = vpow2.f32 %v10858_v60  ;;  %v7187_v51 = vpop.eup %7186  ;;  %v11030_v14 = vadd.f32 %v4657_v23, %v4542_v29  ;;  %v4546_v13 = vmul.f32 %v7185_v1, %v12092_v62  ;;  %v11035_v35 = vsel %vm1937_vm8, %v5192_v32, %v5187_v61  ;;  %v12097_v23 = vld [vmem:[#allocation75_spill] sm:$0xff]  ;;  %v12099_v62 = vld [vmem:[#allocation6_spill] sm:$0xff] }
 0x7a7   :  { %7206 = vpow2.f32 %v12093_v58  ;;  %v7189_v10 = vpop.eup %7188  ;;  %v4596_v60 = vadd.f32 %v4595_v5, %v10749_v28  ;;  %v11040_v24 = vadd.f32 %v4554_v38, %v4504_v47  ;;  %v4505_v19 = vmul.f32 %v7187_v51, %v12094_v31 }
 0x7a8   :  { %7208 = vpow2.f32 %v12095_v52  ;;  %v7191_v36 = vpop.eup %7190  ;;  %v4646_v54 = vadd.f32 %v4645_v22, %v4546_v13  ;;  %v4307_v41 = vadd.f32 1.0, %v7189_v10  ;;  %v11047_v46 = vadd.f32 %v12096_v39, %v10983_v43 }
 0x7a9   :  { %7210 = vpow2.f32 %v10874_v55  ;;  %v7193_v26 = vpop.eup %7192  ;;  %v4587_v45 = vadd.f32 %v4586_v37, %v10985_v7  ;;  %v11050_v21 = vadd.f32 %v4567_v50, %v4505_v19  ;;  %v4269_v28 = vadd.f32 1.0, %v7191_v36  ;;  %v12100_v19 = vld [vmem:[#allocation22_spill] sm:$0xff] }
 0x7aa   :  { %7212 = vpow2.f32 %v10902_v25  ;;  %v7195_v5 = vpop.eup %7194  ;;  %v4647_v11 = vrot.slane %v4646_v54, 4  ;;  %v4270_v40 = vadd.f32 1.0, %v7193_v26  ;;  %v11055_v9 = vadd.f32 %v12097_v23, %v10983_v43 }
 0x7ab   :  { %7214 = vrcp.f32 %v4307_v41  ;;  %v7197_v55 = vpop.eup %7196  ;;  %v4597_v42 = vrot.slane %v4596_v60, 2  ;;  %v4274_v17 = vadd.f32 1.0, %v7195_v5  ;;  %v11059_v7 = vadd.f32 %v12098_v18, %v10983_v43  ;;  %v12101_v41 = vld [vmem:[#allocation71_spill] sm:$0xff]  ;;  %v12102_v5 = vld [vmem:[#allocation76_spill] sm:$0xff] }
 0x7ac   :  { %7216 = vrcp.f32 %v4269_v28  ;;  %v4648_v38 = vadd.f32 %v4647_v11, %v4646_v54  ;;  %v4275_v25 = vadd.f32 1.0, %v7197_v55  ;;  %v11062_v20 = vmul.f32 -1.442695, %v10966_v6 }
 0x7ad   :  { %v7199_v37 = vpop.eup %7198  ;;  %7218 = vrcp.f32 %v4270_v40  ;;  %v4681_v61 = vmul.f32 0.015625, %v4587_v45  ;;  %v11065_v22 = vmul.f32 -1.442695, %v11047_v46  ;;  %v11068_v32 = vmul.f32 -1.442695, %v11055_v9 }
 0x7ae   :  { %v7201_v53 = vpop.eup %7200  ;;  %7220 = vrcp.f32 %v4274_v17  ;;  %v4279_v34 = vadd.f32 1.0, %v7199_v37  ;;  %v4649_v29 = vrot.slane %v4648_v38, 2  ;;  %v4598_v50 = vadd.f32 %v4597_v42, %v4596_v60  ;;  %v12103_v37 = vld [vmem:[#allocation19_spill] sm:$0xff] }
 0x7af   :  { %v7203_v44 = vpop.eup %7202  ;;  %7222 = vrcp.f32 %v4275_v25  ;;  %v4280_v4 = vadd.f32 1.0, %v7201_v53  ;;  %v11071_v47 = vmul.f32 -1.442695, %v11059_v7  ;;  %v11075_v13 = vadd.f32 %v12099_v62, %v10983_v43  ;;  %v12105_v62 = vld [vmem:[#allocation20_spill] sm:$0xff] }
 0x7b0   :  { %v7205_v1 = vpop.eup %7204  ;;  %7224 = vrcp.f32 %v4279_v34  ;;  %v4284_v48 = vadd.f32 1.0, %v7203_v44  ;;  %v4650_v59 = vadd.f32 %v4649_v29, %v4648_v38  ;;  %v4691_v10 = vpack.c.bf16 %v4681_v61, %v4681_v61  ;;  %v12104_v44 = vld [vmem:[#allocation39_spill] sm:$0xff] }
 0x7b1   :  { %v7207_v3 = vpop.eup %7206  ;;  %7226 = vrcp.f32 %v4280_v4  ;;  %v4285_v51 = vadd.f32 1.0, %v7205_v1  ;;  %v11079_v60 = vadd.f32 %v12100_v19, %v10983_v43  ;;  %v11083_v39 = vadd.f32 %v12101_v41, %v10983_v43  ;;  %v12108_v41 = vld [vmem:[#allocation47_spill] sm:$0xff] }
 0x7b2   :  { %v7209_v58 = vpop.eup %7208  ;;  %7228 = vrcp.f32 %v4284_v48  ;;  %v4289_v31 = vadd.f32 1.0, %v7207_v3  ;;  %v4651_v36 = vrot.slane %v4650_v59, 1  ;;  %v4599_v45 = vrot.slane %v4598_v50, 1 }
 0x7b3   :  { %v7211_v52 = vpop.eup %7210  ;;  %7230 = vrcp.f32 %v4285_v51  ;;  %v4290_v54 = vadd.f32 1.0, %v7209_v58  ;;  %v11087_v11 = vadd.f32 %v12102_v5, %v10983_v43  ;;  %v5848_v42 = vmul.f32 -1.442695, %v11075_v13 }
 0x7b4   :  { %v7213_v26 = vpop.eup %7212  ;;  %7232 = vrcp.f32 %v4289_v31  ;;  %v4294_v28 = vadd.f32 1.0, %v7211_v52  ;;  %v4652_v23 = vadd.f32 %v4651_v36, %v4650_v59  ;;  %v4791_v18 = vunpack.c.l.b16 %v4691_v10  ;;  %v12106_v10 = vld [vmem:[#allocation33_spill] sm:$0xff]  ;;  %v12107_v36 = vld [vmem:[#allocation38_spill] sm:$0xff] }
 0x7b5   :  { %v7215_v40 = vpop.eup %7214  ;;  %7234 = vrcp.f32 %v4290_v54  ;;  %v4295_v55 = vadd.f32 1.0, %v7213_v26  ;;  %v5873_v25 = vmul.f32 -1.442695, %v11079_v60  ;;  %v5863_v34 = vmul.f32 -1.442695, %v11083_v39 }
 0x7b6   :  { %v7217_v17 = vpop.eup %7216  ;;  %v4547_v38 = vmul.f32 %v7215_v40, %v12103_v37  ;;  %7236 = vrcp.f32 %v4294_v28  ;;  %v4686_v61 = vmul.f32 0.015625, %v4652_v23  ;;  %v11095_v29 = vadd.f32 %v12104_v44, %v10983_v43 }
 0x7b7   :  { %v7219_v53 = vpop.eup %7218  ;;  %7238 = vrcp.f32 %v4295_v55  ;;  %v5878_v48 = vmul.f32 -1.442695, %v11087_v11  ;;  %v4600_v3 = vadd.f32 %v4599_v45, %v4598_v50  ;;  %v4509_v58 = vmul.f32 %v7217_v17, %v12105_v62  ;;  %v12109_v50 = vld [vmem:[#allocation24_spill] sm:$0xff]  ;;  %v12110_v55 = vld [vmem:[#allocation51_spill] sm:$0xff] }
 0x7b8   :  { %v7221_v4 = vpop.eup %7220  ;;  %v4659_v1 = vadd.f32 %v11030_v14, %v4547_v38  ;;  %7240 = vpow2.f32 %v10917_v57  ;;  %v4696_v51 = vpack.c.bf16 %v4686_v61, %v4686_v61  ;;  %v4510_v54 = vmul.f32 %v7219_v53, %v12107_v36  ;;  %v12111_v38 = vld [vmem:[#allocation48_spill] sm:$0xff]  ;;  %v12113_v62 = vld [vmem:[#allocation43_spill] sm:$0xff] }
 0x7b9   :  { %v7223_v59 = vpop.eup %7222  ;;  %v4514_v31 = vmul.f32 %v7221_v4, %v12106_v10  ;;  %7242 = vpow2.f32 %v10962_v12 }
 0x7ba   :  { %v7225_v19 = vpop.eup %7224  ;;  %v4660_v52 = vrot.slane %v4659_v1, 4  ;;  %v4515_v26 = vmul.f32 %v7223_v59, %v12108_v41  ;;  %7244 = vpow2.f32 %v10977_v8  ;;  %v4796_v14 = vunpack.c.l.b16 %v4696_v51 }
 0x7bb   :  { %v7227_v57 = vpop.eup %7226  ;;  %v4614_v28 = vadd.f32 %v4514_v31, %v4509_v58  ;;  %v4519_v45 = vmul.f32 %v7225_v19, %v12109_v50  ;;  %7246 = vpow2.f32 %v11062_v20  ;;  %v12112_v20 = vld [vmem:[#allocation69_spill] sm:$0xff]  ;;  %v5868_v58 = vmul.f32 -1.442695, %v11095_v29  ;;  %v12114_v19 = vld [vmem:[#allocation31_spill] sm:$0xff] }
 0x7bc   :  { %v7229_v5 = vpop.eup %7228  ;;  %v4661_v40 = vadd.f32 %v4660_v52, %v4659_v1  ;;  %v4627_v23 = vadd.f32 %v4515_v26, %v4510_v54  ;;  %v4520_v12 = vmul.f32 %v7227_v57, %v12110_v55  ;;  %7248 = vpow2.f32 %v11065_v22 }
 0x7bd   :  { %v7231_v17 = vpop.eup %7230  ;;  %v4615_v37 = vadd.f32 %v4614_v28, %v4519_v45  ;;  %v4524_v53 = vmul.f32 %v7229_v5, %v12111_v38  ;;  %7250 = vpow2.f32 %v11068_v32  ;;  %v11113_v8 = vsel %vm1937_vm8, %v4796_v14, %v4791_v18 }
 0x7be   :  { %v7233_v61 = vpop.eup %7232  ;;  %v4662_v44 = vrot.slane %v4661_v40, 2  ;;  %v4628_v4 = vadd.f32 %v4627_v23, %v4520_v12  ;;  %v4525_v59 = vmul.f32 %v7231_v17, %v12112_v20  ;;  %7252 = vpow2.f32 %v11071_v47  ;;  %v12115_v23 = vld [vmem:[#allocation13_spill] sm:$0xff] }
 0x7bf   :  { %v7235_v1 = vpop.eup %7234  ;;  %v4616_v51 = vadd.f32 %v4615_v37, %v4524_v53  ;;  %v4529_v22 = vmul.f32 %v7233_v61, %v12113_v62  ;;  %7254 = vpow2.f32 %v5848_v42  ;;  %v4682_v41 = vmul.f32 0.015625, %v4600_v3 }
 0x7c0   :  { %v7237_v10 = vpop.eup %7236  ;;  %v4663_v31 = vadd.f32 %v4662_v44, %v4661_v40  ;;  %v4629_v32 = vadd.f32 %v4628_v4, %v4525_v59  ;;  %v4530_v18 = vmul.f32 %v7235_v1, %v12114_v19  ;;  %7256 = vpow2.f32 %v5873_v25  ;;  %v12117_v4 = vld [vmem:[#allocation11_spill] sm:$0xff] }
 0x7c1   :  { %v7239_v52 = vpop.eup %7238  ;;  %v4617_v36 = vadd.f32 %v4616_v51, %v4529_v22  ;;  %v4534_v54 = vmul.f32 %v7237_v10, %v10849_v30  ;;  %7258 = vpow2.f32 %v5863_v34  ;;  %v4556_v28 = vrot.slane %v11040_v24, 4 }
 0x7c2   :  { %v7241_v47 = vpop.eup %7240  ;;  %v4664_v26 = vrot.slane %v4663_v31, 1  ;;  %v4630_v57 = vadd.f32 %v4629_v32, %v4530_v18  ;;  %v4535_v14 = vmul.f32 %v7239_v52, %v10868_v0  ;;  %7260 = vpow2.f32 %v5868_v58  ;;  %v12118_v32 = vld [vmem:[#allocation12_spill] sm:$0xff] }
 0x7c3   :  { %v7243_v42 = vpop.eup %7242  ;;  %v11123_v50 = vadd.f32 %v4617_v36, %v4534_v54  ;;  %v4299_v45 = vadd.f32 1.0, %v7241_v47  ;;  %7262 = vpow2.f32 %v5878_v48  ;;  %v11129_v55 = vadd.f32 %v12115_v23, %v10983_v43  ;;  %v12116_v48 = vld [vmem:[#allocation10_spill] sm:$0xff] }
 0x7c4   :  { %v7245_v5 = vpop.eup %7244  ;;  %v11125_v25 = vadd.f32 %v4630_v57, %v4535_v14  ;;  %v4300_v40 = vadd.f32 1.0, %v7243_v42  ;;  %v4665_v30 = vadd.f32 %v4664_v26, %v4663_v31  ;;  %v4692_v0 = vpack.c.bf16 %v4682_v41, %v4682_v41  ;;  %v12119_v26 = vld [vmem:[#allocation18_spill] sm:$0xff] }
 0x7c5   :  { %v7247_v34 = vpop.eup %7246  ;;  %7264 = vrcp.f32 %v4299_v45  ;;  %v4304_v3 = vadd.f32 1.0, %v7245_v5  ;;  %v4569_v17 = vrot.slane %v11050_v21, 4  ;;  %v11134_v44 = vadd.f32 %v12116_v48, %v10983_v43 }
 0x7c6   :  { %v7249_v12 = vpop.eup %7248  ;;  %7266 = vrcp.f32 %v4300_v40  ;;  %v4305_v37 = vadd.f32 1.0, %v7247_v34  ;;  %v4687_v38 = vmul.f32 0.015625, %v4665_v30  ;;  %v11138_v20 = vadd.f32 %v12117_v4, %v10983_v43  ;;  %v6425_v40 = vld [vmem:[%s11398_s15] sm:$0xff]  }
 0x7c7   :  { %v7251_v53 = vpop.eup %7250  ;;  %7268 = vrcp.f32 %v4304_v3  ;;  %v4243_v61 = vadd.f32 1.0, %v7249_v12  ;;  %v4557_v1 = vadd.f32 %v4556_v28, %v11040_v24  ;;  %v5893_v10 = vmul.f32 -1.442695, %v11129_v55  ;;  %v6428_v12 = vld [vmem:[%s11398_s15 + $0x48] sm:$0xff]  }
 0x7c8   :  { %v7253_v59 = vpop.eup %7252  ;;  %7270 = vrcp.f32 %v4305_v37  ;;  %v4233_v51 = vadd.f32 1.0, %v7251_v53  ;;  %v4697_v62 = vpack.c.bf16 %v4687_v38, %v4687_v38  ;;  %v4792_v31 = vunpack.c.l.b16 %v4692_v0  ;;  %v12120_v38 = vld [vmem:[#allocation21_spill] sm:$0xff] }
 0x7c9   :  { %v7255_v22 = vpop.eup %7254  ;;  %v4248_v58 = vadd.f32 1.0, %v7253_v59  ;;  %v11144_v19 = vadd.f32 %v12118_v32, %v10983_v43  ;;  %v4570_v52 = vadd.f32 %v4569_v17, %v11050_v21  ;;  %v5883_v24 = vmul.f32 -1.442695, %v11134_v44  ;;  %v12121_v59 = vld [vmem:[#allocation61_spill] sm:$0xff] }
 0x7ca   :  { %v7257_v18 = vpop.eup %7256  ;;  %7272 = vrcp.f32 %v4233_v51  ;;  %v4238_v36 = vadd.f32 1.0, %v7255_v22  ;;  %v4797_v54 = vunpack.c.l.b16 %v4697_v62  ;;  %v5898_v47 = vmul.f32 -1.442695, %v11138_v20 }
 0x7cb   :  { %v7259_v41 = vpop.eup %7258  ;;  %7274 = vrcp.f32 %v4243_v61  ;;  %v11151_v57 = vadd.f32 %v12119_v26, %v10983_v43  ;;  %v4558_v14 = vrot.slane %v4557_v1, 2  ;;  %v4263_v21 = vadd.f32 1.0, %v7257_v18 }
 0x7cc   :  { %7276 = vrcp.f32 %v4238_v36  ;;  %v4253_v42 = vadd.f32 1.0, %v7259_v41  ;;  %v4802_v28 = vsel %vm1937_vm8, %v4797_v54, %v4792_v31  ;;  %v7261_v45 = vpop.eup %7260  ;;  %v5888_v30 = vmul.f32 -1.442695, %v11144_v19 }
 0x7cd   :  { %7278 = vrcp.f32 %v4248_v58  ;;  %v4807_v5 = vpack.c.b16 %v4802_v28, %v4802_v28  ;;  %v7263_v34 = vpop.eup %7262  ;;  %v4571_v3 = vrot.slane %v4570_v52, 2  ;;  %v4258_v23 = vadd.f32 1.0, %v7261_v45  ;;  %v6429_v58 = vld [vmem:[%s11398_s15 + $0x8] sm:$0xff]   ;;  %v6434_v28 = vld [vmem:[%s11398_s15 + $0x58] sm:$0xff]  }
 0x7ce   :  { %7280 = vrcp.f32 %v4253_v42  ;;  %v4806_v0 = vpack.c.b16 %v11113_v8, %v11113_v8  ;;  %v5200_v37 = vpack.c.b16 %v10969_v2, %v10969_v2  ;;  %v11167_v53 = vadd.f32 %v12120_v38, %v10983_v43 }
 0x7cf   :  { %v7265_v17 = vpop.eup %7264  ;;  %7282 = vpow2.f32 %v5893_v10  ;;  %5126 = vmatprep.mubr.bf16.mxu1 %v4807_v5  ;;  %v5903_v61 = vmul.f32 -1.442695, %v11151_v57  ;;  %v4559_v4 = vadd.f32 %v4558_v14, %v4557_v1  ;;  %v11173_v51 = vadd.f32 %v12121_v59, %v10983_v43  ;;  %v12122_v1 = vld [vmem:[#allocation55_spill] sm:$0xff] }
 0x7d0   :  { %v7267_v48 = vpop.eup %7266  ;;  %v4539_v8 = vmul.f32 %v7265_v17, %v10881_v16  ;;  %7284 = vrcp.f32 %v4258_v23  ;;  %5127 = vmatmul.mubr.bf16.vlgmr.msra.gmra.mrb[112].mxu1 %v4806_v0  ;;  %v4268_v2 = vadd.f32 1.0, %v7263_v34  ;;  %v11181_v16 = vadd.f32 %v12122_v1, %v10983_v43  ;;  %v6431_v14 = vld [vmem:[%s11398_s15 + $0x10] sm:$0xff]  }
 0x7d1   :  { %v7269_v62 = vpop.eup %7268  ;;  %v4540_v22 = vmul.f32 %v7267_v48, %v10909_v56  ;;  %7286 = vrcp.f32 %v4263_v21  ;;  %6117 = vmatpush3.bf16.msra.mxu1 %v6425_v40  ;;  %5481 = vmatprep.mubr.bf16.mxu1 %v5200_v37  ;;  %v4572_v31 = vadd.f32 %v4571_v3, %v4570_v52  ;;  %v6430_v56 = vld [vmem:[%s11398_s15 + $0x50] sm:$0xff]   ;;  %v5913_v43 = vmul.f32 -1.442695, %v11167_v53  ;;  %v6435_v37 = vld [vmem:[%s11398_s15 + $0x18] sm:$0xff]  }
 0x7d2   :  { %v7271_v10 = vpop.eup %7270  ;;  %v4619_v32 = vadd.f32 %v11123_v50, %v4539_v8  ;;  %v4544_v18 = vmul.f32 %v7269_v62, %v10959_v33  ;;  %7288 = vpow2.f32 %v5883_v24  ;;  %6118 = vmatprep.subr.bf16.mxu1 %v6428_v12  ;;  %v4560_v26 = vrot.slane %v4559_v4, 1 }
 0x7d3   :  { %v4632_v36 = vadd.f32 %v11125_v25, %v4540_v22  ;;  %v4545_v54 = vmul.f32 %v7271_v10, %v10966_v6  ;;  %7290 = vpow2.f32 %v5898_v47  ;;  %v5908_v50 = vmul.f32 -1.442695, %v11173_v51 }
 0x7d4   :  { %v7273_v41 = vpop.eup %7272  ;;  %v4620_v52 = vadd.f32 %v4619_v32, %v4544_v18  ;;  %7292 = vpow2.f32 %v5888_v30  ;;  %v4573_v42 = vrot.slane %v4572_v31, 1  ;;  %v5918_v47 = vmul.f32 -1.442695, %v11181_v16 }
 0x7d5   :  { %v7275_v33 = vpop.eup %7274  ;;  %v4633_v24 = vadd.f32 %v4632_v36, %v4545_v54  ;;  %7294 = vrcp.f32 %v4268_v2  ;;  %6119 = vmatpush3.bf16.msra.mxu1 %v6429_v58  ;;  %v4473_v5 = vmul.f32 %v7273_v41, %v11055_v9  ;;  %v4561_v34 = vadd.f32 %v4560_v26, %v4559_v4  ;;  %v6436_v9 = vld [vmem:[%s11398_s15 + $0x60] sm:$0xff]  }
 0x7d6   :  { %v7277_v25 = vpop.eup %7276  ;;  %v4621_v6 = vrot.slane %v4620_v52, 4  ;;  %7296 = vpow2.f32 %v5903_v61  ;;  %6120 = vmatprep.subr.bf16.mxu1 %v6430_v56  ;;  %v4483_v12 = vmul.f32 %v7275_v33, %v11047_v46 }
 0x7d7   :  { %v7279_v45 = vpop.eup %7278  ;;  %v4634_v21 = vrot.slane %v4633_v24, 4  ;;  %v4478_v40 = vmul.f32 %v7277_v25, %v11075_v13  ;;  %7298 = vpow2.f32 %v5913_v43  ;;  %v4574_v13 = vadd.f32 %v4573_v42, %v4572_v31  ;;  %v6437_v31 = vld [vmem:[%s11398_s15 + $0x20] sm:$0xff]  }
 0x7d8   :  { %v7281_v30 = vpop.eup %7280  ;;  %v4622_v3 = vadd.f32 %v4621_v6, %v4620_v52  ;;  %7300 = vpow2.f32 %v5908_v50  ;;  %v4488_v8 = vmul.f32 %v7279_v45, %v11059_v7  ;;  %v4679_v22 = vmul.f32 0.015625, %v4561_v34 }
 0x7d9   :  { %v7283_v23 = vpop.eup %7282  ;;  %v4635_v0 = vadd.f32 %v4634_v21, %v4633_v24  ;;  %v4601_v17 = vadd.f32 %v4478_v40, %v4473_v5  ;;  %6121 = vmatpush3.bf16.msra.mxu1 %v6431_v14  ;;  %7302 = vpow2.f32 %v5918_v47  ;;  %v4493_v59 = vmul.f32 %v7281_v30, %v11083_v39  ;;  %v6440_v39 = vld [vmem:[%s11398_s15 + $0x68] sm:$0xff]  }
 0x7da   :  { %v7285_v38 = vpop.eup %7284  ;;  %v4623_v61 = vrot.slane %v4622_v3, 2  ;;  %6122 = vmatprep.subr.bf16.mxu1 %v6434_v28  ;;  %v4283_v58 = vadd.f32 1.0, %v7283_v23  ;;  %v4680_v43 = vmul.f32 0.015625, %v4574_v13  ;;  %v4689_v33 = vpack.c.bf16 %v4679_v22, %v4679_v22  ;;  %v6441_v47 = vld [vmem:[%s11398_s15 + $0x28] sm:$0xff]  }
 0x7db   :  { %v7287_v48 = vpop.eup %7286  ;;  %v4636_v4 = vrot.slane %v4635_v0, 2  ;;  %v4602_v46 = vadd.f32 %v4601_v17, %v4483_v12  ;;  %v4498_v18 = vmul.f32 %v7285_v38, %v11095_v29 }
 0x7dc   :  { %v7289_v62 = vpop.eup %7288  ;;  %v4624_v2 = vadd.f32 %v4623_v61, %v4622_v3  ;;  %v4503_v14 = vmul.f32 %v7287_v48, %v11079_v60  ;;  %v6442_v60 = vld [vmem:[%s11398_s15 + $0x70] sm:$0xff]   ;;  %v4690_v40 = vpack.c.bf16 %v4680_v43, %v4680_v43  ;;  %v4789_v38 = vunpack.c.l.b16 %v4689_v33 }
 0x7dd   :  { %v7291_v1 = vpop.eup %7290  ;;  %v4637_v10 = vadd.f32 %v4636_v4, %v4635_v0  ;;  %v4603_v32 = vadd.f32 %v4602_v46, %v4488_v8  ;;  %v4273_v56 = vadd.f32 1.0, %v7289_v62  ;;  %6123 = vmatpush3.bf16.msra.mxu1 %v6435_v37  ;;  %v5199_v43 = vpack.c.b16 %v10974_v27, %v10974_v27  ;;  %v6450_v27 = vld [vmem:[%s11398_s15 + $0x108] sm:$0xff]  }
 0x7de   :  { %v7293_v36 = vpop.eup %7292  ;;  %v4625_v7 = vrot.slane %v4624_v2, 1  ;;  %v4288_v54 = vadd.f32 1.0, %v7291_v1  ;;  %6124 = vmatprep.subr.bf16.mxu1 %v6436_v9  ;;  %v6446_v9 = vld [vmem:[%s11398_s15 + $0x78] sm:$0xff]   ;;  %v4790_v48 = vunpack.c.l.b16 %v4690_v40 }
 0x7df   :  { %v7295_v41 = vpop.eup %7294  ;;  %v4638_v26 = vrot.slane %v4637_v10, 1  ;;  %v4604_v52 = vadd.f32 %v4603_v32, %v4493_v59  ;;  %7304 = vrcp.f32 %v4273_v56  ;;  %v4278_v29 = vadd.f32 1.0, %v7293_v36  ;;  %v6447_v59 = vld [vmem:[%s11398_s15 + $0x38] sm:$0xff]  }
 0x7e0   :  { %v7297_v50 = vpop.eup %7296  ;;  %v4626_v24 = vadd.f32 %v4625_v7, %v4624_v2  ;;  %7306 = vrcp.f32 %v4283_v58  ;;  %v4508_v5 = vmul.f32 %v7295_v41, %v11087_v11  ;;  %v6443_v11 = vld [vmem:[%s11398_s15 + $0x30] sm:$0xff]   ;;  %v6449_v58 = vld [vmem:[%s11398_s15 + $0x240] sm:$0xff]  }
 0x7e1   :  { %v7299_v25 = vpop.eup %7298  ;;  %v4605_v42 = vadd.f32 %v4604_v52, %v4498_v18  ;;  %7308 = vrcp.f32 %v4278_v29  ;;  %v4293_v6 = vadd.f32 1.0, %v7297_v50  ;;  %6125 = vmatpush3.bf16.msra.mxu1 %v6437_v31  ;;  %v4639_v28 = vadd.f32 %v4638_v26, %v4637_v10  ;;  %v6448_v7 = vld [vmem:[%s11398_s15 + $0x100] sm:$0xff]  }
 0x7e2   :  { %v7301_v45 = vpop.eup %7300  ;;  %v4684_v21 = vmul.f32 0.015625, %v4626_v24  ;;  %7310 = vrcp.f32 %v4288_v54  ;;  %6126 = vmatprep.subr.bf16.mxu1 %v6440_v39  ;;  %v4303_v17 = vadd.f32 1.0, %v7299_v25  ;;  %v6452_v25 = vld [vmem:[%s11398_s15 + $0x110] sm:$0xff]  }
 0x7e3   :  { %v4606_v30 = vadd.f32 %v4605_v42, %v4503_v14  ;;  %7312 = vrcp.f32 %v4293_v6  ;;  %v4298_v34 = vadd.f32 1.0, %v7301_v45  ;;  %v4685_v3 = vmul.f32 0.015625, %v4639_v28  ;;  %v7303_v23 = vpop.eup %7302  ;;  %v6455_v6 = vld [vmem:[%s11398_s15 + $0x258] sm:$0xff]  }
 0x7e4   :  { %v4694_v0 = vpack.c.bf16 %v4684_v21, %v4684_v21  ;;  %v4308_v13 = vadd.f32 1.0, %v7303_v23  ;;  %v6454_v21 = vld [vmem:[%s11398_s15 + $0x118] sm:$0xff]  }
 0x7e5   :  { %v4607_v12 = vadd.f32 %v4606_v30, %v4508_v5  ;;  %7314 = vrcp.f32 %v4298_v34  ;;  %6127 = vmatpush3.bf16.msra.mxu1 %v6441_v47  ;;  %v4695_v37 = vpack.c.bf16 %v4685_v3, %v4685_v3  ;;  %v6457_v5 = vld [vmem:[%s11398_s15 + $0x260] sm:$0xff]   ;;  %v6459_v34 = vld [vmem:[%s11398_s15 + $0x268] sm:$0xff]  }
 0x7e6   :  { %v4794_v61 = vunpack.c.l.b16 %v4694_v0  ;;  %6128 = vmatprep.subr.bf16.mxu1 %v6442_v60  ;;  %7316 = vrcp.f32 %v4303_v17  ;;  %v6458_v0 = vld [vmem:[%s11398_s15 + $0x128] sm:$0xff]   ;;  %v6461_v17 = vld [vmem:[%s11398_s15 + $0x270] sm:$0xff]  }
 0x7e7   :  { %v4795_v4 = vunpack.c.l.b16 %v4695_v37  ;;  %7318 = vrcp.f32 %v4308_v13  ;;  %v4608_v18 = vrot.slane %v4607_v12, 4  ;;  %v6464_v13 = vld [vmem:[%s11398_s15 + $0xc0] sm:$0xff]  }
 0x7e8   :  { %v4799_v8 = vsel %vm1937_vm8, %v4794_v61, %v4789_v38  ;;  %v6460_v38 = vld [vmem:[%s11398_s15 + $0x130] sm:$0xff]   ;;  %v6463_v61 = vld [vmem:[%s11398_s15 + $0x278] sm:$0xff]  }
 0x7e9   :  { %v7305_v46 = vpop.eup %7304  ;;  %6129 = vmatpush3.bf16.msra.mxu1 %v6443_v11  ;;  %v4800_v62 = vsel %vm1937_vm8, %v4795_v4, %v4790_v48  ;;  %v4804_v10 = vpack.c.b16 %v4799_v8, %v4799_v8  ;;  %v4609_v41 = vadd.f32 %v4608_v18, %v4607_v12  ;;  %v6462_v8 = vld [vmem:[%s11398_s15 + $0x138] sm:$0xff]   ;;  %v6469_v18 = vld [vmem:[%s11398_s15 + $0x90] sm:$0xff]  }
 0x7ea   :  { %v7307_v22 = vpop.eup %7306  ;;  %6130 = vmatprep.subr.bf16.mxu1 %v6446_v9  ;;  %v4805_v2 = vpack.c.b16 %v4800_v62, %v4800_v62  ;;  %v4513_v56 = vmul.f32 %v7305_v46, %v11134_v44  ;;  %v6451_v44 = vld [vmem:[%s11398_s15 + $0x248] sm:$0xff]  }
 0x7eb   :  { %v7309_v1 = vpop.eup %7308  ;;  %v4523_v54 = vmul.f32 %v7307_v22, %v11129_v55  ;;  %v4610_v33 = vrot.slane %v4609_v41, 2  ;;  %v5203_v22 = vpack.c.b16 %v11014_v15, %v11014_v15  ;;  %v6467_v15 = vld [vmem:[%s11398_s15 + $0x88] sm:$0xff]  }
 0x7ec   :  { %v7311_v32 = vpop.eup %7310  ;;  %v4518_v31 = vmul.f32 %v7309_v1, %v11144_v19  ;;  %5086 = vmatprep.mubr.bf16.mxu0 %v4805_v2 }
 0x7ed   :  { %v7313_v36 = vpop.eup %7312  ;;  %6131 = vmatpush3.bf16.msra.mxu1 %v6447_v59  ;;  %5087 = vmatmul.mubr.bf16.vlgmr.msra.gmra.mrb[100].mxu0 %v4804_v10  ;;  %v4528_v55 = vmul.f32 %v7311_v32, %v11138_v20  ;;  %v6453_v20 = vld [vmem:[%s11398_s15 + $0x250] sm:$0xff]   ;;  %v4611_v47 = vadd.f32 %v4610_v33, %v4609_v41  ;;  %v5202_v10 = vpack.c.b16 %v11035_v35, %v11035_v35  ;;  %v6470_v35 = vld [vmem:[%s11398_s15 + $0xd8] sm:$0xff]  }
 0x7ee   :  { %v4666_v39 = vadd.f32 %v4518_v31, %v4513_v56  ;;  %6317 = vmatprep.subr.bf16.mxu1 %v12071_v49  ;;  %6298 = vmatpush3.bf16.msra.mxu0 %v6449_v58  ;;  %v4533_v52 = vmul.f32 %v7313_v36, %v11151_v57  ;;  %v6465_v58 = vld [vmem:[%s11398_s15 + $0x80] sm:$0xff]   ;;  %v6468_v32 = vld [vmem:[%s11398_s15 + $0xd0] sm:$0xff]   ;;  %v6471_v56 = vld [vmem:[%s11398_s15 + $0x98] sm:$0xff]   ;;  %v5201_v41 = vpack.c.b16 %v11028_v63, %v11028_v63 }
 0x7ef   :  { %v7315_v19 = vpop.eup %7314  ;;  %6299 = vmatprep.subr.bf16.mxu0 %v12071_v49  ;;  %6313 = vmatprep.mubr.msk.bf16.mxu0 %vm7367_vm6, %v12071_v49  ;;  %v4612_v60 = vrot.slane %v4611_v47, 1  ;;  %v6472_v31 = vld [vmem:[%s11398_s15 + $0xe0] sm:$0xff]  }
 0x7f0   :  { %v4667_v26 = vadd.f32 %v4666_v39, %v4523_v54  ;;  %5482 = vmatmul.mubr.bf16.vlgmr.msra.gmra.mrb[116].mxu1 %v5199_v43  ;;  %v4538_v50 = vmul.f32 %v7315_v19, %v11173_v51  ;;  %v7317_v57 = vpop.eup %7316  ;;  %v6473_v36 = vld [vmem:[%s11398_s15 + $0xa0] sm:$0xff]   ;;  %v6475_v54 = vld [vmem:[%s11398_s15 + $0xa8] sm:$0xff]   ;;  %v6476_v39 = vld [vmem:[%s11398_s15 + $0xf0] sm:$0xff]  }
 0x7f1   :  { %6318 = vmatpush3.bf16.msra.mxu1 %v6448_v7  ;;  %6333 = vmatprep.mubr.msk.bf16.mxu1 %vm7367_vm6, %v12071_v49  ;;  %v7319_v14 = vpop.eup %7318  ;;  %v4543_v51 = vmul.f32 %v7317_v57, %v11167_v53  ;;  %v4613_v23 = vadd.f32 %v4612_v60, %v4611_v47  ;;  %v6474_v7 = vld [vmem:[%s11398_s15 + $0xe8] sm:$0xff]   ;;  %v6477_v43 = vld [vmem:[%s11398_s15 + $0xb0] sm:$0xff]   ;;  %v6479_v19 = vld [vmem:[%s11398_s15 + $0xb8] sm:$0xff]  }
 0x7f2   :  { %v4668_v29 = vadd.f32 %v4667_v26, %v4528_v55  ;;  %6319 = vmatprep.subr.bf16.mxu1 %v12071_v49  ;;  %6300 = vmatpush3.bf16.msra.mxu0 %v6451_v44  ;;  %v4548_v28 = vmul.f32 %v7319_v14, %v11181_v16  ;;  %v6456_v16 = vld [vmem:[%s11398_s15 + $0x120] sm:$0xff]   ;;  %v6478_v44 = vld [vmem:[%s11398_s15 + $0xf8] sm:$0xff]  }
 0x7f3   :  { %6301 = vmatprep.subr.bf16.mxu0 %v12071_v49  ;;  %v4683_v37 = vmul.f32 0.015625, %v4613_v23 }
 0x7f4   :  { %v4669_v24 = vadd.f32 %v4668_v29, %v4533_v52 }
 0x7f5   :  { %6320 = vmatpush3.bf16.msra.mxu1 %v6450_v27  ;;  %v4693_v4 = vpack.c.bf16 %v4683_v37, %v4683_v37 }
 0x7f6   :  { %v4670_v42 = vadd.f32 %v4669_v24, %v4538_v50  ;;  %6321 = vmatprep.subr.bf16.mxu1 %v12071_v49  ;;  %6302 = vmatpush3.bf16.msra.mxu0 %v6453_v20 }
 0x7f7   :  { %6303 = vmatprep.subr.bf16.mxu0 %v12071_v49  ;;  %v4793_v59 = vunpack.c.l.b16 %v4693_v4 }
 0x7f8   :  { %v4671_v45 = vadd.f32 %v4670_v42, %v4543_v51 }
 0x7f9   :  { %6322 = vmatpush3.bf16.msra.mxu1 %v6452_v25 }
 0x7fa   :  { %v4672_v53 = vadd.f32 %v4671_v45, %v4548_v28  ;;  %6323 = vmatprep.subr.bf16.mxu1 %v12071_v49  ;;  %6304 = vmatpush3.bf16.msra.mxu0 %v6455_v6 }
 0x7fb   :  { %6305 = vmatprep.subr.bf16.mxu0 %v12071_v49 }
 0x7fc   :  { %v4673_v40 = vrot.slane %v4672_v53, 4 }
 0x7fd   :  { %6324 = vmatpush3.bf16.msra.mxu1 %v6454_v21 }
 0x7fe   :  { %v4674_v30 = vadd.f32 %v4673_v40, %v4672_v53  ;;  %6325 = vmatprep.subr.bf16.mxu1 %v12071_v49  ;;  %6306 = vmatpush3.bf16.msra.mxu0 %v6457_v5 }
 0x7ff   :  { %6307 = vmatprep.subr.bf16.mxu0 %v12071_v49 }
 0x800   :  { %v4675_v3 = vrot.slane %v4674_v30, 2 }
 0x801   :  { %6326 = vmatpush3.bf16.msra.mxu1 %v6456_v16 }
 0x802   :  { %v4676_v12 = vadd.f32 %v4675_v3, %v4674_v30  ;;  %6327 = vmatprep.subr.bf16.mxu1 %v12071_v49  ;;  %6308 = vmatpush3.bf16.msra.mxu0 %v6459_v34 }
 0x803   :  { %6309 = vmatprep.subr.bf16.mxu0 %v12071_v49 }
 0x804   :  { %v4677_v11 = vrot.slane %v4676_v12, 1 }
 0x805   :  { %6328 = vmatpush3.bf16.msra.mxu1 %v6458_v0 }
 0x806   :  { %6329 = vmatprep.subr.bf16.mxu1 %v12071_v49  ;;  %6310 = vmatpush3.bf16.msra.mxu0 %v6461_v17  ;;  %v4678_v9 = vadd.f32 %v4677_v11, %v4676_v12  ;;  %v5999_v11 = vld [vmem:[%s11399_s16] ss:$0 sm:$0xff] }
 0x807   :  { %6311 = vmatprep.subr.bf16.mxu0 %v12071_v49 }
 0x808   :  { %v4688_v48 = vmul.f32 0.015625, %v4678_v9 }
 0x809   :  { %6330 = vmatpush3.bf16.msra.mxu1 %v6460_v38 }
 0x80a   :  { %6331 = vmatprep.subr.bf16.mxu1 %v12071_v49  ;;  %6312 = vmatpush3.bf16.msra.mxu0 %v6463_v61  ;;  %v4698_v46 = vpack.c.bf16 %v4688_v48, %v4688_v48  ;;  %v6466_v49 = vld [vmem:[%s11398_s15 + $0xc8] sm:$0xff]  }
 0x80b   :  { %6138 = vmatprep.subr.bf16.mxu0 %v6464_v13 }
 0x80c   :  { %v4798_v62 = vunpack.c.l.b16 %v4698_v46 }
 0x80d   :  { %6332 = vmatpush3.bf16.msra.mxu1 %v6462_v8 }
 0x80e   :  { %v4803_v2 = vsel %vm1937_vm8, %v4798_v62, %v4793_v59 }
 0x80f   :  { %v4808_v1 = vpack.c.b16 %v4803_v2, %v4803_v2 }
 0x810   :  { %6334 = vmatmul.mubr.bf16.vlgmr.msra.gmra.mrb[120].mxu1 %v5203_v22 }
 0x811   :  { %6314 = vmatmul.mubr.bf16.vlgmr.msra.gmra.mrb[104].mxu0 %v4808_v1 }
 0x812   :  { %6139 = vmatpush3.bf16.msra.mxu0 %v6465_v58  ;;  %5521 = vmatprep.mubr.bf16.mxu0 %v5202_v10 }
 0x813   :  { %6140 = vmatprep.subr.bf16.mxu0 %v6466_v49 }
 0x816   :  { %6141 = vmatpush3.bf16.msra.mxu0 %v6467_v15 }
 0x817   :  { %6142 = vmatprep.subr.bf16.mxu0 %v6468_v32 }
 0x81a   :  { %6143 = vmatpush3.bf16.msra.mxu0 %v6469_v18 }
 0x81b   :  { %6144 = vmatprep.subr.bf16.mxu0 %v6470_v35 }
 0x81e   :  { %6145 = vmatpush3.bf16.msra.mxu0 %v6471_v56 }
 0x81f   :  { %6146 = vmatprep.subr.bf16.mxu0 %v6472_v31 }
 0x822   :  { %6147 = vmatpush3.bf16.msra.mxu0 %v6473_v36 }
 0x823   :  { %6148 = vmatprep.subr.bf16.mxu0 %v6474_v7 }
 0x826   :  { %6149 = vmatpush3.bf16.msra.mxu0 %v6475_v54 }
 0x827   :  { %6150 = vmatprep.subr.bf16.mxu0 %v6476_v39 }
 0x82a   :  { %6151 = vmatpush3.bf16.msra.mxu0 %v6477_v43 }
 0x82b   :  { %6152 = vmatprep.subr.bf16.mxu0 %v6478_v44 }
 0x82e   :  { %6153 = vmatpush3.bf16.msra.mxu0 %v6479_v19 }
 0x831   :  { %5522 = vmatmul.mubr.bf16.vlgmr.msra.gmra.mrb[108].mxu0 %v5201_v41 }
 0x8a3   :  { %v6101_v55 = vpop.f32.mrb[112].mxu1 }
 0x8a4   :  { %v6102_v26 = vpop.f32.mrb[113].mxu1 }
 0x8a5   :  { %v6103_v52 = vadd.f32 %v6102_v26, %v6101_v55  ;;  %v6104_v27 = vpop.f32.mrb[114].mxu1 }
 0x8a6   :  { %v6105_v29 = vpop.f32.mrb[115].mxu1 }
 0x8c0   :  { %v6079_v50 = vpop.f32.mrb[100].mxu0 }
 0x8c1   :  { %v6080_v20 = vpop.f32.mrb[101].mxu0 }
 0x8c2   :  { %v6081_v57 = vadd.f32 %v6080_v20, %v6079_v50  ;;  %v6082_v33 = vpop.f32.mrb[102].mxu0 }
 0x8c3   :  { %v6132_v24 = vpop.f32.mrb[116].mxu1  ;;  %v6083_v14 = vpop.f32.mrb[103].mxu0 }
 0x8c4   :  { %v6133_v25 = vpop.f32.mrb[117].mxu1  ;;  %v5129_v51 = vadd.f32 %v6103_v52, %v6081_v57 }
 0x8c5   :  { %v6134_v42 = vadd.f32 %v6133_v25, %v6132_v24  ;;  %v6135_v6 = vpop.f32.mrb[118].mxu1 }
 0x8c6   :  { %v6136_v47 = vpop.f32.mrb[119].mxu1 }
 0x8e3   :  { %v5563_v28 = vpop.f32.mrb[120].mxu1 }
 0x8e4   :  { %v6335_v45 = vpop.f32.mrb[121].mxu1  ;;  %v5168_v63 = vpop.f32.mrb[104].mxu0 }
 0x8e5   :  { %v5566_v21 = vpop.f32.mrb[122].mxu1  ;;  %v5169_v53 = vadd.f32 %v5168_v63, %v5129_v51  ;;  %v6315_v5 = vpop.f32.mrb[105].mxu0 }
 0x8e6   :  { %v6336_v60 = vpop.f32.mrb[123].mxu1  ;;  %v5171_v40 = vpop.f32.mrb[106].mxu0 }
 0x8e7   :  { %v5484_v16 = vadd.f32 %v6134_v42, %v5169_v53  ;;  %v6316_v30 = vpop.f32.mrb[107].mxu0 }
 0x904   :  { %v6154_v34 = vpop.f32.mrb[108].mxu0 }
 0x905   :  { %v6155_v3 = vpop.f32.mrb[109].mxu0 }
 0x906   :  { %v6156_v23 = vadd.f32 %v6155_v3, %v6154_v34  ;;  %v6157_v0 = vpop.f32.mrb[110].mxu0 }
 0x907   :  { %v6158_v12 = vpop.f32.mrb[111].mxu0 }
 0x908   :  { %v5524_v17 = vadd.f32 %v6156_v23, %v5484_v16 }
 0x90a   :  { %v5564_v37 = vadd.f32 %v5563_v28, %v5524_v17 }
 0x90c   :  { %v5576_v38 = vadd.f32 %v5999_v11, %v5564_v37 }
 0x90e   :  { %5577 = vst [vmem:[#allocation3] sm:$0x3] %v5576_v38 }
 0x90f   :  { %7351 = shalt.err (!%p7348_p4)
}
 0x910   :  { %s7352_s18 = scalar_lea.hbm %s11400_s17, 32 }
 0x911   :  { %p7353_p5 = scmp.ne.s32.totalorder %s11400_s17, %s7352_s18  ;;  %p7356_p6 = scmp.lt.u32.totalorder %s7352_s18, %s11400_s17 }
 0x913   :  { %p7358_p7 = pnand %p7356_p6, %p7353_p5 }
 0x915   :  { %7361 = shalt.err (!%p7358_p7)
}
 0x916   :  { %5587 = dma.vmem_to_hbm [thread:$0]  %s5585_s9, 32, %s11400_s17, [#allocation4]  }
 0x917   :  { %7362 = dma.done.wait [#allocation4], 32  }
 0x918   :  { %7363 = vsyncadd [#allocation4], 4294967264 }
 0x919   :  { %5591 = vsyncpa [#allocation4], 1 }

</bundles_post_ra>
